<compile_context>
chip_gen: v7x
topology: tpu7x:2x2x1
jax: 0.10.0
libtpu: 0.0.40
codegen_flags: <defaults>
</compile_context>

<pallas_src>
import functools

import jax
import jax.numpy as jnp
import numpy as np
from jax.experimental import pallas as pl
from jax.experimental.pallas import tpu as pltpu


# ----------------------------------------------------------------------------
# Fused conv1(3x3,SAME)+ReLU + conv2(3x3,SAME)+ReLU, one image per grid step.
# Each conv is ONE im2col MXU matmul; output is channel-major bf16 (lane-dense).
# ----------------------------------------------------------------------------
def _fused_convs_kernel(xp_ref, w1i_ref, b1_ref, w2i_ref, b2_ref, o_ref,
                        pad_ref, col1_ref, col2_ref, *, H, W):
    # xp_ref : (1, H+2, W+2, Cin)   zero-padded input image (f32)
    # w1i_ref: (9*Cin, C1)          conv1 weights, im2col row = (ky*3+kx)*Cin+cin
    # b1_ref : (1, C1)
    # w2i_ref: (9*C1, C2)           conv2 weights, im2col row = (ky*3+kx)*C1+c1
    # b2_ref : (1, C2)
    # o_ref  : (1, C2, H*W)         channel-major conv2 activation (bf16)
    # pad_ref: VMEM (H+2, W+16, C1) zero-padded conv1 activation
    #          (logical padded column j lives at buffer column j+7; interior
    #           store at column 8 keeps the store sublane-tile aligned)
    # col1_ref: VMEM (H*W, 9*Cin)   conv1 im2col scratch
    # col2_ref: VMEM (H*W, 9*C1)    conv2 im2col scratch
    Cin = xp_ref.shape[-1]
    C1 = w1i_ref.shape[-1]
    C2 = w2i_ref.shape[-1]

    # ---- conv1 + bias + ReLU as ONE im2col matmul (K = 9*Cin) -------------
    x = xp_ref[0]                                            # (H+2, W+2, Cin)
    for ky in range(3):
        for kx in range(3):
            t = 3 * ky + kx
            col1_ref[:, pl.ds(t * Cin, Cin)] = (
                x[ky:ky + H, kx:kx + W, :].reshape(H * W, Cin))
    h1 = jnp.maximum(
        jnp.dot(col1_ref[...], w1i_ref[...],
                preferred_element_type=jnp.float32) + b1_ref[...], 0.0)  # (H*W, C1)

    # ---- zero-pad conv1's activation in VMEM (border only; interior is
    #      fully overwritten below, so no full-buffer fill) ------------------
    pad_ref[pl.ds(0, 1), :, :] = jnp.zeros((1, W + 16, C1), jnp.float32)
    pad_ref[pl.ds(H + 1, 1), :, :] = jnp.zeros((1, W + 16, C1), jnp.float32)
    pad_ref[pl.ds(1, H), pl.ds(7, 1), :] = jnp.zeros((H, 1, C1), jnp.float32)
    pad_ref[pl.ds(1, H), pl.ds(W + 8, 1), :] = jnp.zeros((H, 1, C1), jnp.float32)
    pad_ref[pl.ds(1, H), pl.ds(8, W), :] = h1.reshape(H, W, C1)

    # ---- conv2 + bias + ReLU as ONE im2col matmul (K = 9*C1) ---------------
    P = pad_ref[...]                                         # (H+2, W+16, C1)
    for ky in range(3):
        for kx in range(3):
            t = 3 * ky + kx
            col2_ref[:, pl.ds(t * C1, C1)] = (
                P[ky:ky + H, 7 + kx:7 + kx + W, :].reshape(H * W, C1))
    h2 = jnp.maximum(
        jnp.dot(col2_ref[...], w2i_ref[...],
                preferred_element_type=jnp.float32) + b2_ref[...], 0.0)  # (H*W, C2)

    # ---- lane-dense bf16 store, channel-major == PyTorch NCHW flatten ------
    o_ref[0] = h2.T.astype(o_ref.dtype)                      # (C2, H*W)


def fused_convs(x, w1i, b1, w2i, b2):
    """x: (N,H,W,Cin) f32; w1i: (9*Cin,C1); w2i: (9*C1,C2).
    Returns (N, C2, H*W) bf16 activation in channel-major (NCHW-flatten) order."""
    N, H, W, Cin = x.shape
    C1 = w1i.shape[-1]
    C2 = w2i.shape[-1]
    xp = jnp.pad(x, ((0, 0), (1, 1), (1, 1), (0, 0)))        # SAME padding (tiny glue op)
    kern = functools.partial(_fused_convs_kernel, H=H, W=W)
    return pl.pallas_call(
        kern,
        out_shape=jax.ShapeDtypeStruct((N, C2, H * W), jnp.bfloat16),
        grid_spec=pltpu.PrefetchScalarGridSpec(
            num_scalar_prefetch=0,
            grid=(N,),
            in_specs=[
                pl.BlockSpec((1, H + 2, W + 2, Cin), lambda n: (n, 0, 0, 0)),
                pl.BlockSpec((9 * Cin, C1), lambda n: (0, 0)),
                pl.BlockSpec((1, C1), lambda n: (0, 0)),
                pl.BlockSpec((9 * C1, C2), lambda n: (0, 0)),
                pl.BlockSpec((1, C2), lambda n: (0, 0)),
            ],
            out_specs=pl.BlockSpec((1, C2, H * W), lambda n: (n, 0, 0)),
            scratch_shapes=[
                pltpu.VMEM((H + 2, W + 16, C1), jnp.float32),   # padded conv1 act
                pltpu.VMEM((H * W, 9 * Cin), jnp.float32),      # conv1 im2col
                pltpu.VMEM((H * W, 9 * C1), jnp.float32),       # conv2 im2col
            ],
        ),
        compiler_params=pltpu.CompilerParams(
            dimension_semantics=("parallel",)),   # megacore: batch split across TCs
    )(xp, w1i, b1.reshape(1, C1), w2i, b2.reshape(1, C2))


# ----------------------------------------------------------------------------
# Fused dense head: Linear(K -> Hd) + ReLU + Linear(Hd -> A).
# grid = (hidden-column blocks, K // tk): column axis "parallel" (v7x megacore),
# K-reduction tiled at tk=8192, f32 VMEM accumulator, fc2 fused per column
# block; the tiny per-block partial Q values are summed by the caller.
# ----------------------------------------------------------------------------
def _mlp_kernel(x_ref, w1_ref, b1_ref, w2_ref, o_ref, acc_ref):
    k = pl.program_id(1)

    @pl.when(k == 0)
    def _():
        acc_ref[...] = jnp.zeros_like(acc_ref)

    acc_ref[...] += jnp.dot(x_ref[...], w1_ref[...],
                            preferred_element_type=jnp.float32)

    @pl.when(k == pl.num_programs(1) - 1)
    def _():
        hidden = jnp.maximum(acc_ref[...] + b1_ref[...], 0.0)     # (N, th) f32
        o_ref[0] = jnp.dot(hidden, w2_ref[...],
                           preferred_element_type=jnp.float32).astype(o_ref.dtype)


def _largest_divisor_leq(n, cap):
    for t in range(min(cap, n), 0, -1):
        if n % t == 0:
            return t
    return n


def mlp_head(x, w1, b1, w2, b2, *, tk=8192, col_split=1):
    """x: (N,K) bf16, w1: (K,Hd) bf16, b1: (Hd,), w2: (Hd,A) f32, b2: (A,).
    Returns (N, A) f32 Q-values."""
    N, K = x.shape
    Hd = w1.shape[1]
    A = w2.shape[1]
    if x.dtype != w1.dtype:
        x = x.astype(w1.dtype)
    tk = _largest_divisor_leq(K, tk)                 # always divides K
    ncol = col_split if (col_split >= 1 and Hd % col_split == 0
                         and (Hd // col_split) % 128 == 0) else 1
    th = Hd // ncol
    partials = pl.pallas_call(
        _mlp_kernel,
        out_shape=jax.ShapeDtypeStruct((ncol, N, A), jnp.float32),
        grid_spec=pltpu.PrefetchScalarGridSpec(
            num_scalar_prefetch=0,
            grid=(ncol, K // tk),
            in_specs=[
                pl.BlockSpec((N, tk), lambda c, k: (0, k)),
                pl.BlockSpec((tk, th), lambda c, k: (k, c)),
                pl.BlockSpec((1, th), lambda c, k: (0, c)),
                pl.BlockSpec((th, A), lambda c, k: (c, 0)),
            ],
            out_specs=pl.BlockSpec((1, N, A), lambda c, k: (c, 0, 0)),
            scratch_shapes=[pltpu.VMEM((N, th), jnp.float32)],
        ),
        compiler_params=pltpu.CompilerParams(
            dimension_semantics=("parallel", "arbitrary")),
    )(x, w1, b1.reshape(1, Hd), w2)
    return jnp.sum(partials, axis=0) + b2


def _mlp_col_split():
    """2 hidden-column blocks (one per TensorCore) only on v7x; 1 elsewhere."""
    try:
        kind = jax.devices()[0].device_kind.lower()
    except Exception:
        return 1
    return 2 if "v7" in kind else 1


# ----------------------------------------------------------------------------
# One-time parameter preparation (host side, outside the forward pass).
# ----------------------------------------------------------------------------
def prepare_params(p):
    """Repack conv weights into im2col layout and cast w_fc1 to bf16.
    w_fc1's rows are already in PyTorch NCHW-flatten order, which is exactly the
    channel-major layout the conv kernel emits, so no row permutation is needed."""
    w1 = jnp.asarray(p["w_conv1"], jnp.float32)   # (3,3,Cin,C1)
    w2 = jnp.asarray(p["w_conv2"], jnp.float32)   # (3,3,C1,C2)
    kh, kw, Cin, C1 = w1.shape
    C2 = w2.shape[-1]
    return {
        "w1_im2col": w1.reshape(kh * kw * Cin, C1),
        "b_conv1": jnp.asarray(p["b_conv1"], jnp.float32),
        "w2_im2col": w2.reshape(kh * kw * C1, C2),
        "b_conv2": jnp.asarray(p["b_conv2"], jnp.float32),
        "w_fc1": jnp.asarray(p["w_fc1"], jnp.bfloat16),
        "b_fc1": jnp.asarray(p["b_fc1"], jnp.float32),
        "w_fc2": jnp.asarray(p["w_fc2"], jnp.float32),
        "b_fc2": jnp.asarray(p["b_fc2"], jnp.float32),
    }


# ----------------------------------------------------------------------------
# Full RedQ forward.
# ----------------------------------------------------------------------------
@functools.partial(jax.jit, static_argnames=("col_split",))
def red_q_forward(x, prepared, col_split=1):
    """x: (N, H, W, C) float32  ->  Q-values (N, num_actions) float32."""
    y = fused_convs(x, prepared["w1_im2col"], prepared["b_conv1"],
                    prepared["w2_im2col"], prepared["b_conv2"])   # (N, C2, H*W) bf16
    flat = y.reshape(y.shape[0], -1)          # free reshape, NCHW-flatten order
    return mlp_head(flat, prepared["w_fc1"], prepared["b_fc1"],
                    prepared["w_fc2"], prepared["b_fc2"], col_split=col_split)


# ----------------------------------------------------------------------------
# Pure-JAX reference (same math as the PyTorch module, f32, NCHW flatten).
# ----------------------------------------------------------------------------
def red_q_reference(x, p):
    dn = ("NHWC", "HWIO", "NHWC")
    y = jax.lax.conv_general_dilated(x, p["w_conv1"], (1, 1), "SAME",
                                     dimension_numbers=dn) + p["b_conv1"]
    y = jnp.maximum(y, 0.0)
    y = jax.lax.conv_general_dilated(y, p["w_conv2"], (1, 1), "SAME",
                                     dimension_numbers=dn) + p["b_conv2"]
    y = jnp.maximum(y, 0.0)
    N = y.shape[0]
    flat = jnp.transpose(y, (0, 3, 1, 2)).reshape(N, -1)          # nn.Flatten on NCHW
    h = jnp.maximum(flat @ p["w_fc1"] + p["b_fc1"], 0.0)
    return h @ p["w_fc2"] + p["b_fc2"]


if __name__ == "__main__":
    # forma_entrada = (alto=16, ancho=16, canales=4), num_acciones = 4, batch = 2
    H, W, C = 16, 16, 4
    A = 4
    N = 2

    key = jax.random.PRNGKey(0)
    ks = jax.random.split(key, 9)
    x = jax.random.normal(ks[0], (N, H, W, C), jnp.float32)

    params = {
        # conv weights stored as (kh, kw, Cin, Cout) == PyTorch (Cout,Cin,kh,kw) permuted
        "w_conv1": jax.random.normal(ks[1], (3, 3, C, 32), jnp.float32) * 0.05,
        "b_conv1": jax.random.normal(ks[2], (32,), jnp.float32) * 0.05,
        "w_conv2": jax.random.normal(ks[3], (3, 3, 32, 64), jnp.float32) * 0.05,
        "b_conv2": jax.random.normal(ks[4], (64,), jnp.float32) * 0.05,
        # dense weights stored as (in_features, out_features); w_fc1 rows in
        # PyTorch NCHW-flatten order (as nn.Linear after nn.Flatten sees them)
        "w_fc1": jax.random.normal(ks[5], (64 * H * W, 256), jnp.float32) * 0.02,
        "b_fc1": jax.random.normal(ks[6], (256,), jnp.float32) * 0.02,
        "w_fc2": jax.random.normal(ks[7], (256, A), jnp.float32) * 0.05,
        "b_fc2": jax.random.normal(ks[8], (A,), jnp.float32) * 0.05,
    }

    run_params = prepare_params(params)      # one-time: im2col repack + bf16 w_fc1
    col_split = _mlp_col_split()             # 2 only on v7x (dual-TC chip)

    q = red_q_forward(x, run_params, col_split=col_split)
    q = jax.block_until_ready(q)
    assert q.shape == (N, A) and q.dtype == jnp.float32

    q_ref = jax.block_until_ready(red_q_reference(x, params))
    np.testing.assert_allclose(np.asarray(q), np.asarray(q_ref),
                               rtol=2e-2, atol=2e-2)

    print("KERNEL_OK")
</pallas_src>

<mosaic_0001>
module attributes {stable_mosaic.version = 11 : i64} {
  func.func @_mlp_kernel(%arg0: i32, %arg1: i32, %arg2: memref<2x8192xbf16, #tpu.memory_space<vmem>>, %arg3: memref<8192x256xbf16, #tpu.memory_space<vmem>>, %arg4: memref<1x256xf32, #tpu.memory_space<vmem>>, %arg5: memref<256x4xf32, #tpu.memory_space<vmem>>, %arg6: memref<1x2x4xf32, #tpu.memory_space<vmem>>, %arg7: memref<2x256xf32, #tpu.memory_space<vmem>>) attributes {dimension_semantics = [#tpu.dimension_semantics<parallel>, #tpu.dimension_semantics<arbitrary>], iteration_bounds = array<i64: 1, 2>, scalar_prefetch = 0 : i64, scratch_operands = 1 : i64, tpu.core_type = #tpu.core_type<tc>, window_params = [{transform_indices = @transform_0, window_bounds = array<i64: 2, 8192>}, {transform_indices = @transform_1, window_bounds = array<i64: 8192, 256>}, {transform_indices = @transform_2, window_bounds = array<i64: 1, 256>}, {transform_indices = @transform_3, window_bounds = array<i64: 256, 4>}, {transform_indices = @transform_4, window_bounds = array<i64: 1, 2, 4>}]} {
    %c0_i32 = arith.constant 0 : i32
    %0 = arith.cmpi eq, %arg1, %c0_i32 : i32
    %1 = arith.extui %0 : i1 to i32
    %c0_i32_0 = arith.constant 0 : i32
    %2 = arith.cmpi ne, %1, %c0_i32_0 : i32
    scf.if %2 {
      %cst_9 = arith.constant 0.000000e+00 : f32
      %12 = vector.broadcast %cst_9 : f32 to vector<2x256xf32>
      %c0_10 = arith.constant 0 : index
      %c0_11 = arith.constant 0 : index
      %13 = vector.load %arg7[%c0_10, %c0_11] : memref<2x256xf32, #tpu.memory_space<vmem>>, vector<2x256xf32>
      tpu.vector_store %arg7[%c0_10, %c0_11], %12 {strides = array<i32>} : memref<2x256xf32, #tpu.memory_space<vmem>>, vector<2x256xf32>,
    } else {
    }
    %c0 = arith.constant 0 : index
    %c0_1 = arith.constant 0 : index
    %3 = vector.load %arg7[%c0, %c0_1] : memref<2x256xf32, #tpu.memory_space<vmem>>, vector<2x256xf32>
    %c0_2 = arith.constant 0 : index
    %c0_3 = arith.constant 0 : index
    %4 = vector.load %arg2[%c0_2, %c0_3] : memref<2x8192xbf16, #tpu.memory_space<vmem>>, vector<2x8192xbf16>
    %c0_4 = arith.constant 0 : index
    %c0_5 = arith.constant 0 : index
    %5 = vector.load %arg3[%c0_4, %c0_5] : memref<8192x256xbf16, #tpu.memory_space<vmem>>, vector<8192x256xbf16>
    %cst = arith.constant dense<0.000000e+00> : vector<2x256xf32>
    %6 = tpu.matmul %4, %5, %cst {dimension_numbers = #tpu.dot_dimension_numbers<[1], [0], [0], [1], [0, 0, 1, 1], [], []>} : vector<2x8192xbf16>, vector<8192x256xbf16>, vector<2x256xf32> -> vector<2x256xf32>
    %7 = arith.addf %3, %6 : vector<2x256xf32>
    %c0_6 = arith.constant 0 : index
    %c0_7 = arith.constant 0 : index
    %8 = vector.load %arg7[%c0_6, %c0_7] : memref<2x256xf32, #tpu.memory_space<vmem>>, vector<2x256xf32>
    tpu.vector_store %arg7[%c0_6, %c0_7], %7 {strides = array<i32>} : memref<2x256xf32, #tpu.memory_space<vmem>>, vector<2x256xf32>,
    %c1_i32 = arith.constant 1 : i32
    %9 = arith.cmpi eq, %arg1, %c1_i32 : i32
    %10 = arith.extui %9 : i1 to i32
    %c0_i32_8 = arith.constant 0 : i32
    %11 = arith.cmpi ne, %10, %c0_i32_8 : i32
    scf.if %11 {
      %c0_9 = arith.constant 0 : index
      %c0_10 = arith.constant 0 : index
      %12 = vector.load %arg7[%c0_9, %c0_10] : memref<2x256xf32, #tpu.memory_space<vmem>>, vector<2x256xf32>
      %c0_11 = arith.constant 0 : index
      %c0_12 = arith.constant 0 : index
      %13 = vector.load %arg4[%c0_11, %c0_12] : memref<1x256xf32, #tpu.memory_space<vmem>>, vector<1x256xf32>
      %14 = vector.broadcast %13 : vector<1x256xf32> to vector<2x256xf32>
      %15 = arith.addf %12, %14 : vector<2x256xf32>
      %cst_13 = arith.constant 0.000000e+00 : f32
      %16 = vector.broadcast %cst_13 : f32 to vector<2x256xf32>
      %17 = arith.maximumf %15, %16 : vector<2x256xf32>
      %c0_14 = arith.constant 0 : index
      %c0_15 = arith.constant 0 : index
      %18 = vector.load %arg5[%c0_14, %c0_15] : memref<256x4xf32, #tpu.memory_space<vmem>>, vector<256x4xf32>
      %cst_16 = arith.constant dense<0.000000e+00> : vector<2x4xf32>
      %19 = tpu.matmul %17, %18, %cst_16 {dimension_numbers = #tpu.dot_dimension_numbers<[1], [0], [0], [1], [0, 0, 1, 1], [], []>} : vector<2x256xf32>, vector<256x4xf32>, vector<2x4xf32> -> vector<2x4xf32>
      %c0_17 = arith.constant 0 : index
      %c0_18 = arith.constant 0 : index
      %c0_19 = arith.constant 0 : index
      %20 = vector.load %arg6[%c0_17, %c0_18, %c0_19] : memref<1x2x4xf32, #tpu.memory_space<vmem>>, vector<1x2x4xf32>
      %21 = vector.shape_cast %20 : vector<1x2x4xf32> to vector<2x4xf32>
      %22 = vector.shape_cast %19 : vector<2x4xf32> to vector<1x2x4xf32>
      tpu.vector_store %arg6[%c0_17, %c0_18, %c0_19], %22 {strides = array<i32>} : memref<1x2x4xf32, #tpu.memory_space<vmem>>, vector<1x2x4xf32>,
    } else {
    }
    return
  }
  func.func @transform_0(%arg0: i32, %arg1: i32) -> (i32, i32) {
    %c0_i32 = arith.constant 0 : i32
    %c0_i32_0 = arith.constant 0 : i32
    return %c0_i32, %arg1 : i32, i32
  }
  func.func @transform_1(%arg0: i32, %arg1: i32) -> (i32, i32) {
    %c0_i32 = arith.constant 0 : i32
    return %arg1, %arg0 : i32, i32
  }
  func.func @transform_2(%arg0: i32, %arg1: i32) -> (i32, i32) {
    %c0_i32 = arith.constant 0 : i32
    %c0_i32_0 = arith.constant 0 : i32
    return %c0_i32, %arg0 : i32, i32
  }
  func.func @transform_3(%arg0: i32, %arg1: i32) -> (i32, i32) {
    %c0_i32 = arith.constant 0 : i32
    %c0_i32_0 = arith.constant 0 : i32
    return %arg0, %c0_i32 : i32, i32
  }
  func.func @transform_4(%arg0: i32, %arg1: i32) -> (i32, i32, i32) {
    %c0_i32 = arith.constant 0 : i32
    %c0_i32_0 = arith.constant 0 : i32
    %c0_i32_1 = arith.constant 0 : i32
    return %arg0, %c0_i32, %c0_i32_0 : i32, i32, i32
  }
}

module attributes {stable_mosaic.version = 11 : i64} {
  func.func @_fused_convs_kernel(%arg0: i32, %arg1: memref<1x18x18x4xf32, #tpu.memory_space<vmem>>, %arg2: memref<36x32xf32, #tpu.memory_space<vmem>>, %arg3: memref<1x32xf32, #tpu.memory_space<vmem>>, %arg4: memref<288x64xf32, #tpu.memory_space<vmem>>, %arg5: memref<1x64xf32, #tpu.memory_space<vmem>>, %arg6: memref<1x64x256xbf16, #tpu.memory_space<vmem>>, %arg7: memref<18x32x32xf32, #tpu.memory_space<vmem>>, %arg8: memref<256x36xf32, #tpu.memory_space<vmem>>, %arg9: memref<256x288xf32, #tpu.memory_space<vmem>>) attributes {dimension_semantics = [#tpu.dimension_semantics<parallel>], iteration_bounds = array<i64: 2>, scalar_prefetch = 0 : i64, scratch_operands = 3 : i64, tpu.core_type = #tpu.core_type<tc>, window_params = [{transform_indices = @transform_0, window_bounds = array<i64: 1, 18, 18, 4>}, {pipeline_mode = #tpu.pipeline_mode<synchronous>, transform_indices = @transform_1, window_bounds = array<i64: 36, 32>}, {pipeline_mode = #tpu.pipeline_mode<synchronous>, transform_indices = @transform_2, window_bounds = array<i64: 1, 32>}, {pipeline_mode = #tpu.pipeline_mode<synchronous>, transform_indices = @transform_3, window_bounds = array<i64: 288, 64>}, {pipeline_mode = #tpu.pipeline_mode<synchronous>, transform_indices = @transform_4, window_bounds = array<i64: 1, 64>}, {transform_indices = @transform_5, window_bounds = array<i64: 1, 64, 256>}]} {
    %c0 = arith.constant 0 : index
    %c0_0 = arith.constant 0 : index
    %c0_1 = arith.constant 0 : index
    %c0_2 = arith.constant 0 : index
    %0 = vector.load %arg1[%c0, %c0_0, %c0_1, %c0_2] : memref<1x18x18x4xf32, #tpu.memory_space<vmem>>, vector<1x18x18x4xf32>
    %1 = vector.shape_cast %0 : vector<1x18x18x4xf32> to vector<18x18x4xf32>
    %2 = vector.extract_strided_slice %1 {offsets = [0, 0, 0], sizes = [16, 16, 4], strides = [1, 1, 1]} : vector<18x18x4xf32> to vector<16x16x4xf32>
    %3 = vector.shape_cast %2 : vector<16x16x4xf32> to vector<256x4xf32>
    %c0_3 = arith.constant 0 : index
    %c0_4 = arith.constant 0 : index
    %4 = vector.load %arg8[%c0_3, %c0_4] : memref<256x36xf32, #tpu.memory_space<vmem>>, vector<256x4xf32>
    tpu.vector_store %arg8[%c0_3, %c0_4], %3 {strides = array<i32>} : memref<256x36xf32, #tpu.memory_space<vmem>>, vector<256x4xf32>,
    %5 = vector.extract_strided_slice %1 {offsets = [0, 1, 0], sizes = [16, 16, 4], strides = [1, 1, 1]} : vector<18x18x4xf32> to vector<16x16x4xf32>
    %6 = vector.shape_cast %5 : vector<16x16x4xf32> to vector<256x4xf32>
    %c0_5 = arith.constant 0 : index
    %c4 = arith.constant 4 : index
    %7 = vector.load %arg8[%c0_5, %c4] : memref<256x36xf32, #tpu.memory_space<vmem>>, vector<256x4xf32>
    tpu.vector_store %arg8[%c0_5, %c4], %6 {strides = array<i32>} : memref<256x36xf32, #tpu.memory_space<vmem>>, vector<256x4xf32>,
    %8 = vector.extract_strided_slice %1 {offsets = [0, 2, 0], sizes = [16, 16, 4], strides = [1, 1, 1]} : vector<18x18x4xf32> to vector<16x16x4xf32>
    %9 = vector.shape_cast %8 : vector<16x16x4xf32> to vector<256x4xf32>
    %c0_6 = arith.constant 0 : index
    %c8 = arith.constant 8 : index
    %10 = vector.load %arg8[%c0_6, %c8] : memref<256x36xf32, #tpu.memory_space<vmem>>, vector<256x4xf32>
    tpu.vector_store %arg8[%c0_6, %c8], %9 {strides = array<i32>} : memref<256x36xf32, #tpu.memory_space<vmem>>, vector<256x4xf32>,
    %11 = vector.extract_strided_slice %1 {offsets = [1, 0, 0], sizes = [16, 16, 4], strides = [1, 1, 1]} : vector<18x18x4xf32> to vector<16x16x4xf32>
    %12 = vector.shape_cast %11 : vector<16x16x4xf32> to vector<256x4xf32>
    %c0_7 = arith.constant 0 : index
    %c12 = arith.constant 12 : index
    %13 = vector.load %arg8[%c0_7, %c12] : memref<256x36xf32, #tpu.memory_space<vmem>>, vector<256x4xf32>
    tpu.vector_store %arg8[%c0_7, %c12], %12 {strides = array<i32>} : memref<256x36xf32, #tpu.memory_space<vmem>>, vector<256x4xf32>,
    %14 = vector.extract_strided_slice %1 {offsets = [1, 1, 0], sizes = [16, 16, 4], strides = [1, 1, 1]} : vector<18x18x4xf32> to vector<16x16x4xf32>
    %15 = vector.shape_cast %14 : vector<16x16x4xf32> to vector<256x4xf32>
    %c0_8 = arith.constant 0 : index
    %c16 = arith.constant 16 : index
    %16 = vector.load %arg8[%c0_8, %c16] : memref<256x36xf32, #tpu.memory_space<vmem>>, vector<256x4xf32>
    tpu.vector_store %arg8[%c0_8, %c16], %15 {strides = array<i32>} : memref<256x36xf32, #tpu.memory_space<vmem>>, vector<256x4xf32>,
    %17 = vector.extract_strided_slice %1 {offsets = [1, 2, 0], sizes = [16, 16, 4], strides = [1, 1, 1]} : vector<18x18x4xf32> to vector<16x16x4xf32>
    %18 = vector.shape_cast %17 : vector<16x16x4xf32> to vector<256x4xf32>
    %c0_9 = arith.constant 0 : index
    %c20 = arith.constant 20 : index
    %19 = vector.load %arg8[%c0_9, %c20] : memref<256x36xf32, #tpu.memory_space<vmem>>, vector<256x4xf32>
    tpu.vector_store %arg8[%c0_9, %c20], %18 {strides = array<i32>} : memref<256x36xf32, #tpu.memory_space<vmem>>, vector<256x4xf32>,
    %20 = vector.extract_strided_slice %1 {offsets = [2, 0, 0], sizes = [16, 16, 4], strides = [1, 1, 1]} : vector<18x18x4xf32> to vector<16x16x4xf32>
    %21 = vector.shape_cast %20 : vector<16x16x4xf32> to vector<256x4xf32>
    %c0_10 = arith.constant 0 : index
    %c24 = arith.constant 24 : index
    %22 = vector.load %arg8[%c0_10, %c24] : memref<256x36xf32, #tpu.memory_space<vmem>>, vector<256x4xf32>
    tpu.vector_store %arg8[%c0_10, %c24], %21 {strides = array<i32>} : memref<256x36xf32, #tpu.memory_space<vmem>>, vector<256x4xf32>,
    %23 = vector.extract_strided_slice %1 {offsets = [2, 1, 0], sizes = [16, 16, 4], strides = [1, 1, 1]} : vector<18x18x4xf32> to vector<16x16x4xf32>
    %24 = vector.shape_cast %23 : vector<16x16x4xf32> to vector<256x4xf32>
    %c0_11 = arith.constant 0 : index
    %c28 = arith.constant 28 : index
    %25 = vector.load %arg8[%c0_11, %c28] : memref<256x36xf32, #tpu.memory_space<vmem>>, vector<256x4xf32>
    tpu.vector_store %arg8[%c0_11, %c28], %24 {strides = array<i32>} : memref<256x36xf32, #tpu.memory_space<vmem>>, vector<256x4xf32>,
    %26 = vector.extract_strided_slice %1 {offsets = [2, 2, 0], sizes = [16, 16, 4], strides = [1, 1, 1]} : vector<18x18x4xf32> to vector<16x16x4xf32>
    %27 = vector.shape_cast %26 : vector<16x16x4xf32> to vector<256x4xf32>
    %c0_12 = arith.constant 0 : index
    %c32 = arith.constant 32 : index
    %28 = vector.load %arg8[%c0_12, %c32] : memref<256x36xf32, #tpu.memory_space<vmem>>, vector<256x4xf32>
    tpu.vector_store %arg8[%c0_12, %c32], %27 {strides = array<i32>} : memref<256x36xf32, #tpu.memory_space<vmem>>, vector<256x4xf32>,
    %c0_13 = arith.constant 0 : index
    %c0_14 = arith.constant 0 : index
    %29 = vector.load %arg8[%c0_13, %c0_14] : memref<256x36xf32, #tpu.memory_space<vmem>>, vector<256x36xf32>
    %c0_15 = arith.constant 0 : index
    %c0_16 = arith.constant 0 : index
    %30 = vector.load %arg2[%c0_15, %c0_16] : memref<36x32xf32, #tpu.memory_space<vmem>>, vector<36x32xf32>
    %cst = arith.constant dense<0.000000e+00> : vector<256x32xf32>
    %31 = tpu.matmul %29, %30, %cst {dimension_numbers = #tpu.dot_dimension_numbers<[1], [0], [0], [1], [0, 0, 1, 1], [], []>} : vector<256x36xf32>, vector<36x32xf32>, vector<256x32xf32> -> vector<256x32xf32>
    %c0_17 = arith.constant 0 : index
    %c0_18 = arith.constant 0 : index
    %32 = vector.load %arg3[%c0_17, %c0_18] : memref<1x32xf32, #tpu.memory_space<vmem>>, vector<1x32xf32>
    %33 = vector.broadcast %32 : vector<1x32xf32> to vector<256x32xf32>
    %34 = arith.addf %31, %33 : vector<256x32xf32>
    %cst_19 = arith.constant 0.000000e+00 : f32
    %35 = vector.broadcast %cst_19 : f32 to vector<256x32xf32>
    %36 = arith.maximumf %34, %35 : vector<256x32xf32>
    %cst_20 = arith.constant 0.000000e+00 : f32
    %37 = vector.broadcast %cst_20 : f32 to vector<1x32x32xf32>
    %c0_21 = arith.constant 0 : index
    %c0_22 = arith.constant 0 : index
    %c0_23 = arith.constant 0 : index
    %38 = vector.load %arg7[%c0_21, %c0_22, %c0_23] : memref<18x32x32xf32, #tpu.memory_space<vmem>>, vector<1x32x32xf32>
    tpu.vector_store %arg7[%c0_21, %c0_22, %c0_23], %37 {strides = array<i32>} : memref<18x32x32xf32, #tpu.memory_space<vmem>>, vector<1x32x32xf32>,
    %cst_24 = arith.constant 0.000000e+00 : f32
    %39 = vector.broadcast %cst_24 : f32 to vector<1x32x32xf32>
    %c17 = arith.constant 17 : index
    %c0_25 = arith.constant 0 : index
    %c0_26 = arith.constant 0 : index
    %40 = vector.load %arg7[%c17, %c0_25, %c0_26] : memref<18x32x32xf32, #tpu.memory_space<vmem>>, vector<1x32x32xf32>
    tpu.vector_store %arg7[%c17, %c0_25, %c0_26], %39 {strides = array<i32>} : memref<18x32x32xf32, #tpu.memory_space<vmem>>, vector<1x32x32xf32>,
    %cst_27 = arith.constant 0.000000e+00 : f32
    %41 = vector.broadcast %cst_27 : f32 to vector<16x1x32xf32>
    %c1 = arith.constant 1 : index
    %c7 = arith.constant 7 : index
    %c0_28 = arith.constant 0 : index
    %42 = vector.load %arg7[%c1, %c7, %c0_28] : memref<18x32x32xf32, #tpu.memory_space<vmem>>, vector<16x1x32xf32>
    tpu.vector_store %arg7[%c1, %c7, %c0_28], %41 {strides = array<i32>} : memref<18x32x32xf32, #tpu.memory_space<vmem>>, vector<16x1x32xf32>,
    %cst_29 = arith.constant 0.000000e+00 : f32
    %43 = vector.broadcast %cst_29 : f32 to vector<16x1x32xf32>
    %c1_30 = arith.constant 1 : index
    %c24_31 = arith.constant 24 : index
    %c0_32 = arith.constant 0 : index
    %44 = vector.load %arg7[%c1_30, %c24_31, %c0_32] : memref<18x32x32xf32, #tpu.memory_space<vmem>>, vector<16x1x32xf32>
    tpu.vector_store %arg7[%c1_30, %c24_31, %c0_32], %43 {strides = array<i32>} : memref<18x32x32xf32, #tpu.memory_space<vmem>>, vector<16x1x32xf32>,
    %45 = vector.shape_cast %36 : vector<256x32xf32> to vector<16x16x32xf32>
    %c1_33 = arith.constant 1 : index
    %c8_34 = arith.constant 8 : index
    %c0_35 = arith.constant 0 : index
    %46 = vector.load %arg7[%c1_33, %c8_34, %c0_35] : memref<18x32x32xf32, #tpu.memory_space<vmem>>, vector<16x16x32xf32>
    tpu.vector_store %arg7[%c1_33, %c8_34, %c0_35], %45 {strides = array<i32>} : memref<18x32x32xf32, #tpu.memory_space<vmem>>, vector<16x16x32xf32>,
    %c0_36 = arith.constant 0 : index
    %c0_37 = arith.constant 0 : index
    %c0_38 = arith.constant 0 : index
    %47 = vector.load %arg7[%c0_36, %c0_37, %c0_38] : memref<18x32x32xf32, #tpu.memory_space<vmem>>, vector<18x32x32xf32>
    %48 = vector.extract_strided_slice %47 {offsets = [0, 7, 0], sizes = [16, 16, 32], strides = [1, 1, 1]} : vector<18x32x32xf32> to vector<16x16x32xf32>
    %49 = vector.shape_cast %48 : vector<16x16x32xf32> to vector<256x32xf32>
    %c0_39 = arith.constant 0 : index
    %c0_40 = arith.constant 0 : index
    %50 = vector.load %arg9[%c0_39, %c0_40] : memref<256x288xf32, #tpu.memory_space<vmem>>, vector<256x32xf32>
    tpu.vector_store %arg9[%c0_39, %c0_40], %49 {strides = array<i32>} : memref<256x288xf32, #tpu.memory_space<vmem>>, vector<256x32xf32>,
    %51 = vector.extract_strided_slice %47 {offsets = [0, 8, 0], sizes = [16, 16, 32], strides = [1, 1, 1]} : vector<18x32x32xf32> to vector<16x16x32xf32>
    %52 = vector.shape_cast %51 : vector<16x16x32xf32> to vector<256x32xf32>
    %c0_41 = arith.constant 0 : index
    %c32_42 = arith.constant 32 : index
    %53 = vector.load %arg9[%c0_41, %c32_42] : memref<256x288xf32, #tpu.memory_space<vmem>>, vector<256x32xf32>
    tpu.vector_store %arg9[%c0_41, %c32_42], %52 {strides = array<i32>} : memref<256x288xf32, #tpu.memory_space<vmem>>, vector<256x32xf32>,
    %54 = vector.extract_strided_slice %47 {offsets = [0, 9, 0], sizes = [16, 16, 32], strides = [1, 1, 1]} : vector<18x32x32xf32> to vector<16x16x32xf32>
    %55 = vector.shape_cast %54 : vector<16x16x32xf32> to vector<256x32xf32>
    %c0_43 = arith.constant 0 : index
    %c64 = arith.constant 64 : index
    %56 = vector.load %arg9[%c0_43, %c64] : memref<256x288xf32, #tpu.memory_space<vmem>>, vector<256x32xf32>
    tpu.vector_store %arg9[%c0_43, %c64], %55 {strides = array<i32>} : memref<256x288xf32, #tpu.memory_space<vmem>>, vector<256x32xf32>,
    %57 = vector.extract_strided_slice %47 {offsets = [1, 7, 0], sizes = [16, 16, 32], strides = [1, 1, 1]} : vector<18x32x32xf32> to vector<16x16x32xf32>
    %58 = vector.shape_cast %57 : vector<16x16x32xf32> to vector<256x32xf32>
    %c0_44 = arith.constant 0 : index
    %c96 = arith.constant 96 : index
    %59 = vector.load %arg9[%c0_44, %c96] : memref<256x288xf32, #tpu.memory_space<vmem>>, vector<256x32xf32>
    tpu.vector_store %arg9[%c0_44, %c96], %58 {strides = array<i32>} : memref<256x288xf32, #tpu.memory_space<vmem>>, vector<256x32xf32>,
    %60 = vector.extract_strided_slice %47 {offsets = [1, 8, 0], sizes = [16, 16, 32], strides = [1, 1, 1]} : vector<18x32x32xf32> to vector<16x16x32xf32>
    %61 = vector.shape_cast %60 : vector<16x16x32xf32> to vector<256x32xf32>
    %c0_45 = arith.constant 0 : index
    %c128 = arith.constant 128 : index
    %62 = vector.load %arg9[%c0_45, %c128] : memref<256x288xf32, #tpu.memory_space<vmem>>, vector<256x32xf32>
    tpu.vector_store %arg9[%c0_45, %c128], %61 {strides = array<i32>} : memref<256x288xf32, #tpu.memory_space<vmem>>, vector<256x32xf32>,
    %63 = vector.extract_strided_slice %47 {offsets = [1, 9, 0], sizes = [16, 16, 32], strides = [1, 1, 1]} : vector<18x32x32xf32> to vector<16x16x32xf32>
    %64 = vector.shape_cast %63 : vector<16x16x32xf32> to vector<256x32xf32>
    %c0_46 = arith.constant 0 : index
    %c160 = arith.constant 160 : index
    %65 = vector.load %arg9[%c0_46, %c160] : memref<256x288xf32, #tpu.memory_space<vmem>>, vector<256x32xf32>
    tpu.vector_store %arg9[%c0_46, %c160], %64 {strides = array<i32>} : memref<256x288xf32, #tpu.memory_space<vmem>>, vector<256x32xf32>,
    %66 = vector.extract_strided_slice %47 {offsets = [2, 7, 0], sizes = [16, 16, 32], strides = [1, 1, 1]} : vector<18x32x32xf32> to vector<16x16x32xf32>
    %67 = vector.shape_cast %66 : vector<16x16x32xf32> to vector<256x32xf32>
    %c0_47 = arith.constant 0 : index
    %c192 = arith.constant 192 : index
    %68 = vector.load %arg9[%c0_47, %c192] : memref<256x288xf32, #tpu.memory_space<vmem>>, vector<256x32xf32>
    tpu.vector_store %arg9[%c0_47, %c192], %67 {strides = array<i32>} : memref<256x288xf32, #tpu.memory_space<vmem>>, vector<256x32xf32>,
    %69 = vector.extract_strided_slice %47 {offsets = [2, 8, 0], sizes = [16, 16, 32], strides = [1, 1, 1]} : vector<18x32x32xf32> to vector<16x16x32xf32>
    %70 = vector.shape_cast %69 : vector<16x16x32xf32> to vector<256x32xf32>
    %c0_48 = arith.constant 0 : index
    %c224 = arith.constant 224 : index
    %71 = vector.load %arg9[%c0_48, %c224] : memref<256x288xf32, #tpu.memory_space<vmem>>, vector<256x32xf32>
    tpu.vector_store %arg9[%c0_48, %c224], %70 {strides = array<i32>} : memref<256x288xf32, #tpu.memory_space<vmem>>, vector<256x32xf32>,
    %72 = vector.extract_strided_slice %47 {offsets = [2, 9, 0], sizes = [16, 16, 32], strides = [1, 1, 1]} : vector<18x32x32xf32> to vector<16x16x32xf32>
    %73 = vector.shape_cast %72 : vector<16x16x32xf32> to vector<256x32xf32>
    %c0_49 = arith.constant 0 : index
    %c256 = arith.constant 256 : index
    %74 = vector.load %arg9[%c0_49, %c256] : memref<256x288xf32, #tpu.memory_space<vmem>>, vector<256x32xf32>
    tpu.vector_store %arg9[%c0_49, %c256], %73 {strides = array<i32>} : memref<256x288xf32, #tpu.memory_space<vmem>>, vector<256x32xf32>,
    %c0_50 = arith.constant 0 : index
    %c0_51 = arith.constant 0 : index
    %75 = vector.load %arg9[%c0_50, %c0_51] : memref<256x288xf32, #tpu.memory_space<vmem>>, vector<256x288xf32>
    %c0_52 = arith.constant 0 : index
    %c0_53 = arith.constant 0 : index
    %76 = vector.load %arg4[%c0_52, %c0_53] : memref<288x64xf32, #tpu.memory_space<vmem>>, vector<288x64xf32>
    %cst_54 = arith.constant dense<0.000000e+00> : vector<256x64xf32>
    %77 = tpu.matmul %75, %76, %cst_54 {dimension_numbers = #tpu.dot_dimension_numbers<[1], [0], [0], [1], [0, 0, 1, 1], [], []>} : vector<256x288xf32>, vector<288x64xf32>, vector<256x64xf32> -> vector<256x64xf32>
    %c0_55 = arith.constant 0 : index
    %c0_56 = arith.constant 0 : index
    %78 = vector.load %arg5[%c0_55, %c0_56] : memref<1x64xf32, #tpu.memory_space<vmem>>, vector<1x64xf32>
    %79 = vector.broadcast %78 : vector<1x64xf32> to vector<256x64xf32>
    %80 = arith.addf %77, %79 : vector<256x64xf32>
    %cst_57 = arith.constant 0.000000e+00 : f32
    %81 = vector.broadcast %cst_57 : f32 to vector<256x64xf32>
    %82 = arith.maximumf %80, %81 : vector<256x64xf32>
    %83 = tpu.transpose %82, [1, 0] : vector<256x64xf32> -> vector<64x256xf32>
    %84 = arith.truncf %83 : vector<64x256xf32> to vector<64x256xbf16>
    %c0_58 = arith.constant 0 : index
    %c0_59 = arith.constant 0 : index
    %c0_60 = arith.constant 0 : index
    %85 = vector.load %arg6[%c0_58, %c0_59, %c0_60] : memref<1x64x256xbf16, #tpu.memory_space<vmem>>, vector<1x64x256xbf16>
    %86 = vector.shape_cast %85 : vector<1x64x256xbf16> to vector<64x256xbf16>
    %87 = vector.shape_cast %84 : vector<64x256xbf16> to vector<1x64x256xbf16>
    tpu.vector_store %arg6[%c0_58, %c0_59, %c0_60], %87 {strides = array<i32>} : memref<1x64x256xbf16, #tpu.memory_space<vmem>>, vector<1x64x256xbf16>,
    return
  }
  func.func @transform_0(%arg0: i32) -> (i32, i32, i32, i32) {
    %c0_i32 = arith.constant 0 : i32
    %c0_i32_0 = arith.constant 0 : i32
    %c0_i32_1 = arith.constant 0 : i32
    %c0_i32_2 = arith.constant 0 : i32
    return %arg0, %c0_i32, %c0_i32_0, %c0_i32_1 : i32, i32, i32, i32
  }
  func.func @transform_1(%arg0: i32) -> (i32, i32) {
    %c0_i32 = arith.constant 0 : i32
    %c0_i32_0 = arith.constant 0 : i32
    %c0_i32_1 = arith.constant 0 : i32
    return %c0_i32, %c0_i32_0 : i32, i32
  }
  func.func @transform_2(%arg0: i32) -> (i32, i32) {
    %c0_i32 = arith.constant 0 : i32
    %c0_i32_0 = arith.constant 0 : i32
    %c0_i32_1 = arith.constant 0 : i32
    return %c0_i32, %c0_i32_0 : i32, i32
  }
  func.func @transform_3(%arg0: i32) -> (i32, i32) {
    %c0_i32 = arith.constant 0 : i32
    %c0_i32_0 = arith.constant 0 : i32
    %c0_i32_1 = arith.constant 0 : i32
    return %c0_i32, %c0_i32_0 : i32, i32
  }
  func.func @transform_4(%arg0: i32) -> (i32, i32) {
    %c0_i32 = arith.constant 0 : i32
    %c0_i32_0 = arith.constant 0 : i32
    %c0_i32_1 = arith.constant 0 : i32
    return %c0_i32, %c0_i32_0 : i32, i32
  }
  func.func @transform_5(%arg0: i32) -> (i32, i32, i32) {
    %c0_i32 = arith.constant 0 : i32
    %c0_i32_0 = arith.constant 0 : i32
    %c0_i32_1 = arith.constant 0 : i32
    return %arg0, %c0_i32, %c0_i32_0 : i32, i32, i32
  }
}

</mosaic_0001>

<bundles_post_ra>
// kernel: red_q_forward.2
= control target key start
LH: loop header
LB: loop body
LE: loop exit
PB: predicated region body
PF: predicated region fallthrough
CT: control target
= control target key end

     0   :  { %10 = vsyncpa [#allocation6], 0  ;;  %s7798_s0 = inlined_call_operand.vmem [shape: f32[2,18,18,4], index: 0, kind: input, shape index: {}]   ;;  %s7799_s1 = inlined_call_operand.vmem [shape: f32[36,32], index: 1, kind: input, shape index: {}]   ;;  %s7800_s2 = inlined_call_operand.hbm [shape: f32[1,32], index: 2, kind: input, shape index: {}]   ;;  %s7801_s3 = inlined_call_operand.vmem [shape: f32[288,64], index: 3, kind: input, shape index: {}]   ;;  %s7802_s4 = inlined_call_operand.hbm [shape: f32[1,64], index: 4, kind: input, shape index: {}]   ;;  %s7803_s5 = inlined_call_operand.vmem [shape: bf16[2,64,256], index: 5, kind: output, shape index: {}]  }
   0x1   :  { %11 = vsyncpa [#allocation8], 0  ;;  %s4868_s18 = smov 0  }
   0x2 LB: > { %s4874_s19 = sadd.s32 4294967295, %s4822_s18   ;;  %p4256_p0 = scmp.ge.s32.totalorder %s4822_s18, 1  ;;  %s4822_s18 = sphi %s4868_s18, %s17_s18  }
   0x3   : > { %p158_p1 = scmp.lt.s32.totalorder %s4822_s18, 3  ;;  %p7804_p2 = scmp.eq.s32.totalorder %s4874_s19, 0 }
   0x4   : > { %s4824_s21 = smov [#allocation5]   ;;  %s4825_s23 = smov [#allocation7]  }
   0x5   : > { %p4879_p3 = pnand %p4256_p0, %p158_p1  ;;  %s174_s22 = sshll.u32 %s4824_s21, 4  ;;  %s175_s22 = int_to_ptr.vmem [resolvable:$true] %s174_s22 }
   0x6   : > { %s188_s24 = sshll.u32 %s4825_s23, 4  ;;  %s4752_s28 = scalar_lea.hbm %s7800_s2, 16  ;;  %s4891_s24 = int_to_ptr.vmem [resolvable:$true] %s188_s24 }
   0x7   : > { %s7880_s20 = scalar_select %p4879_p3, 1, 0 }
   0x8   : > { %p4644_p4 = pneg %p4879_p3  ;;  %p4753_p6 = scmp.ne.s32.totalorder %s7800_s2, %s4752_s28 }
   0x9   : > { %p4759_p10 = scmp.lt.u32.totalorder %s4752_s28, %s7800_s2 }
   0xa   : > { %p4887_p5 = pnand %p7804_p2, %p4644_p4 }
   0xc   : > { %p4754_p7 = pneg %p4887_p5 }
   0xe   : > { %p4755_p8 = pnand %p4754_p7, %p4753_p6 }
  0x10   : > { %p4756_p9 = pneg %p4755_p8 }
  0x12   : > { %p4761_p11 = pnand %p4759_p10, %p4756_p9 }
  0x14   : > { %4764 = shalt.err (!%p4761_p11)
}
  0x15   : > { %s4765_s8 = scalar_lea.vmem %s175_s22, 16  ;;  %s4772_s9 = scalar_lea.vmem %s175_s22, 32 }
  0x16   : > { %p4766_p12 = scmp.ne.s32.totalorder %s175_s22, %s4765_s8  ;;  %p4773_p1 = scmp.lt.s32.totalorder %s175_s22, %s175_s22 }
  0x17   : > { %p4774_p4 = scmp.lt.s32.totalorder %s4772_s9, %s4765_s8 }
  0x18   : > { %p4768_p13 = pnand %p4766_p12, %p4754_p7 }
  0x19   : > { %p4775_p2 = por %p4774_p4, %p4773_p1 }
  0x1a   : > { %p4769_p0 = pneg %p4768_p13 }
  0x1c   : > { %p4776_p3 = pnand %p4775_p2, %p4769_p0 }
  0x1e   : > { %4779 = shalt.err (!%p4776_p3)
}
  0x1f   : > { %4647 = dma.hbm_to_vmem [thread:$0]  (!%p4887_p5), %s7800_s2, 16, %s175_s22, [#allocation6]  }
  0x20   : > { %s4780_s14 = scalar_lea.hbm %s7802_s4, 16 }
  0x21   : > { %p4781_p6 = scmp.ne.s32.totalorder %s7802_s4, %s4780_s14  ;;  %p4787_p3 = scmp.lt.u32.totalorder %s4780_s14, %s7802_s4 }
  0x23   : > { %p4783_p8 = pnand %p4781_p6, %p4754_p7 }
  0x25   : > { %p4784_p2 = pneg %p4783_p8 }
  0x27   : > { %p4789_p9 = pnand %p4787_p3, %p4784_p2 }
  0x29   : > { %4792 = shalt.err (!%p4789_p9)
}
  0x2a   : > { %s4793_s22 = scalar_lea.vmem %s4891_s24, 16  ;;  %s4800_s23 = scalar_lea.vmem %s4891_s24, 32 }
  0x2b   : > { %p4794_p10 = scmp.ne.s32.totalorder %s4891_s24, %s4793_s22  ;;  %p4801_p13 = scmp.lt.s32.totalorder %s4891_s24, %s4891_s24 }
  0x2c   : > { %p4802_p0 = scmp.lt.s32.totalorder %s4800_s23, %s4793_s22 }
  0x2d   : > { %p4796_p11 = pnand %p4794_p10, %p4754_p7 }
  0x2e   : > { %p4803_p1 = por %p4802_p0, %p4801_p13 }
  0x2f   : > { %p4797_p12 = pneg %p4796_p11 }
  0x31   : > { %p4804_p4 = pnand %p4803_p1, %p4797_p12 }
  0x33   : > { %4807 = shalt.err (!%p4804_p4)
}
  0x34   : > { %4650 = dma.hbm_to_vmem [thread:$0]  (!%p4887_p5), %s7802_s4, 16, %s4891_s24, [#allocation8]  }
  0x35   : > { %p7882_p6 = scmp.ne.s32.totalorder %s7880_s20, 0 }
  0x37   : > { %209 = sbr.rel (%p7882_p6) target bundleno = 1532 (0x5fc), region = 40 }
  0x3e   : > { %p7883_p7 = scmp.eq.s32.totalorder %s4874_s19, 0 }
  0x40   : > { %4813 = dma.done.wait (%p7883_p7), [#allocation6], 16   ;;  %p7884_p8 = pmov %p7883_p7 }
  0x41   : > { %p7885_p2 = pmov %p7883_p7 }
  0x42   : > { %4815 = vsyncadd (%p7884_p8), [#allocation6], 4294967280 }
  0x43   : > { %4817 = dma.done.wait (%p7885_p2), [#allocation8], 16   ;;  %p7886_p3 = pmov %p7885_p2 }
  0x44   : > { %p241_p9 = scmp.lt.s32.totalorder %s4874_s19, 1  ;;  %vm305_vm0 = vcmask 31744   ;;  %vm386_vm1 = vcmask 1046528   ;;  %s4826_s29 = smov 4   ;;  %vm596_vm2 = vcmask 1045504   ;;  %vm563_vm3 = vcmask 64544  }
  0x45   : > { %4819 = vsyncadd (%p7886_p3), [#allocation8], 4294967280  ;;  %s4827_s30 = smov 8   ;;  %s4828_s6 = smov 12   ;;  %vm773_vm4 = vcmask 97344   ;;  %vm1747_vm5 = vcmask 1043456  }
  0x46   : > { %s7963_s19 = smov (!%p241_p9, %s4874_s19), 1  ;;  %s4829_s7 = smov 16   ;;  %vm904_vm6 = vcmask 130144   ;;  %vm1039_vm7 = vcmask 162944   ;;  %vm1173_vm8 = vcmask 195744   ;;  %vm1304_vm9 = vcmask 228544  }
  0x47   : > { %s4635_s20 = smul.u32 432, %s7963_s19  ;;  %s4830_s12 = smov 20   ;;  %vm1439_vm10 = vcmask 261344   ;;  %vm1573_vm11 = vcmask 294144   ;;  %vm1650_vm12 = vcmask 293888   ;;  %vm2008_vm13 = vcmask 261120  }
  0x48   : > { %s4831_s17 = smov 24   ;;  %s4832_s21 = smov 28   ;;  %vm2019_vm14 = vcmask 253952   ;;  %vm2204_vm15 = vcmask 1040384  }
  0x49   : > { %s4959_s28 = scalar_lea.vmem %s7798_s0, %s4635_s20  ;;  %s4833_s26 = smov 32  }
  0x4a   : > { %v4962_v0 = vld [vmem:[%s4959_s28] sm:$0xff]  ;;  %v4965_v1 = vld [vmem:[%s4959_s28 + $0x8] sm:$0xff]  ;;  %v4968_v2 = vld [vmem:[%s4959_s28 + $0x18] sm:$0xff]  ;;  %s4836_s22 = smov 64   ;;  %s4837_s23 = smov 96  }
  0x4b   : > { %v387_v3 = vrot.slane %v4962_v0, 1  ;;  %v388_v4 = vrot.slane %v4965_v1, 1  ;;  %v4973_v5 = vld [vmem:[%s4959_s28 + $0x20] sm:$0xff]  ;;  %v392_v6 = vrot.slane %v4968_v2, 1  ;;  %v4977_v7 = vld [vmem:[%s4959_s28 + $0x10] sm:$0x3] }
  0x4c   : > { %306 = vst.msk [vmem:[#allocation3] sm:$0xff] %vm305_vm0, %v4962_v0  ;;  %307 = vst.msk [vmem:[#allocation3 + $0x8] sm:$0xff] %vm305_vm0, %v4965_v1  ;;  %v393_v8 = vrot.slane %v4973_v5, 1  ;;  %v390_v9 = vrot.slane %v4977_v7, 1  ;;  %v4988_v10 = vld [vmem:[%s4959_s28 + $0x28] sm:$0x3] }
  0x4d   : > { %308 = vst.msk [vmem:[#allocation3 + $0x10] sm:$0xff] %vm305_vm0, %v4968_v2  ;;  %v4991_v11 = vld [vmem:[%s4959_s28 + $0x30] sm:$0xff]  ;;  %v4994_v12 = vld [vmem:[%s4959_s28 + $0x38] sm:$0xff]  ;;  %309 = vst.msk [vmem:[#allocation3 + $0x18] sm:$0xff] %vm305_vm0, %v4973_v5  ;;  %v389_v13 = vsel %vm386_vm1, %v387_v3, %v388_v4  ;;  %v395_v14 = vrot.slane %v4988_v10, 1 }
  0x4e   : > { %v5001_v15 = vld [vmem:[%s4959_s28 + $0x40] sm:$0x3]  ;;  %v5004_v16 = vld [vmem:[%s4959_s28 + $0x48] sm:$0xff]  ;;  %310 = vst.msk [vmem:[#allocation3 + $0x20] sm:$0xff] %vm305_vm0, %v4991_v11  ;;  %311 = vst.msk [vmem:[#allocation3 + $0x28] sm:$0xff] %vm305_vm0, %v4994_v12  ;;  %467 = vrot.lane.b32.xlu0 %v389_v13, %s4826_s29  ;;  %v5012_v17 = vsel %vm386_vm1, %v392_v6, %v393_v8  ;;  %v391_v20 = vsel %vm386_vm1, %v388_v4, %v390_v9  ;;  %v397_v21 = vrot.slane %v4991_v11, 1 }
  0x4f   : > { %v5015_v18 = vld [vmem:[%s4959_s28 + $0x50] sm:$0xff]  ;;  %v5018_v19 = vld [vmem:[%s4959_s28 + $0x60] sm:$0xff]  ;;  %312 = vst.msk [vmem:[#allocation3 + $0x30] sm:$0xff] %vm305_vm0, %v5004_v16  ;;  %471 = vrot.lane.b32.xlu1 %v5012_v17, %s4826_s29  ;;  %v398_v22 = vrot.slane %v4994_v12, 1  ;;  %v5028_v23 = vld [vmem:[%s4959_s28 + $0x68] sm:$0xff]  ;;  %v5038_v25 = vsel %vm386_vm1, %v393_v8, %v395_v14  ;;  %v400_v26 = vrot.slane %v5001_v15, 1 }
  0x50   : > { %v5031_v24 = vld [vmem:[%s4959_s28 + $0x78] sm:$0xff]  ;;  %313 = vst.msk [vmem:[#allocation3 + $0x38] sm:$0xff] %vm305_vm0, %v5015_v18  ;;  %314 = vst.msk [vmem:[#allocation3 + $0x40] sm:$0xff] %vm305_vm0, %v5018_v19  ;;  %v5042_v27 = vld [vmem:[%s4959_s28 + $0x80] sm:$0xff]  ;;  %v402_v34 = vrot.slane %v5004_v16, 1  ;;  %v403_v35 = vrot.slane %v5015_v18, 1 }
  0x51   : > { %315 = vst.msk [vmem:[#allocation3 + $0x48] sm:$0xff] %vm305_vm0, %v5028_v23  ;;  %316 = vst.msk [vmem:[#allocation3 + $0x50] sm:$0xff] %vm305_vm0, %v5031_v24  ;;  %v5049_v28 = vld [vmem:[%s4959_s28 + $0x58] sm:$0x3]  ;;  %v5052_v29 = vld [vmem:[%s4959_s28 + $0x90] sm:$0xff]  ;;  %v5073_v33 = vsel %vm386_vm1, %v397_v21, %v398_v22  ;;  %v5091_v39 = vsel %vm386_vm1, %v398_v22, %v400_v26  ;;  %v407_v48 = vrot.slane %v5018_v19, 1 }
  0x52   : > { %v5055_v30 = vld [vmem:[%s4959_s28 + $0x98] sm:$0xff]  ;;  %317 = vst.msk [vmem:[#allocation3 + $0x58] sm:$0xff] %vm305_vm0, %v5042_v27  ;;  %469 = vrot.lane.b32.xlu0 %v391_v20, %s4826_s29  ;;  %v5061_v31 = vld [vmem:[%s4959_s28 + $0xa8] sm:$0xff]  ;;  %v5064_v32 = vld [vmem:[%s4959_s28 + $0xb0] sm:$0xff]  ;;  %v405_v40 = vrot.slane %v5049_v28, 1  ;;  %v5129_v47 = vsel %vm386_vm1, %v402_v34, %v403_v35  ;;  %v408_v49 = vrot.slane %v5028_v23, 1 }
  0x53   : > { %318 = vst.msk [vmem:[#allocation3 + $0x60] sm:$0xff] %vm305_vm0, %v5052_v29  ;;  %319 = vst.msk [vmem:[#allocation3 + $0x68] sm:$0xff] %vm305_vm0, %v5055_v30  ;;  %473 = vrot.lane.b32.xlu1 %v5038_v25, %s4826_s29  ;;  %v5078_v36 = vld [vmem:[%s4959_s28 + $0xc0] sm:$0xff]  ;;  %v5081_v37 = vld [vmem:[%s4959_s28 + $0xc8] sm:$0xff]  ;;  %v412_v60 = vrot.slane %v5031_v24, 1  ;;  %v413_v61 = vrot.slane %v5042_v27, 1 }
  0x54   : > { %v5084_v38 = vld [vmem:[%s4959_s28 + $0xd8] sm:$0xff]  ;;  %320 = vst.msk [vmem:[#allocation3 + $0x70] sm:$0xff] %vm305_vm0, %v5061_v31  ;;  %321 = vst.msk [vmem:[#allocation3 + $0x78] sm:$0xff] %vm305_vm0, %v5064_v32  ;;  %v5095_v41 = vld [vmem:[%s4959_s28 + $0xe0] sm:$0xff]  ;;  %v5144_v52 = vsel %vm386_vm1, %v403_v35, %v405_v40  ;;  %v5175_v59 = vsel %vm386_vm1, %v407_v48, %v408_v49  ;;  %v597_v8 = vrot.slane %v4962_v0, 2  ;;  %v417_v13 = vrot.slane %v5052_v29, 1 }
  0x55   : > { %322 = vst.msk [vmem:[#allocation3 + $0x80] sm:$0xff] %vm305_vm0, %v5078_v36  ;;  %323 = vst.msk [vmem:[#allocation3 + $0x88] sm:$0xff] %vm305_vm0, %v5081_v37  ;;  %v5104_v42 = vld [vmem:[%s4959_s28 + $0x70] sm:$0x3]  ;;  %v5110_v44 = vld [vmem:[%s4959_s28 + $0xf8] sm:$0xff]  ;;  %v5206_v9 = vsel %vm386_vm1, %v412_v60, %v413_v61  ;;  %v418_v14 = vrot.slane %v5055_v30, 1 }
  0x56   : > { %324 = vst.msk [vmem:[#allocation3 + $0x90] sm:$0xff] %vm305_vm0, %v5084_v38  ;;  %v5107_v43 = vld [vmem:[%s4959_s28 + $0xf0] sm:$0xff]  ;;  %325 = vst.msk [vmem:[#allocation3 + $0x98] sm:$0xff] %vm305_vm0, %v5095_v41  ;;  %475 = vrot.lane.b32.xlu0 %v5073_v33, %s4826_s29  ;;  %v5117_v45 = vld [vmem:[%s4959_s28 + $0x108] sm:$0xff]  ;;  %v410_v53 = vrot.slane %v5104_v42, 1  ;;  %v7806_v20 = vrot.slane %v4965_v1, 2 }
  0x57   : > { %v5120_v46 = vld [vmem:[%s4959_s28 + $0x110] sm:$0xff]  ;;  %326 = vst.msk [vmem:[#allocation3 + $0xa0] sm:$0xff] %vm305_vm0, %v5107_v43  ;;  %327 = vst.msk [vmem:[#allocation3 + $0xa8] sm:$0xff] %vm305_vm0, %v5110_v44  ;;  %477 = vrot.lane.b32.xlu1 %v5091_v39, %s4826_s29  ;;  %v5134_v50 = vld [vmem:[%s4959_s28 + $0x120] sm:$0xff]  ;;  %v5228_v34 = vsel %vm386_vm1, %v417_v13, %v418_v14  ;;  %v422_v35 = vrot.slane %v5061_v31, 1  ;;  %v423_v40 = vrot.slane %v5064_v32, 1 }
  0x58   : > { %v5137_v51 = vld [vmem:[%s4959_s28 + $0x128] sm:$0xff]  ;;  %328 = vst.msk [vmem:[#allocation3 + $0xb0] sm:$0xff] %vm305_vm0, %v5117_v45  ;;  %329 = vst.msk [vmem:[#allocation3 + $0xb8] sm:$0xff] %vm305_vm0, %v5120_v46  ;;  %v5148_v54 = vld [vmem:[%s4959_s28 + $0x138] sm:$0xff]  ;;  %v5190_v3 = vsel %vm386_vm1, %v408_v49, %v410_v53  ;;  %v5221_v0 = vsel %vm596_vm2, %v597_v8, %v7806_v20  ;;  %v433_v20 = vrot.slane %v5095_v41, 1 }
  0x59   : > { %330 = vst.msk [vmem:[#allocation3 + $0xc0] sm:$0xff] %vm305_vm0, %v5134_v50  ;;  %331 = vst.msk [vmem:[#allocation3 + $0xc8] sm:$0xff] %vm305_vm0, %v5137_v51  ;;  %v5155_v55 = vld [vmem:[%s4959_s28 + $0x88] sm:$0x3]  ;;  %v5158_v56 = vld [vmem:[%s4959_s28 + $0x140] sm:$0xff]  ;;  %v5244_v60 = vsel %vm386_vm1, %v422_v35, %v423_v40  ;;  %v432_v35 = vrot.slane %v5084_v38, 1 }
  0x5a   : > { %332 = vst.msk [vmem:[#allocation3 + $0xd0] sm:$0xff] %vm305_vm0, %v5148_v54  ;;  %479 = vrot.lane.b32.xlu0 %v5129_v47, %s4826_s29  ;;  %v5165_v57 = vld [vmem:[%s4959_s28 + $0x150] sm:$0xff]  ;;  %v5168_v58 = vld [vmem:[%s4959_s28 + $0x158] sm:$0xff]  ;;  %333 = vst.msk [vmem:[#allocation3 + $0xd8] sm:$0xff] %vm305_vm0, %v5158_v56  ;;  %v415_v4 = vrot.slane %v5155_v55, 1 }
  0x5b   : > { %481 = vrot.lane.b32.xlu1 %v5144_v52, %s4826_s29  ;;  %7887 = vst [vmem:[#allocation11_spill] sm:$0xff] %v5175_v59  ;;  %v5180_v62 = vld [vmem:[%s4959_s28 + $0x168] sm:$0xff]  ;;  %v5183_v63 = vld [vmem:[%s4959_s28 + $0x170] sm:$0xff]  ;;  %334 = vst.msk [vmem:[#allocation3 + $0xe0] sm:$0xff] %vm305_vm0, %v5165_v57 }
  0x5c   : > { %7888 = vst [vmem:[#allocation12_spill] sm:$0xff] %v5183_v63  ;;  %335 = vst.msk [vmem:[#allocation3 + $0xe8] sm:$0xff] %vm305_vm0, %v5168_v58  ;;  %v5198_v6 = vld [vmem:[%s4959_s28 + $0xa0] sm:$0x3]  ;;  %v5212_v21 = vsel %vm386_vm1, %v413_v61, %v415_v4  ;;  %v5216_v26 = vld [vmem:[%s4959_s28 + $0xb8] sm:$0x3] }
  0x5d   : > { %7889 = vst [vmem:[#allocation13_spill] sm:$0xff] %v5190_v3  ;;  %336 = vst.msk [vmem:[#allocation3 + $0xf0] sm:$0xff] %vm305_vm0, %v5180_v62  ;;  %v420_v22 = vrot.slane %v5198_v6, 1  ;;  %v425_v49 = vrot.slane %v5216_v26, 1  ;;  %v5237_v53 = vld [vmem:[%s4959_s28 + $0xd0] sm:$0x3] }
  0x5e   : > { %337 = vst.msk [vmem:[#allocation3 + $0xf8] sm:$0xff] %vm305_vm0, %v5183_v63  ;;  %483 = vrot.lane.b32.xlu0 %v5175_v59, %s4826_s29  ;;  %7890 = vst [vmem:[#allocation14_spill] sm:$0xff] %v5206_v9  ;;  %v427_v61 = vrot.slane %v5078_v36, 1  ;;  %v428_v4 = vrot.slane %v5081_v37, 1  ;;  %v430_v13 = vrot.slane %v5237_v53, 1  ;;  %vm2445_vm0 = vcmask 523520  }
  0x5f   : > { %485 = vrot.lane.b32.xlu1 %v5190_v3, %s4826_s29  ;;  %7891 = vst [vmem:[#allocation15_spill] sm:$0xff] %v5212_v21  ;;  %7892 = vst [vmem:[#allocation16_spill] sm:$0xff] %v5228_v34  ;;  %v5233_v48 = vsel %vm386_vm1, %v418_v14, %v420_v22  ;;  %v5249_v8 = vsel %vm386_vm1, %v423_v40, %v425_v49  ;;  %v5253_v14 = vld [vmem:[%s4959_s28 + $0xe8] sm:$0x3]  ;;  %v5333_v3 = vld [vmem:[%s4959_s28 + $0x160] sm:$0x3] }
  0x60   : > { %7893 = vst [vmem:[#allocation17_spill] sm:$0xff] %v5233_v48  ;;  %7894 = vst [vmem:[#allocation18_spill] sm:$0xff] %v5244_v60  ;;  %v5260_v22 = vsel %vm386_vm1, %v427_v61, %v428_v4  ;;  %v5265_v40 = vsel %vm386_vm1, %v428_v4, %v430_v13  ;;  %v435_v49 = vrot.slane %v5253_v14, 1  ;;  %v5276_v61 = vsel %vm386_vm1, %v432_v35, %v433_v20  ;;  %v5349_v59 = vld [vmem:[%s4959_s28 + $0x178] sm:$0x3] }
  0x61   : > { %7895 = vst [vmem:[#allocation19_spill] sm:$0xff] %v5249_v8  ;;  %7896 = vst [vmem:[#allocation20_spill] sm:$0xff] %v5260_v22 }
  0x62   : > { %487 = vrot.lane.b32.xlu0 %v5206_v9, %s4826_s29  ;;  %7897 = vst [vmem:[#allocation21_spill] sm:$0xff] %v5265_v40  ;;  %7898 = vst [vmem:[#allocation22_spill] sm:$0xff] %v5276_v61  ;;  %v5281_v4 = vsel %vm386_vm1, %v433_v20, %v435_v49  ;;  %v5317_v9 = vld [vmem:[%s4959_s28 + $0x148] sm:$0x3] }
  0x63   : > { %489 = vrot.lane.b32.xlu1 %v5212_v21, %s4826_s29  ;;  %7899 = vst [vmem:[#allocation23_spill] sm:$0xff] %v5281_v4  ;;  %v5301_v21 = vld [vmem:[%s4959_s28 + $0x130] sm:$0x3] }
  0x66   : > { %491 = vrot.lane.b32.xlu0 %v5228_v34, %s4826_s29  ;;  %v5285_v34 = vld [vmem:[%s4959_s28 + $0x118] sm:$0x3] }
  0x67   : > { %493 = vrot.lane.b32.xlu1 %v5233_v48, %s4826_s29  ;;  %v5269_v48 = vld [vmem:[%s4959_s28 + $0x100] sm:$0x3]  ;;  %v445_v49 = vrot.slane %v5285_v34, 1 }
  0x68   : > { %v440_v13 = vrot.slane %v5269_v48, 1 }
  0x6a   : > { %495 = vrot.lane.b32.xlu0 %v5244_v60, %s4826_s29  ;;  %v438_v60 = vrot.slane %v5110_v44, 1 }
  0x6b   : > { %497 = vrot.lane.b32.xlu1 %v5249_v8, %s4826_s29  ;;  %v437_v8 = vrot.slane %v5107_v43, 1 }
  0x6c   : > { %v5297_v20 = vsel %vm386_vm1, %v438_v60, %v440_v13  ;;  %v450_v13 = vrot.slane %v5301_v21, 1 }
  0x6d   : > { %v5292_v35 = vsel %vm386_vm1, %v437_v8, %v438_v60  ;;  %7901 = vst [vmem:[#allocation25_spill] sm:$0xff] %v5297_v20 }
  0x6e   : > { %499 = vrot.lane.b32.xlu0 %v5260_v22, %s4826_s29  ;;  %7900 = vst [vmem:[#allocation24_spill] sm:$0xff] %v5292_v35  ;;  %v443_v22 = vrot.slane %v5120_v46, 1 }
  0x6f   : > { %501 = vrot.lane.b32.xlu1 %v5265_v40, %s4826_s29  ;;  %v442_v40 = vrot.slane %v5117_v45, 1 }
  0x70   : > { %v5313_v60 = vsel %vm386_vm1, %v443_v22, %v445_v49  ;;  %v455_v49 = vrot.slane %v5317_v9, 1 }
  0x71   : > { %v5308_v8 = vsel %vm386_vm1, %v442_v40, %v443_v22  ;;  %7903 = vst [vmem:[#allocation27_spill] sm:$0xff] %v5313_v60 }
  0x72   : > { %503 = vrot.lane.b32.xlu0 %v5276_v61, %s4826_s29  ;;  %7902 = vst [vmem:[#allocation26_spill] sm:$0xff] %v5308_v8  ;;  %v448_v61 = vrot.slane %v5137_v51, 1 }
  0x73   : > { %505 = vrot.lane.b32.xlu1 %v5281_v4, %s4826_s29  ;;  %v447_v4 = vrot.slane %v5134_v50, 1 }
  0x74   : > { %v5329_v22 = vsel %vm386_vm1, %v448_v61, %v450_v13  ;;  %v460_v13 = vrot.slane %v5333_v3, 1 }
  0x75   : > { %v5324_v40 = vsel %vm386_vm1, %v447_v4, %v448_v61  ;;  %7905 = vst [vmem:[#allocation29_spill] sm:$0xff] %v5329_v22 }
  0x76   : > { %507 = vrot.lane.b32.xlu0 %v5292_v35, %s4826_s29  ;;  %7904 = vst [vmem:[#allocation28_spill] sm:$0xff] %v5324_v40  ;;  %v453_v35 = vrot.slane %v5158_v56, 1 }
  0x77   : > { %509 = vrot.lane.b32.xlu1 %v5297_v20, %s4826_s29  ;;  %v452_v20 = vrot.slane %v5148_v54, 1 }
  0x78   : > { %v5345_v61 = vsel %vm386_vm1, %v453_v35, %v455_v49  ;;  %v465_v49 = vrot.slane %v5349_v59, 1 }
  0x79   : > { %v5340_v4 = vsel %vm386_vm1, %v452_v20, %v453_v35  ;;  %7907 = vst [vmem:[#allocation31_spill] sm:$0xff] %v5345_v61 }
  0x7a   : > { %511 = vrot.lane.b32.xlu0 %v5308_v8, %s4826_s29  ;;  %7906 = vst [vmem:[#allocation30_spill] sm:$0xff] %v5340_v4  ;;  %v458_v8 = vrot.slane %v5168_v58, 1 }
  0x7b   : > { %513 = vrot.lane.b32.xlu1 %v5313_v60, %s4826_s29  ;;  %v457_v60 = vrot.slane %v5165_v57, 1 }
  0x7c   : > { %v5361_v35 = vsel %vm386_vm1, %v458_v8, %v460_v13  ;;  %v603_v13 = vrot.slane %v4973_v5, 2 }
  0x7d   : > { %v5356_v20 = vsel %vm386_vm1, %v457_v60, %v458_v8  ;;  %7909 = vst [vmem:[#allocation33_spill] sm:$0xff] %v5361_v35  ;;  %v602_v8 = vrot.slane %v4968_v2, 2 }
  0x7e   : > { %515 = vrot.lane.b32.xlu0 %v5324_v40, %s4826_s29  ;;  %7908 = vst [vmem:[#allocation32_spill] sm:$0xff] %v5356_v20  ;;  %v463_v40 = vrot.slane %v5183_v63, 1 }
  0x7f   : > { %517 = vrot.lane.b32.xlu1 %v5329_v22, %s4826_s29  ;;  %v462_v22 = vrot.slane %v5180_v62, 1 }
  0x80   : > { %v5372_v60 = vsel %vm386_vm1, %v463_v40, %v465_v49  ;;  %v608_v49 = vrot.slane %v4994_v12, 2 }
  0x81   : > { %7911 = vst [vmem:[#allocation35_spill] sm:$0xff] %v5372_v60 }
  0x82   : > { %519 = vrot.lane.b32.xlu0 %v5340_v4, %s4826_s29  ;;  %v600_v4 = vrot.slane %v4977_v7, 2  ;;  %v5389_v7 = vsel %vm596_vm2, %v602_v8, %v603_v13  ;;  %v617_v8 = vrot.slane %v5018_v19, 2 }
  0x83   : > { %521 = vrot.lane.b32.xlu1 %v5345_v61, %s4826_s29  ;;  %v5369_v61 = vsel %vm386_vm1, %v462_v22, %v463_v40  ;;  %v607_v40 = vrot.slane %v4991_v11, 2 }
  0x84   : > { %7910 = vst [vmem:[#allocation34_spill] sm:$0xff] %v5369_v61 }
  0x86   : > { %523 = vrot.lane.b32.xlu0 %v5356_v20, %s4826_s29  ;;  %v605_v20 = vrot.slane %v4988_v10, 2  ;;  %v5402_v10 = vsel %vm596_vm2, %v607_v40, %v608_v49  ;;  %v620_v40 = vrot.slane %v5104_v42, 2 }
  0x87   : > { %525 = vrot.lane.b32.xlu1 %v5361_v35, %s4826_s29  ;;  %v7912_v35 = vrot.slane %v4965_v1, 2  ;;  %v610_v1 = vrot.slane %v5001_v15, 2 }
  0x89   : > { %v601_v22 = vsel %vm596_vm2, %v7912_v35, %v600_v4  ;;  %v613_v4 = vrot.slane %v5015_v18, 2  ;;  %v5407_v35 = vsel %vm596_vm2, %v608_v49, %v610_v1  ;;  %v622_v49 = vrot.slane %v5031_v24, 2 }
  0x8a   : > { %527 = vrot.lane.b32.xlu0 %v5369_v61, %s4826_s29  ;;  %v623_v1 = vrot.slane %v5042_v27, 2 }
  0x8b   : > { %529 = vrot.lane.b32.xlu1 %v5372_v60, %s4826_s29  ;;  %v5394_v60 = vsel %vm596_vm2, %v603_v13, %v605_v20  ;;  %v615_v20 = vrot.slane %v5049_v28, 2  ;;  %v618_v13 = vrot.slane %v5028_v23, 2 }
  0x8c   : > { %v5441_v42 = vsel %vm596_vm2, %v622_v49, %v623_v1  ;;  %v633_v49 = vrot.slane %v5064_v32, 2 }
  0x8d   : > { %v5428_v28 = vsel %vm596_vm2, %v617_v8, %v618_v13  ;;  %v628_v8 = vrot.slane %v5055_v30, 2 }
  0x8e   : > { %677 = vrot.lane.b32.xlu0 %v5221_v0, %s4827_s30  ;;  %v612_v0 = vrot.slane %v5004_v16, 2 }
  0x8f   : > { %679 = vrot.lane.b32.xlu1 %v601_v22, %s4827_s30  ;;  %v5420_v22 = vsel %vm596_vm2, %v613_v4, %v615_v20  ;;  %v627_v20 = vrot.slane %v5052_v29, 2 }
  0x90   : > { %v5415_v15 = vsel %vm596_vm2, %v612_v0, %v613_v4  ;;  %v5433_v0 = vsel %vm596_vm2, %v618_v13, %v620_v40  ;;  %v625_v4 = vrot.slane %v5155_v55, 2  ;;  %v630_v13 = vrot.slane %v5198_v6, 2 }
  0x91   : > { %7913 = vst [vmem:[#allocation36_spill] sm:$0xff] %v5433_v0  ;;  %v5454_v55 = vsel %vm596_vm2, %v627_v20, %v628_v8  ;;  %v632_v40 = vrot.slane %v5061_v31, 2  ;;  %v638_v20 = vrot.slane %v5081_v37, 2 }
  0x92   : > { %681 = vrot.lane.b32.xlu0 %v5389_v7, %s4827_s30  ;;  %v5446_v61 = vsel %vm596_vm2, %v623_v1, %v625_v4  ;;  %v635_v1 = vrot.slane %v5216_v26, 2  ;;  %v637_v4 = vrot.slane %v5078_v36, 2 }
  0x93   : > { %683 = vrot.lane.b32.xlu1 %v5394_v60, %s4827_s30  ;;  %7914 = vst [vmem:[#allocation37_spill] sm:$0xff] %v5446_v61  ;;  %v5467_v6 = vsel %vm596_vm2, %v632_v40, %v633_v49  ;;  %v643_v40 = vrot.slane %v5095_v41, 2 }
  0x94   : > { %v5480_v26 = vsel %vm596_vm2, %v637_v4, %v638_v20  ;;  %v648_v4 = vrot.slane %v5110_v44, 2 }
  0x96   : > { %685 = vrot.lane.b32.xlu0 %v5402_v10, %s4827_s30 }
  0x97   : > { %687 = vrot.lane.b32.xlu1 %v5407_v35, %s4827_s30 }
  0x9a   : > { %689 = vrot.lane.b32.xlu0 %v5415_v15, %s4827_s30 }
  0x9b   : > { %691 = vrot.lane.b32.xlu1 %v5420_v22, %s4827_s30 }
  0x9e   : > { %693 = vrot.lane.b32.xlu0 %v5428_v28, %s4827_s30 }
  0x9f   : > { %695 = vrot.lane.b32.xlu1 %v5433_v0, %s4827_s30  ;;  %v5459_v0 = vsel %vm596_vm2, %v628_v8, %v630_v13  ;;  %v640_v8 = vrot.slane %v5237_v53, 2  ;;  %v642_v13 = vrot.slane %v5084_v38, 2 }
  0xa0   : > { %7915 = vst [vmem:[#allocation38_spill] sm:$0xff] %v5459_v0 }
  0xa1   : > { %v5493_v53 = vsel %vm596_vm2, %v642_v13, %v643_v40  ;;  %v653_v13 = vrot.slane %v5120_v46, 2 }
  0xa2   : > { %697 = vrot.lane.b32.xlu0 %v5441_v42, %s4827_s30 }
  0xa3   : > { %699 = vrot.lane.b32.xlu1 %v5446_v61, %s4827_s30  ;;  %v5472_v61 = vsel %vm596_vm2, %v633_v49, %v635_v1  ;;  %v645_v49 = vrot.slane %v5253_v14, 2  ;;  %v647_v1 = vrot.slane %v5107_v43, 2 }
  0xa4   : > { %7916 = vst [vmem:[#allocation39_spill] sm:$0xff] %v5472_v61 }
  0xa5   : > { %v5506_v14 = vsel %vm596_vm2, %v647_v1, %v648_v4  ;;  %v658_v1 = vrot.slane %v5137_v51, 2 }
  0xa6   : > { %701 = vrot.lane.b32.xlu0 %v5454_v55, %s4827_s30 }
  0xa7   : > { %703 = vrot.lane.b32.xlu1 %v5459_v0, %s4827_s30  ;;  %v5485_v0 = vsel %vm596_vm2, %v638_v20, %v640_v8  ;;  %v650_v20 = vrot.slane %v5269_v48, 2  ;;  %v652_v8 = vrot.slane %v5117_v45, 2 }
  0xa8   : > { %7917 = vst [vmem:[#allocation40_spill] sm:$0xff] %v5485_v0 }
  0xa9   : > { %v5519_v48 = vsel %vm596_vm2, %v652_v8, %v653_v13  ;;  %v663_v8 = vrot.slane %v5158_v56, 2 }
  0xaa   : > { %705 = vrot.lane.b32.xlu0 %v5467_v6, %s4827_s30 }
  0xab   : > { %707 = vrot.lane.b32.xlu1 %v5472_v61, %s4827_s30  ;;  %v5498_v61 = vsel %vm596_vm2, %v643_v40, %v645_v49  ;;  %v655_v40 = vrot.slane %v5285_v34, 2  ;;  %v657_v49 = vrot.slane %v5134_v50, 2 }
  0xac   : > { %7918 = vst [vmem:[#allocation41_spill] sm:$0xff] %v5498_v61 }
  0xad   : > { %v5532_v34 = vsel %vm596_vm2, %v657_v49, %v658_v1  ;;  %v668_v49 = vrot.slane %v5168_v58, 2 }
  0xae   : > { %709 = vrot.lane.b32.xlu0 %v5480_v26, %s4827_s30 }
  0xaf   : > { %711 = vrot.lane.b32.xlu1 %v5485_v0, %s4827_s30  ;;  %v5511_v0 = vsel %vm596_vm2, %v648_v4, %v650_v20  ;;  %v660_v4 = vrot.slane %v5301_v21, 2  ;;  %v662_v20 = vrot.slane %v5148_v54, 2 }
  0xb0   : > { %7919 = vst [vmem:[#allocation42_spill] sm:$0xff] %v5511_v0 }
  0xb1   : > { %v5545_v21 = vsel %vm596_vm2, %v662_v20, %v663_v8 }
  0xb2   : > { %713 = vrot.lane.b32.xlu0 %v5493_v53, %s4827_s30 }
  0xb3   : > { %715 = vrot.lane.b32.xlu1 %v5498_v61, %s4827_s30  ;;  %v5524_v61 = vsel %vm596_vm2, %v653_v13, %v655_v40  ;;  %v665_v13 = vrot.slane %v5317_v9, 2  ;;  %v667_v40 = vrot.slane %v5165_v57, 2  ;;  %v670_v9 = vrot.slane %v5333_v3, 2 }
  0xb4   : > { %7920 = vst [vmem:[#allocation43_spill] sm:$0xff] %v5524_v61 }
  0xb5   : > { %v5560_v20 = vsel %vm596_vm2, %v667_v40, %v668_v49  ;;  %v5565_v3 = vsel %vm596_vm2, %v668_v49, %v670_v9 }
  0xb6   : > { %717 = vrot.lane.b32.xlu0 %v5506_v14, %s4827_s30 }
  0xb7   : > { %719 = vrot.lane.b32.xlu1 %v5511_v0, %s4827_s30  ;;  %v5537_v0 = vsel %vm596_vm2, %v658_v1, %v660_v4  ;;  %v5550_v1 = vsel %vm596_vm2, %v663_v8, %v665_v13  ;;  %v673_v8 = vrot.slane %v5183_v63, 2 }
  0xb8   : > { %7921 = vst [vmem:[#allocation44_spill] sm:$0xff] %v5537_v0  ;;  %7922 = vst [vmem:[#allocation45_spill] sm:$0xff] %v5550_v1 }
  0xba   : > { %721 = vrot.lane.b32.xlu0 %v5519_v48, %s4827_s30 }
  0xbb   : > { %723 = vrot.lane.b32.xlu1 %v5524_v61, %s4827_s30 }
  0xbe   : > { %725 = vrot.lane.b32.xlu0 %v5532_v34, %s4827_s30 }
  0xbf   : > { %727 = vrot.lane.b32.xlu1 %v5537_v0, %s4827_s30  ;;  %v672_v0 = vrot.slane %v5180_v62, 2 }
  0xc0   : > { %v468_v61 = vpop.permute.xlu0 %467 }
  0xc1   : > { %564 = vst.msk [vmem:[#allocation3] sm:$0xff] %vm563_vm3, %v468_v61  ;;  %v472_v4 = vpop.permute.xlu1 %471  ;;  %v675_v61 = vrot.slane %v5349_v59, 2  ;;  %v5575_v40 = vsel %vm596_vm2, %v672_v0, %v673_v8 }
  0xc2   : > { %566 = vst.msk [vmem:[#allocation3 + $0x10] sm:$0xff] %vm563_vm3, %v472_v4  ;;  %729 = vrot.lane.b32.xlu0 %v5545_v21, %s4827_s30  ;;  %7923 = vst [vmem:[#allocation46_spill] sm:$0xff] %v5575_v40 }
  0xc3   : > { %731 = vrot.lane.b32.xlu1 %v5550_v1, %s4827_s30  ;;  %v5578_v49 = vsel %vm596_vm2, %v673_v8, %v675_v61 }
  0xc4   : > { %v470_v13 = vpop.permute.xlu0 %469  ;;  %7924 = vst [vmem:[#allocation47_spill] sm:$0xff] %v5578_v49 }
  0xc5   : > { %565 = vst.msk [vmem:[#allocation3 + $0x8] sm:$0xff] %vm563_vm3, %v470_v13  ;;  %v474_v4 = vpop.permute.xlu1 %473 }
  0xc6   : > { %567 = vst.msk [vmem:[#allocation3 + $0x18] sm:$0xff] %vm563_vm3, %v474_v4  ;;  %733 = vrot.lane.b32.xlu0 %v5560_v20, %s4827_s30 }
  0xc7   : > { %735 = vrot.lane.b32.xlu1 %v5565_v3, %s4827_s30 }
  0xc8   : > { %v476_v1 = vpop.permute.xlu0 %475 }
  0xc9   : > { %568 = vst.msk [vmem:[#allocation3 + $0x20] sm:$0xff] %vm563_vm3, %v476_v1  ;;  %v478_v59 = vpop.permute.xlu1 %477 }
  0xca   : > { %569 = vst.msk [vmem:[#allocation3 + $0x28] sm:$0xff] %vm563_vm3, %v478_v59  ;;  %737 = vrot.lane.b32.xlu0 %v5575_v40, %s4827_s30 }
  0xcb   : > { %739 = vrot.lane.b32.xlu1 %v5578_v49, %s4827_s30  ;;  %v7933_v49 = vld [vmem:[#allocation20_spill] sm:$0xff] }
  0xcc   : > { %v480_v9 = vpop.permute.xlu0 %479 }
  0xcd   : > { %570 = vst.msk [vmem:[#allocation3 + $0x30] sm:$0xff] %vm563_vm3, %v480_v9  ;;  %v482_v0 = vpop.permute.xlu1 %481 }
  0xce   : > { %571 = vst.msk [vmem:[#allocation3 + $0x38] sm:$0xff] %vm563_vm3, %v482_v0  ;;  %808 = vrot.lane.b32.xlu0 %v4968_v2, %s4828_s6 }
  0xcf   : > { %810 = vrot.lane.b32.xlu1 %v4973_v5, %s4828_s6 }
  0xd0   : > { %v484_v1 = vpop.permute.xlu0 %483 }
  0xd1   : > { %572 = vst.msk [vmem:[#allocation3 + $0x40] sm:$0xff] %vm563_vm3, %v484_v1  ;;  %v486_v8 = vpop.permute.xlu1 %485 }
  0xd2   : > { %573 = vst.msk [vmem:[#allocation3 + $0x48] sm:$0xff] %vm563_vm3, %v486_v8  ;;  %812 = vrot.lane.b32.xlu0 %v4991_v11, %s4828_s6 }
  0xd3   : > { %814 = vrot.lane.b32.xlu1 %v4994_v12, %s4828_s6 }
  0xd4   : > { %v488_v13 = vpop.permute.xlu0 %487 }
  0xd5   : > { %574 = vst.msk [vmem:[#allocation3 + $0x50] sm:$0xff] %vm563_vm3, %v488_v13  ;;  %v490_v61 = vpop.permute.xlu1 %489 }
  0xd6   : > { %575 = vst.msk [vmem:[#allocation3 + $0x58] sm:$0xff] %vm563_vm3, %v490_v61  ;;  %816 = vrot.lane.b32.xlu0 %v5004_v16, %s4828_s6 }
  0xd7   : > { %818 = vrot.lane.b32.xlu1 %v5015_v18, %s4828_s6 }
  0xd8   : > { %v492_v2 = vpop.permute.xlu0 %491 }
  0xd9   : > { %576 = vst.msk [vmem:[#allocation3 + $0x60] sm:$0xff] %vm563_vm3, %v492_v2  ;;  %v494_v5 = vpop.permute.xlu1 %493 }
  0xda   : > { %577 = vst.msk [vmem:[#allocation3 + $0x68] sm:$0xff] %vm563_vm3, %v494_v5  ;;  %820 = vrot.lane.b32.xlu0 %v5018_v19, %s4828_s6 }
  0xdb   : > { %822 = vrot.lane.b32.xlu1 %v5028_v23, %s4828_s6 }
  0xdc   : > { %v496_v4 = vpop.permute.xlu0 %495 }
  0xdd   : > { %578 = vst.msk [vmem:[#allocation3 + $0x70] sm:$0xff] %vm563_vm3, %v496_v4  ;;  %v498_v59 = vpop.permute.xlu1 %497 }
  0xde   : > { %579 = vst.msk [vmem:[#allocation3 + $0x78] sm:$0xff] %vm563_vm3, %v498_v59  ;;  %824 = vrot.lane.b32.xlu0 %v5031_v24, %s4828_s6 }
  0xdf   : > { %826 = vrot.lane.b32.xlu1 %v5042_v27, %s4828_s6 }
  0xe0   : > { %v500_v9 = vpop.permute.xlu0 %499 }
  0xe1   : > { %580 = vst.msk [vmem:[#allocation3 + $0x80] sm:$0xff] %vm563_vm3, %v500_v9  ;;  %v502_v0 = vpop.permute.xlu1 %501 }
  0xe2   : > { %581 = vst.msk [vmem:[#allocation3 + $0x88] sm:$0xff] %vm563_vm3, %v502_v0  ;;  %828 = vrot.lane.b32.xlu0 %v5052_v29, %s4828_s6 }
  0xe3   : > { %830 = vrot.lane.b32.xlu1 %v5055_v30, %s4828_s6 }
  0xe4   : > { %v504_v1 = vpop.permute.xlu0 %503 }
  0xe5   : > { %582 = vst.msk [vmem:[#allocation3 + $0x90] sm:$0xff] %vm563_vm3, %v504_v1  ;;  %v506_v8 = vpop.permute.xlu1 %505 }
  0xe6   : > { %583 = vst.msk [vmem:[#allocation3 + $0x98] sm:$0xff] %vm563_vm3, %v506_v8  ;;  %832 = vrot.lane.b32.xlu0 %v5061_v31, %s4828_s6 }
  0xe7   : > { %834 = vrot.lane.b32.xlu1 %v5064_v32, %s4828_s6 }
  0xe8   : > { %v508_v13 = vpop.permute.xlu0 %507 }
  0xe9   : > { %584 = vst.msk [vmem:[#allocation3 + $0xa0] sm:$0xff] %vm563_vm3, %v508_v13  ;;  %v510_v61 = vpop.permute.xlu1 %509 }
  0xea   : > { %585 = vst.msk [vmem:[#allocation3 + $0xa8] sm:$0xff] %vm563_vm3, %v510_v61  ;;  %836 = vrot.lane.b32.xlu0 %v5078_v36, %s4828_s6 }
  0xeb   : > { %838 = vrot.lane.b32.xlu1 %v5081_v37, %s4828_s6 }
  0xec   : > { %v512_v2 = vpop.permute.xlu0 %511 }
  0xed   : > { %586 = vst.msk [vmem:[#allocation3 + $0xb0] sm:$0xff] %vm563_vm3, %v512_v2  ;;  %v514_v5 = vpop.permute.xlu1 %513 }
  0xee   : > { %587 = vst.msk [vmem:[#allocation3 + $0xb8] sm:$0xff] %vm563_vm3, %v514_v5  ;;  %840 = vrot.lane.b32.xlu0 %v5084_v38, %s4828_s6 }
  0xef   : > { %842 = vrot.lane.b32.xlu1 %v5095_v41, %s4828_s6 }
  0xf0   : > { %v516_v4 = vpop.permute.xlu0 %515 }
  0xf1   : > { %588 = vst.msk [vmem:[#allocation3 + $0xc0] sm:$0xff] %vm563_vm3, %v516_v4  ;;  %v518_v59 = vpop.permute.xlu1 %517 }
  0xf2   : > { %589 = vst.msk [vmem:[#allocation3 + $0xc8] sm:$0xff] %vm563_vm3, %v518_v59  ;;  %844 = vrot.lane.b32.xlu0 %v5107_v43, %s4828_s6 }
  0xf3   : > { %846 = vrot.lane.b32.xlu1 %v5110_v44, %s4828_s6 }
  0xf4   : > { %v520_v9 = vpop.permute.xlu0 %519 }
  0xf5   : > { %590 = vst.msk [vmem:[#allocation3 + $0xd0] sm:$0xff] %vm563_vm3, %v520_v9  ;;  %v522_v0 = vpop.permute.xlu1 %521  ;;  %v299_v9 = vld [vmem:[%s4959_s28 + $0x180] sm:$0xff] }
  0xf6   : > { %591 = vst.msk [vmem:[#allocation3 + $0xd8] sm:$0xff] %vm563_vm3, %v522_v0  ;;  %848 = vrot.lane.b32.xlu0 %v5117_v45, %s4828_s6 }
  0xf7   : > { %850 = vrot.lane.b32.xlu1 %v5120_v46, %s4828_s6 }
  0xf8   : > { %v524_v1 = vpop.permute.xlu0 %523 }
  0xf9   : > { %592 = vst.msk [vmem:[#allocation3 + $0xe0] sm:$0xff] %vm563_vm3, %v524_v1  ;;  %v526_v8 = vpop.permute.xlu1 %525  ;;  %v300_v1 = vld [vmem:[%s4959_s28 + $0x188] sm:$0xff] }
  0xfa   : > { %593 = vst.msk [vmem:[#allocation3 + $0xe8] sm:$0xff] %vm563_vm3, %v526_v8  ;;  %852 = vrot.lane.b32.xlu0 %v5134_v50, %s4828_s6 }
  0xfb   : > { %854 = vrot.lane.b32.xlu1 %v5137_v51, %s4828_s6 }
  0xfc   : > { %v528_v13 = vpop.permute.xlu0 %527 }
  0xfd   : > { %594 = vst.msk [vmem:[#allocation3 + $0xf0] sm:$0xff] %vm563_vm3, %v528_v13  ;;  %v530_v61 = vpop.permute.xlu1 %529 }
  0xfe   : > { %595 = vst.msk [vmem:[#allocation3 + $0xf8] sm:$0xff] %vm563_vm3, %v530_v61  ;;  %856 = vrot.lane.b32.xlu0 %v5148_v54, %s4828_s6  ;;  %vm2807_vm3 = vcmask 1048320  }
  0xff   : > { %858 = vrot.lane.b32.xlu1 %v5158_v56, %s4828_s6 }
 0x100   : > { %v678_v2 = vpop.permute.xlu0 %677 }
 0x101   : > { %774 = vst.msk [vmem:[#allocation3] sm:$0xff] %vm773_vm4, %v678_v2  ;;  %v680_v5 = vpop.permute.xlu1 %679 }
 0x102   : > { %775 = vst.msk [vmem:[#allocation3 + $0x8] sm:$0xff] %vm773_vm4, %v680_v5  ;;  %860 = vrot.lane.b32.xlu0 %v5165_v57, %s4828_s6 }
 0x103   : > { %862 = vrot.lane.b32.xlu1 %v5168_v58, %s4828_s6 }
 0x104   : > { %v682_v4 = vpop.permute.xlu0 %681 }
 0x105   : > { %776 = vst.msk [vmem:[#allocation3 + $0x10] sm:$0xff] %vm773_vm4, %v682_v4  ;;  %v684_v59 = vpop.permute.xlu1 %683 }
 0x106   : > { %777 = vst.msk [vmem:[#allocation3 + $0x18] sm:$0xff] %vm773_vm4, %v684_v59  ;;  %864 = vrot.lane.b32.xlu0 %v5180_v62, %s4828_s6 }
 0x107   : > { %866 = vrot.lane.b32.xlu1 %v5183_v63, %s4828_s6  ;;  %v1640_v63 = vld [vmem:[%s7799_s1 + $0x10] sm:$0xff] }
 0x108   : > { %v686_v0 = vpop.permute.xlu0 %685 }
 0x109   : > { %778 = vst.msk [vmem:[#allocation3 + $0x20] sm:$0xff] %vm773_vm4, %v686_v0  ;;  %v688_v8 = vpop.permute.xlu1 %687  ;;  %v7926_v0 = vld [vmem:[#allocation13_spill] sm:$0xff] }
 0x10a   : > { %779 = vst.msk [vmem:[#allocation3 + $0x28] sm:$0xff] %vm773_vm4, %v688_v8  ;;  %868 = vrot.lane.b32.xlu0 %v299_v9, %s4828_s6  ;;  %v7925_v9 = vld [vmem:[#allocation11_spill] sm:$0xff] }
 0x10b   : > { %870 = vrot.lane.b32.xlu1 %v300_v1, %s4828_s6 }
 0x10c   : > { %v690_v13 = vpop.permute.xlu0 %689 }
 0x10d   : > { %780 = vst.msk [vmem:[#allocation3 + $0x30] sm:$0xff] %vm773_vm4, %v690_v13  ;;  %v692_v61 = vpop.permute.xlu1 %691  ;;  %v7927_v13 = vld [vmem:[#allocation14_spill] sm:$0xff] }
 0x10e   : > { %781 = vst.msk [vmem:[#allocation3 + $0x38] sm:$0xff] %vm773_vm4, %v692_v61  ;;  %943 = vrot.lane.b32.xlu0 %v5012_v17, %s4829_s7  ;;  %v7928_v61 = vld [vmem:[#allocation15_spill] sm:$0xff] }
 0x10f   : > { %945 = vrot.lane.b32.xlu1 %v5038_v25, %s4829_s7 }
 0x110   : > { %v694_v2 = vpop.permute.xlu0 %693 }
 0x111   : > { %782 = vst.msk [vmem:[#allocation3 + $0x40] sm:$0xff] %vm773_vm4, %v694_v2  ;;  %v696_v5 = vpop.permute.xlu1 %695 }
 0x112   : > { %783 = vst.msk [vmem:[#allocation3 + $0x48] sm:$0xff] %vm773_vm4, %v696_v5  ;;  %947 = vrot.lane.b32.xlu0 %v5073_v33, %s4829_s7 }
 0x113   : > { %949 = vrot.lane.b32.xlu1 %v5091_v39, %s4829_s7 }
 0x114   : > { %v698_v4 = vpop.permute.xlu0 %697 }
 0x115   : > { %784 = vst.msk [vmem:[#allocation3 + $0x50] sm:$0xff] %vm773_vm4, %v698_v4  ;;  %v700_v59 = vpop.permute.xlu1 %699  ;;  %v7929_v4 = vld [vmem:[#allocation16_spill] sm:$0xff] }
 0x116   : > { %785 = vst.msk [vmem:[#allocation3 + $0x58] sm:$0xff] %vm773_vm4, %v700_v59  ;;  %951 = vrot.lane.b32.xlu0 %v5129_v47, %s4829_s7  ;;  %v7930_v59 = vld [vmem:[#allocation17_spill] sm:$0xff] }
 0x117   : > { %953 = vrot.lane.b32.xlu1 %v5144_v52, %s4829_s7 }
 0x118   : > { %v702_v17 = vpop.permute.xlu0 %701 }
 0x119   : > { %786 = vst.msk [vmem:[#allocation3 + $0x60] sm:$0xff] %vm773_vm4, %v702_v17  ;;  %v704_v25 = vpop.permute.xlu1 %703 }
 0x11a   : > { %787 = vst.msk [vmem:[#allocation3 + $0x68] sm:$0xff] %vm773_vm4, %v704_v25  ;;  %955 = vrot.lane.b32.xlu0 %v7925_v9, %s4829_s7 }
 0x11b   : > { %957 = vrot.lane.b32.xlu1 %v7926_v0, %s4829_s7 }
 0x11c   : > { %v706_v1 = vpop.permute.xlu0 %705 }
 0x11d   : > { %788 = vst.msk [vmem:[#allocation3 + $0x70] sm:$0xff] %vm773_vm4, %v706_v1  ;;  %v708_v8 = vpop.permute.xlu1 %707  ;;  %v7931_v1 = vld [vmem:[#allocation18_spill] sm:$0xff] }
 0x11e   : > { %789 = vst.msk [vmem:[#allocation3 + $0x78] sm:$0xff] %vm773_vm4, %v708_v8  ;;  %959 = vrot.lane.b32.xlu0 %v7927_v13, %s4829_s7  ;;  %v7932_v8 = vld [vmem:[#allocation19_spill] sm:$0xff] }
 0x11f   : > { %961 = vrot.lane.b32.xlu1 %v7928_v61, %s4829_s7 }
 0x120   : > { %v710_v2 = vpop.permute.xlu0 %709 }
 0x121   : > { %790 = vst.msk [vmem:[#allocation3 + $0x80] sm:$0xff] %vm773_vm4, %v710_v2  ;;  %v712_v5 = vpop.permute.xlu1 %711 }
 0x122   : > { %791 = vst.msk [vmem:[#allocation3 + $0x88] sm:$0xff] %vm773_vm4, %v712_v5  ;;  %963 = vrot.lane.b32.xlu0 %v7929_v4, %s4829_s7 }
 0x123   : > { %965 = vrot.lane.b32.xlu1 %v7930_v59, %s4829_s7 }
 0x124   : > { %v714_v17 = vpop.permute.xlu0 %713 }
 0x125   : > { %792 = vst.msk [vmem:[#allocation3 + $0x90] sm:$0xff] %vm773_vm4, %v714_v17  ;;  %v716_v25 = vpop.permute.xlu1 %715  ;;  %v1638_v17 = vld [vmem:[%s7799_s1] sm:$0xff] }
 0x126   : > { %793 = vst.msk [vmem:[#allocation3 + $0x98] sm:$0xff] %vm773_vm4, %v716_v25  ;;  %967 = vrot.lane.b32.xlu0 %v7931_v1, %s4829_s7  ;;  %v1639_v25 = vld [vmem:[%s7799_s1 + $0x8] sm:$0xff] }
 0x127   : > { %969 = vrot.lane.b32.xlu1 %v7932_v8, %s4829_s7  ;;  %v4539_v40 = vpack.c.bf16 %v1639_v25, %v1638_v17 }
 0x128   : > { %v718_v2 = vpop.permute.xlu0 %717 }
 0x129   : > { %794 = vst.msk [vmem:[#allocation3 + $0xa0] sm:$0xff] %vm773_vm4, %v718_v2  ;;  %v720_v5 = vpop.permute.xlu1 %719  ;;  %4540 = vmatprep.subr.bf16.mxu0 %v4539_v40 }
 0x12a   : > { %795 = vst.msk [vmem:[#allocation3 + $0xa8] sm:$0xff] %vm773_vm4, %v720_v5  ;;  %971 = vrot.lane.b32.xlu0 %v7933_v49, %s4829_s7  ;;  %4542 = vmatpush3.bf16.msra.mxu0 %v4539_v40 }
 0x12b   : > { %1077 = vrot.lane.b32.xlu1 %v5389_v7, %s4830_s12  ;;  %v1641_v7 = vld [vmem:[%s7799_s1 + $0x18] sm:$0xff] }
 0x12c   : > { %v722_v2 = vpop.permute.xlu0 %721  ;;  %v4543_v17 = vpack.c.bf16 %v1641_v7, %v1640_v63 }
 0x12d   : > { %796 = vst.msk [vmem:[#allocation3 + $0xb0] sm:$0xff] %vm773_vm4, %v722_v2  ;;  %v724_v5 = vpop.permute.xlu1 %723 }
 0x12e   : > { %797 = vst.msk [vmem:[#allocation3 + $0xb8] sm:$0xff] %vm773_vm4, %v724_v5  ;;  %1079 = vrot.lane.b32.xlu0 %v5394_v60, %s4830_s12  ;;  %4544 = vmatprep.subr.bf16.mxu0 %v4543_v17 }
 0x12f   : > { %1208 = vrot.lane.b32.xlu1 %v4991_v11, %s4831_s17  ;;  %4546 = vmatpush3.bf16.msra.mxu0 %v4543_v17  ;;  %v1642_v11 = vld [vmem:[%s7799_s1 + $0x20] sm:$0xf] }
 0x130   : > { %v726_v25 = vpop.permute.xlu0 %725  ;;  %4433 = vmatprep.subr.msk.mxu0 %vm1747_vm5, %v1642_v11 }
 0x131   : > { %798 = vst.msk [vmem:[#allocation3 + $0xc0] sm:$0xff] %vm773_vm4, %v726_v25  ;;  %v728_v2 = vpop.permute.xlu1 %727 }
 0x132   : > { %799 = vst.msk [vmem:[#allocation3 + $0xc8] sm:$0xff] %vm773_vm4, %v728_v2  ;;  %1210 = vrot.lane.b32.xlu0 %v4994_v12, %s4831_s17 }
 0x133   : > { %1343 = vrot.lane.b32.xlu1 %v5073_v33, %s4832_s21  ;;  %4434 = vmatpush3.msk.msra.mxu0 %vm1747_vm5, %v1642_v11 }
 0x134   : > { %v730_v60 = vpop.permute.xlu0 %729 }
 0x135   : > { %800 = vst.msk [vmem:[#allocation3 + $0xd0] sm:$0xff] %vm773_vm4, %v730_v60  ;;  %v732_v63 = vpop.permute.xlu1 %731 }
 0x136   : > { %801 = vst.msk [vmem:[#allocation3 + $0xd8] sm:$0xff] %vm773_vm4, %v732_v63  ;;  %1345 = vrot.lane.b32.xlu0 %v5091_v39, %s4832_s21 }
 0x137   : > { %1477 = vrot.lane.b32.xlu1 %v5402_v10, %s4833_s26 }
 0x138   : > { %v734_v12 = vpop.permute.xlu0 %733 }
 0x139   : > { %802 = vst.msk [vmem:[#allocation3 + $0xe0] sm:$0xff] %vm773_vm4, %v734_v12  ;;  %v736_v33 = vpop.permute.xlu1 %735 }
 0x13a   : > { %803 = vst.msk [vmem:[#allocation3 + $0xe8] sm:$0xff] %vm773_vm4, %v736_v33  ;;  %1081 = vrot.lane.b32.xlu0 %v5402_v10, %s4830_s12 }
 0x13b   : > { %1479 = vrot.lane.b32.xlu1 %v5407_v35, %s4833_s26 }
 0x13c   : > { %v738_v40 = vpop.permute.xlu0 %737 }
 0x13d   : > { %804 = vst.msk [vmem:[#allocation3 + $0xf0] sm:$0xff] %vm773_vm4, %v738_v40  ;;  %v740_v39 = vpop.permute.xlu1 %739 }
 0x13e   : > { %805 = vst.msk [vmem:[#allocation3 + $0xf8] sm:$0xff] %vm773_vm4, %v740_v39  ;;  %1083 = vrot.lane.b32.xlu0 %v5407_v35, %s4830_s12 }
 0x13f   : > { %1212 = vrot.lane.b32.xlu1 %v5004_v16, %s4831_s17 }
 0x140   : > { %v809_v5 = vpop.permute.xlu0 %808 }
 0x141   : > { %905 = vst.msk [vmem:[#allocation3] sm:$0xff] %vm904_vm6, %v809_v5  ;;  %v811_v10 = vpop.permute.xlu1 %810 }
 0x142   : > { %906 = vst.msk [vmem:[#allocation3 + $0x8] sm:$0xff] %vm904_vm6, %v811_v10  ;;  %1214 = vrot.lane.b32.xlu0 %v5015_v18, %s4831_s17 }
 0x143   : > { %1347 = vrot.lane.b32.xlu1 %v5129_v47, %s4832_s21 }
 0x144   : > { %v813_v7 = vpop.permute.xlu0 %812 }
 0x145   : > { %907 = vst.msk [vmem:[#allocation3 + $0x10] sm:$0xff] %vm904_vm6, %v813_v7  ;;  %v815_v35 = vpop.permute.xlu1 %814 }
 0x146   : > { %908 = vst.msk [vmem:[#allocation3 + $0x18] sm:$0xff] %vm904_vm6, %v815_v35  ;;  %1349 = vrot.lane.b32.xlu0 %v5144_v52, %s4832_s21 }
 0x147   : > { %1481 = vrot.lane.b32.xlu1 %v5415_v15, %s4833_s26 }
 0x148   : > { %v817_v16 = vpop.permute.xlu0 %816 }
 0x149   : > { %909 = vst.msk [vmem:[#allocation3 + $0x20] sm:$0xff] %vm904_vm6, %v817_v16  ;;  %v819_v17 = vpop.permute.xlu1 %818 }
 0x14a   : > { %910 = vst.msk [vmem:[#allocation3 + $0x28] sm:$0xff] %vm904_vm6, %v819_v17  ;;  %1085 = vrot.lane.b32.xlu0 %v5415_v15, %s4830_s12 }
 0x14b   : > { %1483 = vrot.lane.b32.xlu1 %v5420_v22, %s4833_s26 }
 0x14c   : > { %v821_v18 = vpop.permute.xlu0 %820 }
 0x14d   : > { %911 = vst.msk [vmem:[#allocation3 + $0x30] sm:$0xff] %vm904_vm6, %v821_v18  ;;  %v823_v47 = vpop.permute.xlu1 %822 }
 0x14e   : > { %912 = vst.msk [vmem:[#allocation3 + $0x38] sm:$0xff] %vm904_vm6, %v823_v47  ;;  %1087 = vrot.lane.b32.xlu0 %v5420_v22, %s4830_s12 }
 0x14f   : > { %1216 = vrot.lane.b32.xlu1 %v5018_v19, %s4831_s17 }
 0x150   : > { %v825_v52 = vpop.permute.xlu0 %824 }
 0x151   : > { %913 = vst.msk [vmem:[#allocation3 + $0x40] sm:$0xff] %vm904_vm6, %v825_v52  ;;  %v827_v25 = vpop.permute.xlu1 %826 }
 0x152   : > { %914 = vst.msk [vmem:[#allocation3 + $0x48] sm:$0xff] %vm904_vm6, %v827_v25  ;;  %1218 = vrot.lane.b32.xlu0 %v5028_v23, %s4831_s17  ;;  %v7934_v23 = vld [vmem:[#allocation36_spill] sm:$0xff] }
 0x153   : > { %1351 = vrot.lane.b32.xlu1 %v7925_v9, %s4832_s21 }
 0x154   : > { %v829_v15 = vpop.permute.xlu0 %828 }
 0x155   : > { %915 = vst.msk [vmem:[#allocation3 + $0x50] sm:$0xff] %vm904_vm6, %v829_v15  ;;  %v831_v2 = vpop.permute.xlu1 %830 }
 0x156   : > { %916 = vst.msk [vmem:[#allocation3 + $0x58] sm:$0xff] %vm904_vm6, %v831_v2  ;;  %1353 = vrot.lane.b32.xlu0 %v7926_v0, %s4832_s21 }
 0x157   : > { %1485 = vrot.lane.b32.xlu1 %v5428_v28, %s4833_s26 }
 0x158   : > { %v833_v19 = vpop.permute.xlu0 %832 }
 0x159   : > { %917 = vst.msk [vmem:[#allocation3 + $0x60] sm:$0xff] %vm904_vm6, %v833_v19  ;;  %v835_v22 = vpop.permute.xlu1 %834 }
 0x15a   : > { %918 = vst.msk [vmem:[#allocation3 + $0x68] sm:$0xff] %vm904_vm6, %v835_v22  ;;  %1089 = vrot.lane.b32.xlu0 %v5428_v28, %s4830_s12 }
 0x15b   : > { %1487 = vrot.lane.b32.xlu1 %v7934_v23, %s4833_s26 }
 0x15c   : > { %v837_v9 = vpop.permute.xlu0 %836 }
 0x15d   : > { %919 = vst.msk [vmem:[#allocation3 + $0x70] sm:$0xff] %vm904_vm6, %v837_v9  ;;  %v839_v60 = vpop.permute.xlu1 %838  ;;  %v7941_v9 = vld [vmem:[#allocation23_spill] sm:$0xff] }
 0x15e   : > { %920 = vst.msk [vmem:[#allocation3 + $0x78] sm:$0xff] %vm904_vm6, %v839_v60  ;;  %1091 = vrot.lane.b32.xlu0 %v7934_v23, %s4830_s12  ;;  %v7940_v23 = vld [vmem:[#allocation22_spill] sm:$0xff] }
 0x15f   : > { %1220 = vrot.lane.b32.xlu1 %v5031_v24, %s4831_s17 }
 0x160   : > { %v841_v0 = vpop.permute.xlu0 %840 }
 0x161   : > { %921 = vst.msk [vmem:[#allocation3 + $0x80] sm:$0xff] %vm904_vm6, %v841_v0  ;;  %v843_v11 = vpop.permute.xlu1 %842 }
 0x162   : > { %922 = vst.msk [vmem:[#allocation3 + $0x88] sm:$0xff] %vm904_vm6, %v843_v11  ;;  %1222 = vrot.lane.b32.xlu0 %v5042_v27, %s4831_s17  ;;  %v7935_v27 = vld [vmem:[#allocation37_spill] sm:$0xff] }
 0x163   : > { %1355 = vrot.lane.b32.xlu1 %v7927_v13, %s4832_s21 }
 0x164   : > { %v845_v28 = vpop.permute.xlu0 %844 }
 0x165   : > { %923 = vst.msk [vmem:[#allocation3 + $0x90] sm:$0xff] %vm904_vm6, %v845_v28  ;;  %v847_v63 = vpop.permute.xlu1 %846 }
 0x166   : > { %924 = vst.msk [vmem:[#allocation3 + $0x98] sm:$0xff] %vm904_vm6, %v847_v63  ;;  %1357 = vrot.lane.b32.xlu0 %v7928_v61, %s4832_s21 }
 0x167   : > { %1489 = vrot.lane.b32.xlu1 %v5441_v42, %s4833_s26 }
 0x168   : > { %v849_v24 = vpop.permute.xlu0 %848 }
 0x169   : > { %925 = vst.msk [vmem:[#allocation3 + $0xa0] sm:$0xff] %vm904_vm6, %v849_v24  ;;  %v851_v12 = vpop.permute.xlu1 %850 }
 0x16a   : > { %926 = vst.msk [vmem:[#allocation3 + $0xa8] sm:$0xff] %vm904_vm6, %v851_v12  ;;  %1093 = vrot.lane.b32.xlu0 %v5441_v42, %s4830_s12 }
 0x16b   : > { %1491 = vrot.lane.b32.xlu1 %v7935_v27, %s4833_s26 }
 0x16c   : > { %v853_v13 = vpop.permute.xlu0 %852 }
 0x16d   : > { %927 = vst.msk [vmem:[#allocation3 + $0xb0] sm:$0xff] %vm904_vm6, %v853_v13  ;;  %v855_v33 = vpop.permute.xlu1 %854 }
 0x16e   : > { %928 = vst.msk [vmem:[#allocation3 + $0xb8] sm:$0xff] %vm904_vm6, %v855_v33  ;;  %1095 = vrot.lane.b32.xlu0 %v7935_v27, %s4830_s12 }
 0x16f   : > { %1224 = vrot.lane.b32.xlu1 %v5052_v29, %s4831_s17 }
 0x170   : > { %v857_v61 = vpop.permute.xlu0 %856 }
 0x171   : > { %929 = vst.msk [vmem:[#allocation3 + $0xc0] sm:$0xff] %vm904_vm6, %v857_v61  ;;  %v859_v40 = vpop.permute.xlu1 %858  ;;  %v7943_v61 = vld [vmem:[#allocation24_spill] sm:$0xff] }
 0x172   : > { %930 = vst.msk [vmem:[#allocation3 + $0xc8] sm:$0xff] %vm904_vm6, %v859_v40  ;;  %1226 = vrot.lane.b32.xlu0 %v5055_v30, %s4831_s17  ;;  %v7936_v30 = vld [vmem:[#allocation38_spill] sm:$0xff]  ;;  %v7944_v40 = vld [vmem:[#allocation25_spill] sm:$0xff] }
 0x173   : > { %1359 = vrot.lane.b32.xlu1 %v7929_v4, %s4832_s21 }
 0x174   : > { %v861_v42 = vpop.permute.xlu0 %860 }
 0x175   : > { %931 = vst.msk [vmem:[#allocation3 + $0xd0] sm:$0xff] %vm904_vm6, %v861_v42  ;;  %v863_v39 = vpop.permute.xlu1 %862 }
 0x176   : > { %932 = vst.msk [vmem:[#allocation3 + $0xd8] sm:$0xff] %vm904_vm6, %v863_v39  ;;  %1361 = vrot.lane.b32.xlu0 %v7930_v59, %s4832_s21 }
 0x177   : > { %1493 = vrot.lane.b32.xlu1 %v5454_v55, %s4833_s26 }
 0x178   : > { %v865_v29 = vpop.permute.xlu0 %864 }
 0x179   : > { %933 = vst.msk [vmem:[#allocation3 + $0xe0] sm:$0xff] %vm904_vm6, %v865_v29  ;;  %v867_v5 = vpop.permute.xlu1 %866 }
 0x17a   : > { %934 = vst.msk [vmem:[#allocation3 + $0xe8] sm:$0xff] %vm904_vm6, %v867_v5  ;;  %1495 = vrot.lane.b32.xlu0 %v7936_v30, %s4833_s26 }
 0x17b   : > { %1097 = vrot.lane.b32.xlu1 %v5454_v55, %s4830_s12 }
 0x17c   : > { %v869_v4 = vpop.permute.xlu0 %868 }
 0x17d   : > { %935 = vst.msk [vmem:[#allocation3 + $0xf0] sm:$0xff] %vm904_vm6, %v869_v4  ;;  %v871_v10 = vpop.permute.xlu1 %870 }
 0x17e   : > { %936 = vst.msk [vmem:[#allocation3 + $0xf8] sm:$0xff] %vm904_vm6, %v871_v10  ;;  %1099 = vrot.lane.b32.xlu0 %v7936_v30, %s4830_s12 }
 0x17f   : > { %1228 = vrot.lane.b32.xlu1 %v5061_v31, %s4831_s17 }
 0x180   : > { %v944_v59 = vpop.permute.xlu0 %943 }
 0x181   : > { %1040 = vst.msk [vmem:[#allocation3] sm:$0xff] %vm1039_vm7, %v944_v59  ;;  %v946_v7 = vpop.permute.xlu1 %945 }
 0x182   : > { %1041 = vst.msk [vmem:[#allocation3 + $0x8] sm:$0xff] %vm1039_vm7, %v946_v7  ;;  %1230 = vrot.lane.b32.xlu0 %v5064_v32, %s4831_s17  ;;  %v7937_v32 = vld [vmem:[#allocation39_spill] sm:$0xff] }
 0x183   : > { %1363 = vrot.lane.b32.xlu1 %v7931_v1, %s4832_s21 }
 0x184   : > { %v948_v55 = vpop.permute.xlu0 %947 }
 0x185   : > { %1042 = vst.msk [vmem:[#allocation3 + $0x10] sm:$0xff] %vm1039_vm7, %v948_v55  ;;  %v950_v35 = vpop.permute.xlu1 %949 }
 0x186   : > { %1043 = vst.msk [vmem:[#allocation3 + $0x18] sm:$0xff] %vm1039_vm7, %v950_v35  ;;  %1365 = vrot.lane.b32.xlu0 %v7932_v8, %s4832_s21 }
 0x187   : > { %1497 = vrot.lane.b32.xlu1 %v5467_v6, %s4833_s26 }
 0x188   : > { %v952_v31 = vpop.permute.xlu0 %951 }
 0x189   : > { %1044 = vst.msk [vmem:[#allocation3 + $0x20] sm:$0xff] %vm1039_vm7, %v952_v31  ;;  %v954_v16 = vpop.permute.xlu1 %953  ;;  %v7947_v31 = vld [vmem:[#allocation27_spill] sm:$0xff] }
 0x18a   : > { %1045 = vst.msk [vmem:[#allocation3 + $0x28] sm:$0xff] %vm1039_vm7, %v954_v16  ;;  %1499 = vrot.lane.b32.xlu0 %v7937_v32, %s4833_s26 }
 0x18b   : > { %1101 = vrot.lane.b32.xlu1 %v5467_v6, %s4830_s12 }
 0x18c   : > { %v956_v1 = vpop.permute.xlu0 %955 }
 0x18d   : > { %1046 = vst.msk [vmem:[#allocation3 + $0x30] sm:$0xff] %vm1039_vm7, %v956_v1  ;;  %v958_v17 = vpop.permute.xlu1 %957 }
 0x18e   : > { %1047 = vst.msk [vmem:[#allocation3 + $0x38] sm:$0xff] %vm1039_vm7, %v958_v17  ;;  %1103 = vrot.lane.b32.xlu0 %v7937_v32, %s4830_s12 }
 0x18f   : > { %1232 = vrot.lane.b32.xlu1 %v5078_v36, %s4831_s17  ;;  %v7938_v36 = vld [vmem:[#allocation21_spill] sm:$0xff] }
 0x190   : > { %v960_v8 = vpop.permute.xlu0 %959 }
 0x191   : > { %1048 = vst.msk [vmem:[#allocation3 + $0x40] sm:$0xff] %vm1039_vm7, %v960_v8  ;;  %v962_v18 = vpop.permute.xlu1 %961 }
 0x192   : > { %1049 = vst.msk [vmem:[#allocation3 + $0x48] sm:$0xff] %vm1039_vm7, %v962_v18  ;;  %1234 = vrot.lane.b32.xlu0 %v5081_v37, %s4831_s17  ;;  %v7939_v37 = vld [vmem:[#allocation40_spill] sm:$0xff] }
 0x193   : > { %1367 = vrot.lane.b32.xlu1 %v7933_v49, %s4832_s21 }
 0x194   : > { %v964_v6 = vpop.permute.xlu0 %963 }
 0x195   : > { %1050 = vst.msk [vmem:[#allocation3 + $0x50] sm:$0xff] %vm1039_vm7, %v964_v6  ;;  %v966_v47 = vpop.permute.xlu1 %965 }
 0x196   : > { %1051 = vst.msk [vmem:[#allocation3 + $0x58] sm:$0xff] %vm1039_vm7, %v966_v47  ;;  %1369 = vrot.lane.b32.xlu0 %v7938_v36, %s4832_s21 }
 0x197   : > { %1501 = vrot.lane.b32.xlu1 %v5480_v26, %s4833_s26 }
 0x198   : > { %v968_v52 = vpop.permute.xlu0 %967 }
 0x199   : > { %1052 = vst.msk [vmem:[#allocation3 + $0x60] sm:$0xff] %vm1039_vm7, %v968_v52  ;;  %v970_v25 = vpop.permute.xlu1 %969 }
 0x19a   : > { %1053 = vst.msk [vmem:[#allocation3 + $0x68] sm:$0xff] %vm1039_vm7, %v970_v25  ;;  %1503 = vrot.lane.b32.xlu0 %v7939_v37, %s4833_s26 }
 0x19b   : > { %973 = vrot.lane.b32.xlu1 %v7938_v36, %s4829_s7 }
 0x19c   : > { %v972_v49 = vpop.permute.xlu0 %971 }
 0x19d   : > { %1054 = vst.msk [vmem:[#allocation3 + $0x70] sm:$0xff] %vm1039_vm7, %v972_v49  ;;  %v1078_v15 = vpop.permute.xlu1 %1077  ;;  %v7950_v49 = vld [vmem:[#allocation29_spill] sm:$0xff] }
 0x19e   : > { %1174 = vst.msk [vmem:[#allocation3] sm:$0xff] %vm1173_vm8, %v1078_v15  ;;  %1105 = vrot.lane.b32.xlu0 %v5480_v26, %s4830_s12 }
 0x19f   : > { %1107 = vrot.lane.b32.xlu1 %v7939_v37, %s4830_s12  ;;  %v7949_v37 = vld [vmem:[#allocation28_spill] sm:$0xff] }
 0x1a0   : > { %v1080_v2 = vpop.permute.xlu0 %1079 }
 0x1a1   : > { %1175 = vst.msk [vmem:[#allocation3 + $0x8] sm:$0xff] %vm1173_vm8, %v1080_v2  ;;  %v1209_v19 = vpop.permute.xlu1 %1208  ;;  %v7951_v2 = vld [vmem:[#allocation44_spill] sm:$0xff] }
 0x1a2   : > { %1305 = vst.msk [vmem:[#allocation3] sm:$0xff] %vm1304_vm9, %v1209_v19  ;;  %1236 = vrot.lane.b32.xlu0 %v5084_v38, %s4831_s17 }
 0x1a3   : > { %1238 = vrot.lane.b32.xlu1 %v5095_v41, %s4831_s17  ;;  %v7942_v41 = vld [vmem:[#allocation41_spill] sm:$0xff] }
 0x1a4   : > { %v1211_v22 = vpop.permute.xlu0 %1210 }
 0x1a5   : > { %1306 = vst.msk [vmem:[#allocation3 + $0x8] sm:$0xff] %vm1304_vm9, %v1211_v22  ;;  %v1344_v26 = vpop.permute.xlu1 %1343 }
 0x1a6   : > { %1440 = vst.msk [vmem:[#allocation3] sm:$0xff] %vm1439_vm10, %v1344_v26  ;;  %1371 = vrot.lane.b32.xlu0 %v7940_v23, %s4832_s21 }
 0x1a7   : > { %1373 = vrot.lane.b32.xlu1 %v7941_v9, %s4832_s21 }
 0x1a8   : > { %v1346_v60 = vpop.permute.xlu0 %1345 }
 0x1a9   : > { %1441 = vst.msk [vmem:[#allocation3 + $0x8] sm:$0xff] %vm1439_vm10, %v1346_v60  ;;  %v1478_v38 = vpop.permute.xlu1 %1477 }
 0x1aa   : > { %1574 = vst.msk [vmem:[#allocation3] sm:$0xff] %vm1573_vm11, %v1478_v38  ;;  %1505 = vrot.lane.b32.xlu0 %v5493_v53, %s4833_s26 }
 0x1ab   : > { %1507 = vrot.lane.b32.xlu1 %v7942_v41, %s4833_s26 }
 0x1ac   : > { %v1082_v0 = vpop.permute.xlu0 %1081 }
 0x1ad   : > { %1176 = vst.msk [vmem:[#allocation3 + $0x10] sm:$0xff] %vm1173_vm8, %v1082_v0  ;;  %v1480_v11 = vpop.permute.xlu1 %1479 }
 0x1ae   : > { %1575 = vst.msk [vmem:[#allocation3 + $0x8] sm:$0xff] %vm1573_vm11, %v1480_v11  ;;  %975 = vrot.lane.b32.xlu0 %v7940_v23, %s4829_s7  ;;  %v7952_v11 = vld [vmem:[#allocation30_spill] sm:$0xff] }
 0x1af   : > { %977 = vrot.lane.b32.xlu1 %v7941_v9, %s4829_s7 }
 0x1b0   : > { %v1084_v28 = vpop.permute.xlu0 %1083 }
 0x1b1   : > { %1177 = vst.msk [vmem:[#allocation3 + $0x18] sm:$0xff] %vm1173_vm8, %v1084_v28  ;;  %v1213_v63 = vpop.permute.xlu1 %1212  ;;  %v1606_v24 = vld [vmem:[#allocation3] sm:$0xff] }
 0x1b2   : > { %1307 = vst.msk [vmem:[#allocation3 + $0x10] sm:$0xff] %vm1304_vm9, %v1213_v63  ;;  %4435 = vmatprep.mubr.msk.f32.mxu0 %vm1650_vm12, %v1606_v24  ;;  %1109 = vrot.lane.b32.xlu0 %v5493_v53, %s4830_s12  ;;  %v7953_v28 = vld [vmem:[#allocation31_spill] sm:$0xff] }
 0x1b3   : > { %1111 = vrot.lane.b32.xlu1 %v7942_v41, %s4830_s12 }
 0x1b4   : > { %v1215_v12 = vpop.permute.xlu0 %1214 }
 0x1b5   : > { %1308 = vst.msk [vmem:[#allocation3 + $0x18] sm:$0xff] %vm1304_vm9, %v1215_v12  ;;  %v1348_v27 = vpop.permute.xlu1 %1347  ;;  %v1607_v13 = vld [vmem:[#allocation3 + $0x8] sm:$0xff] }
 0x1b6   : > { %1442 = vst.msk [vmem:[#allocation3 + $0x10] sm:$0xff] %vm1439_vm10, %v1348_v27  ;;  %4436 = vmatmul.mubr.msk.f32.vlgmr.msra.gmra.mrb[0].mxu0 %vm1650_vm12, %v1607_v13  ;;  %1240 = vrot.lane.b32.xlu0 %v5107_v43, %s4831_s17  ;;  %v7945_v43 = vld [vmem:[#allocation42_spill] sm:$0xff] }
 0x1b7   : > { %1242 = vrot.lane.b32.xlu1 %v5110_v44, %s4831_s17 }
 0x1b8   : > { %v1350_v33 = vpop.permute.xlu0 %1349 }
 0x1b9   : > { %1443 = vst.msk [vmem:[#allocation3 + $0x18] sm:$0xff] %vm1439_vm10, %v1350_v33  ;;  %v1482_v53 = vpop.permute.xlu1 %1481 }
 0x1ba   : > { %1576 = vst.msk [vmem:[#allocation3 + $0x10] sm:$0xff] %vm1573_vm11, %v1482_v53  ;;  %1375 = vrot.lane.b32.xlu0 %v7943_v61, %s4832_s21 }
 0x1bb   : > { %1377 = vrot.lane.b32.xlu1 %v7944_v40, %s4832_s21 }
 0x1bc   : > { %v1086_v42 = vpop.permute.xlu0 %1085 }
 0x1bd   : > { %1178 = vst.msk [vmem:[#allocation3 + $0x20] sm:$0xff] %vm1173_vm8, %v1086_v42  ;;  %v1484_v39 = vpop.permute.xlu1 %1483 }
 0x1be   : > { %1577 = vst.msk [vmem:[#allocation3 + $0x18] sm:$0xff] %vm1573_vm11, %v1484_v39  ;;  %1509 = vrot.lane.b32.xlu0 %v5506_v14, %s4833_s26  ;;  %v7955_v39 = vld [vmem:[#allocation32_spill] sm:$0xff] }
 0x1bf   : > { %1511 = vrot.lane.b32.xlu1 %v7945_v43, %s4833_s26 }
 0x1c0   : > { %v1088_v44 = vpop.permute.xlu0 %1087 }
 0x1c1   : > { %1179 = vst.msk [vmem:[#allocation3 + $0x28] sm:$0xff] %vm1173_vm8, %v1088_v44  ;;  %v1217_v29 = vpop.permute.xlu1 %1216  ;;  %v1608_v5 = vld [vmem:[#allocation3 + $0x10] sm:$0xff] }
 0x1c2   : > { %1309 = vst.msk [vmem:[#allocation3 + $0x20] sm:$0xff] %vm1304_vm9, %v1217_v29  ;;  %4438 = vmatprep.mubr.msk.f32.mxu0 %vm1650_vm12, %v1608_v5  ;;  %979 = vrot.lane.b32.xlu0 %v7943_v61, %s4829_s7  ;;  %v4834_v29 = vmov 0.0  }
 0x1c3   : > { %981 = vrot.lane.b32.xlu1 %v7944_v40, %s4829_s7  ;;  %2011 = vst.msk [vmem:[#allocation2 + $0x10] sm:$0xff] %vm2008_vm13, %v4834_v29  ;;  %2009 = vst.msk [vmem:[#allocation2] sm:$0xff] %vm2008_vm13, %v4834_v29 }
 0x1c4   : > { %v1219_v30 = vpop.permute.xlu0 %1218  ;;  %2010 = vst.msk [vmem:[#allocation2 + $0x8] sm:$0xff] %vm2008_vm13, %v4834_v29  ;;  %2012 = vst.msk [vmem:[#allocation2 + $0x18] sm:$0xff] %vm2008_vm13, %v4834_v29 }
 0x1c5   : > { %1310 = vst.msk [vmem:[#allocation3 + $0x28] sm:$0xff] %vm1304_vm9, %v1219_v30  ;;  %v1352_v4 = vpop.permute.xlu1 %1351  ;;  %v1609_v10 = vld [vmem:[#allocation3 + $0x18] sm:$0xff] }
 0x1c6   : > { %1444 = vst.msk [vmem:[#allocation3 + $0x20] sm:$0xff] %vm1439_vm10, %v1352_v4  ;;  %4439 = vmatmul.mubr.msk.f32.gmra.mrb[2].mxu0 %vm1650_vm12, %v1609_v10  ;;  %1113 = vrot.lane.b32.xlu0 %v5506_v14, %s4830_s12  ;;  %v7946_v14 = vld [vmem:[#allocation26_spill] sm:$0xff] }
 0x1c7   : > { %1115 = vrot.lane.b32.xlu1 %v7945_v43, %s4830_s12  ;;  %v7956_v43 = vld [vmem:[#allocation33_spill] sm:$0xff]  ;;  %2014 = vst.msk [vmem:[#allocation2 + $0x220] sm:$0xff] %vm2008_vm13, %v4834_v29  ;;  %2015 = vst.msk [vmem:[#allocation2 + $0x228] sm:$0xff] %vm2008_vm13, %v4834_v29 }
 0x1c8   : > { %v1354_v59 = vpop.permute.xlu0 %1353  ;;  %2016 = vst.msk [vmem:[#allocation2 + $0x230] sm:$0xff] %vm2008_vm13, %v4834_v29  ;;  %2017 = vst.msk [vmem:[#allocation2 + $0x238] sm:$0xff] %vm2008_vm13, %v4834_v29 }
 0x1c9   : > { %1445 = vst.msk [vmem:[#allocation3 + $0x28] sm:$0xff] %vm1439_vm10, %v1354_v59  ;;  %v1486_v7 = vpop.permute.xlu1 %1485 }
 0x1ca   : > { %1578 = vst.msk [vmem:[#allocation3 + $0x20] sm:$0xff] %vm1573_vm11, %v1486_v7  ;;  %1244 = vrot.lane.b32.xlu0 %v5117_v45, %s4831_s17 }
 0x1cb   : > { %1246 = vrot.lane.b32.xlu1 %v5120_v46, %s4831_s17  ;;  %v7948_v46 = vld [vmem:[#allocation43_spill] sm:$0xff]  ;;  %2024 = vst.msk [vmem:[#allocation2 + $0xa7] sm:$0x1] %vm2019_vm14, %v4834_v29  ;;  %2020 = vst.msk [vmem:[#allocation2 + $0x27] sm:$0x1] %vm2019_vm14, %v4834_v29 }
 0x1cc   : > { %v1090_v55 = vpop.permute.xlu0 %1089  ;;  %2021 = vst.msk [vmem:[#allocation2 + $0x47] sm:$0x1] %vm2019_vm14, %v4834_v29  ;;  %2022 = vst.msk [vmem:[#allocation2 + $0x67] sm:$0x1] %vm2019_vm14, %v4834_v29 }
 0x1cd   : > { %1180 = vst.msk [vmem:[#allocation3 + $0x30] sm:$0xff] %vm1173_vm8, %v1090_v55  ;;  %v1488_v35 = vpop.permute.xlu1 %1487 }
 0x1ce   : > { %1579 = vst.msk [vmem:[#allocation3 + $0x28] sm:$0xff] %vm1573_vm11, %v1488_v35  ;;  %1379 = vrot.lane.b32.xlu0 %v7946_v14, %s4832_s21  ;;  %v7957_v35 = vld [vmem:[#allocation12_spill] sm:$0xff] }
 0x1cf   : > { %1381 = vrot.lane.b32.xlu1 %v7947_v31, %s4832_s21  ;;  %2023 = vst.msk [vmem:[#allocation2 + $0x87] sm:$0x1] %vm2019_vm14, %v4834_v29  ;;  %2025 = vst.msk [vmem:[#allocation2 + $0xc7] sm:$0x1] %vm2019_vm14, %v4834_v29 }
 0x1d0   : > { %v1092_v16 = vpop.permute.xlu0 %1091  ;;  %2026 = vst.msk [vmem:[#allocation2 + $0xe7] sm:$0x1] %vm2019_vm14, %v4834_v29  ;;  %2027 = vst.msk [vmem:[#allocation2 + $0x107] sm:$0x1] %vm2019_vm14, %v4834_v29 }
 0x1d1   : > { %1181 = vst.msk [vmem:[#allocation3 + $0x38] sm:$0xff] %vm1173_vm8, %v1092_v16  ;;  %v1221_v32 = vpop.permute.xlu1 %1220  ;;  %v1610_v45 = vld [vmem:[#allocation3 + $0x20] sm:$0xff] }
 0x1d2   : > { %1311 = vst.msk [vmem:[#allocation3 + $0x30] sm:$0xff] %vm1304_vm9, %v1221_v32  ;;  %4441 = vmatprep.mubr.msk.f32.mxu0 %vm1650_vm12, %v1610_v45  ;;  %1513 = vrot.lane.b32.xlu0 %v5519_v48, %s4833_s26  ;;  %v7961_v45 = vld [vmem:[#allocation47_spill] sm:$0xff] }
 0x1d3   : > { %1515 = vrot.lane.b32.xlu1 %v7948_v46, %s4833_s26  ;;  %2028 = vst.msk [vmem:[#allocation2 + $0x127] sm:$0x1] %vm2019_vm14, %v4834_v29  ;;  %2029 = vst.msk [vmem:[#allocation2 + $0x147] sm:$0x1] %vm2019_vm14, %v4834_v29 }
 0x1d4   : > { %v1223_v1 = vpop.permute.xlu0 %1222  ;;  %2030 = vst.msk [vmem:[#allocation2 + $0x167] sm:$0x1] %vm2019_vm14, %v4834_v29  ;;  %2031 = vst.msk [vmem:[#allocation2 + $0x187] sm:$0x1] %vm2019_vm14, %v4834_v29 }
 0x1d5   : > { %1312 = vst.msk [vmem:[#allocation3 + $0x38] sm:$0xff] %vm1304_vm9, %v1223_v1  ;;  %v1356_v17 = vpop.permute.xlu1 %1355  ;;  %v1611_v8 = vld [vmem:[#allocation3 + $0x28] sm:$0xff] }
 0x1d6   : > { %1446 = vst.msk [vmem:[#allocation3 + $0x30] sm:$0xff] %vm1439_vm10, %v1356_v17  ;;  %4442 = vmatmul.mubr.msk.f32.gmra.mrb[4].mxu0 %vm1650_vm12, %v1611_v8  ;;  %983 = vrot.lane.b32.xlu0 %v7946_v14, %s4829_s7 }
 0x1d7   : > { %985 = vrot.lane.b32.xlu1 %v7947_v31, %s4829_s7  ;;  %2032 = vst.msk [vmem:[#allocation2 + $0x1a7] sm:$0x1] %vm2019_vm14, %v4834_v29  ;;  %2033 = vst.msk [vmem:[#allocation2 + $0x1c7] sm:$0x1] %vm2019_vm14, %v4834_v29 }
 0x1d8   : > { %v1358_v18 = vpop.permute.xlu0 %1357  ;;  %2034 = vst.msk [vmem:[#allocation2 + $0x1e7] sm:$0x1] %vm2019_vm14, %v4834_v29  ;;  %2035 = vst.msk [vmem:[#allocation2 + $0x207] sm:$0x1] %vm2019_vm14, %v4834_v29 }
 0x1d9   : > { %1447 = vst.msk [vmem:[#allocation3 + $0x38] sm:$0xff] %vm1439_vm10, %v1358_v18  ;;  %v1490_v6 = vpop.permute.xlu1 %1489 }
 0x1da   : > { %1580 = vst.msk [vmem:[#allocation3 + $0x30] sm:$0xff] %vm1573_vm11, %v1490_v6  ;;  %1117 = vrot.lane.b32.xlu0 %v5519_v48, %s4830_s12 }
 0x1db   : > { %1119 = vrot.lane.b32.xlu1 %v7948_v46, %s4830_s12  ;;  %2036 = vst.msk [vmem:[#allocation2 + $0x38] sm:$0x1] %vm2019_vm14, %v4834_v29  ;;  %2037 = vst.msk [vmem:[#allocation2 + $0x58] sm:$0x1] %vm2019_vm14, %v4834_v29 }
 0x1dc   : > { %v1094_v47 = vpop.permute.xlu0 %1093  ;;  %2038 = vst.msk [vmem:[#allocation2 + $0x78] sm:$0x1] %vm2019_vm14, %v4834_v29  ;;  %2039 = vst.msk [vmem:[#allocation2 + $0x98] sm:$0x1] %vm2019_vm14, %v4834_v29 }
 0x1dd   : > { %1182 = vst.msk [vmem:[#allocation3 + $0x40] sm:$0xff] %vm1173_vm8, %v1094_v47  ;;  %v1492_v36 = vpop.permute.xlu1 %1491  ;;  %v301_v47 = vld [vmem:[%s4959_s28 + $0x190] sm:$0x3] }
 0x1de   : > { %1581 = vst.msk [vmem:[#allocation3 + $0x38] sm:$0xff] %vm1573_vm11, %v1492_v36  ;;  %1248 = vrot.lane.b32.xlu0 %v5134_v50, %s4831_s17  ;;  %v4749_v36 = vld [vmem:[%s4959_s28 + $0x180] sm:$0xff] }
 0x1df   : > { %1250 = vrot.lane.b32.xlu1 %v5137_v51, %s4831_s17  ;;  %2040 = vst.msk [vmem:[#allocation2 + $0xb8] sm:$0x1] %vm2019_vm14, %v4834_v29  ;;  %2041 = vst.msk [vmem:[#allocation2 + $0xd8] sm:$0x1] %vm2019_vm14, %v4834_v29 }
 0x1e0   : > { %v1096_v52 = vpop.permute.xlu0 %1095  ;;  %2042 = vst.msk [vmem:[#allocation2 + $0xf8] sm:$0x1] %vm2019_vm14, %v4834_v29  ;;  %2043 = vst.msk [vmem:[#allocation2 + $0x118] sm:$0x1] %vm2019_vm14, %v4834_v29 }
 0x1e1   : > { %1183 = vst.msk [vmem:[#allocation3 + $0x48] sm:$0xff] %vm1173_vm8, %v1096_v52  ;;  %v1225_v25 = vpop.permute.xlu1 %1224  ;;  %v1612_v48 = vld [vmem:[#allocation3 + $0x30] sm:$0xff]  ;;  %v938_v52 = vrot.slane %v4749_v36, 1 }
 0x1e2   : > { %1313 = vst.msk [vmem:[#allocation3 + $0x40] sm:$0xff] %vm1304_vm9, %v1225_v25  ;;  %4444 = vmatprep.mubr.msk.f32.mxu0 %vm1650_vm12, %v1612_v48  ;;  %1383 = vrot.lane.b32.xlu0 %v7949_v37, %s4832_s21  ;;  %v4750_v25 = vld [vmem:[%s4959_s28 + $0x188] sm:$0xff] }
 0x1e3   : > { %1385 = vrot.lane.b32.xlu1 %v7950_v49, %s4832_s21  ;;  %2044 = vst.msk [vmem:[#allocation2 + $0x138] sm:$0x1] %vm2019_vm14, %v4834_v29  ;;  %2045 = vst.msk [vmem:[#allocation2 + $0x158] sm:$0x1] %vm2019_vm14, %v4834_v29  ;;  %v939_v48 = vrot.slane %v4750_v25, 1 }
 0x1e4   : > { %v1227_v15 = vpop.permute.xlu0 %1226  ;;  %2046 = vst.msk [vmem:[#allocation2 + $0x178] sm:$0x1] %vm2019_vm14, %v4834_v29  ;;  %2047 = vst.msk [vmem:[#allocation2 + $0x198] sm:$0x1] %vm2019_vm14, %v4834_v29 }
 0x1e5   : > { %1314 = vst.msk [vmem:[#allocation3 + $0x48] sm:$0xff] %vm1304_vm9, %v1227_v15  ;;  %v1360_v50 = vpop.permute.xlu1 %1359  ;;  %v1613_v51 = vld [vmem:[#allocation3 + $0x38] sm:$0xff] }
 0x1e6   : > { %1448 = vst.msk [vmem:[#allocation3 + $0x40] sm:$0xff] %vm1439_vm10, %v1360_v50  ;;  %4445 = vmatmul.mubr.msk.f32.gmra.mrb[6].mxu0 %vm1650_vm12, %v1613_v51  ;;  %1517 = vrot.lane.b32.xlu0 %v5532_v34, %s4833_s26  ;;  %v1072_v50 = vrot.slane %v4749_v36, 2  ;;  %v1073_v51 = vrot.slane %v4750_v25, 2 }
 0x1e7   : > { %1519 = vrot.lane.b32.xlu1 %v7951_v2, %s4833_s26  ;;  %2048 = vst.msk [vmem:[#allocation2 + $0x1b8] sm:$0x1] %vm2019_vm14, %v4834_v29  ;;  %2049 = vst.msk [vmem:[#allocation2 + $0x1d8] sm:$0x1] %vm2019_vm14, %v4834_v29 }
 0x1e8   : > { %v1362_v19 = vpop.permute.xlu0 %1361  ;;  %2050 = vst.msk [vmem:[#allocation2 + $0x1f8] sm:$0x1] %vm2019_vm14, %v4834_v29  ;;  %2051 = vst.msk [vmem:[#allocation2 + $0x218] sm:$0x1] %vm2019_vm14, %v4834_v29 }
 0x1e9   : > { %1449 = vst.msk [vmem:[#allocation3 + $0x48] sm:$0xff] %vm1439_vm10, %v1362_v19  ;;  %v1494_v22 = vpop.permute.xlu1 %1493 }
 0x1ea   : > { %1582 = vst.msk [vmem:[#allocation3 + $0x40] sm:$0xff] %vm1573_vm11, %v1494_v22  ;;  %987 = vrot.lane.b32.xlu0 %v7949_v37, %s4829_s7 }
 0x1eb   : > { %989 = vrot.lane.b32.xlu1 %v7950_v49, %s4829_s7  ;;  %v941_v49 = vrot.slane %v301_v47, 1 }
 0x1ec   : > { %v1496_v26 = vpop.permute.xlu0 %1495 }
 0x1ed   : > { %1583 = vst.msk [vmem:[#allocation3 + $0x48] sm:$0xff] %vm1573_vm11, %v1496_v26  ;;  %v1098_v23 = vpop.permute.xlu1 %1097  ;;  %v942_v22 = vsel %vm386_vm1, %v939_v48, %v941_v49  ;;  %v1075_v26 = vrot.slane %v301_v47, 2 }
 0x1ee   : > { %1184 = vst.msk [vmem:[#allocation3 + $0x50] sm:$0xff] %vm1173_vm8, %v1098_v23  ;;  %1121 = vrot.lane.b32.xlu0 %v5532_v34, %s4830_s12 }
 0x1ef   : > { %1123 = vrot.lane.b32.xlu1 %v7951_v2, %s4830_s12  ;;  %v940_v2 = vsel %vm386_vm1, %v938_v52, %v939_v48 }
 0x1f0   : > { %v1100_v9 = vpop.permute.xlu0 %1099 }
 0x1f1   : > { %1185 = vst.msk [vmem:[#allocation3 + $0x58] sm:$0xff] %vm1173_vm8, %v1100_v9  ;;  %v1614_v60 = vld [vmem:[#allocation3 + $0x40] sm:$0xff]  ;;  %v1229_v38 = vpop.permute.xlu1 %1228  ;;  %v1074_v9 = vsel %vm596_vm2, %v1072_v50, %v1073_v51 }
 0x1f2   : > { %4447 = vmatprep.mubr.msk.f32.mxu0 %vm1650_vm12, %v1614_v60  ;;  %1315 = vst.msk [vmem:[#allocation3 + $0x50] sm:$0xff] %vm1304_vm9, %v1229_v38  ;;  %1252 = vrot.lane.b32.xlu0 %v5148_v54, %s4831_s17  ;;  %v1076_v38 = vsel %vm596_vm2, %v1073_v51, %v1075_v26 }
 0x1f3   : > { %1254 = vrot.lane.b32.xlu1 %v5158_v56, %s4831_s17  ;;  %v7954_v56 = vld [vmem:[#allocation45_spill] sm:$0xff] }
 0x1f4   : > { %v1615_v41 = vld [vmem:[#allocation3 + $0x48] sm:$0xff]  ;;  %v1231_v34 = vpop.permute.xlu0 %1230 }
 0x1f5   : > { %4448 = vmatmul.mubr.msk.f32.gmra.mrb[8].mxu0 %vm1650_vm12, %v1615_v41  ;;  %1316 = vst.msk [vmem:[#allocation3 + $0x58] sm:$0xff] %vm1304_vm9, %v1231_v34  ;;  %v1364_v0 = vpop.permute.xlu1 %1363 }
 0x1f6   : > { %1450 = vst.msk [vmem:[#allocation3 + $0x50] sm:$0xff] %vm1439_vm10, %v1364_v0  ;;  %1387 = vrot.lane.b32.xlu0 %v7952_v11, %s4832_s21 }
 0x1f7   : > { %1389 = vrot.lane.b32.xlu1 %v7953_v28, %s4832_s21 }
 0x1f8   : > { %v1366_v63 = vpop.permute.xlu0 %1365 }
 0x1f9   : > { %1451 = vst.msk [vmem:[#allocation3 + $0x58] sm:$0xff] %vm1439_vm10, %v1366_v63  ;;  %v1498_v54 = vpop.permute.xlu1 %1497 }
 0x1fa   : > { %1584 = vst.msk [vmem:[#allocation3 + $0x50] sm:$0xff] %vm1573_vm11, %v1498_v54  ;;  %1521 = vrot.lane.b32.xlu0 %v5545_v21, %s4833_s26  ;;  %v303_v54 = vld [vmem:[%s4959_s28 + $0x1a0] sm:$0xff] }
 0x1fb   : > { %1523 = vrot.lane.b32.xlu1 %v7954_v56, %s4833_s26 }
 0x1fc   : > { %v1500_v24 = vpop.permute.xlu0 %1499 }
 0x1fd   : > { %1585 = vst.msk [vmem:[#allocation3 + $0x58] sm:$0xff] %vm1573_vm11, %v1500_v24  ;;  %v1102_v12 = vpop.permute.xlu1 %1101 }
 0x1fe   : > { %1186 = vst.msk [vmem:[#allocation3 + $0x60] sm:$0xff] %vm1173_vm8, %v1102_v12  ;;  %991 = vrot.lane.b32.xlu0 %v7952_v11, %s4829_s7  ;;  %v304_v12 = vld [vmem:[%s4959_s28 + $0x1a8] sm:$0x3] }
 0x1ff   : > { %993 = vrot.lane.b32.xlu1 %v7953_v28, %s4829_s7 }
 0x200   : > { %v1104_v27 = vpop.permute.xlu0 %1103 }
 0x201   : > { %v1616_v13 = vld [vmem:[#allocation3 + $0x50] sm:$0xff]  ;;  %1187 = vst.msk [vmem:[#allocation3 + $0x68] sm:$0xff] %vm1173_vm8, %v1104_v27  ;;  %v1233_v33 = vpop.permute.xlu1 %1232  ;;  %v1339_v27 = vrot.slane %v303_v54, 1 }
 0x202   : > { %4450 = vmatprep.mubr.msk.f32.mxu0 %vm1650_vm12, %v1616_v13  ;;  %1317 = vst.msk [vmem:[#allocation3 + $0x60] sm:$0xff] %vm1304_vm9, %v1233_v33  ;;  %1125 = vrot.lane.b32.xlu0 %v5545_v21, %s4830_s12 }
 0x203   : > { %1127 = vrot.lane.b32.xlu1 %v7954_v56, %s4830_s12  ;;  %v302_v56 = vld [vmem:[%s4959_s28 + $0x198] sm:$0xff] }
 0x204   : > { %v1617_v53 = vld [vmem:[#allocation3 + $0x58] sm:$0xff]  ;;  %v1235_v61 = vpop.permute.xlu0 %1234  ;;  %v1338_v13 = vrot.slane %v302_v56, 1 }
 0x205   : > { %4451 = vmatmul.mubr.msk.f32.gmra.mrb[10].mxu0 %vm1650_vm12, %v1617_v53  ;;  %1318 = vst.msk [vmem:[#allocation3 + $0x68] sm:$0xff] %vm1304_vm9, %v1235_v61  ;;  %v1368_v40 = vpop.permute.xlu1 %1367  ;;  %v1341_v53 = vrot.slane %v304_v12, 1 }
 0x206   : > { %1452 = vst.msk [vmem:[#allocation3 + $0x60] sm:$0xff] %vm1439_vm10, %v1368_v40  ;;  %1256 = vrot.lane.b32.xlu0 %v5165_v57, %s4831_s17  ;;  %v1473_v40 = vrot.slane %v303_v54, 2 }
 0x207   : > { %1258 = vrot.lane.b32.xlu1 %v5168_v58, %s4831_s17 }
 0x208   : > { %v1370_v42 = vpop.permute.xlu0 %1369 }
 0x209   : > { %1453 = vst.msk [vmem:[#allocation3 + $0x68] sm:$0xff] %vm1439_vm10, %v1370_v42  ;;  %v1502_v21 = vpop.permute.xlu1 %1501  ;;  %v1472_v42 = vrot.slane %v302_v56, 2 }
 0x20a   : > { %1586 = vst.msk [vmem:[#allocation3 + $0x60] sm:$0xff] %vm1573_vm11, %v1502_v21  ;;  %1391 = vrot.lane.b32.xlu0 %v7955_v39, %s4832_s21  ;;  %v1340_v21 = vsel %vm386_vm1, %v1338_v13, %v1339_v27 }
 0x20b   : > { %1393 = vrot.lane.b32.xlu1 %v7956_v43, %s4832_s21 }
 0x20c   : > { %v1504_v44 = vpop.permute.xlu0 %1503 }
 0x20d   : > { %1587 = vst.msk [vmem:[#allocation3 + $0x68] sm:$0xff] %vm1573_vm11, %v1504_v44  ;;  %v974_v57 = vpop.permute.xlu1 %973  ;;  %v1475_v44 = vrot.slane %v304_v12, 2 }
 0x20e   : > { %1055 = vst.msk [vmem:[#allocation3 + $0x78] sm:$0xff] %vm1039_vm7, %v974_v57  ;;  %1525 = vrot.lane.b32.xlu0 %v5560_v20, %s4833_s26  ;;  %v1474_v57 = vsel %vm596_vm2, %v1472_v42, %v1473_v40 }
 0x20f   : > { %1527 = vrot.lane.b32.xlu1 %v5565_v3, %s4833_s26 }
 0x210   : > { %v1106_v58 = vpop.permute.xlu0 %1105 }
 0x211   : > { %v1618_v5 = vld [vmem:[#allocation3 + $0x60] sm:$0xff]  ;;  %1188 = vst.msk [vmem:[#allocation3 + $0x70] sm:$0xff] %vm1173_vm8, %v1106_v58  ;;  %v1108_v30 = vpop.permute.xlu1 %1107 }
 0x212   : > { %4453 = vmatprep.mubr.msk.f32.mxu0 %vm1650_vm12, %v1618_v5  ;;  %1189 = vst.msk [vmem:[#allocation3 + $0x78] sm:$0xff] %vm1173_vm8, %v1108_v30  ;;  %995 = vrot.lane.b32.xlu0 %v7955_v39, %s4829_s7  ;;  %v1476_v5 = vsel %vm596_vm2, %v1473_v40, %v1475_v44  ;;  %vm2670_vm2 = vcmask 785920  }
 0x213   : > { %997 = vrot.lane.b32.xlu1 %v7956_v43, %s4829_s7  ;;  %v1342_v43 = vsel %vm386_vm1, %v1339_v27, %v1341_v53 }
 0x214   : > { %v1619_v4 = vld [vmem:[#allocation3 + $0x68] sm:$0xff]  ;;  %v1237_v10 = vpop.permute.xlu0 %1236 }
 0x215   : > { %4454 = vmatmul.mubr.msk.f32.gmra.mrb[12].mxu0 %vm1650_vm12, %v1619_v4  ;;  %1319 = vst.msk [vmem:[#allocation3 + $0x70] sm:$0xff] %vm1304_vm9, %v1237_v10  ;;  %v1239_v59 = vpop.permute.xlu1 %1238  ;;  %v6233_v4 = vld [vmem:[#allocation2 + $0x8] sm:$0xff] }
 0x216   : > { %1320 = vst.msk [vmem:[#allocation3 + $0x78] sm:$0xff] %vm1304_vm9, %v1239_v59  ;;  %1129 = vrot.lane.b32.xlu0 %v5560_v20, %s4830_s12  ;;  %v7958_v20 = vld [vmem:[#allocation34_spill] sm:$0xff]  ;;  %v6235_v59 = vld [vmem:[#allocation2 + $0x10] sm:$0xff] }
 0x217   : > { %1131 = vrot.lane.b32.xlu1 %v5565_v3, %s4830_s12  ;;  %v7959_v3 = vld [vmem:[#allocation35_spill] sm:$0xff] }
 0x218   : > { %v1372_v7 = vpop.permute.xlu0 %1371 }
 0x219   : > { %1454 = vst.msk [vmem:[#allocation3 + $0x70] sm:$0xff] %vm1439_vm10, %v1372_v7  ;;  %v1374_v55 = vpop.permute.xlu1 %1373 }
 0x21a   : > { %1455 = vst.msk [vmem:[#allocation3 + $0x78] sm:$0xff] %vm1439_vm10, %v1374_v55  ;;  %1260 = vrot.lane.b32.xlu0 %v5180_v62, %s4831_s17  ;;  %v7960_v62 = vld [vmem:[#allocation46_spill] sm:$0xff] }
 0x21b   : > { %1262 = vrot.lane.b32.xlu1 %v7957_v35, %s4831_s17 }
 0x21c   : > { %v1506_v14 = vpop.permute.xlu0 %1505 }
 0x21d   : > { %1588 = vst.msk [vmem:[#allocation3 + $0x70] sm:$0xff] %vm1573_vm11, %v1506_v14  ;;  %v1508_v31 = vpop.permute.xlu1 %1507 }
 0x21e   : > { %1589 = vst.msk [vmem:[#allocation3 + $0x78] sm:$0xff] %vm1573_vm11, %v1508_v31  ;;  %1395 = vrot.lane.b32.xlu0 %v7958_v20, %s4832_s21 }
 0x21f   : > { %1397 = vrot.lane.b32.xlu1 %v7959_v3, %s4832_s21 }
 0x220   : > { %v976_v16 = vpop.permute.xlu0 %975 }
 0x221   : > { %1056 = vst.msk [vmem:[#allocation3 + $0x80] sm:$0xff] %vm1039_vm7, %v976_v16  ;;  %v978_v32 = vpop.permute.xlu1 %977 }
 0x222   : > { %1057 = vst.msk [vmem:[#allocation3 + $0x88] sm:$0xff] %vm1039_vm7, %v978_v32  ;;  %1529 = vrot.lane.b32.xlu0 %v7960_v62, %s4833_s26 }
 0x223   : > { %1531 = vrot.lane.b32.xlu1 %v7961_v45, %s4833_s26 }
 0x224   : > { %v1620_v46 = vld [vmem:[#allocation3 + $0x70] sm:$0xff]  ;;  %v1110_v1 = vpop.permute.xlu0 %1109 }
 0x225   : > { %4456 = vmatprep.mubr.msk.f32.mxu0 %vm1650_vm12, %v1620_v46  ;;  %v1621_v17 = vld [vmem:[#allocation3 + $0x78] sm:$0xff]  ;;  %1190 = vst.msk [vmem:[#allocation3 + $0x80] sm:$0xff] %vm1173_vm8, %v1110_v1  ;;  %v1112_v8 = vpop.permute.xlu1 %1111 }
 0x226   : > { %4457 = vmatmul.mubr.msk.f32.gmra.mrb[14].mxu0 %vm1650_vm12, %v1621_v17  ;;  %1191 = vst.msk [vmem:[#allocation3 + $0x88] sm:$0xff] %vm1173_vm8, %v1112_v8  ;;  %999 = vrot.lane.b32.xlu0 %v7958_v20, %s4829_s7 }
 0x227   : > { %1001 = vrot.lane.b32.xlu1 %v7959_v3, %s4829_s7 }
 0x228   : > { %v1241_v18 = vpop.permute.xlu0 %1240 }
 0x229   : > { %1321 = vst.msk [vmem:[#allocation3 + $0x80] sm:$0xff] %vm1304_vm9, %v1241_v18  ;;  %v1243_v6 = vpop.permute.xlu1 %1242 }
 0x22a   : > { %1322 = vst.msk [vmem:[#allocation3 + $0x88] sm:$0xff] %vm1304_vm9, %v1243_v6  ;;  %1133 = vrot.lane.b32.xlu0 %v7960_v62, %s4830_s12 }
 0x22b   : > { %1135 = vrot.lane.b32.xlu1 %v7961_v45, %s4830_s12 }
 0x22c   : > { %v1376_v37 = vpop.permute.xlu0 %1375 }
 0x22d   : > { %1456 = vst.msk [vmem:[#allocation3 + $0x80] sm:$0xff] %vm1439_vm10, %v1376_v37  ;;  %v1378_v15 = vpop.permute.xlu1 %1377 }
 0x22e   : > { %1457 = vst.msk [vmem:[#allocation3 + $0x88] sm:$0xff] %vm1439_vm10, %v1378_v15  ;;  %1264 = vrot.lane.b32.xlu0 %v4749_v36, %s4831_s17 }
 0x22f   : > { %1266 = vrot.lane.b32.xlu1 %v4750_v25, %s4831_s17 }
 0x230   : > { %v1510_v19 = vpop.permute.xlu0 %1509 }
 0x231   : > { %1590 = vst.msk [vmem:[#allocation3 + $0x80] sm:$0xff] %vm1573_vm11, %v1510_v19  ;;  %v1512_v23 = vpop.permute.xlu1 %1511 }
 0x232   : > { %1591 = vst.msk [vmem:[#allocation3 + $0x88] sm:$0xff] %vm1573_vm11, %v1512_v23  ;;  %1399 = vrot.lane.b32.xlu0 %v940_v2, %s4832_s21  ;;  %v2495_v23 = vrot.slane %v6235_v59, 1 }
 0x233   : > { %1401 = vrot.lane.b32.xlu1 %v942_v22, %s4832_s21 }
 0x234   : > { %v980_v60 = vpop.permute.xlu0 %979 }
 0x235   : > { %v982_v41 = vpop.permute.xlu1 %981  ;;  %1058 = vst.msk [vmem:[#allocation3 + $0x90] sm:$0xff] %vm1039_vm7, %v980_v60 }
 0x236   : > { %1059 = vst.msk [vmem:[#allocation3 + $0x98] sm:$0xff] %vm1039_vm7, %v982_v41  ;;  %1533 = vrot.lane.b32.xlu0 %v1074_v9, %s4833_s26  ;;  %v2206_v41 = vrot.slane %v6233_v4, 7 }
 0x237   : > { %1535 = vrot.lane.b32.xlu1 %v1076_v38, %s4833_s26 }
 0x238   : > { %v1622_v34 = vld [vmem:[#allocation3 + $0x80] sm:$0xff]  ;;  %v1114_v0 = vpop.permute.xlu0 %1113 }
 0x239   : > { %4459 = vmatprep.mubr.msk.f32.mxu0 %vm1650_vm12, %v1622_v34  ;;  %v1623_v11 = vld [vmem:[#allocation3 + $0x88] sm:$0xff]  ;;  %v1116_v28 = vpop.permute.xlu1 %1115  ;;  %1192 = vst.msk [vmem:[#allocation3 + $0x90] sm:$0xff] %vm1173_vm8, %v1114_v0 }
 0x23a   : > { %4460 = vmatmul.mubr.msk.f32.gmra.mrb[16].mxu0 %vm1650_vm12, %v1623_v11  ;;  %1193 = vst.msk [vmem:[#allocation3 + $0x98] sm:$0xff] %vm1173_vm8, %v1116_v28  ;;  %1003 = vrot.lane.b32.xlu0 %v940_v2, %s4829_s7 }
 0x23b   : > { %1005 = vrot.lane.b32.xlu1 %v942_v22, %s4829_s7 }
 0x23c   : > { %v1245_v63 = vpop.permute.xlu0 %1244 }
 0x23d   : > { %v1247_v24 = vpop.permute.xlu1 %1246  ;;  %1323 = vst.msk [vmem:[#allocation3 + $0x90] sm:$0xff] %vm1304_vm9, %v1245_v63 }
 0x23e   : > { %1324 = vst.msk [vmem:[#allocation3 + $0x98] sm:$0xff] %vm1304_vm9, %v1247_v24  ;;  %1137 = vrot.lane.b32.xlu0 %v1074_v9, %s4830_s12  ;;  %v2494_v9 = vrot.slane %v6233_v4, 1  ;;  %v6288_v24 = vld [vmem:[#allocation5] ss:$0 sm:$0xff] }
 0x23f   : > { %1139 = vrot.lane.b32.xlu1 %v1076_v38, %s4830_s12  ;;  %v2208_v38 = vrot.slane %v6235_v59, 7 }
 0x240   : > { %v1380_v33 = vpop.permute.xlu0 %1379  ;;  %v6282_v0 = vsel %vm386_vm1, %v2494_v9, %v2495_v23  ;;  %v2092_v9 = vld [vmem:[#allocation2 + $0x40] sm:$0xff] }
 0x241   : > { %v1382_v61 = vpop.permute.xlu1 %1381  ;;  %1458 = vst.msk [vmem:[#allocation3 + $0x90] sm:$0xff] %vm1439_vm10, %v1380_v33  ;;  %v2209_v63 = vsel %vm2204_vm15, %v2206_v41, %v2208_v38  ;;  %v3441_v38 = vld [vmem:[%s7801_s3 + $0x28] sm:$0xff] }
 0x242   : > { %1459 = vst.msk [vmem:[#allocation3 + $0x98] sm:$0xff] %vm1439_vm10, %v1382_v61  ;;  %1268 = vrot.lane.b32.xlu0 %v302_v56, %s4831_s17 }
 0x243   : > { %1270 = vrot.lane.b32.xlu1 %v303_v54, %s4831_s17  ;;  %v2084_v54 = vld [vmem:[#allocation2] sm:$0xff]  ;;  %2318 = vst.msk [vmem:[#allocation4 + $0x18] sm:$0xff] %vm2008_vm13, %v2209_v63 }
 0x244   : > { %v1514_v39 = vpop.permute.xlu0 %1513  ;;  %v2205_v56 = vrot.slane %v2084_v54, 7  ;;  %v2215_v54 = vrot.slane %v2092_v9, 7 }
 0x245   : > { %v1516_v29 = vpop.permute.xlu1 %1515  ;;  %1592 = vst.msk [vmem:[#allocation3 + $0x90] sm:$0xff] %vm1573_vm11, %v1514_v39 }
 0x246   : > { %1593 = vst.msk [vmem:[#allocation3 + $0x98] sm:$0xff] %vm1573_vm11, %v1516_v29  ;;  %1403 = vrot.lane.b32.xlu0 %v1340_v21, %s4832_s21  ;;  %v2207_v13 = vsel %vm2204_vm15, %v2205_v56, %v2206_v41 }
 0x247   : > { %1405 = vrot.lane.b32.xlu1 %v1342_v43, %s4832_s21  ;;  %2317 = vst.msk [vmem:[#allocation4] sm:$0xff] %vm2008_vm13, %v2207_v13 }
 0x248   : > { %v984_v58 = vpop.permute.xlu0 %983 }
 0x249   : > { %v986_v30 = vpop.permute.xlu1 %985  ;;  %1060 = vst.msk [vmem:[#allocation3 + $0xa0] sm:$0xff] %vm1039_vm7, %v984_v58 }
 0x24a   : > { %1061 = vst.msk [vmem:[#allocation3 + $0xa8] sm:$0xff] %vm1039_vm7, %v986_v30  ;;  %1537 = vrot.lane.b32.xlu0 %v1474_v57, %s4833_s26 }
 0x24b   : > { %1539 = vrot.lane.b32.xlu1 %v1476_v5, %s4833_s26  ;;  %v2088_v5 = vld [vmem:[#allocation2 + $0x20] sm:$0xff] }
 0x24c   : > { %v1118_v10 = vpop.permute.xlu0 %1117  ;;  %v1624_v7 = vld [vmem:[#allocation3 + $0x90] sm:$0xff] }
 0x24d   : > { %v1120_v55 = vpop.permute.xlu1 %1119  ;;  %1194 = vst.msk [vmem:[#allocation3 + $0xa0] sm:$0xff] %vm1173_vm8, %v1118_v10  ;;  %4462 = vmatprep.mubr.msk.f32.mxu0 %vm1650_vm12, %v1624_v7  ;;  %v1625_v35 = vld [vmem:[#allocation3 + $0x98] sm:$0xff]  ;;  %v2210_v7 = vrot.slane %v2088_v5, 7 }
 0x24e   : > { %1195 = vst.msk [vmem:[#allocation3 + $0xa8] sm:$0xff] %vm1173_vm8, %v1120_v55  ;;  %2349 = vrot.lane.b32.xlu0 %v6233_v4, %s4833_s26  ;;  %4463 = vmatmul.mubr.msk.f32.gmra.mrb[18].mxu0 %vm1650_vm12, %v1625_v35 }
 0x24f   : > { %2351 = vrot.lane.b32.xlu1 %v6235_v59, %s4833_s26 }
 0x250   : > { %v1249_v14 = vpop.permute.xlu0 %1248 }
 0x251   : > { %v1251_v31 = vpop.permute.xlu1 %1250  ;;  %1325 = vst.msk [vmem:[#allocation3 + $0xa0] sm:$0xff] %vm1304_vm9, %v1249_v14 }
 0x252   : > { %1326 = vst.msk [vmem:[#allocation3 + $0xa8] sm:$0xff] %vm1304_vm9, %v1251_v31 }
 0x254   : > { %v1384_v20 = vpop.permute.xlu0 %1383 }
 0x255   : > { %v1386_v3 = vpop.permute.xlu1 %1385  ;;  %1460 = vst.msk [vmem:[#allocation3 + $0xa0] sm:$0xff] %vm1439_vm10, %v1384_v20 }
 0x256   : > { %1461 = vst.msk [vmem:[#allocation3 + $0xa8] sm:$0xff] %vm1439_vm10, %v1386_v3 }
 0x258   : > { %v1518_v16 = vpop.permute.xlu0 %1517 }
 0x259   : > { %v1520_v32 = vpop.permute.xlu1 %1519  ;;  %1594 = vst.msk [vmem:[#allocation3 + $0xa0] sm:$0xff] %vm1573_vm11, %v1518_v16 }
 0x25a   : > { %1595 = vst.msk [vmem:[#allocation3 + $0xa8] sm:$0xff] %vm1573_vm11, %v1520_v32 }
 0x25c   : > { %v988_v62 = vpop.permute.xlu0 %987 }
 0x25d   : > { %v990_v45 = vpop.permute.xlu1 %989  ;;  %1062 = vst.msk [vmem:[#allocation3 + $0xb0] sm:$0xff] %vm1039_vm7, %v988_v62 }
 0x25e   : > { %1063 = vst.msk [vmem:[#allocation3 + $0xb8] sm:$0xff] %vm1039_vm7, %v990_v45 }
 0x260   : > { %v1122_v46 = vpop.permute.xlu0 %1121  ;;  %v1626_v1 = vld [vmem:[#allocation3 + $0xa0] sm:$0xff] }
 0x261   : > { %v1124_v17 = vpop.permute.xlu1 %1123  ;;  %1196 = vst.msk [vmem:[#allocation3 + $0xb0] sm:$0xff] %vm1173_vm8, %v1122_v46  ;;  %4465 = vmatprep.mubr.msk.f32.mxu0 %vm1650_vm12, %v1626_v1  ;;  %v1627_v8 = vld [vmem:[#allocation3 + $0xa8] sm:$0xff] }
 0x262   : > { %1197 = vst.msk [vmem:[#allocation3 + $0xb8] sm:$0xff] %vm1173_vm8, %v1124_v17  ;;  %4466 = vmatmul.mubr.msk.f32.gmra.mrb[20].mxu0 %vm1650_vm12, %v1627_v8 }
 0x264   : > { %v1253_v18 = vpop.permute.xlu0 %1252 }
 0x265   : > { %v1255_v6 = vpop.permute.xlu1 %1254  ;;  %1327 = vst.msk [vmem:[#allocation3 + $0xb0] sm:$0xff] %vm1304_vm9, %v1253_v18  ;;  %v4835_v18 = vmov 0.0|0.0  }
 0x266   : > { %1328 = vst.msk [vmem:[#allocation3 + $0xb8] sm:$0xff] %vm1304_vm9, %v1255_v6  ;;  %4603 = vmatprep.subr.bf16.mxu1 %v4835_v18  ;;  %v3436_v6 = vld [vmem:[%s7801_s3] sm:$0xff]  ;;  %4547 = vmatprep.subr.bf16.mxu0 %v4835_v18 }
 0x268   : > { %v1388_v47 = vpop.permute.xlu0 %1387 }
 0x269   : > { %v1390_v36 = vpop.permute.xlu1 %1389  ;;  %1462 = vst.msk [vmem:[#allocation3 + $0xb0] sm:$0xff] %vm1439_vm10, %v1388_v47  ;;  %v3437_v47 = vld [vmem:[%s7801_s3 + $0x8] sm:$0xff] }
 0x26a   : > { %1463 = vst.msk [vmem:[#allocation3 + $0xb8] sm:$0xff] %vm1439_vm10, %v1390_v36 }
 0x26c   : > { %v1522_v52 = vpop.permute.xlu0 %1521 }
 0x26d   : > { %v1524_v25 = vpop.permute.xlu1 %1523  ;;  %1596 = vst.msk [vmem:[#allocation3 + $0xb0] sm:$0xff] %vm1573_vm11, %v1522_v52 }
 0x26e   : > { %1597 = vst.msk [vmem:[#allocation3 + $0xb8] sm:$0xff] %vm1573_vm11, %v1524_v25 }
 0x270   : > { %v992_v48 = vpop.permute.xlu0 %991 }
 0x271   : > { %v994_v37 = vpop.permute.xlu1 %993  ;;  %1064 = vst.msk [vmem:[#allocation3 + $0xc0] sm:$0xff] %vm1039_vm7, %v992_v48  ;;  %v4548_v48 = vpack.c.bf16 %v3437_v47, %v3436_v6  ;;  %v2099_v6 = vld [vmem:[#allocation2 + $0x78] sm:$0xff] }
 0x272   : > { %1065 = vst.msk [vmem:[#allocation3 + $0xc8] sm:$0xff] %vm1039_vm7, %v994_v37 }
 0x273   : > { %4619 = vmatpush1.bf16.msra.mxu1 %v4548_v48  ;;  %4549 = vmatpush1.bf16.msra.mxu0 %v4548_v48  ;;  %v3449_v48 = vld [vmem:[%s7801_s3 + $0x68] sm:$0xff] }
 0x274   : > { %v1126_v49 = vpop.permute.xlu0 %1125  ;;  %v1628_v15 = vld [vmem:[#allocation3 + $0xb0] sm:$0xff]  ;;  %4604 = vmatprep.subr.bf16.mxu1 %v4835_v18  ;;  %4550 = vmatprep.subr.bf16.mxu0 %v4835_v18 }
 0x275   : > { %v1128_v50 = vpop.permute.xlu1 %1127  ;;  %1198 = vst.msk [vmem:[#allocation3 + $0xc0] sm:$0xff] %vm1173_vm8, %v1126_v49  ;;  %4468 = vmatprep.mubr.msk.f32.mxu0 %vm1650_vm12, %v1628_v15  ;;  %v1629_v51 = vld [vmem:[#allocation3 + $0xb8] sm:$0xff] }
 0x276   : > { %1199 = vst.msk [vmem:[#allocation3 + $0xc8] sm:$0xff] %vm1173_vm8, %v1128_v50  ;;  %4469 = vmatmul.mubr.msk.f32.gmra.mrb[22].mxu0 %vm1650_vm12, %v1629_v51  ;;  %v3438_v50 = vld [vmem:[%s7801_s3 + $0x10] sm:$0xff]  ;;  %v3439_v51 = vld [vmem:[%s7801_s3 + $0x18] sm:$0xff] }
 0x278   : > { %v1257_v2 = vpop.permute.xlu0 %1256 }
 0x279   : > { %v1259_v19 = vpop.permute.xlu1 %1258  ;;  %1329 = vst.msk [vmem:[#allocation3 + $0xc0] sm:$0xff] %vm1304_vm9, %v1257_v2 }
 0x27a   : > { %1330 = vst.msk [vmem:[#allocation3 + $0xc8] sm:$0xff] %vm1304_vm9, %v1259_v19  ;;  %v4551_v19 = vpack.c.bf16 %v3439_v51, %v3438_v50 }
 0x27c   : > { %v1392_v22 = vpop.permute.xlu0 %1391  ;;  %4620 = vmatpush1.bf16.msra.mxu1 %v4551_v19  ;;  %4552 = vmatpush1.bf16.msra.mxu0 %v4551_v19 }
 0x27d   : > { %v1394_v26 = vpop.permute.xlu1 %1393  ;;  %1464 = vst.msk [vmem:[#allocation3 + $0xc0] sm:$0xff] %vm1439_vm10, %v1392_v22  ;;  %4605 = vmatprep.subr.bf16.mxu1 %v4835_v18  ;;  %4553 = vmatprep.subr.bf16.mxu0 %v4835_v18 }
 0x27e   : > { %1465 = vst.msk [vmem:[#allocation3 + $0xc8] sm:$0xff] %vm1439_vm10, %v1394_v26  ;;  %v2095_v26 = vld [vmem:[#allocation2 + $0x58] sm:$0xff] }
 0x280   : > { %v1526_v60 = vpop.permute.xlu0 %1525 }
 0x281   : > { %v1528_v34 = vpop.permute.xlu1 %1527  ;;  %1598 = vst.msk [vmem:[#allocation3 + $0xc0] sm:$0xff] %vm1573_vm11, %v1526_v60  ;;  %v3440_v60 = vld [vmem:[%s7801_s3 + $0x20] sm:$0xff] }
 0x282   : > { %1599 = vst.msk [vmem:[#allocation3 + $0xc8] sm:$0xff] %vm1573_vm11, %v1528_v34  ;;  %v4554_v34 = vpack.c.bf16 %v3441_v38, %v3440_v60  ;;  %v3450_v38 = vld [vmem:[%s7801_s3 + $0x70] sm:$0xff] }
 0x284   : > { %v996_v11 = vpop.permute.xlu0 %995  ;;  %4621 = vmatpush1.bf16.msra.mxu1 %v4554_v34  ;;  %4555 = vmatpush1.bf16.msra.mxu0 %v4554_v34 }
 0x285   : > { %v998_v28 = vpop.permute.xlu1 %997  ;;  %1066 = vst.msk [vmem:[#allocation3 + $0xd0] sm:$0xff] %vm1039_vm7, %v996_v11  ;;  %v2507_v11 = vrot.slane %v2095_v26, 1  ;;  %4606 = vmatprep.subr.bf16.mxu1 %v4835_v18  ;;  %4556 = vmatprep.subr.bf16.mxu0 %v4835_v18 }
 0x286   : > { %1067 = vst.msk [vmem:[#allocation3 + $0xd8] sm:$0xff] %vm1039_vm7, %v998_v28 }
 0x288   : > { %v1130_v12 = vpop.permute.xlu0 %1129  ;;  %v1630_v27 = vld [vmem:[#allocation3 + $0xc0] sm:$0xff] }
 0x289   : > { %v4437_v33 = vpop.f32.mrb[0].mxu0  ;;  %v1132_v53 = vpop.permute.xlu1 %1131  ;;  %1200 = vst.msk [vmem:[#allocation3 + $0xd0] sm:$0xff] %vm1173_vm8, %v1130_v12  ;;  %4471 = vmatprep.mubr.msk.f32.mxu0 %vm1650_vm12, %v1630_v27  ;;  %v1631_v61 = vld [vmem:[#allocation3 + $0xc8] sm:$0xff] }
 0x28a   : > { %v1823_v40 = vadd.f32 %v4437_v33, %v6288_v24  ;;  %v1817_v42 = vpop.f32.mrb[1].mxu0  ;;  %1201 = vst.msk [vmem:[#allocation3 + $0xd8] sm:$0xff] %vm1173_vm8, %v1132_v53  ;;  %4472 = vmatmul.mubr.msk.f32.gmra.mrb[24].mxu0 %vm1650_vm12, %v1631_v61  ;;  %v3442_v33 = vld [vmem:[%s7801_s3 + $0x30] sm:$0xff]  ;;  %v3443_v53 = vld [vmem:[%s7801_s3 + $0x38] sm:$0xff] }
 0x28b   : > { %v1818_v21 = vadd.f32 %v6288_v24, %v1817_v42  ;;  %v4557_v42 = vpack.c.bf16 %v3443_v53, %v3442_v33 }
 0x28c   : > { %v1977_v39 = vmax.f32 %v1823_v40, 0.0  ;;  %v1261_v43 = vpop.permute.xlu0 %1260 }
 0x28d   : > { %v1976_v44 = vmax.f32 %v1818_v21, 0.0  ;;  %v1263_v29 = vpop.permute.xlu1 %1262  ;;  %1331 = vst.msk [vmem:[#allocation3 + $0xd0] sm:$0xff] %vm1304_vm9, %v1261_v43  ;;  %4622 = vmatpush1.bf16.msra.mxu1 %v4557_v42  ;;  %4558 = vmatpush1.bf16.msra.mxu0 %v4557_v42  ;;  %v3452_v42 = vld [vmem:[%s7801_s3 + $0x80] sm:$0xff] }
 0x28e   : > { %2053 = vst.msk [vmem:[#allocation2 + $0x30] sm:$0xff] %vm2008_vm13, %v1977_v39  ;;  %4607 = vmatprep.subr.bf16.mxu1 %v4835_v18  ;;  %4559 = vmatprep.subr.bf16.mxu0 %v4835_v18 }
 0x28f   : > { %1332 = vst.msk [vmem:[#allocation3 + $0xd8] sm:$0xff] %vm1304_vm9, %v1263_v29 }
 0x290   : > { %2052 = vst.msk [vmem:[#allocation2 + $0x28] sm:$0xff] %vm2008_vm13, %v1976_v44  ;;  %v1396_v57 = vpop.permute.xlu0 %1395 }
 0x291   : > { %v1398_v58 = vpop.permute.xlu1 %1397  ;;  %1466 = vst.msk [vmem:[#allocation3 + $0xd0] sm:$0xff] %vm1439_vm10, %v1396_v57 }
 0x292   : > { %1467 = vst.msk [vmem:[#allocation3 + $0xd8] sm:$0xff] %vm1439_vm10, %v1398_v58 }
 0x294   : > { %v1530_v30 = vpop.permute.xlu0 %1529 }
 0x295   : > { %v6304_v4 = vld [vmem:[#allocation2 + $0x30] sm:$0xff]  ;;  %v1532_v10 = vpop.permute.xlu1 %1531  ;;  %1600 = vst.msk [vmem:[#allocation3 + $0xd0] sm:$0xff] %vm1573_vm11, %v1530_v30 }
 0x296   : > { %2355 = vrot.lane.b32.xlu1 %v6304_v4, %s4833_s26  ;;  %v2213_v55 = vrot.slane %v6304_v4, 7  ;;  %v2500_v35 = vrot.slane %v6304_v4, 1  ;;  %2841 = vst.msk [vmem:[#allocation4 + $0x20] sm:$0xff] %vm2008_vm13, %v6304_v4 }
 0x297   : > { %v2089_v14 = vld [vmem:[#allocation2 + $0x28] sm:$0xff]  ;;  %1601 = vst.msk [vmem:[#allocation3 + $0xd8] sm:$0xff] %vm1573_vm11, %v1532_v10  ;;  %v3444_v10 = vld [vmem:[%s7801_s3 + $0x40] sm:$0xff] }
 0x298   : > { %2353 = vrot.lane.b32.xlu0 %v2089_v14, %s4833_s26  ;;  %v2211_v31 = vrot.slane %v2089_v14, 7  ;;  %v2499_v20 = vrot.slane %v2089_v14, 1  ;;  %2840 = vst.msk [vmem:[#allocation4 + $0x8] sm:$0xff] %vm2008_vm13, %v2089_v14  ;;  %v1000_v3 = vpop.permute.xlu0 %999 }
 0x299   : > { %v4440_v16 = vpop.f32.mrb[2].mxu0  ;;  %v1002_v32 = vpop.permute.xlu1 %1001  ;;  %1068 = vst.msk [vmem:[#allocation3 + $0xe0] sm:$0xff] %vm1039_vm7, %v1000_v3 }
 0x29a   : > { %v6320_v62 = vsel %vm386_vm1, %v2499_v20, %v2500_v35  ;;  %v6323_v45 = vsel %vm2204_vm15, %v2211_v31, %v2213_v55  ;;  %v6326_v46 = vsel %vm2204_vm15, %v2210_v7, %v2211_v31  ;;  %v1833_v1 = vadd.f32 %v4440_v16, %v6288_v24  ;;  %v1827_v17 = vpop.f32.mrb[3].mxu0  ;;  %1069 = vst.msk [vmem:[#allocation3 + $0xe8] sm:$0xff] %vm1039_vm7, %v1002_v32  ;;  %v3445_v7 = vld [vmem:[%s7801_s3 + $0x48] sm:$0xff]  ;;  %v3446_v16 = vld [vmem:[%s7801_s3 + $0x50] sm:$0xff]  ;;  %v3447_v32 = vld [vmem:[%s7801_s3 + $0x58] sm:$0xff] }
 0x29b   : > { %2320 = vst.msk [vmem:[#allocation4 + $0x48] sm:$0xff] %vm2008_vm13, %v6323_v45  ;;  %2319 = vst.msk [vmem:[#allocation4 + $0x30] sm:$0xff] %vm2008_vm13, %v6326_v46  ;;  %v1828_v8 = vadd.f32 %v6288_v24, %v1827_v17  ;;  %v4560_v31 = vpack.c.bf16 %v3445_v7, %v3444_v10  ;;  %v3454_v7 = vld [vmem:[%s7801_s3 + $0x90] sm:$0xff] }
 0x29c   : > { %v1979_v36 = vmax.f32 %v1833_v1, 0.0  ;;  %v1134_v52 = vpop.permute.xlu0 %1133  ;;  %v1632_v25 = vld [vmem:[#allocation3 + $0xd0] sm:$0xff] }
 0x29d   : > { %v1978_v37 = vmax.f32 %v1828_v8, 0.0  ;;  %v1136_v49 = vpop.permute.xlu1 %1135  ;;  %1202 = vst.msk [vmem:[#allocation3 + $0xe0] sm:$0xff] %vm1173_vm8, %v1134_v52  ;;  %4474 = vmatprep.mubr.msk.f32.mxu0 %vm1650_vm12, %v1632_v25  ;;  %4623 = vmatpush1.bf16.msra.mxu1 %v4560_v31  ;;  %v4563_v8 = vpack.c.bf16 %v3447_v32, %v3446_v16  ;;  %v2096_v52 = vld [vmem:[#allocation2 + $0x60] sm:$0xff] }
 0x29e   : > { %v1633_v15 = vld [vmem:[#allocation3 + $0xd8] sm:$0xff]  ;;  %2055 = vst.msk [vmem:[#allocation2 + $0x50] sm:$0xff] %vm2008_vm13, %v1979_v36  ;;  %4608 = vmatprep.subr.bf16.mxu1 %v4835_v18  ;;  %4561 = vmatpush1.bf16.msra.mxu0 %v4560_v31  ;;  %v3448_v25 = vld [vmem:[%s7801_s3 + $0x60] sm:$0xff] }
 0x29f   : > { %1203 = vst.msk [vmem:[#allocation3 + $0xe8] sm:$0xff] %vm1173_vm8, %v1136_v49  ;;  %4475 = vmatmul.mubr.msk.f32.gmra.mrb[26].mxu0 %vm1650_vm12, %v1633_v15  ;;  %4562 = vmatprep.subr.bf16.mxu0 %v4835_v18  ;;  %v4566_v15 = vpack.c.bf16 %v3449_v48, %v3448_v25  ;;  %v2100_v16 = vld [vmem:[#allocation2 + $0x80] sm:$0xff] }
 0x2a0   : > { %2054 = vst.msk [vmem:[#allocation2 + $0x48] sm:$0xff] %vm2008_vm13, %v1978_v37  ;;  %v1265_v2 = vpop.permute.xlu0 %1264  ;;  %v2512_v37 = vrot.slane %v2099_v6, 1  ;;  %v3456_v32 = vld [vmem:[%s7801_s3 + $0xa0] sm:$0xff] }
 0x2a1   : > { %v1267_v22 = vpop.permute.xlu1 %1266  ;;  %1333 = vst.msk [vmem:[#allocation3 + $0xe0] sm:$0xff] %vm1304_vm9, %v1265_v2  ;;  %4624 = vmatpush1.bf16.msra.mxu1 %v4563_v8  ;;  %v2220_v2 = vrot.slane %v2096_v52, 7 }
 0x2a2   : > { %1334 = vst.msk [vmem:[#allocation3 + $0xe8] sm:$0xff] %vm1304_vm9, %v1267_v22  ;;  %4609 = vmatprep.subr.bf16.mxu1 %v4835_v18  ;;  %4564 = vmatpush1.bf16.msra.mxu0 %v4563_v8 }
 0x2a3   : > { %4565 = vmatprep.subr.bf16.mxu0 %v4835_v18 }
 0x2a4   : > { %v1400_v41 = vpop.permute.xlu0 %1399 }
 0x2a5   : > { %v6367_v28 = vld [vmem:[#allocation2 + $0x50] sm:$0xff]  ;;  %v1402_v63 = vpop.permute.xlu1 %1401  ;;  %1468 = vst.msk [vmem:[#allocation3 + $0xe0] sm:$0xff] %vm1439_vm10, %v1400_v41  ;;  %4625 = vmatpush1.bf16.msra.mxu1 %v4566_v15  ;;  %v3451_v41 = vld [vmem:[%s7801_s3 + $0x78] sm:$0xff] }
 0x2a6   : > { %2359 = vrot.lane.b32.xlu1 %v6367_v28, %s4833_s26  ;;  %v2218_v56 = vrot.slane %v6367_v28, 7  ;;  %2843 = vst.msk [vmem:[#allocation4 + $0x50] sm:$0xff] %vm2008_vm13, %v6367_v28  ;;  %v2505_v27 = vrot.slane %v6367_v28, 1  ;;  %4610 = vmatprep.subr.bf16.mxu1 %v4835_v18 }
 0x2a7   : > { %v6375_v12 = vld [vmem:[#allocation2 + $0x48] sm:$0xff]  ;;  %1469 = vst.msk [vmem:[#allocation3 + $0xe8] sm:$0xff] %vm1439_vm10, %v1402_v63  ;;  %v4569_v63 = vpack.c.bf16 %v3451_v41, %v3450_v38  ;;  %4567 = vmatpush1.bf16.msra.mxu0 %v4566_v15 }
 0x2a8   : > { %2357 = vrot.lane.b32.xlu0 %v6375_v12, %s4833_s26  ;;  %2842 = vst.msk [vmem:[#allocation4 + $0x38] sm:$0xff] %vm2008_vm13, %v6375_v12  ;;  %v2216_v13 = vrot.slane %v6375_v12, 7  ;;  %v2504_v61 = vrot.slane %v6375_v12, 1  ;;  %v1534_v40 = vpop.permute.xlu0 %1533  ;;  %v6393_v21 = vsel %vm386_vm1, %v2505_v27, %v2507_v11  ;;  %4568 = vmatprep.subr.bf16.mxu0 %v4835_v18 }
 0x2a9   : > { %v4443_v39 = vpop.f32.mrb[4].mxu0  ;;  %v1536_v43 = vpop.permute.xlu1 %1535  ;;  %1602 = vst.msk [vmem:[#allocation3 + $0xe0] sm:$0xff] %vm1573_vm11, %v1534_v40  ;;  %4626 = vmatpush1.bf16.msra.mxu1 %v4569_v63 }
 0x2aa   : > { %v6397_v44 = vsel %vm2204_vm15, %v2215_v54, %v2216_v13  ;;  %v6400_v29 = vsel %vm2204_vm15, %v2216_v13, %v2218_v56  ;;  %v6403_v57 = vsel %vm386_vm1, %v2504_v61, %v2505_v27  ;;  %3309 = vst.msk [vmem:[#allocation4 + $0x28] sm:$0xff] %vm2008_vm13, %v6393_v21  ;;  %v1843_v58 = vadd.f32 %v4443_v39, %v6288_v24  ;;  %v1837_v5 = vpop.f32.mrb[5].mxu0  ;;  %v3453_v39 = vld [vmem:[%s7801_s3 + $0x88] sm:$0xff] }
 0x2ab   : > { %1603 = vst.msk [vmem:[#allocation3 + $0xe8] sm:$0xff] %vm1573_vm11, %v1536_v43  ;;  %v1838_v30 = vadd.f32 %v6288_v24, %v1837_v5  ;;  %4611 = vmatprep.subr.bf16.mxu1 %v4835_v18  ;;  %v4572_v5 = vpack.c.bf16 %v3453_v39, %v3452_v42  ;;  %4570 = vmatpush1.bf16.msra.mxu0 %v4569_v63  ;;  %v3462_v39 = vld [vmem:[%s7801_s3 + $0xd0] sm:$0xff] }
 0x2ac   : > { %2321 = vst.msk [vmem:[#allocation4 + $0x60] sm:$0xff] %vm2008_vm13, %v6397_v44  ;;  %2322 = vst.msk [vmem:[#allocation4 + $0x78] sm:$0xff] %vm2008_vm13, %v6400_v29  ;;  %v1981_v55 = vmax.f32 %v1843_v58, 0.0  ;;  %v1004_v14 = vpop.permute.xlu0 %1003  ;;  %4571 = vmatprep.subr.bf16.mxu0 %v4835_v18 }
 0x2ad   : > { %3308 = vst.msk [vmem:[#allocation4 + $0x10] sm:$0xff] %vm2008_vm13, %v6403_v57  ;;  %v1980_v20 = vmax.f32 %v1838_v30, 0.0  ;;  %v1006_v3 = vpop.permute.xlu1 %1005  ;;  %4627 = vmatpush1.bf16.msra.mxu1 %v4572_v5 }
 0x2ae   : > { %1070 = vst.msk [vmem:[#allocation3 + $0xf0] sm:$0xff] %vm1039_vm7, %v1004_v14  ;;  %1071 = vst.msk [vmem:[#allocation3 + $0xf8] sm:$0xff] %vm1039_vm7, %v1006_v3  ;;  %4612 = vmatprep.subr.bf16.mxu1 %v4835_v18 }
 0x2af   : > { %2057 = vst.msk [vmem:[#allocation2 + $0x70] sm:$0xff] %vm2008_vm13, %v1981_v55  ;;  %2056 = vst.msk [vmem:[#allocation2 + $0x68] sm:$0xff] %vm2008_vm13, %v1980_v20  ;;  %v3455_v55 = vld [vmem:[%s7801_s3 + $0x98] sm:$0xff]  ;;  %4573 = vmatpush1.bf16.msra.mxu0 %v4572_v5 }
 0x2b0   : > { %v1138_v1 = vpop.permute.xlu0 %1137  ;;  %v1634_v17 = vld [vmem:[#allocation3 + $0xe0] sm:$0xff]  ;;  %v4575_v31 = vpack.c.bf16 %v3455_v55, %v3454_v7  ;;  %v2103_v20 = vld [vmem:[#allocation2 + $0x98] sm:$0xff]  ;;  %4574 = vmatprep.subr.bf16.mxu0 %v4835_v18  ;;  %v3465_v55 = vld [vmem:[%s7801_s3 + $0xe8] sm:$0xff] }
 0x2b1   : > { %v1140_v47 = vpop.permute.xlu1 %1139  ;;  %1204 = vst.msk [vmem:[#allocation3 + $0xf0] sm:$0xff] %vm1173_vm8, %v1138_v1  ;;  %4477 = vmatprep.mubr.msk.f32.mxu0 %vm1650_vm12, %v1634_v17  ;;  %v3457_v1 = vld [vmem:[%s7801_s3 + $0xa8] sm:$0xff]  ;;  %v2517_v17 = vrot.slane %v2103_v20, 1  ;;  %v3464_v7 = vld [vmem:[%s7801_s3 + $0xe0] sm:$0xff] }
 0x2b2   : > { %v1635_v36 = vld [vmem:[#allocation3 + $0xe8] sm:$0xff]  ;;  %1205 = vst.msk [vmem:[#allocation3 + $0xf8] sm:$0xff] %vm1173_vm8, %v1140_v47  ;;  %4628 = vmatpush1.bf16.msra.mxu1 %v4575_v31  ;;  %v4578_v6 = vpack.c.bf16 %v3457_v1, %v3456_v32  ;;  %v4590_v20 = vpack.c.bf16 %v3465_v55, %v3464_v7 }
 0x2b3   : > { %4478 = vmatmul.mubr.msk.f32.gmra.mrb[28].mxu0 %vm1650_vm12, %v1635_v36  ;;  %4613 = vmatprep.subr.bf16.mxu1 %v4835_v18  ;;  %v2225_v36 = vrot.slane %v2100_v16, 7 }
 0x2b4   : > { %v1269_v49 = vpop.permute.xlu0 %1268  ;;  %4576 = vmatpush1.bf16.msra.mxu0 %v4575_v31 }
 0x2b5   : > { %v1271_v51 = vpop.permute.xlu1 %1270  ;;  %1335 = vst.msk [vmem:[#allocation3 + $0xf0] sm:$0xff] %vm1304_vm9, %v1269_v49  ;;  %4577 = vmatprep.subr.bf16.mxu0 %v4835_v18 }
 0x2b6   : > { %v6448_v50 = vld [vmem:[#allocation2 + $0x70] sm:$0xff]  ;;  %v6457_v22 = vld [vmem:[#allocation2 + $0x68] sm:$0xff]  ;;  %1336 = vst.msk [vmem:[#allocation3 + $0xf8] sm:$0xff] %vm1304_vm9, %v1271_v51  ;;  %4629 = vmatpush1.bf16.msra.mxu1 %v4578_v6 }
 0x2b7   : > { %2363 = vrot.lane.b32.xlu1 %v6448_v50, %s4833_s26  ;;  %v2223_v19 = vrot.slane %v6448_v50, 7  ;;  %2845 = vst.msk [vmem:[#allocation4 + $0x80] sm:$0xff] %vm2008_vm13, %v6448_v50  ;;  %v2510_v26 = vrot.slane %v6448_v50, 1  ;;  %v2221_v9 = vrot.slane %v6457_v22, 7  ;;  %2361 = vrot.lane.b32.xlu0 %v6457_v22, %s4833_s26  ;;  %2844 = vst.msk [vmem:[#allocation4 + $0x68] sm:$0xff] %vm2008_vm13, %v6457_v22  ;;  %v2509_v60 = vrot.slane %v6457_v22, 1 }
 0x2b8   : > { %v1404_v11 = vpop.permute.xlu0 %1403  ;;  %v3458_v51 = vld [vmem:[%s7801_s3 + $0xb0] sm:$0xff]  ;;  %4614 = vmatprep.subr.bf16.mxu1 %v4835_v18  ;;  %4579 = vmatpush1.bf16.msra.mxu0 %v4578_v6 }
 0x2b9   : > { %v6475_v34 = vsel %vm386_vm1, %v2510_v26, %v2512_v37  ;;  %v4446_v54 = vpop.f32.mrb[6].mxu0  ;;  %v6478_v56 = vsel %vm386_vm1, %v2509_v60, %v2510_v26  ;;  %v1406_v27 = vpop.permute.xlu1 %1405  ;;  %1470 = vst.msk [vmem:[#allocation3 + $0xf0] sm:$0xff] %vm1439_vm10, %v1404_v11  ;;  %v6484_v13 = vsel %vm2204_vm15, %v2221_v9, %v2223_v19  ;;  %v6487_v33 = vsel %vm2204_vm15, %v2220_v2, %v2221_v9  ;;  %v3459_v2 = vld [vmem:[%s7801_s3 + $0xb8] sm:$0xff]  ;;  %v3466_v6 = vld [vmem:[%s7801_s3 + $0xf0] sm:$0xff] }
 0x2ba   : > { %3311 = vst.msk [vmem:[#allocation4 + $0x58] sm:$0xff] %vm2008_vm13, %v6475_v34  ;;  %v1853_v53 = vadd.f32 %v4446_v54, %v6288_v24  ;;  %v1847_v61 = vpop.f32.mrb[7].mxu0  ;;  %3310 = vst.msk [vmem:[#allocation4 + $0x40] sm:$0xff] %vm2008_vm13, %v6478_v56  ;;  %v4581_v9 = vpack.c.bf16 %v3459_v2, %v3458_v51  ;;  %4580 = vmatprep.subr.bf16.mxu0 %v4835_v18 }
 0x2bb   : > { %1471 = vst.msk [vmem:[#allocation3 + $0xf8] sm:$0xff] %vm1439_vm10, %v1406_v27  ;;  %v1848_v40 = vadd.f32 %v6288_v24, %v1847_v61  ;;  %v3461_v61 = vld [vmem:[%s7801_s3 + $0xc8] sm:$0xff] }
 0x2bc   : > { %2324 = vst.msk [vmem:[#allocation4 + $0xa8] sm:$0xff] %vm2008_vm13, %v6484_v13  ;;  %2323 = vst.msk [vmem:[#allocation4 + $0x90] sm:$0xff] %vm2008_vm13, %v6487_v33  ;;  %v1983_v43 = vmax.f32 %v1853_v53, 0.0  ;;  %v1538_v58 = vpop.permute.xlu0 %1537  ;;  %4630 = vmatpush1.bf16.msra.mxu1 %v4581_v9  ;;  %v3460_v53 = vld [vmem:[%s7801_s3 + $0xc0] sm:$0xff]  ;;  %4582 = vmatpush1.bf16.msra.mxu0 %v4581_v9 }
 0x2bd   : > { %v1982_v30 = vmax.f32 %v1848_v40, 0.0  ;;  %v1540_v10 = vpop.permute.xlu1 %1539  ;;  %1604 = vst.msk [vmem:[#allocation3 + $0xf0] sm:$0xff] %vm1573_vm11, %v1538_v58  ;;  %4615 = vmatprep.subr.bf16.mxu1 %v4835_v18  ;;  %v4584_v42 = vpack.c.bf16 %v3461_v61, %v3460_v53  ;;  %4583 = vmatprep.subr.bf16.mxu0 %v4835_v18  ;;  %v2107_v58 = vld [vmem:[#allocation2 + $0xb8] sm:$0xff] }
 0x2be   : > { %2059 = vst.msk [vmem:[#allocation2 + $0x90] sm:$0xff] %vm2008_vm13, %v1983_v43  ;;  %v3463_v43 = vld [vmem:[%s7801_s3 + $0xd8] sm:$0xff] }
 0x2bf   : > { %1605 = vst.msk [vmem:[#allocation3 + $0xf8] sm:$0xff] %vm1573_vm11, %v1540_v10  ;;  %v4587_v5 = vpack.c.bf16 %v3463_v43, %v3462_v39  ;;  %v2522_v10 = vrot.slane %v2107_v58, 1 }
 0x2c0   : > { %2058 = vst.msk [vmem:[#allocation2 + $0x88] sm:$0xff] %vm2008_vm13, %v1982_v30  ;;  %v2350_v14 = vpop.permute.xlu0 %2349  ;;  %4631 = vmatpush1.bf16.msra.mxu1 %v4584_v42  ;;  %4585 = vmatpush1.bf16.msra.mxu0 %v4584_v42  ;;  %v2104_v30 = vld [vmem:[#allocation2 + $0xa0] sm:$0xff] }
 0x2c1   : > { %v2352_v3 = vpop.permute.xlu1 %2351  ;;  %2446 = vst.msk [vmem:[#allocation4] sm:$0xff] %vm2445_vm0, %v2350_v14  ;;  %4616 = vmatprep.subr.bf16.mxu1 %v4835_v18  ;;  %4586 = vmatprep.subr.bf16.mxu0 %v4835_v18  ;;  %v2230_v31 = vrot.slane %v2104_v30, 7 }
 0x2c2   : > { %2447 = vst.msk [vmem:[#allocation4 + $0x18] sm:$0xff] %vm2445_vm0, %v2352_v3 }
 0x2c4   : > { %v1636_v8 = vld [vmem:[#allocation3 + $0xf0] sm:$0xff]  ;;  %4632 = vmatpush1.bf16.msra.mxu1 %v4587_v5  ;;  %4588 = vmatpush1.bf16.msra.mxu0 %v4587_v5 }
 0x2c5   : > { %v6528_v47 = vld [vmem:[#allocation2 + $0x90] sm:$0xff]  ;;  %4480 = vmatprep.mubr.msk.f32.mxu0 %vm1650_vm12, %v1636_v8  ;;  %4617 = vmatprep.subr.bf16.mxu1 %v4835_v18 }
 0x2c6   : > { %v1637_v52 = vld [vmem:[#allocation3 + $0xf8] sm:$0xff]  ;;  %2367 = vrot.lane.b32.xlu1 %v6528_v47, %s4833_s26  ;;  %2847 = vst.msk [vmem:[#allocation4 + $0xb0] sm:$0xff] %vm2008_vm13, %v6528_v47  ;;  %v2515_v48 = vrot.slane %v6528_v47, 1  ;;  %v2228_v37 = vrot.slane %v6528_v47, 7  ;;  %4589 = vmatprep.subr.bf16.mxu0 %v4835_v18 }
 0x2c7   : > { %v6536_v25 = vld [vmem:[#allocation2 + $0x88] sm:$0xff]  ;;  %4481 = vmatmul.mubr.msk.f32.gmra.mrb[30].mxu0 %vm1650_vm12, %v1637_v52 }
 0x2c8   : > { %2365 = vrot.lane.b32.xlu0 %v6536_v25, %s4833_s26  ;;  %2846 = vst.msk [vmem:[#allocation4 + $0x98] sm:$0xff] %vm2008_vm13, %v6536_v25  ;;  %v2514_v49 = vrot.slane %v6536_v25, 1  ;;  %v2226_v15 = vrot.slane %v6536_v25, 7  ;;  %v4449_v19 = vpop.f32.mrb[8].mxu0  ;;  %v6554_v26 = vsel %vm386_vm1, %v2515_v48, %v2517_v17  ;;  %4633 = vmatpush1.bf16.msra.mxu1 %v4590_v20 }
 0x2c9   : > { %v1863_v60 = vadd.f32 %v4449_v19, %v6288_v24  ;;  %v1857_v38 = vpop.f32.mrb[9].mxu0  ;;  %3313 = vst.msk [vmem:[#allocation4 + $0x88] sm:$0xff] %vm2008_vm13, %v6554_v26  ;;  %4618 = vmatprep.subr.bf16.mxu1 %v4835_v18  ;;  %4591 = vmatpush1.bf16.msra.mxu0 %v4590_v20 }
 0x2ca   : > { %v6559_v41 = vsel %vm386_vm1, %v2514_v49, %v2515_v48  ;;  %v6564_v11 = vsel %vm2204_vm15, %v2225_v36, %v2226_v15  ;;  %v6567_v63 = vsel %vm2204_vm15, %v2226_v15, %v2228_v37  ;;  %v1858_v54 = vadd.f32 %v6288_v24, %v1857_v38  ;;  %v3467_v36 = vld [vmem:[%s7801_s3 + $0xf8] sm:$0xff]  ;;  %4592 = vmatprep.subr.bf16.mxu0 %v4835_v18 }
 0x2cb   : > { %3312 = vst.msk [vmem:[#allocation4 + $0x70] sm:$0xff] %vm2008_vm13, %v6559_v41  ;;  %2325 = vst.msk [vmem:[#allocation4 + $0xc0] sm:$0xff] %vm2008_vm13, %v6564_v11  ;;  %v1985_v27 = vmax.f32 %v1863_v60, 0.0  ;;  %v4593_v15 = vpack.c.bf16 %v3467_v36, %v3466_v6  ;;  %v2111_v38 = vld [vmem:[#allocation2 + $0xd8] sm:$0xff] }
 0x2cc   : > { %2326 = vst.msk [vmem:[#allocation4 + $0xd8] sm:$0xff] %vm2008_vm13, %v6567_v63  ;;  %v1984_v40 = vmax.f32 %v1858_v54, 0.0  ;;  %v2108_v54 = vld [vmem:[#allocation2 + $0xc0] sm:$0xff]  ;;  %v2527_v18 = vrot.slane %v2111_v38, 1 }
 0x2cd   : > { %2061 = vst.msk [vmem:[#allocation2 + $0xb0] sm:$0xff] %vm2008_vm13, %v1985_v27  ;;  %4634 = vmatpush1.bf16.msra.mxu1 %v4593_v15  ;;  %4594 = vmatpush1.bf16.msra.mxu0 %v4593_v15  ;;  %v2235_v27 = vrot.slane %v2108_v54, 7 }
 0x2ce   : > { %2060 = vst.msk [vmem:[#allocation2 + $0xa8] sm:$0xff] %vm2008_vm13, %v1984_v40 }
 0x2d4   : > { %v6601_v14 = vld [vmem:[#allocation2 + $0xb0] sm:$0xff] }
 0x2d5   : > { %2371 = vrot.lane.b32.xlu1 %v6601_v14, %s4833_s26  ;;  %2849 = vst.msk [vmem:[#allocation4 + $0xe0] sm:$0xff] %vm2008_vm13, %v6601_v14  ;;  %v2105_v3 = vld [vmem:[#allocation2 + $0xa8] sm:$0xff]  ;;  %v2233_v16 = vrot.slane %v6601_v14, 7  ;;  %v2520_v32 = vrot.slane %v6601_v14, 1 }
 0x2d6   : > { %2369 = vrot.lane.b32.xlu0 %v2105_v3, %s4833_s26  ;;  %2848 = vst.msk [vmem:[#allocation4 + $0xc8] sm:$0xff] %vm2008_vm13, %v2105_v3  ;;  %v2231_v1 = vrot.slane %v2105_v3, 7  ;;  %v2519_v17 = vrot.slane %v2105_v3, 1 }
 0x2d7   : > { %v6614_v8 = vsel %vm386_vm1, %v2520_v32, %v2522_v10 }
 0x2d8   : > { %v6623_v52 = vsel %vm2204_vm15, %v2230_v31, %v2231_v1  ;;  %v4452_v48 = vpop.f32.mrb[10].mxu0  ;;  %v6626_v37 = vsel %vm2204_vm15, %v2231_v1, %v2233_v16  ;;  %v6629_v49 = vsel %vm386_vm1, %v2519_v17, %v2520_v32  ;;  %3315 = vst.msk [vmem:[#allocation4 + $0xb8] sm:$0xff] %vm2008_vm13, %v6614_v8  ;;  %v2115_v32 = vld [vmem:[#allocation2 + $0xf8] sm:$0xff]  ;;  %v2112_v1 = vld [vmem:[#allocation2 + $0xe0] sm:$0xff] }
 0x2d9   : > { %3026 = vrot.lane.b32.xlu1 %v6623_v52, %s4836_s22  ;;  %2327 = vst.msk [vmem:[#allocation4 + $0xf0] sm:$0xff] %vm2008_vm13, %v6623_v52  ;;  %v1873_v51 = vadd.f32 %v4452_v48, %v6288_v24  ;;  %v1867_v2 = vpop.f32.mrb[11].mxu0  ;;  %2328 = vst.msk [vmem:[#allocation4 + $0x108] sm:$0xff] %vm2008_vm13, %v6626_v37  ;;  %v2240_v17 = vrot.slane %v2112_v1, 7 }
 0x2da   : > { %3314 = vst.msk [vmem:[#allocation4 + $0xa0] sm:$0xff] %vm2008_vm13, %v6629_v49  ;;  %2890 = vrot.lane.b32.xlu0 %v6559_v41, %s4833_s26  ;;  %v1868_v19 = vadd.f32 %v6288_v24, %v1867_v2 }
 0x2db   : > { %v1987_v9 = vmax.f32 %v1873_v51, 0.0 }
 0x2dc   : > { %v1986_v60 = vmax.f32 %v1868_v19, 0.0 }
 0x2dd   : > { %2063 = vst.msk [vmem:[#allocation2 + $0xd0] sm:$0xff] %vm2008_vm13, %v1987_v9  ;;  %3154 = vrot.lane.b32.xlu1 %v2105_v3, %s4837_s23 }
 0x2de   : > { %2062 = vst.msk [vmem:[#allocation2 + $0xc8] sm:$0xff] %vm2008_vm13, %v1986_v60  ;;  %2586 = vrot.lane.b32.xlu0 %v6478_v56, %s4836_s22 }
 0x2e1   : > { %2892 = vrot.lane.b32.xlu1 %v6554_v26, %s4833_s26 }
 0x2e2   : > { %2723 = vrot.lane.b32.xlu0 %v6564_v11, %s4837_s23 }
 0x2e4   : > { %v6656_v53 = vld [vmem:[#allocation2 + $0xd0] sm:$0xff] }
 0x2e5   : > { %2588 = vrot.lane.b32.xlu1 %v6475_v34, %s4836_s22  ;;  %v6660_v61 = vld [vmem:[#allocation2 + $0xc8] sm:$0xff]  ;;  %v2238_v40 = vrot.slane %v6656_v53, 7  ;;  %2851 = vst.msk [vmem:[#allocation4 + $0x110] sm:$0xff] %vm2008_vm13, %v6656_v53  ;;  %v2525_v42 = vrot.slane %v6656_v53, 1 }
 0x2e6   : > { %3028 = vrot.lane.b32.xlu0 %v6626_v37, %s4836_s22  ;;  %v2236_v39 = vrot.slane %v6660_v61, 7  ;;  %2850 = vst.msk [vmem:[#allocation4 + $0xf8] sm:$0xff] %vm2008_vm13, %v6660_v61  ;;  %v2524_v43 = vrot.slane %v6660_v61, 1 }
 0x2e7   : > { %v6673_v58 = vsel %vm386_vm1, %v2525_v42, %v2527_v18 }
 0x2e8   : > { %v6676_v5 = vsel %vm2204_vm15, %v2235_v27, %v2236_v39  ;;  %v4455_v30 = vpop.f32.mrb[12].mxu0  ;;  %v6679_v10 = vsel %vm2204_vm15, %v2236_v39, %v2238_v40  ;;  %v6682_v7 = vsel %vm386_vm1, %v2524_v43, %v2525_v42  ;;  %3317 = vst.msk [vmem:[#allocation4 + $0xe8] sm:$0xff] %vm2008_vm13, %v6673_v58  ;;  %v2119_v40 = vld [vmem:[#allocation2 + $0x118] sm:$0xff]  ;;  %v2116_v42 = vld [vmem:[#allocation2 + $0x100] sm:$0xff] }
 0x2e9   : > { %2725 = vrot.lane.b32.xlu1 %v6567_v63, %s4837_s23  ;;  %2329 = vst.msk [vmem:[#allocation4 + $0x120] sm:$0xff] %vm2008_vm13, %v6676_v5  ;;  %v1883_v55 = vadd.f32 %v4455_v30, %v6288_v24  ;;  %v1877_v31 = vpop.f32.mrb[13].mxu0  ;;  %2330 = vst.msk [vmem:[#allocation4 + $0x138] sm:$0xff] %vm2008_vm13, %v6679_v10  ;;  %v2537_v39 = vrot.slane %v2119_v40, 1 }
 0x2ea   : > { %3316 = vst.msk [vmem:[#allocation4 + $0xd0] sm:$0xff] %vm2008_vm13, %v6682_v7  ;;  %3156 = vrot.lane.b32.xlu0 %v6601_v14, %s4837_s23  ;;  %v1878_v20 = vadd.f32 %v6288_v24, %v1877_v31  ;;  %v2532_v14 = vrot.slane %v2115_v32, 1 }
 0x2eb   : > { %v1989_v3 = vmax.f32 %v1883_v55, 0.0 }
 0x2ec   : > { %v1988_v16 = vmax.f32 %v1878_v20, 0.0 }
 0x2ed   : > { %3030 = vrot.lane.b32.xlu1 %v6676_v5, %s4836_s22  ;;  %2065 = vst.msk [vmem:[#allocation2 + $0xf0] sm:$0xff] %vm2008_vm13, %v1989_v3 }
 0x2ee   : > { %2894 = vrot.lane.b32.xlu0 %v6629_v49, %s4833_s26  ;;  %2064 = vst.msk [vmem:[#allocation2 + $0xe8] sm:$0xff] %vm2008_vm13, %v1988_v16 }
 0x2f1   : > { %3158 = vrot.lane.b32.xlu1 %v6660_v61, %s4837_s23 }
 0x2f2   : > { %2590 = vrot.lane.b32.xlu0 %v6559_v41, %s4836_s22 }
 0x2f4   : > { %v6708_v6 = vld [vmem:[#allocation2 + $0xf0] sm:$0xff] }
 0x2f5   : > { %2896 = vrot.lane.b32.xlu1 %v6614_v8, %s4833_s26  ;;  %v6712_v36 = vld [vmem:[#allocation2 + $0xe8] sm:$0xff]  ;;  %v2243_v48 = vrot.slane %v6708_v6, 7  ;;  %2853 = vst.msk [vmem:[#allocation4 + $0x140] sm:$0xff] %vm2008_vm13, %v6708_v6  ;;  %v2530_v15 = vrot.slane %v6708_v6, 1 }
 0x2f6   : > { %2727 = vrot.lane.b32.xlu0 %v6623_v52, %s4837_s23  ;;  %v2241_v41 = vrot.slane %v6712_v36, 7  ;;  %2852 = vst.msk [vmem:[#allocation4 + $0x128] sm:$0xff] %vm2008_vm13, %v6712_v36  ;;  %v2529_v51 = vrot.slane %v6712_v36, 1 }
 0x2f7   : > { %v6725_v2 = vsel %vm386_vm1, %v2530_v15, %v2532_v14 }
 0x2f8   : > { %v6728_v19 = vsel %vm2204_vm15, %v2240_v17, %v2241_v41  ;;  %v6731_v9 = vsel %vm2204_vm15, %v2241_v41, %v2243_v48  ;;  %v6734_v60 = vsel %vm386_vm1, %v2529_v51, %v2530_v15  ;;  %3319 = vst.msk [vmem:[#allocation4 + $0x118] sm:$0xff] %vm2008_vm13, %v6725_v2  ;;  %v2091_v48 = vld [vmem:[#allocation2 + $0x38] sm:$0xff] }
 0x2f9   : > { %2592 = vrot.lane.b32.xlu1 %v6554_v26, %s4836_s22  ;;  %2331 = vst.msk [vmem:[#allocation4 + $0x150] sm:$0xff] %vm2008_vm13, %v6728_v19  ;;  %2332 = vst.msk [vmem:[#allocation4 + $0x168] sm:$0xff] %vm2008_vm13, %v6731_v9  ;;  %v4458_v52 = vpop.f32.mrb[14].mxu0  ;;  %v2087_v51 = vld [vmem:[#allocation2 + $0x18] sm:$0xff] }
 0x2fa   : > { %3318 = vst.msk [vmem:[#allocation4 + $0x100] sm:$0xff] %vm2008_vm13, %v6734_v60  ;;  %3032 = vrot.lane.b32.xlu0 %v6679_v10, %s4836_s22  ;;  %v1893_v38 = vadd.f32 %v4458_v52, %v6288_v24  ;;  %v1887_v54 = vpop.f32.mrb[15].mxu0 }
 0x2fb   : > { %v1888_v18 = vadd.f32 %v6288_v24, %v1887_v54  ;;  %v2502_v54 = vrot.slane %v2091_v48, 1 }
 0x2fc   : > { %v1991_v27 = vmax.f32 %v1893_v38, 0.0 }
 0x2fd   : > { %2729 = vrot.lane.b32.xlu1 %v6626_v37, %s4837_s23  ;;  %v1990_v26 = vmax.f32 %v1888_v18, 0.0  ;;  %v2245_v37 = vrot.slane %v2116_v42, 7 }
 0x2fe   : > { %3160 = vrot.lane.b32.xlu0 %v6656_v53, %s4837_s23  ;;  %2067 = vst.msk [vmem:[#allocation2 + $0x110] sm:$0xff] %vm2008_vm13, %v1991_v27  ;;  %v2123_v27 = vld [vmem:[#allocation2 + $0x138] sm:$0xff] }
 0x2ff   : > { %2066 = vst.msk [vmem:[#allocation2 + $0x108] sm:$0xff] %vm2008_vm13, %v1990_v26  ;;  %v2120_v26 = vld [vmem:[#allocation2 + $0x120] sm:$0xff]  ;;  %v2542_v42 = vrot.slane %v2123_v27, 1 }
 0x300   : > { %v2250_v4 = vrot.slane %v2120_v26, 7 }
 0x301   : > { %2898 = vrot.lane.b32.xlu1 %v6682_v7, %s4833_s26 }
 0x302   : > { %2878 = vrot.lane.b32.xlu0 %v6320_v62, %s4833_s26 }
 0x305   : > { %2574 = vrot.lane.b32.xlu1 %v6282_v0, %s4836_s22  ;;  %v6762_v43 = vld [vmem:[#allocation2 + $0x110] sm:$0xff] }
 0x306   : > { %3014 = vrot.lane.b32.xlu0 %v6397_v44, %s4836_s22  ;;  %v6766_v30 = vld [vmem:[#allocation2 + $0x108] sm:$0xff]  ;;  %v2248_v55 = vrot.slane %v6762_v43, 7  ;;  %2855 = vst.msk [vmem:[#allocation4 + $0x170] sm:$0xff] %vm2008_vm13, %v6762_v43  ;;  %v2535_v31 = vrot.slane %v6762_v43, 1 }
 0x307   : > { %v2246_v20 = vrot.slane %v6766_v30, 7  ;;  %2854 = vst.msk [vmem:[#allocation4 + $0x158] sm:$0xff] %vm2008_vm13, %v6766_v30  ;;  %v2534_v0 = vrot.slane %v6766_v30, 1 }
 0x308   : > { %v2356_v3 = vpop.permute.xlu1 %2355  ;;  %v6777_v16 = vsel %vm386_vm1, %v2535_v31, %v2537_v39 }
 0x309   : > { %3142 = vrot.lane.b32.xlu1 %v6375_v12, %s4837_s23  ;;  %2449 = vst.msk [vmem:[#allocation4 + $0x48] sm:$0xff] %vm2445_vm0, %v2356_v3  ;;  %v6783_v1 = vsel %vm2204_vm15, %v2245_v37, %v2246_v20  ;;  %v6786_v14 = vsel %vm2204_vm15, %v2246_v20, %v2248_v55  ;;  %v6789_v17 = vsel %vm386_vm1, %v2534_v0, %v2535_v31 }
 0x30a   : > { %v2354_v32 = vpop.permute.xlu0 %2353  ;;  %3321 = vst.msk [vmem:[#allocation4 + $0x148] sm:$0xff] %vm2008_vm13, %v6777_v16  ;;  %3034 = vrot.lane.b32.xlu0 %v6728_v19, %s4836_s22  ;;  %2333 = vst.msk [vmem:[#allocation4 + $0x180] sm:$0xff] %vm2008_vm13, %v6783_v1 }
 0x30b   : > { %2448 = vst.msk [vmem:[#allocation4 + $0x30] sm:$0xff] %vm2445_vm0, %v2354_v32 }
 0x30c   : > { %2334 = vst.msk [vmem:[#allocation4 + $0x198] sm:$0xff] %vm2008_vm13, %v6786_v14  ;;  %3320 = vst.msk [vmem:[#allocation4 + $0x130] sm:$0xff] %vm2008_vm13, %v6789_v17 }
 0x30d   : > { %2711 = vrot.lane.b32.xlu1 %v6326_v46, %s4837_s23  ;;  %v4461_v12 = vpop.f32.mrb[16].mxu0  ;;  %v2497_v46 = vrot.slane %v2087_v51, 1 }
 0x30e   : > { %2594 = vrot.lane.b32.xlu0 %v6629_v49, %s4836_s22  ;;  %v1903_v15 = vadd.f32 %v4461_v12, %v6288_v24  ;;  %v1897_v41 = vpop.f32.mrb[17].mxu0  ;;  %v6819_v49 = vsel %vm386_vm1, %v2500_v35, %v2502_v54 }
 0x30f   : > { %v1898_v52 = vadd.f32 %v6288_v24, %v1897_v41 }
 0x310   : > { %v1993_v38 = vmax.f32 %v1903_v15, 0.0 }
 0x311   : > { %2731 = vrot.lane.b32.xlu1 %v6676_v5, %s4837_s23  ;;  %v1992_v18 = vmax.f32 %v1898_v52, 0.0  ;;  %v2498_v5 = vsel %vm386_vm1, %v2495_v23, %v2497_v46 }
 0x312   : > { %3162 = vrot.lane.b32.xlu0 %v6712_v36, %s4837_s23  ;;  %2069 = vst.msk [vmem:[#allocation2 + $0x130] sm:$0xff] %vm2008_vm13, %v1993_v38 }
 0x313   : > { %2068 = vst.msk [vmem:[#allocation2 + $0x128] sm:$0xff] %vm2008_vm13, %v1992_v18 }
 0x315   : > { %2900 = vrot.lane.b32.xlu1 %v6673_v58, %s4833_s26 }
 0x316   : > { %2880 = vrot.lane.b32.xlu0 %v6819_v49, %s4833_s26 }
 0x318   : > { %v2360_v40 = vpop.permute.xlu1 %2359 }
 0x319   : > { %2576 = vrot.lane.b32.xlu1 %v2498_v5, %s4836_s22  ;;  %2451 = vst.msk [vmem:[#allocation4 + $0x78] sm:$0xff] %vm2445_vm0, %v2360_v40  ;;  %v6828_v37 = vld [vmem:[#allocation2 + $0x130] sm:$0xff] }
 0x31a   : > { %v2358_v39 = vpop.permute.xlu0 %2357  ;;  %3016 = vrot.lane.b32.xlu0 %v6400_v29, %s4836_s22  ;;  %v6833_v35 = vld [vmem:[#allocation2 + $0x128] sm:$0xff]  ;;  %v2253_v59 = vrot.slane %v6828_v37, 7  ;;  %2857 = vst.msk [vmem:[#allocation4 + $0x1a0] sm:$0xff] %vm2008_vm13, %v6828_v37  ;;  %v2540_v23 = vrot.slane %v6828_v37, 1 }
 0x31b   : > { %2450 = vst.msk [vmem:[#allocation4 + $0x60] sm:$0xff] %vm2445_vm0, %v2358_v39  ;;  %v2251_v55 = vrot.slane %v6833_v35, 7  ;;  %v2539_v31 = vrot.slane %v6833_v35, 1 }
 0x31c   : > { %2856 = vst.msk [vmem:[#allocation4 + $0x188] sm:$0xff] %vm2008_vm13, %v6833_v35  ;;  %v6844_v20 = vsel %vm386_vm1, %v2540_v23, %v2542_v42 }
 0x31d   : > { %3144 = vrot.lane.b32.xlu1 %v6367_v28, %s4837_s23  ;;  %v6849_v0 = vsel %vm2204_vm15, %v2250_v4, %v2251_v55  ;;  %v6852_v3 = vsel %vm2204_vm15, %v2251_v55, %v2253_v59  ;;  %v6855_v32 = vsel %vm386_vm1, %v2539_v31, %v2540_v23  ;;  %3323 = vst.msk [vmem:[#allocation4 + $0x178] sm:$0xff] %vm2008_vm13, %v6844_v20  ;;  %v6929_v59 = vld [vmem:[#allocation5] ss:$0 sm:$0xff] }
 0x31e   : > { %3036 = vrot.lane.b32.xlu0 %v6731_v9, %s4836_s22  ;;  %2335 = vst.msk [vmem:[#allocation4 + $0x1b0] sm:$0xff] %vm2008_vm13, %v6849_v0  ;;  %2336 = vst.msk [vmem:[#allocation4 + $0x1c8] sm:$0xff] %vm2008_vm13, %v6852_v3 }
 0x31f   : > { %3322 = vst.msk [vmem:[#allocation4 + $0x160] sm:$0xff] %vm2008_vm13, %v6855_v32 }
 0x321   : > { %2713 = vrot.lane.b32.xlu1 %v6323_v45, %s4837_s23  ;;  %v4464_v28 = vpop.f32.mrb[18].mxu0 }
 0x322   : > { %2596 = vrot.lane.b32.xlu0 %v6614_v8, %s4836_s22  ;;  %v1913_v12 = vadd.f32 %v4464_v28, %v6288_v24  ;;  %v1907_v48 = vpop.f32.mrb[19].mxu0 }
 0x323   : > { %v1908_v15 = vadd.f32 %v6288_v24, %v1907_v48  ;;  %v2127_v24 = vld [vmem:[#allocation2 + $0x158] sm:$0xff]  ;;  %v2128_v48 = vld [vmem:[#allocation2 + $0x160] sm:$0xff] }
 0x324   : > { %v1995_v41 = vmax.f32 %v1913_v12, 0.0  ;;  %v2547_v52 = vrot.slane %v2127_v24, 1 }
 0x325   : > { %2733 = vrot.lane.b32.xlu1 %v6679_v10, %s4837_s23  ;;  %v1994_v51 = vmax.f32 %v1908_v15, 0.0  ;;  %v2124_v10 = vld [vmem:[#allocation2 + $0x140] sm:$0xff] }
 0x326   : > { %3164 = vrot.lane.b32.xlu0 %v6708_v6, %s4837_s23  ;;  %2071 = vst.msk [vmem:[#allocation2 + $0x150] sm:$0xff] %vm2008_vm13, %v1995_v41  ;;  %v2255_v38 = vrot.slane %v2124_v10, 7  ;;  %v2260_v41 = vrot.slane %v2128_v48, 7 }
 0x327   : > { %2070 = vst.msk [vmem:[#allocation2 + $0x148] sm:$0xff] %vm2008_vm13, %v1994_v51 }
 0x329   : > { %v2364_v45 = vpop.permute.xlu1 %2363  ;;  %2902 = vrot.lane.b32.xlu1 %v6734_v60, %s4833_s26  ;;  %v2362_v8 = vpop.permute.xlu0 %2361 }
 0x32a   : > { %2453 = vst.msk [vmem:[#allocation4 + $0xa8] sm:$0xff] %vm2445_vm0, %v2364_v45  ;;  %2452 = vst.msk [vmem:[#allocation4 + $0x90] sm:$0xff] %vm2445_vm0, %v2362_v8  ;;  %2882 = vrot.lane.b32.xlu0 %v6403_v57, %s4833_s26 }
 0x32d   : > { %2373 = vrot.lane.b32.xlu1 %v6660_v61, %s4833_s26  ;;  %v6887_v54 = vld [vmem:[#allocation2 + $0x150] sm:$0xff] }
 0x32e   : > { %3018 = vrot.lane.b32.xlu0 %v6487_v33, %s4836_s22  ;;  %v6891_v18 = vld [vmem:[#allocation2 + $0x148] sm:$0xff]  ;;  %v2258_v46 = vrot.slane %v6887_v54, 7  ;;  %2859 = vst.msk [vmem:[#allocation4 + $0x1d0] sm:$0xff] %vm2008_vm13, %v6887_v54  ;;  %v2545_v27 = vrot.slane %v6887_v54, 1 }
 0x32f   : > { %v2256_v5 = vrot.slane %v6891_v18, 7  ;;  %2858 = vst.msk [vmem:[#allocation4 + $0x1b8] sm:$0xff] %vm2008_vm13, %v6891_v18  ;;  %v2544_v61 = vrot.slane %v6891_v18, 1 }
 0x330   : > { %v6902_v26 = vsel %vm386_vm1, %v2545_v27, %v2547_v52 }
 0x331   : > { %3038 = vrot.lane.b32.xlu1 %v6783_v1, %s4836_s22  ;;  %v6907_v40 = vsel %vm2204_vm15, %v2255_v38, %v2256_v5  ;;  %v6910_v42 = vsel %vm2204_vm15, %v2256_v5, %v2258_v46  ;;  %v6913_v39 = vsel %vm386_vm1, %v2544_v61, %v2545_v27  ;;  %3325 = vst.msk [vmem:[#allocation4 + $0x1a8] sm:$0xff] %vm2008_vm13, %v6902_v26 }
 0x332   : > { %2578 = vrot.lane.b32.xlu0 %v6320_v62, %s4836_s22  ;;  %2337 = vst.msk [vmem:[#allocation4 + $0x1e0] sm:$0xff] %vm2008_vm13, %v6907_v40  ;;  %2338 = vst.msk [vmem:[#allocation4 + $0x1f8] sm:$0xff] %vm2008_vm13, %v6910_v42 }
 0x333   : > { %3324 = vst.msk [vmem:[#allocation4 + $0x190] sm:$0xff] %vm2008_vm13, %v6913_v39 }
 0x335   : > { %2598 = vrot.lane.b32.xlu1 %v6682_v7, %s4836_s22  ;;  %v4467_v4 = vpop.f32.mrb[20].mxu0 }
 0x336   : > { %3146 = vrot.lane.b32.xlu0 %v6457_v22, %s4837_s23  ;;  %v1923_v62 = vadd.f32 %v6929_v59, %v4467_v4  ;;  %v1917_v23 = vpop.f32.mrb[21].mxu0  ;;  %v2131_v22 = vld [vmem:[#allocation2 + $0x178] sm:$0xff] }
 0x337   : > { %v1918_v55 = vadd.f32 %v6929_v59, %v1917_v23  ;;  %v2552_v15 = vrot.slane %v2131_v22, 1 }
 0x338   : > { %v2368_v31 = vpop.permute.xlu1 %2367  ;;  %v1997_v28 = vmax.f32 %v1923_v62, 0.0 }
 0x339   : > { %3166 = vrot.lane.b32.xlu1 %v6766_v30, %s4837_s23  ;;  %2455 = vst.msk [vmem:[#allocation4 + $0xd8] sm:$0xff] %vm2445_vm0, %v2368_v31  ;;  %v1996_v7 = vmax.f32 %v1918_v55, 0.0 }
 0x33a   : > { %v2366_v12 = vpop.permute.xlu0 %2365  ;;  %2715 = vrot.lane.b32.xlu0 %v6397_v44, %s4837_s23  ;;  %2073 = vst.msk [vmem:[#allocation2 + $0x170] sm:$0xff] %vm2008_vm13, %v1997_v28 }
 0x33b   : > { %2454 = vst.msk [vmem:[#allocation4 + $0xc0] sm:$0xff] %vm2445_vm0, %v2366_v12 }
 0x33c   : > { %2072 = vst.msk [vmem:[#allocation2 + $0x168] sm:$0xff] %vm2008_vm13, %v1996_v7 }
 0x33d   : > { %2884 = vrot.lane.b32.xlu1 %v6393_v21, %s4833_s26 }
 0x33e   : > { %2735 = vrot.lane.b32.xlu0 %v6728_v19, %s4837_s23 }
 0x341   : > { %3020 = vrot.lane.b32.xlu1 %v6484_v13, %s4836_s22  ;;  %v6947_v51 = vld [vmem:[#allocation2 + $0x170] sm:$0xff] }
 0x342   : > { %2904 = vrot.lane.b32.xlu0 %v6725_v2, %s4833_s26  ;;  %v2263_v45 = vrot.slane %v6947_v51, 7  ;;  %2861 = vst.msk [vmem:[#allocation4 + $0x200] sm:$0xff] %vm2008_vm13, %v6947_v51  ;;  %v2550_v19 = vrot.slane %v6947_v51, 1 }
 0x343   : > { %v6951_v44 = vld [vmem:[#allocation2 + $0x168] sm:$0xff] }
 0x344   : > { %v2261_v8 = vrot.slane %v6951_v44, 7  ;;  %2860 = vst.msk [vmem:[#allocation4 + $0x1e8] sm:$0xff] %vm2008_vm13, %v6951_v44  ;;  %v2549_v24 = vrot.slane %v6951_v44, 1  ;;  %v6962_v10 = vsel %vm386_vm1, %v2550_v19, %v2552_v15 }
 0x345   : > { %2580 = vrot.lane.b32.xlu1 %v6819_v49, %s4836_s22  ;;  %3327 = vst.msk [vmem:[#allocation4 + $0x1d8] sm:$0xff] %vm2008_vm13, %v6962_v10 }
 0x346   : > { %v6967_v52 = vsel %vm2204_vm15, %v2260_v41, %v2261_v8  ;;  %v6970_v38 = vsel %vm2204_vm15, %v2261_v8, %v2263_v45  ;;  %v6973_v46 = vsel %vm386_vm1, %v2549_v24, %v2550_v19  ;;  %2375 = vrot.lane.b32.xlu0 %v6656_v53, %s4833_s26 }
 0x347   : > { %2339 = vst.msk [vmem:[#allocation4 + $0x210] sm:$0xff] %vm2008_vm13, %v6967_v52  ;;  %2340 = vst.msk [vmem:[#allocation4 + $0x228] sm:$0xff] %vm2008_vm13, %v6970_v38  ;;  %v2372_v49 = vpop.permute.xlu1 %2371 }
 0x348   : > { %3326 = vst.msk [vmem:[#allocation4 + $0x1c0] sm:$0xff] %vm2008_vm13, %v6973_v46  ;;  %v2370_v27 = vpop.permute.xlu0 %2369 }
 0x349   : > { %2457 = vst.msk [vmem:[#allocation4 + $0x108] sm:$0xff] %vm2445_vm0, %v2372_v49  ;;  %2456 = vst.msk [vmem:[#allocation4 + $0xf0] sm:$0xff] %vm2445_vm0, %v2370_v27  ;;  %3148 = vrot.lane.b32.xlu1 %v6448_v50, %s4837_s23  ;;  %v4470_v5 = vpop.f32.mrb[22].mxu0 }
 0x34a   : > { %3040 = vrot.lane.b32.xlu0 %v6786_v14, %s4836_s22  ;;  %v1933_v53 = vadd.f32 %v6929_v59, %v4470_v5  ;;  %v1927_v61 = vpop.f32.mrb[23].mxu0 }
 0x34b   : > { %v3027_v4 = vpop.permute.xlu1 %3026  ;;  %v1928_v62 = vadd.f32 %v6929_v59, %v1927_v61 }
 0x34c   : > { %v2891_v23 = vpop.permute.xlu0 %2890  ;;  %v1999_v55 = vmax.f32 %v1933_v53, 0.0 }
 0x34d   : > { %2980 = vst.msk [vmem:[#allocation4 + $0x98] sm:$0xff] %vm2445_vm0, %v2891_v23  ;;  %2717 = vrot.lane.b32.xlu1 %v6400_v29, %s4837_s23  ;;  %v1998_v50 = vmax.f32 %v1928_v62, 0.0  ;;  %v2135_v29 = vld [vmem:[#allocation2 + $0x198] sm:$0xff] }
 0x34e   : > { %2600 = vrot.lane.b32.xlu0 %v6673_v58, %s4836_s22  ;;  %3116 = vst.msk [vmem:[#allocation4 + $0x98] sm:$0xff] %vm2670_vm2, %v3027_v4  ;;  %v2132_v58 = vld [vmem:[#allocation2 + $0x180] sm:$0xff]  ;;  %v2557_v22 = vrot.slane %v2135_v29, 1 }
 0x34f   : > { %2075 = vst.msk [vmem:[#allocation2 + $0x190] sm:$0xff] %vm2008_vm13, %v1999_v55  ;;  %v3155_v31 = vpop.permute.xlu1 %3154  ;;  %2074 = vst.msk [vmem:[#allocation2 + $0x188] sm:$0xff] %vm2008_vm13, %v1998_v50  ;;  %v2265_v48 = vrot.slane %v2132_v58, 7 }
 0x350   : > { %3244 = vst.msk [vmem:[#allocation4 + $0x98] sm:$0xff] %vm2807_vm3, %v3155_v31  ;;  %v2587_v28 = vpop.permute.xlu0 %2586 }
 0x351   : > { %2677 = vst.msk [vmem:[#allocation4 + $0x90] sm:$0xff] %vm2670_vm2, %v2587_v28  ;;  %2737 = vrot.lane.b32.xlu1 %v6731_v9, %s4837_s23 }
 0x352   : > { %3168 = vrot.lane.b32.xlu0 %v6762_v43, %s4837_s23 }
 0x353   : > { %v2893_v12 = vpop.permute.xlu1 %2892 }
 0x354   : > { %2981 = vst.msk [vmem:[#allocation4 + $0xb0] sm:$0xff] %vm2445_vm0, %v2893_v12  ;;  %v2724_v7 = vpop.permute.xlu0 %2723 }
 0x355   : > { %2814 = vst.msk [vmem:[#allocation4 + $0x90] sm:$0xff] %vm2807_vm3, %v2724_v7  ;;  %2906 = vrot.lane.b32.xlu1 %v6789_v17, %s4833_s26 }
 0x356   : > { %v7011_v15 = vld [vmem:[#allocation2 + $0x190] sm:$0xff]  ;;  %2886 = vrot.lane.b32.xlu0 %v6478_v56, %s4833_s26  ;;  %v7015_v9 = vld [vmem:[#allocation2 + $0x188] sm:$0xff] }
 0x357   : > { %v2268_v41 = vrot.slane %v7011_v15, 7  ;;  %2863 = vst.msk [vmem:[#allocation4 + $0x230] sm:$0xff] %vm2008_vm13, %v7011_v15  ;;  %v2555_v45 = vrot.slane %v7011_v15, 1  ;;  %v2589_v19 = vpop.permute.xlu1 %2588  ;;  %v3359_v8 = vld [vmem:[#allocation4 + $0x98] sm:$0xff]  ;;  %v2266_v24 = vrot.slane %v7015_v9, 7  ;;  %2862 = vst.msk [vmem:[#allocation4 + $0x218] sm:$0xff] %vm2008_vm13, %v7015_v9 }
 0x358   : > { %v2554_v49 = vrot.slane %v7015_v9, 1  ;;  %2678 = vst.msk [vmem:[#allocation4 + $0xa8] sm:$0xff] %vm2670_vm2, %v2589_v19  ;;  %3669 = vmatprep.mubr.f32.mxu1 %v3359_v8  ;;  %v3029_v56 = vpop.permute.xlu0 %3028 }
 0x359   : > { %v7027_v27 = vsel %vm386_vm1, %v2555_v45, %v2557_v22  ;;  %3117 = vst.msk [vmem:[#allocation4 + $0xb0] sm:$0xff] %vm2670_vm2, %v3029_v56  ;;  %2377 = vrot.lane.b32.xlu1 %v6712_v36, %s4833_s26  ;;  %v7033_v5 = vsel %vm2204_vm15, %v2265_v48, %v2266_v24  ;;  %v7036_v53 = vsel %vm2204_vm15, %v2266_v24, %v2268_v41  ;;  %v2139_v22 = vld [vmem:[#allocation2 + $0x1b8] sm:$0xff] }
 0x35a   : > { %v7039_v61 = vsel %vm386_vm1, %v2554_v49, %v2555_v45  ;;  %3329 = vst.msk [vmem:[#allocation4 + $0x208] sm:$0xff] %vm2008_vm13, %v7027_v27  ;;  %3022 = vrot.lane.b32.xlu0 %v6564_v11, %s4836_s22  ;;  %2341 = vst.msk [vmem:[#allocation4 + $0x240] sm:$0xff] %vm2008_vm13, %v7033_v5  ;;  %v2562_v45 = vrot.slane %v2139_v22, 1 }
 0x35b   : > { %2342 = vst.msk [vmem:[#allocation4 + $0x258] sm:$0xff] %vm2008_vm13, %v7036_v53  ;;  %3328 = vst.msk [vmem:[#allocation4 + $0x1f0] sm:$0xff] %vm2008_vm13, %v7039_v61  ;;  %v2726_v36 = vpop.permute.xlu1 %2725 }
 0x35c   : > { %2815 = vst.msk [vmem:[#allocation4 + $0xa8] sm:$0xff] %vm2807_vm3, %v2726_v36  ;;  %v3157_v4 = vpop.permute.xlu0 %3156  ;;  %v3358_v62 = vld [vmem:[#allocation4 + $0x90] sm:$0xff] }
 0x35d   : > { %3245 = vst.msk [vmem:[#allocation4 + $0xb0] sm:$0xff] %vm2807_vm3, %v3157_v4  ;;  %3670 = vmatmul.mubr.f32.vlgmr.msra.gmra.mrb[0].mxu1 %v3358_v62  ;;  %3042 = vrot.lane.b32.xlu1 %v6849_v0, %s4836_s22  ;;  %v4473_v11 = vpop.f32.mrb[24].mxu0 }
 0x35e   : > { %2582 = vrot.lane.b32.xlu0 %v6403_v57, %s4836_s22  ;;  %v1943_v23 = vadd.f32 %v6929_v59, %v4473_v11  ;;  %v1937_v55 = vpop.f32.mrb[25].mxu0 }
 0x35f   : > { %v3031_v50 = vpop.permute.xlu1 %3030  ;;  %v1938_v31 = vadd.f32 %v6929_v59, %v1937_v55 }
 0x360   : > { %v2895_v28 = vpop.permute.xlu0 %2894  ;;  %v2001_v29 = vmax.f32 %v1943_v23, 0.0 }
 0x361   : > { %2982 = vst.msk [vmem:[#allocation4 + $0xc8] sm:$0xff] %vm2445_vm0, %v2895_v28  ;;  %2602 = vrot.lane.b32.xlu1 %v6734_v60, %s4836_s22  ;;  %v2000_v58 = vmax.f32 %v1938_v31, 0.0 }
 0x362   : > { %3118 = vst.msk [vmem:[#allocation4 + $0xc8] sm:$0xff] %vm2670_vm2, %v3031_v50  ;;  %3150 = vrot.lane.b32.xlu0 %v6536_v25, %s4837_s23  ;;  %v2136_v25 = vld [vmem:[#allocation2 + $0x1a0] sm:$0xff] }
 0x363   : > { %2077 = vst.msk [vmem:[#allocation2 + $0x1b0] sm:$0xff] %vm2008_vm13, %v2001_v29  ;;  %v3159_v57 = vpop.permute.xlu1 %3158  ;;  %2076 = vst.msk [vmem:[#allocation2 + $0x1a8] sm:$0xff] %vm2008_vm13, %v2000_v58  ;;  %v3361_v60 = vld [vmem:[#allocation4 + $0xa8] sm:$0xff]  ;;  %v2270_v19 = vrot.slane %v2136_v25, 7  ;;  %v3468_v50 = vld [vmem:[%s7801_s3 + $0x100] sm:$0xff] }
 0x364   : > { %3246 = vst.msk [vmem:[#allocation4 + $0xc8] sm:$0xff] %vm2807_vm3, %v3159_v57  ;;  %v2591_v12 = vpop.permute.xlu0 %2590  ;;  %v3362_v7 = vld [vmem:[#allocation4 + $0xb0] sm:$0xff] }
 0x365   : > { %2679 = vst.msk [vmem:[#allocation4 + $0xc0] sm:$0xff] %vm2670_vm2, %v2591_v12  ;;  %3674 = vmatprep.mubr.f32.mxu1 %v3362_v7  ;;  %3170 = vrot.lane.b32.xlu1 %v6833_v35, %s4837_s23 }
 0x366   : > { %3675 = vmatmul.mubr.f32.gmra.mrb[2].mxu1 %v3361_v60  ;;  %2719 = vrot.lane.b32.xlu0 %v6487_v33, %s4837_s23 }
 0x367   : > { %v2897_v48 = vpop.permute.xlu1 %2896 }
 0x368   : > { %2983 = vst.msk [vmem:[#allocation4 + $0xe0] sm:$0xff] %vm2445_vm0, %v2897_v48  ;;  %v2728_v41 = vpop.permute.xlu0 %2727 }
 0x369   : > { %2816 = vst.msk [vmem:[#allocation4 + $0xc0] sm:$0xff] %vm2807_vm3, %v2728_v41  ;;  %2888 = vrot.lane.b32.xlu1 %v6475_v34, %s4833_s26 }
 0x36a   : > { %v7077_v8 = vld [vmem:[#allocation2 + $0x1b0] sm:$0xff]  ;;  %2739 = vrot.lane.b32.xlu0 %v6783_v1, %s4837_s23  ;;  %v7081_v24 = vld [vmem:[#allocation2 + $0x1a8] sm:$0xff] }
 0x36b   : > { %v2273_v33 = vrot.slane %v7077_v8, 7  ;;  %2865 = vst.msk [vmem:[#allocation4 + $0x260] sm:$0xff] %vm2008_vm13, %v7077_v8  ;;  %v2560_v49 = vrot.slane %v7077_v8, 1  ;;  %v2593_v56 = vpop.permute.xlu1 %2592  ;;  %v3365_v36 = vld [vmem:[#allocation4 + $0xc8] sm:$0xff]  ;;  %v2271_v4 = vrot.slane %v7081_v24, 7  ;;  %2864 = vst.msk [vmem:[#allocation4 + $0x248] sm:$0xff] %vm2008_vm13, %v7081_v24 }
 0x36c   : > { %v2559_v34 = vrot.slane %v7081_v24, 1  ;;  %2680 = vst.msk [vmem:[#allocation4 + $0xd8] sm:$0xff] %vm2670_vm2, %v2593_v56  ;;  %3679 = vmatprep.mubr.f32.mxu1 %v3365_v36  ;;  %v3033_v1 = vpop.permute.xlu0 %3032 }
 0x36d   : > { %v7093_v62 = vsel %vm386_vm1, %v2560_v49, %v2562_v45  ;;  %3119 = vst.msk [vmem:[#allocation4 + $0xe0] sm:$0xff] %vm2670_vm2, %v3033_v1  ;;  %3024 = vrot.lane.b32.xlu1 %v6567_v63, %s4836_s22  ;;  %v7099_v11 = vsel %vm2204_vm15, %v2270_v19, %v2271_v4  ;;  %v7102_v23 = vsel %vm2204_vm15, %v2271_v4, %v2273_v33  ;;  %v3469_v63 = vld [vmem:[%s7801_s3 + $0x108] sm:$0xff]  ;;  %v2143_v19 = vld [vmem:[#allocation2 + $0x1d8] sm:$0xff]  ;;  %v2140_v33 = vld [vmem:[#allocation2 + $0x1c0] sm:$0xff] }
 0x36e   : > { %v7105_v55 = vsel %vm386_vm1, %v2559_v34, %v2560_v49  ;;  %3331 = vst.msk [vmem:[#allocation4 + $0x238] sm:$0xff] %vm2008_vm13, %v7093_v62  ;;  %2908 = vrot.lane.b32.xlu0 %v6777_v16, %s4833_s26  ;;  %2343 = vst.msk [vmem:[#allocation4 + $0x270] sm:$0xff] %vm2008_vm13, %v7099_v11  ;;  %v7123_v31 = vpack.c.bf16 %v3469_v63, %v3468_v50  ;;  %v2567_v36 = vrot.slane %v2143_v19, 1  ;;  %v2275_v4 = vrot.slane %v2140_v33, 7 }
 0x36f   : > { %2344 = vst.msk [vmem:[#allocation4 + $0x288] sm:$0xff] %vm2008_vm13, %v7102_v23  ;;  %3330 = vst.msk [vmem:[#allocation4 + $0x220] sm:$0xff] %vm2008_vm13, %v7105_v55  ;;  %v2730_v28 = vpop.permute.xlu1 %2729 }
 0x370   : > { %2817 = vst.msk [vmem:[#allocation4 + $0xd8] sm:$0xff] %vm2807_vm3, %v2730_v28  ;;  %v3161_v29 = vpop.permute.xlu0 %3160  ;;  %v3364_v58 = vld [vmem:[#allocation4 + $0xc0] sm:$0xff]  ;;  %4596 = vmatprep.subr.bf16.mxu0 %v7123_v31 }
 0x371   : > { %3247 = vst.msk [vmem:[#allocation4 + $0xe0] sm:$0xff] %vm2807_vm3, %v3161_v29  ;;  %3680 = vmatmul.mubr.f32.gmra.mrb[4].mxu1 %v3364_v58  ;;  %2584 = vrot.lane.b32.xlu1 %v6393_v21, %s4836_s22 }
 0x372   : > { %v4476_v57 = vpop.f32.mrb[26].mxu0  ;;  %2379 = vrot.lane.b32.xlu0 %v6708_v6, %s4833_s26 }
 0x373   : > { %v1953_v12 = vadd.f32 %v6929_v59, %v4476_v57  ;;  %v1947_v7 = vpop.f32.mrb[27].mxu0  ;;  %v2899_v60 = vpop.permute.xlu1 %2898 }
 0x374   : > { %v1948_v22 = vadd.f32 %v6929_v59, %v1947_v7  ;;  %2984 = vst.msk [vmem:[#allocation4 + $0xf8] sm:$0xff] %vm2445_vm0, %v2899_v60  ;;  %v2879_v25 = vpop.permute.xlu0 %2878  ;;  %v3470_v60 = vld [vmem:[%s7801_s3 + $0x110] sm:$0xff] }
 0x375   : > { %v2003_v48 = vmax.f32 %v1953_v12, 0.0  ;;  %2974 = vst.msk [vmem:[#allocation4 + $0x8] sm:$0xff] %vm2445_vm0, %v2879_v25  ;;  %3152 = vrot.lane.b32.xlu1 %v6528_v47, %s4837_s23 }
 0x376   : > { %v2002_v21 = vmax.f32 %v1948_v22, 0.0  ;;  %3044 = vrot.lane.b32.xlu0 %v6852_v3, %s4836_s22  ;;  %v3471_v22 = vld [vmem:[%s7801_s3 + $0x118] sm:$0xff] }
 0x377   : > { %2079 = vst.msk [vmem:[#allocation2 + $0x1d0] sm:$0xff] %vm2008_vm13, %v2003_v48  ;;  %v2575_v6 = vpop.permute.xlu1 %2574  ;;  %v3367_v47 = vld [vmem:[#allocation4 + $0xd8] sm:$0xff] }
 0x378   : > { %2078 = vst.msk [vmem:[#allocation2 + $0x1c8] sm:$0xff] %vm2008_vm13, %v2002_v21  ;;  %v3015_v41 = vpop.permute.xlu0 %3014  ;;  %v3368_v45 = vld [vmem:[#allocation4 + $0xe0] sm:$0xff] }
 0x379   : > { %2671 = vst.msk [vmem:[#allocation4] sm:$0xff] %vm2670_vm2, %v2575_v6  ;;  %3110 = vst.msk [vmem:[#allocation4 + $0x8] sm:$0xff] %vm2670_vm2, %v3015_v41  ;;  %3684 = vmatprep.mubr.f32.mxu1 %v3368_v45  ;;  %2721 = vrot.lane.b32.xlu1 %v6484_v13, %s4837_s23  ;;  %v4599_v41 = vpack.c.bf16 %v3471_v22, %v3470_v60 }
 0x37a   : > { %3685 = vmatmul.mubr.f32.gmra.mrb[6].mxu1 %v3367_v47  ;;  %2604 = vrot.lane.b32.xlu0 %v6725_v2, %s4836_s22 }
 0x37b   : > { %v3143_v49 = vpop.permute.xlu1 %3142 }
 0x37c   : > { %3238 = vst.msk [vmem:[#allocation4 + $0x8] sm:$0xff] %vm2807_vm3, %v3143_v49  ;;  %v3035_v56 = vpop.permute.xlu0 %3034 }
 0x37d   : > { %3120 = vst.msk [vmem:[#allocation4 + $0xf8] sm:$0xff] %vm2670_vm2, %v3035_v56  ;;  %2741 = vrot.lane.b32.xlu1 %v6786_v14, %s4837_s23 }
 0x37e   : > { %v7152_v34 = vld [vmem:[#allocation2 + $0x1d0] sm:$0xff]  ;;  %3172 = vrot.lane.b32.xlu0 %v6828_v37, %s4837_s23 }
 0x37f   : > { %v7156_v13 = vld [vmem:[#allocation2 + $0x1c8] sm:$0xff]  ;;  %v2278_v2 = vrot.slane %v7152_v34, 7  ;;  %2867 = vst.msk [vmem:[#allocation4 + $0x290] sm:$0xff] %vm2008_vm13, %v7152_v34  ;;  %v2565_v1 = vrot.slane %v7152_v34, 1  ;;  %v2712_v50 = vpop.permute.xlu1 %2711 }
 0x380   : > { %v2276_v63 = vrot.slane %v7156_v13, 7  ;;  %2866 = vst.msk [vmem:[#allocation4 + $0x278] sm:$0xff] %vm2008_vm13, %v7156_v13  ;;  %v2564_v14 = vrot.slane %v7156_v13, 1  ;;  %v2595_v28 = vpop.permute.xlu0 %2594 }
 0x381   : > { %2808 = vst.msk [vmem:[#allocation4] sm:$0xff] %vm2807_vm3, %v2712_v50  ;;  %v7168_v29 = vsel %vm386_vm1, %v2565_v1, %v2567_v36  ;;  %2381 = vrot.lane.b32.xlu1 %v6766_v30, %s4833_s26 }
 0x382   : > { %2681 = vst.msk [vmem:[#allocation4 + $0xf0] sm:$0xff] %vm2670_vm2, %v2595_v28  ;;  %v7174_v58 = vsel %vm2204_vm15, %v2275_v4, %v2276_v63  ;;  %v7177_v57 = vsel %vm2204_vm15, %v2276_v63, %v2278_v2  ;;  %v7180_v12 = vsel %vm386_vm1, %v2564_v14, %v2565_v1  ;;  %2910 = vrot.lane.b32.xlu0 %v6855_v32, %s4833_s26  ;;  %v2144_v2 = vld [vmem:[#allocation2 + $0x1e0] sm:$0xff] }
 0x383   : > { %3333 = vst.msk [vmem:[#allocation4 + $0x268] sm:$0xff] %vm2008_vm13, %v7168_v29  ;;  %2345 = vst.msk [vmem:[#allocation4 + $0x2a0] sm:$0xff] %vm2008_vm13, %v7174_v58  ;;  %v2732_v30 = vpop.permute.xlu1 %2731  ;;  %v3341_v7 = vld [vmem:[#allocation4 + $0x8] sm:$0xff]  ;;  %v2280_v14 = vrot.slane %v2144_v2, 7 }
 0x384   : > { %2346 = vst.msk [vmem:[#allocation4 + $0x2b8] sm:$0xff] %vm2008_vm13, %v7177_v57  ;;  %3332 = vst.msk [vmem:[#allocation4 + $0x250] sm:$0xff] %vm2008_vm13, %v7180_v12  ;;  %3639 = vmatprep.mubr.f32.mxu0 %v3341_v7  ;;  %v3163_v25 = vpop.permute.xlu0 %3162 }
 0x385   : > { %2818 = vst.msk [vmem:[#allocation4 + $0xf0] sm:$0xff] %vm2807_vm3, %v2732_v30  ;;  %3248 = vst.msk [vmem:[#allocation4 + $0xf8] sm:$0xff] %vm2807_vm3, %v3163_v25  ;;  %2606 = vrot.lane.b32.xlu1 %v6789_v17, %s4836_s22 }
 0x386   : > { %v4479_v48 = vpop.f32.mrb[28].mxu0  ;;  %3046 = vrot.lane.b32.xlu0 %v6907_v40, %s4836_s22 }
 0x387   : > { %v1963_v21 = vadd.f32 %v6929_v59, %v4479_v48  ;;  %v1957_v6 = vpop.f32.mrb[29].mxu0  ;;  %v2901_v45 = vpop.permute.xlu1 %2900 }
 0x388   : > { %v3340_v47 = vld [vmem:[#allocation4] sm:$0xff]  ;;  %v1958_v19 = vadd.f32 %v6929_v59, %v1957_v6  ;;  %2985 = vst.msk [vmem:[#allocation4 + $0x110] sm:$0xff] %vm2445_vm0, %v2901_v45  ;;  %v2881_v33 = vpop.permute.xlu0 %2880 }
 0x389   : > { %3640 = vmatmul.mubr.f32.vlgmr.msra.gmra.mrb[32].mxu0 %v3340_v47  ;;  %v2005_v49 = vmax.f32 %v1963_v21, 0.0  ;;  %2975 = vst.msk [vmem:[#allocation4 + $0x20] sm:$0xff] %vm2445_vm0, %v2881_v33  ;;  %2743 = vrot.lane.b32.xlu1 %v6849_v0, %s4837_s23 }
 0x38a   : > { %v2004_v17 = vmax.f32 %v1958_v19, 0.0  ;;  %4598 = vmatpush3.bf16.msra.mxu0 %v7123_v31  ;;  %3174 = vrot.lane.b32.xlu0 %v6891_v18, %s4837_s23  ;;  %v2147_v31 = vld [vmem:[#allocation2 + $0x1f8] sm:$0xff] }
 0x38b   : > { %2081 = vst.msk [vmem:[#allocation2 + $0x1f0] sm:$0xff] %vm2008_vm13, %v2005_v49  ;;  %4600 = vmatprep.subr.bf16.mxu0 %v4599_v41  ;;  %v2577_v56 = vpop.permute.xlu1 %2576  ;;  %v2572_v63 = vrot.slane %v2147_v31, 1 }
 0x38c   : > { %2080 = vst.msk [vmem:[#allocation2 + $0x1e8] sm:$0xff] %vm2008_vm13, %v2004_v17  ;;  %v3017_v36 = vpop.permute.xlu0 %3016  ;;  %v3371_v4 = vld [vmem:[#allocation4 + $0xf8] sm:$0xff]  ;;  %v3370_v0 = vld [vmem:[#allocation4 + $0xf0] sm:$0xff] }
 0x38d   : > { %2672 = vst.msk [vmem:[#allocation4 + $0x18] sm:$0xff] %vm2670_vm2, %v2577_v56  ;;  %3111 = vst.msk [vmem:[#allocation4 + $0x20] sm:$0xff] %vm2670_vm2, %v3017_v36  ;;  %3689 = vmatprep.mubr.f32.mxu1 %v3371_v4  ;;  %2383 = vrot.lane.b32.xlu1 %v6762_v43, %s4833_s26 }
 0x38e   : > { %2912 = vrot.lane.b32.xlu0 %v6844_v20, %s4833_s26  ;;  %3690 = vmatmul.mubr.f32.gmra.mrb[8].mxu1 %v3370_v0 }
 0x38f   : > { %v3145_v1 = vpop.permute.xlu1 %3144  ;;  %4602 = vmatpush3.bf16.msra.mxu0 %v4599_v41 }
 0x390   : > { %3239 = vst.msk [vmem:[#allocation4 + $0x20] sm:$0xff] %vm2807_vm3, %v3145_v1  ;;  %v3037_v50 = vpop.permute.xlu0 %3036  ;;  %v2151_v1 = vld [vmem:[#allocation2 + $0x218] sm:$0xff] }
 0x391   : > { %3121 = vst.msk [vmem:[#allocation4 + $0x110] sm:$0xff] %vm2670_vm2, %v3037_v50  ;;  %2608 = vrot.lane.b32.xlu1 %v6777_v16, %s4836_s22 }
 0x392   : > { %v7225_v43 = vld [vmem:[#allocation2 + $0x1f0] sm:$0xff]  ;;  %3048 = vrot.lane.b32.xlu0 %v6910_v42, %s4836_s22 }
 0x393   : > { %v7229_v28 = vld [vmem:[#allocation2 + $0x1e8] sm:$0xff]  ;;  %v2283_v30 = vrot.slane %v7225_v43, 7  ;;  %2869 = vst.msk [vmem:[#allocation4 + $0x2c0] sm:$0xff] %vm2008_vm13, %v7225_v43  ;;  %v2570_v7 = vrot.slane %v7225_v43, 1  ;;  %v2714_v60 = vpop.permute.xlu1 %2713 }
 0x394   : > { %v2281_v22 = vrot.slane %v7229_v28, 7  ;;  %2868 = vst.msk [vmem:[#allocation4 + $0x2a8] sm:$0xff] %vm2008_vm13, %v7229_v28  ;;  %v2569_v16 = vrot.slane %v7229_v28, 1  ;;  %v2597_v25 = vpop.permute.xlu0 %2596 }
 0x395   : > { %2809 = vst.msk [vmem:[#allocation4 + $0x18] sm:$0xff] %vm2807_vm3, %v2714_v60  ;;  %v7241_v48 = vsel %vm386_vm1, %v2570_v7, %v2572_v63  ;;  %2745 = vrot.lane.b32.xlu1 %v6852_v3, %s4837_s23 }
 0x396   : > { %2682 = vst.msk [vmem:[#allocation4 + $0x108] sm:$0xff] %vm2670_vm2, %v2597_v25  ;;  %v7247_v21 = vsel %vm2204_vm15, %v2280_v14, %v2281_v22  ;;  %v7250_v6 = vsel %vm2204_vm15, %v2281_v22, %v2283_v30  ;;  %v7253_v41 = vsel %vm386_vm1, %v2569_v16, %v2570_v7  ;;  %3176 = vrot.lane.b32.xlu0 %v6887_v54, %s4837_s23  ;;  %v2876_v14 = vrot.slane %v2151_v1, 1 }
 0x397   : > { %3335 = vst.msk [vmem:[#allocation4 + $0x298] sm:$0xff] %vm2008_vm13, %v7241_v48  ;;  %2347 = vst.msk [vmem:[#allocation4 + $0x2d0] sm:$0xff] %vm2008_vm13, %v7247_v21  ;;  %v2734_v3 = vpop.permute.xlu1 %2733  ;;  %v3344_v45 = vld [vmem:[#allocation4 + $0x20] sm:$0xff] }
 0x398   : > { %2348 = vst.msk [vmem:[#allocation4 + $0x2e8] sm:$0xff] %vm2008_vm13, %v7250_v6  ;;  %3334 = vst.msk [vmem:[#allocation4 + $0x280] sm:$0xff] %vm2008_vm13, %v7253_v41  ;;  %v3165_v47 = vpop.permute.xlu0 %3164  ;;  %3644 = vmatprep.mubr.f32.mxu0 %v3344_v45 }
 0x399   : > { %2819 = vst.msk [vmem:[#allocation4 + $0x108] sm:$0xff] %vm2807_vm3, %v2734_v3  ;;  %3249 = vst.msk [vmem:[#allocation4 + $0x110] sm:$0xff] %vm2807_vm3, %v3165_v47  ;;  %2385 = vrot.lane.b32.xlu1 %v6833_v35, %s4833_s26 }
 0x39a   : > { %v4482_v19 = vpop.f32.mrb[30].mxu0  ;;  %2914 = vrot.lane.b32.xlu0 %v6913_v39, %s4833_s26 }
 0x39b   : > { %v1973_v33 = vadd.f32 %v6929_v59, %v4482_v19  ;;  %v1967_v49 = vpop.f32.mrb[31].mxu0  ;;  %v2903_v17 = vpop.permute.xlu1 %2902 }
 0x39c   : > { %v3343_v56 = vld [vmem:[#allocation4 + $0x18] sm:$0xff]  ;;  %v1968_v36 = vadd.f32 %v6929_v59, %v1967_v49  ;;  %2986 = vst.msk [vmem:[#allocation4 + $0x128] sm:$0xff] %vm2445_vm0, %v2903_v17  ;;  %v2883_v4 = vpop.permute.xlu0 %2882 }
 0x39d   : > { %3645 = vmatmul.mubr.f32.gmra.mrb[34].mxu0 %v3343_v56  ;;  %v2007_v0 = vmax.f32 %v1973_v33, 0.0  ;;  %2976 = vst.msk [vmem:[#allocation4 + $0x38] sm:$0xff] %vm2445_vm0, %v2883_v4  ;;  %2610 = vrot.lane.b32.xlu1 %v6855_v32, %s4836_s22  ;;  %v7337_v56 = vld [vmem:[#allocation2 + $0x228] sm:$0xff] }
 0x39e   : > { %v2006_v35 = vmax.f32 %v1968_v36, 0.0  ;;  %3050 = vrot.lane.b32.xlu0 %v6967_v52, %s4836_s22 }
 0x39f   : > { %2083 = vst.msk [vmem:[#allocation2 + $0x210] sm:$0xff] %vm2008_vm13, %v2007_v0  ;;  %v2374_v31 = vpop.permute.xlu1 %2373  ;;  %v3271_v0 = vrot.slane %v7337_v56, 1 }
 0x3a0   : > { %2082 = vst.msk [vmem:[#allocation2 + $0x208] sm:$0xff] %vm2008_vm13, %v2006_v35  ;;  %v3019_v59 = vpop.permute.xlu0 %3018  ;;  %v3374_v2 = vld [vmem:[#allocation4 + $0x110] sm:$0xff]  ;;  %v3373_v32 = vld [vmem:[#allocation4 + $0x108] sm:$0xff]  ;;  %v2155_v35 = vld [vmem:[#allocation2 + $0x238] sm:$0xff] }
 0x3a1   : > { %2458 = vst.msk [vmem:[#allocation4 + $0x120] sm:$0xff] %vm2445_vm0, %v2374_v31  ;;  %2747 = vrot.lane.b32.xlu1 %v6907_v40, %s4837_s23  ;;  %3694 = vmatprep.mubr.f32.mxu1 %v3374_v2  ;;  %v3274_v2 = vrot.slane %v2155_v35, 1 }
 0x3a2   : > { %3112 = vst.msk [vmem:[#allocation4 + $0x38] sm:$0xff] %vm2670_vm2, %v3019_v59  ;;  %3178 = vrot.lane.b32.xlu0 %v6951_v44, %s4837_s23  ;;  %3695 = vmatmul.mubr.f32.gmra.mrb[10].mxu1 %v3373_v32 }
 0x3a3   : > { %v3039_v50 = vpop.permute.xlu1 %3038 }
 0x3a4   : > { %3122 = vst.msk [vmem:[#allocation4 + $0x128] sm:$0xff] %vm2670_vm2, %v3039_v50  ;;  %v2579_v63 = vpop.permute.xlu0 %2578 }
 0x3a5   : > { %2673 = vst.msk [vmem:[#allocation4 + $0x30] sm:$0xff] %vm2670_vm2, %v2579_v63  ;;  %2387 = vrot.lane.b32.xlu1 %v6828_v37, %s4833_s26 }
 0x3a6   : > { %v7291_v30 = vld [vmem:[#allocation2 + $0x210] sm:$0xff]  ;;  %2916 = vrot.lane.b32.xlu0 %v6902_v26, %s4833_s26 }
 0x3a7   : > { %v7295_v40 = vld [vmem:[#allocation2 + $0x208] sm:$0xff]  ;;  %2871 = vst.msk [vmem:[#allocation4 + $0x2f0] sm:$0xff] %vm2008_vm13, %v7291_v30  ;;  %v2874_v7 = vrot.slane %v7291_v30, 1  ;;  %v2599_v60 = vpop.permute.xlu1 %2598 }
 0x3a8   : > { %2870 = vst.msk [vmem:[#allocation4 + $0x2d8] sm:$0xff] %vm2008_vm13, %v7295_v40  ;;  %v2873_v22 = vrot.slane %v7295_v40, 1  ;;  %v3147_v37 = vpop.permute.xlu0 %3146 }
 0x3a9   : > { %2683 = vst.msk [vmem:[#allocation4 + $0x120] sm:$0xff] %vm2670_vm2, %v2599_v60  ;;  %v7305_v16 = vsel %vm386_vm1, %v2874_v7, %v2876_v14  ;;  %2612 = vrot.lane.b32.xlu1 %v6844_v20, %s4836_s22 }
 0x3aa   : > { %3240 = vst.msk [vmem:[#allocation4 + $0x38] sm:$0xff] %vm2807_vm3, %v3147_v37  ;;  %v7311_v25 = vsel %vm386_vm1, %v2873_v22, %v2874_v7  ;;  %3052 = vrot.lane.b32.xlu0 %v6970_v38, %s4836_s22 }
 0x3ab   : > { %3337 = vst.msk [vmem:[#allocation4 + $0x2c8] sm:$0xff] %vm2008_vm13, %v7305_v16  ;;  %3336 = vst.msk [vmem:[#allocation4 + $0x2b0] sm:$0xff] %vm2008_vm13, %v7311_v25  ;;  %v3167_v3 = vpop.permute.xlu1 %3166 }
 0x3ac   : > { %3250 = vst.msk [vmem:[#allocation4 + $0x128] sm:$0xff] %vm2807_vm3, %v3167_v3  ;;  %v2716_v45 = vpop.permute.xlu0 %2715 }
 0x3ad   : > { %2810 = vst.msk [vmem:[#allocation4 + $0x30] sm:$0xff] %vm2807_vm3, %v2716_v45  ;;  %2749 = vrot.lane.b32.xlu1 %v6910_v42, %s4837_s23 }
 0x3ae   : > { %3180 = vrot.lane.b32.xlu0 %v6947_v51, %s4837_s23 }
 0x3af   : > { %v2885_v20 = vpop.permute.xlu1 %2884 }
 0x3b0   : > { %2977 = vst.msk [vmem:[#allocation4 + $0x50] sm:$0xff] %vm2445_vm0, %v2885_v20  ;;  %v2736_v47 = vpop.permute.xlu0 %2735 }
 0x3b1   : > { %v3347_v19 = vld [vmem:[#allocation4 + $0x38] sm:$0xff]  ;;  %2820 = vst.msk [vmem:[#allocation4 + $0x120] sm:$0xff] %vm2807_vm3, %v2736_v47  ;;  %2389 = vrot.lane.b32.xlu1 %v6891_v18, %s4833_s26 }
 0x3b2   : > { %3649 = vmatprep.mubr.f32.mxu0 %v3347_v19  ;;  %2918 = vrot.lane.b32.xlu0 %v6973_v46, %s4833_s26 }
 0x3b3   : > { %v3021_v33 = vpop.permute.xlu1 %3020  ;;  %v3377_v49 = vld [vmem:[#allocation4 + $0x128] sm:$0xff] }
 0x3b4   : > { %3113 = vst.msk [vmem:[#allocation4 + $0x50] sm:$0xff] %vm2670_vm2, %v3021_v33  ;;  %v2905_v42 = vpop.permute.xlu0 %2904  ;;  %3699 = vmatprep.mubr.f32.mxu1 %v3377_v49  ;;  %v3346_v17 = vld [vmem:[#allocation4 + $0x30] sm:$0xff] }
 0x3b5   : > { %2987 = vst.msk [vmem:[#allocation4 + $0x140] sm:$0xff] %vm2445_vm0, %v2905_v42  ;;  %2614 = vrot.lane.b32.xlu1 %v6913_v39, %s4836_s22  ;;  %3650 = vmatmul.mubr.f32.gmra.mrb[36].mxu0 %v3346_v17  ;;  %v7344_v39 = vld [vmem:[#allocation2 + $0x230] sm:$0xff] }
 0x3b6   : > { %3054 = vrot.lane.b32.xlu0 %v7033_v5, %s4836_s22  ;;  %v3272_v31 = vrot.slane %v7344_v39, 1 }
 0x3b7   : > { %v2581_v18 = vpop.permute.xlu1 %2580 }
 0x3b8   : > { %2674 = vst.msk [vmem:[#allocation4 + $0x48] sm:$0xff] %vm2670_vm2, %v2581_v18  ;;  %v2376_v36 = vpop.permute.xlu0 %2375  ;;  %v3376_v4 = vld [vmem:[#allocation4 + $0x120] sm:$0xff]  ;;  %v3273_v1 = vsel %vm386_vm1, %v3271_v0, %v3272_v31 }
 0x3b9   : > { %2459 = vst.msk [vmem:[#allocation4 + $0x138] sm:$0xff] %vm2445_vm0, %v2376_v36  ;;  %2751 = vrot.lane.b32.xlu1 %v6967_v52, %s4837_s23  ;;  %3700 = vmatmul.mubr.f32.gmra.mrb[12].mxu1 %v3376_v4  ;;  %v3275_v52 = vsel %vm386_vm1, %v3272_v31, %v3274_v2 }
 0x3ba   : > { %3182 = vrot.lane.b32.xlu0 %v7015_v9, %s4837_s23  ;;  %3338 = vst.msk [vmem:[#allocation4 + $0x2e0] sm:$0xff] %vm2008_vm13, %v3273_v1  ;;  %3339 = vst.msk [vmem:[#allocation4 + $0x2f8] sm:$0xff] %vm2008_vm13, %v3275_v52  ;;  %v3342_v1 = vld [vmem:[#allocation4 + $0x10] sm:$0xff]  ;;  %v3345_v52 = vld [vmem:[#allocation4 + $0x28] sm:$0xff] }
 0x3bb   : > { %v3149_v59 = vpop.permute.xlu1 %3148 }
 0x3bc   : > { %3241 = vst.msk [vmem:[#allocation4 + $0x50] sm:$0xff] %vm2807_vm3, %v3149_v59  ;;  %v3041_v32 = vpop.permute.xlu0 %3040 }
 0x3bd   : > { %3123 = vst.msk [vmem:[#allocation4 + $0x140] sm:$0xff] %vm2670_vm2, %v3041_v32  ;;  %2391 = vrot.lane.b32.xlu1 %v6887_v54, %s4833_s26 }
 0x3be   : > { %2920 = vrot.lane.b32.xlu0 %v6962_v10, %s4833_s26 }
 0x3bf   : > { %v2718_v50 = vpop.permute.xlu1 %2717 }
 0x3c0   : > { %2811 = vst.msk [vmem:[#allocation4 + $0x48] sm:$0xff] %vm2807_vm3, %v2718_v50  ;;  %v2601_v63 = vpop.permute.xlu0 %2600 }
 0x3c1   : > { %2684 = vst.msk [vmem:[#allocation4 + $0x138] sm:$0xff] %vm2670_vm2, %v2601_v63  ;;  %2616 = vrot.lane.b32.xlu1 %v6902_v26, %s4836_s22 }
 0x3c2   : > { %3056 = vrot.lane.b32.xlu0 %v7036_v53, %s4836_s22 }
 0x3c3   : > { %v2738_v54 = vpop.permute.xlu1 %2737  ;;  %v3350_v14 = vld [vmem:[#allocation4 + $0x50] sm:$0xff] }
 0x3c4   : > { %2821 = vst.msk [vmem:[#allocation4 + $0x138] sm:$0xff] %vm2807_vm3, %v2738_v54  ;;  %v3169_v7 = vpop.permute.xlu0 %3168  ;;  %3654 = vmatprep.mubr.f32.mxu0 %v3350_v14 }
 0x3c5   : > { %3251 = vst.msk [vmem:[#allocation4 + $0x140] sm:$0xff] %vm2807_vm3, %v3169_v7  ;;  %2753 = vrot.lane.b32.xlu1 %v6970_v38, %s4837_s23  ;;  %v3351_v7 = vld [vmem:[#allocation4 + $0x58] sm:$0xff] }
 0x3c6   : > { %3184 = vrot.lane.b32.xlu0 %v7011_v15, %s4837_s23 }
 0x3c7   : > { %v2907_v60 = vpop.permute.xlu1 %2906  ;;  %v3349_v22 = vld [vmem:[#allocation4 + $0x48] sm:$0xff] }
 0x3c8   : > { %2988 = vst.msk [vmem:[#allocation4 + $0x158] sm:$0xff] %vm2445_vm0, %v2907_v60  ;;  %v2887_v26 = vpop.permute.xlu0 %2886  ;;  %3655 = vmatmul.mubr.f32.gmra.mrb[38].mxu0 %v3349_v22  ;;  %v3354_v22 = vld [vmem:[#allocation4 + $0x70] sm:$0xff] }
 0x3c9   : > { %2978 = vst.msk [vmem:[#allocation4 + $0x68] sm:$0xff] %vm2445_vm0, %v2887_v26  ;;  %2393 = vrot.lane.b32.xlu1 %v6951_v44, %s4833_s26  ;;  %v3357_v26 = vld [vmem:[#allocation4 + $0x88] sm:$0xff] }
 0x3ca   : > { %2922 = vrot.lane.b32.xlu0 %v7039_v61, %s4833_s26 }
 0x3cb   : > { %v2378_v37 = vpop.permute.xlu1 %2377  ;;  %v3379_v45 = vld [vmem:[#allocation4 + $0x138] sm:$0xff] }
 0x3cc   : > { %2460 = vst.msk [vmem:[#allocation4 + $0x150] sm:$0xff] %vm2445_vm0, %v2378_v37  ;;  %v3023_v38 = vpop.permute.xlu0 %3022  ;;  %v3380_v3 = vld [vmem:[#allocation4 + $0x140] sm:$0xff] }
 0x3cd   : > { %3114 = vst.msk [vmem:[#allocation4 + $0x68] sm:$0xff] %vm2670_vm2, %v3023_v38  ;;  %2618 = vrot.lane.b32.xlu1 %v6973_v46, %s4836_s22  ;;  %3704 = vmatprep.mubr.f32.mxu1 %v3380_v3  ;;  %v3360_v38 = vld [vmem:[#allocation4 + $0xa0] sm:$0xff]  ;;  %v3363_v3 = vld [vmem:[#allocation4 + $0xb8] sm:$0xff] }
 0x3ce   : > { %3058 = vrot.lane.b32.xlu0 %v7099_v11, %s4836_s22  ;;  %3705 = vmatmul.mubr.f32.gmra.mrb[14].mxu1 %v3379_v45 }
 0x3cf   : > { %v3043_v44 = vpop.permute.xlu1 %3042 }
 0x3d0   : > { %3124 = vst.msk [vmem:[#allocation4 + $0x158] sm:$0xff] %vm2670_vm2, %v3043_v44  ;;  %v2583_v20 = vpop.permute.xlu0 %2582 }
 0x3d1   : > { %2675 = vst.msk [vmem:[#allocation4 + $0x60] sm:$0xff] %vm2670_vm2, %v2583_v20  ;;  %2755 = vrot.lane.b32.xlu1 %v7033_v5, %s4837_s23 }
 0x3d2   : > { %3186 = vrot.lane.b32.xlu0 %v7081_v24, %s4837_s23 }
 0x3d3   : > { %v2603_v47 = vpop.permute.xlu1 %2602 }
 0x3d4   : > { %2685 = vst.msk [vmem:[#allocation4 + $0x150] sm:$0xff] %vm2670_vm2, %v2603_v47  ;;  %v3151_v46 = vpop.permute.xlu0 %3150 }
 0x3d5   : > { %3242 = vst.msk [vmem:[#allocation4 + $0x68] sm:$0xff] %vm2807_vm3, %v3151_v46  ;;  %2395 = vrot.lane.b32.xlu1 %v6947_v51, %s4833_s26  ;;  %v3369_v46 = vld [vmem:[#allocation4 + $0xe8] sm:$0xff] }
 0x3d6   : > { %2924 = vrot.lane.b32.xlu0 %v7027_v27, %s4833_s26 }
 0x3d7   : > { %v3171_v19 = vpop.permute.xlu1 %3170 }
 0x3d8   : > { %3252 = vst.msk [vmem:[#allocation4 + $0x158] sm:$0xff] %vm2807_vm3, %v3171_v19  ;;  %v2720_v33 = vpop.permute.xlu0 %2719 }
 0x3d9   : > { %2812 = vst.msk [vmem:[#allocation4 + $0x60] sm:$0xff] %vm2807_vm3, %v2720_v33  ;;  %2620 = vrot.lane.b32.xlu1 %v6962_v10, %s4836_s22  ;;  %v3372_v33 = vld [vmem:[#allocation4 + $0x100] sm:$0xff] }
 0x3da   : > { %3060 = vrot.lane.b32.xlu0 %v7102_v23, %s4836_s22 }
 0x3db   : > { %v2889_v5 = vpop.permute.xlu1 %2888 }
 0x3dc   : > { %2979 = vst.msk [vmem:[#allocation4 + $0x80] sm:$0xff] %vm2445_vm0, %v2889_v5  ;;  %v2740_v49 = vpop.permute.xlu0 %2739  ;;  %v3353_v51 = vld [vmem:[#allocation4 + $0x68] sm:$0xff]  ;;  %v3375_v5 = vld [vmem:[#allocation4 + $0x118] sm:$0xff] }
 0x3dd   : > { %2822 = vst.msk [vmem:[#allocation4 + $0x150] sm:$0xff] %vm2807_vm3, %v2740_v49  ;;  %2757 = vrot.lane.b32.xlu1 %v7036_v53, %s4837_s23  ;;  %3659 = vmatprep.mubr.f32.mxu0 %v3353_v51  ;;  %v3378_v51 = vld [vmem:[#allocation4 + $0x130] sm:$0xff] }
 0x3de   : > { %3188 = vrot.lane.b32.xlu0 %v7077_v8, %s4837_s23 }
 0x3df   : > { %v3025_v42 = vpop.permute.xlu1 %3024  ;;  %v3383_v17 = vld [vmem:[#allocation4 + $0x158] sm:$0xff] }
 0x3e0   : > { %3115 = vst.msk [vmem:[#allocation4 + $0x80] sm:$0xff] %vm2670_vm2, %v3025_v42  ;;  %v2909_v10 = vpop.permute.xlu0 %2908  ;;  %3709 = vmatprep.mubr.f32.mxu1 %v3383_v17  ;;  %v3352_v18 = vld [vmem:[#allocation4 + $0x60] sm:$0xff]  ;;  %v3381_v17 = vld [vmem:[#allocation4 + $0x148] sm:$0xff] }
 0x3e1   : > { %2989 = vst.msk [vmem:[#allocation4 + $0x170] sm:$0xff] %vm2445_vm0, %v2909_v10  ;;  %2397 = vrot.lane.b32.xlu1 %v7015_v9, %s4833_s26  ;;  %3660 = vmatmul.mubr.f32.gmra.mrb[40].mxu0 %v3352_v18  ;;  %v2148_v42 = vld [vmem:[#allocation2 + $0x200] sm:$0xff]  ;;  %v2707_v18 = vrot.slane %v7295_v40, 7 }
 0x3e2   : > { %2926 = vrot.lane.b32.xlu0 %v7105_v55, %s4833_s26  ;;  %v2706_v10 = vrot.slane %v2148_v42, 7 }
 0x3e3   : > { %v2585_v53 = vpop.permute.xlu1 %2584 }
 0x3e4   : > { %2676 = vst.msk [vmem:[#allocation4 + $0x78] sm:$0xff] %vm2670_vm2, %v2585_v53  ;;  %v2380_v36 = vpop.permute.xlu0 %2379  ;;  %v3382_v4 = vld [vmem:[#allocation4 + $0x150] sm:$0xff] }
 0x3e5   : > { %2461 = vst.msk [vmem:[#allocation4 + $0x168] sm:$0xff] %vm2445_vm0, %v2380_v36  ;;  %2622 = vrot.lane.b32.xlu1 %v7039_v61, %s4836_s22  ;;  %3710 = vmatmul.mubr.f32.gmra.mrb[16].mxu1 %v3382_v4 }
 0x3e6   : > { %3062 = vrot.lane.b32.xlu0 %v7174_v58, %s4836_s22 }
 0x3e7   : > { %v3153_v0 = vpop.permute.xlu1 %3152 }
 0x3e8   : > { %3243 = vst.msk [vmem:[#allocation4 + $0x80] sm:$0xff] %vm2807_vm3, %v3153_v0  ;;  %v3045_v9 = vpop.permute.xlu0 %3044 }
 0x3e9   : > { %3125 = vst.msk [vmem:[#allocation4 + $0x170] sm:$0xff] %vm2670_vm2, %v3045_v9  ;;  %2759 = vrot.lane.b32.xlu1 %v7099_v11, %s4837_s23  ;;  %v3387_v9 = vld [vmem:[#allocation4 + $0x178] sm:$0xff] }
 0x3ea   : > { %3190 = vrot.lane.b32.xlu0 %v7156_v13, %s4837_s23 }
 0x3eb   : > { %v2722_v35 = vpop.permute.xlu1 %2721 }
 0x3ec   : > { %2813 = vst.msk [vmem:[#allocation4 + $0x78] sm:$0xff] %vm2807_vm3, %v2722_v35  ;;  %v2605_v61 = vpop.permute.xlu0 %2604  ;;  %v7502_v35 = vsel %vm2204_vm15, %v2706_v10, %v2707_v18 }
 0x3ed   : > { %2686 = vst.msk [vmem:[#allocation4 + $0x168] sm:$0xff] %vm2670_vm2, %v2605_v61  ;;  %2399 = vrot.lane.b32.xlu1 %v7011_v15, %s4833_s26 }
 0x3ee   : > { %2928 = vrot.lane.b32.xlu0 %v7093_v62, %s4833_s26 }
 0x3ef   : > { %v2742_v31 = vpop.permute.xlu1 %2741  ;;  %v3356_v59 = vld [vmem:[#allocation4 + $0x80] sm:$0xff] }
 0x3f0   : > { %2823 = vst.msk [vmem:[#allocation4 + $0x168] sm:$0xff] %vm2807_vm3, %v2742_v31  ;;  %v3173_v11 = vpop.permute.xlu0 %3172  ;;  %3664 = vmatprep.mubr.f32.mxu0 %v3356_v59  ;;  %v3393_v59 = vld [vmem:[#allocation4 + $0x1a8] sm:$0xff] }
 0x3f1   : > { %3253 = vst.msk [vmem:[#allocation4 + $0x170] sm:$0xff] %vm2807_vm3, %v3173_v11  ;;  %2624 = vrot.lane.b32.xlu1 %v7027_v27, %s4836_s22 }
 0x3f2   : > { %3064 = vrot.lane.b32.xlu0 %v7177_v57, %s4836_s22 }
 0x3f3   : > { %v2382_v2 = vpop.permute.xlu1 %2381  ;;  %v3355_v32 = vld [vmem:[#allocation4 + $0x78] sm:$0xff] }
 0x3f4   : > { %2462 = vst.msk [vmem:[#allocation4 + $0x180] sm:$0xff] %vm2445_vm0, %v2382_v2  ;;  %v2911_v15 = vpop.permute.xlu0 %2910  ;;  %3665 = vmatmul.mubr.f32.gmra.mrb[42].mxu0 %v3355_v32  ;;  %v3396_v2 = vld [vmem:[#allocation4 + $0x1c0] sm:$0xff]  ;;  %v3399_v32 = vld [vmem:[#allocation4 + $0x1d8] sm:$0xff] }
 0x3f5   : > { %2990 = vst.msk [vmem:[#allocation4 + $0x188] sm:$0xff] %vm2445_vm0, %v2911_v15  ;;  %2761 = vrot.lane.b32.xlu1 %v7102_v23, %s4837_s23  ;;  %4491 = vmatprep.mubr.msk.f32.mxu0 %vm2008_vm13, %v3342_v1  ;;  %v3348_v23 = vld [vmem:[#allocation4 + $0x40] sm:$0xff] }
 0x3f6   : > { %3192 = vrot.lane.b32.xlu0 %v7152_v34, %s4837_s23 }
 0x3f7   : > { %v2607_v27 = vpop.permute.xlu1 %2606  ;;  %v3385_v54 = vld [vmem:[#allocation4 + $0x168] sm:$0xff] }
 0x3f8   : > { %2687 = vst.msk [vmem:[#allocation4 + $0x180] sm:$0xff] %vm2670_vm2, %v2607_v27  ;;  %v3047_v50 = vpop.permute.xlu0 %3046  ;;  %4492 = vmatmul.mubr.msk.f32.vlgmr.msra.gmra.mrb[44].mxu0 %vm2008_vm13, %v3345_v52  ;;  %v3386_v63 = vld [vmem:[#allocation4 + $0x170] sm:$0xff]  ;;  %v2709_v27 = vrot.slane %v7291_v30, 7 }
 0x3f9   : > { %3126 = vst.msk [vmem:[#allocation4 + $0x188] sm:$0xff] %vm2670_vm2, %v3047_v50  ;;  %2401 = vrot.lane.b32.xlu1 %v7081_v24, %s4833_s26  ;;  %3714 = vmatprep.mubr.f32.mxu1 %v3386_v63  ;;  %v3405_v50 = vld [vmem:[#allocation4 + $0x208] sm:$0xff] }
 0x3fa   : > { %4494 = vmatprep.mubr.msk.f32.mxu0 %vm2008_vm13, %v3348_v23  ;;  %2930 = vrot.lane.b32.xlu0 %v7180_v12, %s4833_s26  ;;  %v3408_v23 = vld [vmem:[#allocation4 + $0x220] sm:$0xff] }
 0x3fb   : > { %3715 = vmatmul.mubr.f32.gmra.mrb[18].mxu1 %v3385_v54  ;;  %v2744_v14 = vpop.permute.xlu1 %2743 }
 0x3fc   : > { %2824 = vst.msk [vmem:[#allocation4 + $0x180] sm:$0xff] %vm2807_vm3, %v2744_v14  ;;  %v3175_v60 = vpop.permute.xlu0 %3174  ;;  %4495 = vmatmul.mubr.msk.f32.gmra.mrb[46].mxu0 %vm2008_vm13, %v3351_v7  ;;  %v3411_v14 = vld [vmem:[#allocation4 + $0x238] sm:$0xff] }
 0x3fd   : > { %3254 = vst.msk [vmem:[#allocation4 + $0x188] sm:$0xff] %vm2807_vm3, %v3175_v60  ;;  %2626 = vrot.lane.b32.xlu1 %v7105_v55, %s4836_s22  ;;  %4497 = vmatprep.mubr.msk.f32.mxu0 %vm2008_vm13, %v3354_v22  ;;  %v3414_v60 = vld [vmem:[#allocation4 + $0x250] sm:$0xff]  ;;  %v2152_v22 = vld [vmem:[#allocation2 + $0x220] sm:$0xff] }
 0x3fe   : > { %3066 = vrot.lane.b32.xlu0 %v7247_v21, %s4836_s22 }
 0x3ff   : > { %v2384_v24 = vpop.permute.xlu1 %2383 }
 0x400   : > { %2463 = vst.msk [vmem:[#allocation4 + $0x198] sm:$0xff] %vm2445_vm0, %v2384_v24  ;;  %v2913_v37 = vpop.permute.xlu0 %2912  ;;  %4498 = vmatmul.mubr.msk.f32.gmra.mrb[48].mxu0 %vm2008_vm13, %v3357_v26  ;;  %v3417_v24 = vld [vmem:[#allocation4 + $0x268] sm:$0xff]  ;;  %v3009_v26 = vrot.slane %v2152_v22, 7 }
 0x401   : > { %2991 = vst.msk [vmem:[#allocation4 + $0x1a0] sm:$0xff] %vm2445_vm0, %v2913_v37  ;;  %2763 = vrot.lane.b32.xlu1 %v7174_v58, %s4837_s23  ;;  %4500 = vmatprep.mubr.msk.f32.mxu0 %vm2008_vm13, %v3360_v38  ;;  %v3366_v58 = vld [vmem:[#allocation4 + $0xd0] sm:$0xff]  ;;  %v3010_v37 = vrot.slane %v7337_v56, 7 }
 0x402   : > { %3194 = vrot.lane.b32.xlu0 %v7229_v28, %s4837_s23 }
 0x403   : > { %v2609_v55 = vpop.permute.xlu1 %2608  ;;  %v3388_v20 = vld [vmem:[#allocation4 + $0x180] sm:$0xff] }
 0x404   : > { %2688 = vst.msk [vmem:[#allocation4 + $0x198] sm:$0xff] %vm2670_vm2, %v2609_v55  ;;  %v3049_v45 = vpop.permute.xlu0 %3048  ;;  %4501 = vmatmul.mubr.msk.f32.gmra.mrb[50].mxu0 %vm2008_vm13, %v3363_v3  ;;  %v3389_v44 = vld [vmem:[#allocation4 + $0x188] sm:$0xff] }
 0x405   : > { %3127 = vst.msk [vmem:[#allocation4 + $0x1a0] sm:$0xff] %vm2670_vm2, %v3049_v45  ;;  %2403 = vrot.lane.b32.xlu1 %v7077_v8, %s4833_s26  ;;  %3719 = vmatprep.mubr.f32.mxu1 %v3389_v44  ;;  %v3423_v45 = vld [vmem:[#allocation4 + $0x298] sm:$0xff]  ;;  %v3011_v44 = vsel %vm2204_vm15, %v3009_v26, %v3010_v37 }
 0x406   : > { %4503 = vmatprep.mubr.msk.f32.mxu0 %vm2008_vm13, %v3366_v58  ;;  %2932 = vrot.lane.b32.xlu0 %v7168_v29, %s4833_s26 }
 0x407   : > { %3720 = vmatmul.mubr.f32.gmra.mrb[20].mxu1 %v3388_v20  ;;  %v2746_v47 = vpop.permute.xlu1 %2745  ;;  %v3426_v20 = vld [vmem:[#allocation4 + $0x2b0] sm:$0xff] }
 0x408   : > { %2825 = vst.msk [vmem:[#allocation4 + $0x198] sm:$0xff] %vm2807_vm3, %v2746_v47  ;;  %v3177_v19 = vpop.permute.xlu0 %3176  ;;  %4504 = vmatmul.mubr.msk.f32.gmra.mrb[52].mxu0 %vm2008_vm13, %v3369_v46  ;;  %v3429_v47 = vld [vmem:[#allocation4 + $0x2c8] sm:$0xff] }
 0x409   : > { %3255 = vst.msk [vmem:[#allocation4 + $0x1a0] sm:$0xff] %vm2807_vm3, %v3177_v19  ;;  %2628 = vrot.lane.b32.xlu1 %v7093_v62, %s4836_s22  ;;  %4506 = vmatprep.mubr.msk.f32.mxu0 %vm2008_vm13, %v3372_v33 }
 0x40a   : > { %3068 = vrot.lane.b32.xlu0 %v7250_v6, %s4836_s22 }
 0x40b   : > { %v2386_v8 = vpop.permute.xlu1 %2385 }
 0x40c   : > { %2464 = vst.msk [vmem:[#allocation4 + $0x1b0] sm:$0xff] %vm2445_vm0, %v2386_v8  ;;  %v2915_v49 = vpop.permute.xlu0 %2914  ;;  %4507 = vmatmul.mubr.msk.f32.gmra.mrb[54].mxu0 %vm2008_vm13, %v3375_v5  ;;  %v3012_v5 = vrot.slane %v7344_v39, 7 }
 0x40d   : > { %2992 = vst.msk [vmem:[#allocation4 + $0x1b8] sm:$0xff] %vm2445_vm0, %v2915_v49  ;;  %2765 = vrot.lane.b32.xlu1 %v7177_v57, %s4837_s23  ;;  %4509 = vmatprep.mubr.msk.f32.mxu0 %vm2008_vm13, %v3378_v51  ;;  %v3384_v57 = vld [vmem:[#allocation4 + $0x160] sm:$0xff] }
 0x40e   : > { %3196 = vrot.lane.b32.xlu0 %v7225_v43, %s4837_s23 }
 0x40f   : > { %v2611_v62 = vpop.permute.xlu1 %2610  ;;  %v3391_v4 = vld [vmem:[#allocation4 + $0x198] sm:$0xff] }
 0x410   : > { %2689 = vst.msk [vmem:[#allocation4 + $0x1b0] sm:$0xff] %vm2670_vm2, %v2611_v62  ;;  %v3051_v53 = vpop.permute.xlu0 %3050  ;;  %4510 = vmatmul.mubr.msk.f32.gmra.mrb[56].mxu0 %vm2008_vm13, %v3381_v17  ;;  %v3392_v36 = vld [vmem:[#allocation4 + $0x1a0] sm:$0xff]  ;;  %v3013_v62 = vsel %vm2204_vm15, %v3010_v37, %v3012_v5 }
 0x411   : > { %3128 = vst.msk [vmem:[#allocation4 + $0x1b8] sm:$0xff] %vm2670_vm2, %v3051_v53  ;;  %2405 = vrot.lane.b32.xlu1 %v7156_v13, %s4833_s26  ;;  %3724 = vmatprep.mubr.f32.mxu1 %v3392_v36  ;;  %v3390_v13 = vld [vmem:[#allocation4 + $0x190] sm:$0xff] }
 0x412   : > { %4512 = vmatprep.mubr.msk.f32.mxu0 %vm2008_vm13, %v3384_v57  ;;  %2934 = vrot.lane.b32.xlu0 %v7253_v41, %s4833_s26 }
 0x413   : > { %3725 = vmatmul.mubr.f32.gmra.mrb[22].mxu1 %v3391_v4  ;;  %v2748_v0 = vpop.permute.xlu1 %2747 }
 0x414   : > { %2826 = vst.msk [vmem:[#allocation4 + $0x1b0] sm:$0xff] %vm2807_vm3, %v2748_v0  ;;  %v3179_v61 = vpop.permute.xlu0 %3178  ;;  %4513 = vmatmul.mubr.msk.f32.gmra.mrb[58].mxu0 %vm2008_vm13, %v3387_v9 }
 0x415   : > { %3256 = vst.msk [vmem:[#allocation4 + $0x1b8] sm:$0xff] %vm2807_vm3, %v3179_v61  ;;  %2630 = vrot.lane.b32.xlu1 %v7180_v12, %s4836_s22  ;;  %4515 = vmatprep.mubr.msk.f32.mxu0 %vm2008_vm13, %v3390_v13 }
 0x416   : > { %3070 = vrot.lane.b32.xlu0 %v7502_v35, %s4836_s22 }
 0x417   : > { %v2388_v31 = vpop.permute.xlu1 %2387 }
 0x418   : > { %2465 = vst.msk [vmem:[#allocation4 + $0x1c8] sm:$0xff] %vm2445_vm0, %v2388_v31  ;;  %v2917_v11 = vpop.permute.xlu0 %2916  ;;  %4516 = vmatmul.mubr.msk.f32.gmra.mrb[60].mxu0 %vm2008_vm13, %v3393_v59 }
 0x419   : > { %2993 = vst.msk [vmem:[#allocation4 + $0x1d0] sm:$0xff] %vm2445_vm0, %v2917_v11  ;;  %2767 = vrot.lane.b32.xlu1 %v7247_v21, %s4837_s23  ;;  %4518 = vmatprep.mubr.msk.f32.mxu0 %vm2008_vm13, %v3396_v2  ;;  %v3402_v21 = vld [vmem:[#allocation4 + $0x1f0] sm:$0xff] }
 0x41a   : > { %3198 = vrot.lane.b32.xlu0 %v7295_v40, %s4837_s23 }
 0x41b   : > { %v2613_v12 = vpop.permute.xlu1 %2612  ;;  %v3394_v40 = vld [vmem:[#allocation4 + $0x1b0] sm:$0xff] }
 0x41c   : > { %2690 = vst.msk [vmem:[#allocation4 + $0x1c8] sm:$0xff] %vm2670_vm2, %v2613_v12  ;;  %v3053_v15 = vpop.permute.xlu0 %3052  ;;  %4519 = vmatmul.mubr.msk.f32.gmra.mrb[62].mxu0 %vm2008_vm13, %v3399_v32  ;;  %v3395_v1 = vld [vmem:[#allocation4 + $0x1b8] sm:$0xff] }
 0x41d   : > { %3129 = vst.msk [vmem:[#allocation4 + $0x1d0] sm:$0xff] %vm2670_vm2, %v3053_v15  ;;  %2407 = vrot.lane.b32.xlu1 %v7152_v34, %s4833_s26  ;;  %3729 = vmatprep.mubr.f32.mxu1 %v3395_v1  ;;  %v7536_v34 = vsel %vm2204_vm15, %v2707_v18, %v2709_v27 }
 0x41e   : > { %4521 = vmatprep.mubr.msk.f32.mxu0 %vm2008_vm13, %v3402_v21  ;;  %2936 = vrot.lane.b32.xlu0 %v7241_v48, %s4833_s26 }
 0x41f   : > { %3730 = vmatmul.mubr.f32.gmra.mrb[24].mxu1 %v3394_v40  ;;  %v2750_v52 = vpop.permute.xlu1 %2749 }
 0x420   : > { %2827 = vst.msk [vmem:[#allocation4 + $0x1c8] sm:$0xff] %vm2807_vm3, %v2750_v52  ;;  %v3181_v63 = vpop.permute.xlu0 %3180  ;;  %4522 = vmatmul.mubr.msk.f32.gmra.mrb[64].mxu0 %vm2008_vm13, %v3405_v50 }
 0x421   : > { %3257 = vst.msk [vmem:[#allocation4 + $0x1d0] sm:$0xff] %vm2807_vm3, %v3181_v63  ;;  %2632 = vrot.lane.b32.xlu1 %v7168_v29, %s4836_s22  ;;  %4524 = vmatprep.mubr.msk.f32.mxu0 %vm2008_vm13, %v3408_v23 }
 0x422   : > { %3072 = vrot.lane.b32.xlu0 %v7536_v34, %s4836_s22 }
 0x423   : > { %v2390_v54 = vpop.permute.xlu1 %2389 }
 0x424   : > { %2466 = vst.msk [vmem:[#allocation4 + $0x1e0] sm:$0xff] %vm2445_vm0, %v2390_v54  ;;  %v2919_v7 = vpop.permute.xlu0 %2918  ;;  %4525 = vmatmul.mubr.msk.f32.gmra.mrb[66].mxu0 %vm2008_vm13, %v3411_v14 }
 0x425   : > { %2994 = vst.msk [vmem:[#allocation4 + $0x1e8] sm:$0xff] %vm2445_vm0, %v2919_v7  ;;  %2769 = vrot.lane.b32.xlu1 %v7250_v6, %s4837_s23  ;;  %4527 = vmatprep.mubr.msk.f32.mxu0 %vm2008_vm13, %v3414_v60  ;;  %v3420_v6 = vld [vmem:[#allocation4 + $0x280] sm:$0xff] }
 0x426   : > { %3200 = vrot.lane.b32.xlu0 %v7291_v30, %s4837_s23 }
 0x427   : > { %v2615_v29 = vpop.permute.xlu1 %2614  ;;  %v3397_v30 = vld [vmem:[#allocation4 + $0x1c8] sm:$0xff] }
 0x428   : > { %2691 = vst.msk [vmem:[#allocation4 + $0x1e0] sm:$0xff] %vm2670_vm2, %v2615_v29  ;;  %v3055_v38 = vpop.permute.xlu0 %3054  ;;  %4528 = vmatmul.mubr.msk.f32.gmra.mrb[68].mxu0 %vm2008_vm13, %v3417_v24  ;;  %v3398_v55 = vld [vmem:[#allocation4 + $0x1d0] sm:$0xff] }
 0x429   : > { %3130 = vst.msk [vmem:[#allocation4 + $0x1e8] sm:$0xff] %vm2670_vm2, %v3055_v38  ;;  %2409 = vrot.lane.b32.xlu1 %v7229_v28, %s4833_s26  ;;  %3734 = vmatprep.mubr.f32.mxu1 %v3398_v55  ;;  %v3432_v28 = vld [vmem:[#allocation4 + $0x2e0] sm:$0xff] }
 0x42a   : > { %4530 = vmatprep.mubr.msk.f32.mxu0 %vm2008_vm13, %v3420_v6  ;;  %2938 = vrot.lane.b32.xlu0 %v7311_v25, %s4833_s26 }
 0x42b   : > { %3735 = vmatmul.mubr.f32.gmra.mrb[26].mxu1 %v3397_v30  ;;  %v2752_v3 = vpop.permute.xlu1 %2751 }
 0x42c   : > { %2828 = vst.msk [vmem:[#allocation4 + $0x1e0] sm:$0xff] %vm2807_vm3, %v2752_v3  ;;  %v3183_v58 = vpop.permute.xlu0 %3182  ;;  %4531 = vmatmul.mubr.msk.f32.gmra.mrb[70].mxu0 %vm2008_vm13, %v3423_v45 }
 0x42d   : > { %3258 = vst.msk [vmem:[#allocation4 + $0x1e8] sm:$0xff] %vm2807_vm3, %v3183_v58  ;;  %2634 = vrot.lane.b32.xlu1 %v7253_v41, %s4836_s22  ;;  %4533 = vmatprep.mubr.msk.f32.mxu0 %vm2008_vm13, %v3426_v20  ;;  %v3435_v41 = vld [vmem:[#allocation4 + $0x2f8] sm:$0xff] }
 0x42e   : > { %3074 = vrot.lane.b32.xlu0 %v3011_v44, %s4836_s22 }
 0x42f   : > { %v2392_v25 = vpop.permute.xlu1 %2391 }
 0x430   : > { %2467 = vst.msk [vmem:[#allocation4 + $0x1f8] sm:$0xff] %vm2445_vm0, %v2392_v25  ;;  %v7566_v46 = vpop.f32.mrb[0].mxu1  ;;  %v2921_v19 = vpop.permute.xlu0 %2920  ;;  %4534 = vmatmul.mubr.msk.f32.gmra.mrb[72].mxu0 %vm2008_vm13, %v3429_v47 }
 0x431   : > { %2995 = vst.msk [vmem:[#allocation4 + $0x200] sm:$0xff] %vm2445_vm0, %v2921_v19  ;;  %v3673_v33 = vpop.f32.mrb[1].mxu1  ;;  %2771 = vrot.lane.b32.xlu1 %v7502_v35, %s4837_s23  ;;  %4536 = vmatprep.mubr.msk.f32.mxu0 %vm2008_vm13, %v3432_v28 }
 0x432   : > { %3202 = vrot.lane.b32.xlu0 %v7337_v56, %s4837_s23 }
 0x433   : > { %v2617_v8 = vpop.permute.xlu1 %2616  ;;  %v3400_v42 = vld [vmem:[#allocation4 + $0x1e0] sm:$0xff] }
 0x434   : > { %2692 = vst.msk [vmem:[#allocation4 + $0x1f8] sm:$0xff] %vm2670_vm2, %v2617_v8  ;;  %v3057_v49 = vpop.permute.xlu0 %3056  ;;  %v3401_v51 = vld [vmem:[#allocation4 + $0x1e8] sm:$0xff]  ;;  %4537 = vmatmul.mubr.msk.f32.gmra.mrb[74].mxu0 %vm2008_vm13, %v3435_v41 }
 0x435   : > { %3131 = vst.msk [vmem:[#allocation4 + $0x200] sm:$0xff] %vm2670_vm2, %v3057_v49  ;;  %2411 = vrot.lane.b32.xlu1 %v7225_v43, %s4833_s26  ;;  %3739 = vmatprep.mubr.f32.mxu1 %v3401_v51 }
 0x436   : > { %2940 = vrot.lane.b32.xlu0 %v7305_v16, %s4833_s26  ;;  %3740 = vmatmul.mubr.f32.gmra.mrb[28].mxu1 %v3400_v42  ;;  %s4343_s26 = sshll.u32 %s7963_s19, 6 }
 0x437   : > { %v2754_v56 = vpop.permute.xlu1 %2753  ;;  %s7785_s9 = scalar_lea.vmem %s7803_s5, %s4343_s26 }
 0x438   : > { %2829 = vst.msk [vmem:[#allocation4 + $0x1f8] sm:$0xff] %vm2807_vm3, %v2754_v56  ;;  %v3185_v17 = vpop.permute.xlu0 %3184 }
 0x439   : > { %3259 = vst.msk [vmem:[#allocation4 + $0x200] sm:$0xff] %vm2807_vm3, %v3185_v17  ;;  %v7586_v10 = vpop.f32.mrb[2].mxu1  ;;  %2636 = vrot.lane.b32.xlu1 %v7241_v48, %s4836_s22 }
 0x43a   : > { %v3678_v43 = vpop.f32.mrb[3].mxu1  ;;  %3076 = vrot.lane.b32.xlu0 %v3013_v62, %s4836_s22 }
 0x43b   : > { %v2394_v18 = vpop.permute.xlu1 %2393 }
 0x43c   : > { %2468 = vst.msk [vmem:[#allocation4 + $0x210] sm:$0xff] %vm2445_vm0, %v2394_v18  ;;  %v2923_v16 = vpop.permute.xlu0 %2922 }
 0x43d   : > { %2996 = vst.msk [vmem:[#allocation4 + $0x218] sm:$0xff] %vm2445_vm0, %v2923_v16  ;;  %2773 = vrot.lane.b32.xlu1 %v7536_v34, %s4837_s23 }
 0x43e   : > { %3204 = vrot.lane.b32.xlu0 %v7344_v39, %s4837_s23 }
 0x43f   : > { %v2619_v53 = vpop.permute.xlu1 %2618  ;;  %v3403_v57 = vld [vmem:[#allocation4 + $0x1f8] sm:$0xff] }
 0x440   : > { %2693 = vst.msk [vmem:[#allocation4 + $0x210] sm:$0xff] %vm2670_vm2, %v2619_v53  ;;  %v3059_v36 = vpop.permute.xlu0 %3058  ;;  %v3404_v48 = vld [vmem:[#allocation4 + $0x200] sm:$0xff] }
 0x441   : > { %3132 = vst.msk [vmem:[#allocation4 + $0x218] sm:$0xff] %vm2670_vm2, %v3059_v36  ;;  %3744 = vmatprep.mubr.f32.mxu1 %v3404_v48 }
 0x442   : > { %3745 = vmatmul.mubr.f32.gmra.mrb[30].mxu1 %v3403_v57 }
 0x443   : > { %v2756_v4 = vpop.permute.xlu1 %2755 }
 0x444   : > { %2830 = vst.msk [vmem:[#allocation4 + $0x210] sm:$0xff] %vm2807_vm3, %v2756_v4  ;;  %v7600_v0 = vpop.f32.mrb[4].mxu1  ;;  %v3187_v9 = vpop.permute.xlu0 %3186 }
 0x445   : > { %3260 = vst.msk [vmem:[#allocation4 + $0x218] sm:$0xff] %vm2807_vm3, %v3187_v9  ;;  %v3683_v35 = vpop.f32.mrb[5].mxu1 }
 0x447   : > { %v2396_v39 = vpop.permute.xlu1 %2395 }
 0x448   : > { %2469 = vst.msk [vmem:[#allocation4 + $0x228] sm:$0xff] %vm2445_vm0, %v2396_v39  ;;  %v2925_v61 = vpop.permute.xlu0 %2924 }
 0x449   : > { %2997 = vst.msk [vmem:[#allocation4 + $0x230] sm:$0xff] %vm2445_vm0, %v2925_v61 }
 0x44b   : > { %v2621_v13 = vpop.permute.xlu1 %2620  ;;  %v3406_v2 = vld [vmem:[#allocation4 + $0x210] sm:$0xff] }
 0x44c   : > { %2694 = vst.msk [vmem:[#allocation4 + $0x228] sm:$0xff] %vm2670_vm2, %v2621_v13  ;;  %v3061_v31 = vpop.permute.xlu0 %3060  ;;  %v3407_v59 = vld [vmem:[#allocation4 + $0x218] sm:$0xff] }
 0x44d   : > { %3133 = vst.msk [vmem:[#allocation4 + $0x230] sm:$0xff] %vm2670_vm2, %v3061_v31  ;;  %v7607_v11 = vpop.f32.mrb[6].mxu1  ;;  %3749 = vmatprep.mubr.f32.mxu1 %v3407_v59 }
 0x44e   : > { %v3688_v12 = vpop.f32.mrb[7].mxu1  ;;  %3750 = vmatmul.mubr.f32.gmra.mrb[32].mxu1 %v3406_v2 }
 0x44f   : > { %v2758_v32 = vpop.permute.xlu1 %2757 }
 0x450   : > { %2831 = vst.msk [vmem:[#allocation4 + $0x228] sm:$0xff] %vm2807_vm3, %v2758_v32  ;;  %v3189_v15 = vpop.permute.xlu0 %3188 }
 0x451   : > { %3261 = vst.msk [vmem:[#allocation4 + $0x230] sm:$0xff] %vm2807_vm3, %v3189_v15 }
 0x453   : > { %v2398_v1 = vpop.permute.xlu1 %2397 }
 0x454   : > { %2470 = vst.msk [vmem:[#allocation4 + $0x240] sm:$0xff] %vm2445_vm0, %v2398_v1  ;;  %v2927_v21 = vpop.permute.xlu0 %2926 }
 0x455   : > { %2998 = vst.msk [vmem:[#allocation4 + $0x248] sm:$0xff] %vm2445_vm0, %v2927_v21 }
 0x457   : > { %v2623_v27 = vpop.permute.xlu1 %2622  ;;  %v3409_v50 = vld [vmem:[#allocation4 + $0x228] sm:$0xff] }
 0x458   : > { %2695 = vst.msk [vmem:[#allocation4 + $0x240] sm:$0xff] %vm2670_vm2, %v2623_v27  ;;  %v3063_v40 = vpop.permute.xlu0 %3062  ;;  %v3410_v52 = vld [vmem:[#allocation4 + $0x230] sm:$0xff] }
 0x459   : > { %3134 = vst.msk [vmem:[#allocation4 + $0x248] sm:$0xff] %vm2670_vm2, %v3063_v40  ;;  %3754 = vmatprep.mubr.f32.mxu1 %v3410_v52 }
 0x45a   : > { %3755 = vmatmul.mubr.f32.gmra.mrb[34].mxu1 %v3409_v50 }
 0x45b   : > { %v2760_v23 = vpop.permute.xlu1 %2759 }
 0x45c   : > { %v7615_v63 = vpop.f32.mrb[32].mxu0  ;;  %2832 = vst.msk [vmem:[#allocation4 + $0x240] sm:$0xff] %vm2807_vm3, %v2760_v23  ;;  %v3191_v34 = vpop.permute.xlu0 %3190 }
 0x45d   : > { %v3643_v54 = vpop.f32.mrb[33].mxu0  ;;  %3262 = vst.msk [vmem:[#allocation4 + $0x248] sm:$0xff] %vm2807_vm3, %v3191_v34 }
 0x45f   : > { %v2400_v14 = vpop.permute.xlu1 %2399 }
 0x460   : > { %2471 = vst.msk [vmem:[#allocation4 + $0x258] sm:$0xff] %vm2445_vm0, %v2400_v14  ;;  %v2929_v7 = vpop.permute.xlu0 %2928 }
 0x461   : > { %2999 = vst.msk [vmem:[#allocation4 + $0x260] sm:$0xff] %vm2445_vm0, %v2929_v7  ;;  %v7621_v60 = vpop.f32.mrb[8].mxu1 }
 0x462   : > { %v3693_v22 = vpop.f32.mrb[9].mxu1 }
 0x463   : > { %v2625_v29 = vpop.permute.xlu1 %2624  ;;  %v3412_v37 = vld [vmem:[#allocation4 + $0x240] sm:$0xff] }
 0x464   : > { %2696 = vst.msk [vmem:[#allocation4 + $0x258] sm:$0xff] %vm2670_vm2, %v2625_v29  ;;  %v3065_v24 = vpop.permute.xlu0 %3064  ;;  %v3413_v26 = vld [vmem:[#allocation4 + $0x248] sm:$0xff] }
 0x465   : > { %3135 = vst.msk [vmem:[#allocation4 + $0x260] sm:$0xff] %vm2670_vm2, %v3065_v24  ;;  %3759 = vmatprep.mubr.f32.mxu1 %v3413_v26 }
 0x466   : > { %3760 = vmatmul.mubr.f32.gmra.mrb[36].mxu1 %v3412_v37 }
 0x467   : > { %v2762_v38 = vpop.permute.xlu1 %2761 }
 0x468   : > { %2833 = vst.msk [vmem:[#allocation4 + $0x258] sm:$0xff] %vm2807_vm3, %v2762_v38  ;;  %v3193_v55 = vpop.permute.xlu0 %3192 }
 0x469   : > { %3263 = vst.msk [vmem:[#allocation4 + $0x260] sm:$0xff] %vm2807_vm3, %v3193_v55 }
 0x46b   : > { %v2402_v6 = vpop.permute.xlu1 %2401 }
 0x46c   : > { %2472 = vst.msk [vmem:[#allocation4 + $0x270] sm:$0xff] %vm2445_vm0, %v2402_v6  ;;  %v2931_v30 = vpop.permute.xlu0 %2930 }
 0x46d   : > { %3000 = vst.msk [vmem:[#allocation4 + $0x278] sm:$0xff] %vm2445_vm0, %v2931_v30 }
 0x46f   : > { %v2627_v45 = vpop.permute.xlu1 %2626  ;;  %v3415_v28 = vld [vmem:[#allocation4 + $0x258] sm:$0xff] }
 0x470   : > { %v7629_v3 = vpop.f32.mrb[34].mxu0  ;;  %2697 = vst.msk [vmem:[#allocation4 + $0x270] sm:$0xff] %vm2670_vm2, %v2627_v45  ;;  %v3067_v44 = vpop.permute.xlu0 %3066  ;;  %v3416_v20 = vld [vmem:[#allocation4 + $0x260] sm:$0xff] }
 0x471   : > { %v3648_v58 = vpop.f32.mrb[35].mxu0  ;;  %3136 = vst.msk [vmem:[#allocation4 + $0x278] sm:$0xff] %vm2670_vm2, %v3067_v44  ;;  %3764 = vmatprep.mubr.f32.mxu1 %v3416_v20 }
 0x472   : > { %3765 = vmatmul.mubr.f32.gmra.mrb[38].mxu1 %v3415_v28 }
 0x473   : > { %v2764_v25 = vpop.permute.xlu1 %2763 }
 0x474   : > { %2834 = vst.msk [vmem:[#allocation4 + $0x270] sm:$0xff] %vm2807_vm3, %v2764_v25  ;;  %v3195_v47 = vpop.permute.xlu0 %3194 }
 0x475   : > { %3264 = vst.msk [vmem:[#allocation4 + $0x278] sm:$0xff] %vm2807_vm3, %v3195_v47  ;;  %v7635_v19 = vpop.f32.mrb[10].mxu1 }
 0x476   : > { %v3698_v33 = vpop.f32.mrb[11].mxu1 }
 0x477   : > { %v2404_v41 = vpop.permute.xlu1 %2403 }
 0x478   : > { %2473 = vst.msk [vmem:[#allocation4 + $0x288] sm:$0xff] %vm2445_vm0, %v2404_v41  ;;  %v2933_v8 = vpop.permute.xlu0 %2932  ;;  %v7673_v41 = vld [vmem:[#allocation7] ss:$0 sm:$0xff] }
 0x479   : > { %3001 = vst.msk [vmem:[#allocation4 + $0x290] sm:$0xff] %vm2445_vm0, %v2933_v8  ;;  %v3647_v8 = vadd.f32 %v7673_v41, %v7629_v3 }
 0x47b   : > { %v2629_v5 = vpop.permute.xlu1 %2628  ;;  %v3418_v42 = vld [vmem:[#allocation4 + $0x270] sm:$0xff] }
 0x47c   : > { %2698 = vst.msk [vmem:[#allocation4 + $0x288] sm:$0xff] %vm2670_vm2, %v2629_v5  ;;  %v3069_v49 = vpop.permute.xlu0 %3068  ;;  %v3419_v51 = vld [vmem:[#allocation4 + $0x278] sm:$0xff]  ;;  %v3642_v5 = vadd.f32 %v7673_v41, %v7615_v63 }
 0x47d   : > { %3137 = vst.msk [vmem:[#allocation4 + $0x290] sm:$0xff] %vm2670_vm2, %v3069_v49  ;;  %3769 = vmatprep.mubr.f32.mxu1 %v3419_v51 }
 0x47e   : > { %3770 = vmatmul.mubr.f32.gmra.mrb[40].mxu1 %v3418_v42 }
 0x47f   : > { %v2766_v56 = vpop.permute.xlu1 %2765 }
 0x480   : > { %2835 = vst.msk [vmem:[#allocation4 + $0x288] sm:$0xff] %vm2807_vm3, %v2766_v56  ;;  %v3197_v62 = vpop.permute.xlu0 %3196 }
 0x481   : > { %3265 = vst.msk [vmem:[#allocation4 + $0x290] sm:$0xff] %vm2807_vm3, %v3197_v62 }
 0x483   : > { %v2406_v17 = vpop.permute.xlu1 %2405 }
 0x484   : > { %2474 = vst.msk [vmem:[#allocation4 + $0x2a0] sm:$0xff] %vm2445_vm0, %v2406_v17  ;;  %v2935_v43 = vpop.permute.xlu0 %2934 }
 0x485   : > { %3002 = vst.msk [vmem:[#allocation4 + $0x2a8] sm:$0xff] %vm2445_vm0, %v2935_v43 }
 0x487   : > { %v2631_v18 = vpop.permute.xlu1 %2630  ;;  %v3421_v57 = vld [vmem:[#allocation4 + $0x288] sm:$0xff] }
 0x488   : > { %2699 = vst.msk [vmem:[#allocation4 + $0x2a0] sm:$0xff] %vm2670_vm2, %v2631_v18  ;;  %v3071_v16 = vpop.permute.xlu0 %3070  ;;  %v7646_v53 = vpop.f32.mrb[36].mxu0  ;;  %v3422_v36 = vld [vmem:[#allocation4 + $0x290] sm:$0xff] }
 0x489   : > { %3138 = vst.msk [vmem:[#allocation4 + $0x2a8] sm:$0xff] %vm2670_vm2, %v3071_v16  ;;  %v3653_v48 = vpop.f32.mrb[37].mxu0  ;;  %3774 = vmatprep.mubr.f32.mxu1 %v3422_v36  ;;  %v3652_v43 = vadd.f32 %v7673_v41, %v7646_v53  ;;  %v3677_v53 = vadd.f32 %v7673_v41, %v7586_v10 }
 0x48a   : > { %3775 = vmatmul.mubr.f32.gmra.mrb[42].mxu1 %v3421_v57 }
 0x48b   : > { %v2768_v4 = vpop.permute.xlu1 %2767 }
 0x48c   : > { %2836 = vst.msk [vmem:[#allocation4 + $0x2a0] sm:$0xff] %vm2807_vm3, %v2768_v4  ;;  %v3199_v9 = vpop.permute.xlu0 %3198  ;;  %v7650_v35 = vpop.f32.mrb[12].mxu1 }
 0x48d   : > { %3266 = vst.msk [vmem:[#allocation4 + $0x2a8] sm:$0xff] %vm2807_vm3, %v3199_v9  ;;  %v3703_v39 = vpop.f32.mrb[13].mxu1 }
 0x48f   : > { %v2408_v61 = vpop.permute.xlu1 %2407 }
 0x490   : > { %2475 = vst.msk [vmem:[#allocation4 + $0x2b8] sm:$0xff] %vm2445_vm0, %v2408_v61  ;;  %v2937_v13 = vpop.permute.xlu0 %2936 }
 0x491   : > { %3003 = vst.msk [vmem:[#allocation4 + $0x2c0] sm:$0xff] %vm2445_vm0, %v2937_v13  ;;  %v3672_v13 = vadd.f32 %v7673_v41, %v7566_v46  ;;  %v3697_v46 = vadd.f32 %v7673_v41, %v7635_v19 }
 0x493   : > { %v2633_v31 = vpop.permute.xlu1 %2632  ;;  %v3424_v12 = vld [vmem:[#allocation4 + $0x2a0] sm:$0xff] }
 0x494   : > { %2700 = vst.msk [vmem:[#allocation4 + $0x2b8] sm:$0xff] %vm2670_vm2, %v2633_v31  ;;  %v3073_v59 = vpop.permute.xlu0 %3072  ;;  %v3425_v2 = vld [vmem:[#allocation4 + $0x2a8] sm:$0xff] }
 0x495   : > { %3139 = vst.msk [vmem:[#allocation4 + $0x2c0] sm:$0xff] %vm2670_vm2, %v3073_v59  ;;  %3779 = vmatprep.mubr.f32.mxu1 %v3425_v2 }
 0x496   : > { %3780 = vmatmul.mubr.f32.gmra.mrb[44].mxu1 %v3424_v12 }
 0x497   : > { %v2770_v32 = vpop.permute.xlu1 %2769 }
 0x498   : > { %2837 = vst.msk [vmem:[#allocation4 + $0x2b8] sm:$0xff] %vm2807_vm3, %v2770_v32  ;;  %v3201_v15 = vpop.permute.xlu0 %3200  ;;  %v3687_v32 = vadd.f32 %v7673_v41, %v7607_v11 }
 0x499   : > { %3267 = vst.msk [vmem:[#allocation4 + $0x2c0] sm:$0xff] %vm2807_vm3, %v3201_v15 }
 0x49b   : > { %v2410_v1 = vpop.permute.xlu1 %2409  ;;  %v3656_v21 = vpop.f32.mrb[38].mxu0 }
 0x49c   : > { %2476 = vst.msk [vmem:[#allocation4 + $0x2d0] sm:$0xff] %vm2445_vm0, %v2410_v1  ;;  %v2939_v27 = vpop.permute.xlu0 %2938  ;;  %v3658_v40 = vpop.f32.mrb[39].mxu0  ;;  %v3657_v62 = vadd.f32 %v7673_v41, %v3656_v21  ;;  %v3682_v1 = vadd.f32 %v7673_v41, %v7600_v0 }
 0x49d   : > { %3004 = vst.msk [vmem:[#allocation4 + $0x2d8] sm:$0xff] %vm2445_vm0, %v2939_v27 }
 0x49f   : > { %v2635_v52 = vpop.permute.xlu1 %2634  ;;  %v3427_v54 = vld [vmem:[#allocation4 + $0x2b8] sm:$0xff] }
 0x4a0   : > { %2701 = vst.msk [vmem:[#allocation4 + $0x2d0] sm:$0xff] %vm2670_vm2, %v2635_v52  ;;  %v3075_v50 = vpop.permute.xlu0 %3074  ;;  %v3428_v23 = vld [vmem:[#allocation4 + $0x2c0] sm:$0xff] }
 0x4a1   : > { %3140 = vst.msk [vmem:[#allocation4 + $0x2d8] sm:$0xff] %vm2670_vm2, %v3075_v50  ;;  %v7663_v34 = vpop.f32.mrb[14].mxu1  ;;  %3784 = vmatprep.mubr.f32.mxu1 %v3428_v23  ;;  %v3692_v50 = vadd.f32 %v7673_v41, %v7621_v60 }
 0x4a2   : > { %v3708_v14 = vpop.f32.mrb[15].mxu1  ;;  %3785 = vmatmul.mubr.f32.gmra.mrb[46].mxu1 %v3427_v54  ;;  %v3707_v0 = vadd.f32 %v7673_v41, %v7663_v34 }
 0x4a3   : > { %v2772_v7 = vpop.permute.xlu1 %2771 }
 0x4a4   : > { %2838 = vst.msk [vmem:[#allocation4 + $0x2d0] sm:$0xff] %vm2807_vm3, %v2772_v7  ;;  %v3203_v22 = vpop.permute.xlu0 %3202  ;;  %v3702_v7 = vadd.f32 %v7673_v41, %v7650_v35 }
 0x4a5   : > { %3268 = vst.msk [vmem:[#allocation4 + $0x2d8] sm:$0xff] %vm2807_vm3, %v3203_v22 }
 0x4a7   : > { %v2412_v29 = vpop.permute.xlu1 %2411 }
 0x4a8   : > { %2477 = vst.msk [vmem:[#allocation4 + $0x2e8] sm:$0xff] %vm2445_vm0, %v2412_v29  ;;  %v2941_v24 = vpop.permute.xlu0 %2940 }
 0x4a9   : > { %3005 = vst.msk [vmem:[#allocation4 + $0x2f0] sm:$0xff] %vm2445_vm0, %v2941_v24 }
 0x4ab   : > { %v2637_v26 = vpop.permute.xlu1 %2636  ;;  %v3430_v55 = vld [vmem:[#allocation4 + $0x2d0] sm:$0xff] }
 0x4ac   : > { %2702 = vst.msk [vmem:[#allocation4 + $0x2e8] sm:$0xff] %vm2670_vm2, %v2637_v26  ;;  %v3077_v37 = vpop.permute.xlu0 %3076  ;;  %v3431_v38 = vld [vmem:[#allocation4 + $0x2d8] sm:$0xff] }
 0x4ad   : > { %3141 = vst.msk [vmem:[#allocation4 + $0x2f0] sm:$0xff] %vm2670_vm2, %v3077_v37  ;;  %3789 = vmatprep.mubr.f32.mxu1 %v3431_v38 }
 0x4ae   : > { %3790 = vmatmul.mubr.f32.gmra.mrb[48].mxu1 %v3430_v55 }
 0x4af   : > { %v2774_v6 = vpop.permute.xlu1 %2773 }
 0x4b0   : > { %2839 = vst.msk [vmem:[#allocation4 + $0x2e8] sm:$0xff] %vm2807_vm3, %v2774_v6  ;;  %v3205_v30 = vpop.permute.xlu0 %3204 }
 0x4b1   : > { %3269 = vst.msk [vmem:[#allocation4 + $0x2f0] sm:$0xff] %vm2807_vm3, %v3205_v30 }
 0x4b4   : > { %v3661_v45 = vpop.f32.mrb[40].mxu0 }
 0x4b5   : > { %v3663_v44 = vpop.f32.mrb[41].mxu0  ;;  %v3662_v57 = vadd.f32 %v7673_v41, %v3661_v45 }
 0x4b7   : > { %v3433_v25 = vld [vmem:[#allocation4 + $0x2e8] sm:$0xff] }
 0x4b8   : > { %v3711_v58 = vpop.f32.mrb[16].mxu1  ;;  %v3434_v20 = vld [vmem:[#allocation4 + $0x2f0] sm:$0xff] }
 0x4b9   : > { %v3713_v28 = vpop.f32.mrb[17].mxu1  ;;  %3794 = vmatprep.mubr.f32.mxu1 %v3434_v20  ;;  %v3712_v37 = vadd.f32 %v7673_v41, %v3711_v58 }
 0x4ba   : > { %3795 = vmatmul.mubr.f32.gmra.mrb[50].mxu1 %v3433_v25 }
 0x4c7   : > { %v3666_v47 = vpop.f32.mrb[42].mxu0 }
 0x4c8   : > { %v3668_v33 = vpop.f32.mrb[43].mxu0  ;;  %v3667_v63 = vadd.f32 %v7673_v41, %v3666_v47 }
 0x4cb   : > { %v4493_v49 = vpop.f32.mrb[44].mxu0 }
 0x4cc   : > { %v7679_v51 = vadd.f32 %v4493_v49, %v3647_v8  ;;  %v3866_v42 = vpop.f32.mrb[45].mxu0 }
 0x4cd   : > { %v7681_v56 = vadd.f32 %v3866_v42, %v3642_v5 }
 0x4ce   : > { %v3716_v17 = vpop.f32.mrb[18].mxu1  ;;  %v4026_v47 = vmax.f32 %v7679_v51, 0.0 }
 0x4cf   : > { %v3718_v18 = vpop.f32.mrb[19].mxu1  ;;  %v4496_v16 = vpop.f32.mrb[46].mxu0  ;;  %v3717_v60 = vadd.f32 %v7673_v41, %v3716_v17  ;;  %v4025_v58 = vmax.f32 %v7681_v56, 0.0 }
 0x4d0   : > { %v7686_v36 = vadd.f32 %v4496_v16, %v3657_v62  ;;  %v3876_v3 = vpop.f32.mrb[47].mxu0 }
 0x4d1   : > { %v7688_v48 = vadd.f32 %v3876_v3, %v3652_v43 }
 0x4d3   : > { %v4499_v4 = vpop.f32.mrb[48].mxu0 }
 0x4d4   : > { %v7692_v9 = vadd.f32 %v4499_v4, %v3667_v63  ;;  %v3886_v39 = vpop.f32.mrb[49].mxu0 }
 0x4d5   : > { %v7694_v61 = vadd.f32 %v3886_v39, %v3662_v57  ;;  %v4027_v57 = vmax.f32 %v7688_v48, 0.0 }
 0x4d7   : > { %v4502_v31 = vpop.f32.mrb[50].mxu0 }
 0x4d8   : > { %v7700_v59 = vadd.f32 %v4502_v31, %v3677_v53  ;;  %v3896_v2 = vpop.f32.mrb[51].mxu0 }
 0x4d9   : > { %v7702_v12 = vadd.f32 %v3896_v2, %v3672_v13 }
 0x4da   : > { %v3721_v15 = vpop.f32.mrb[20].mxu1 }
 0x4db   : > { %v3723_v21 = vpop.f32.mrb[21].mxu1  ;;  %v4505_v27 = vpop.f32.mrb[52].mxu0  ;;  %v3722_v45 = vadd.f32 %v7673_v41, %v3721_v15 }
 0x4dc   : > { %v7708_v40 = vadd.f32 %v4505_v27, %v3687_v32  ;;  %v3906_v10 = vpop.f32.mrb[53].mxu0  ;;  %v4028_v27 = vmax.f32 %v7686_v36, 0.0 }
 0x4dd   : > { %v7710_v52 = vadd.f32 %v3906_v10, %v3682_v1 }
 0x4df   : > { %v4508_v23 = vpop.f32.mrb[54].mxu0 }
 0x4e0   : > { %v7716_v54 = vadd.f32 %v4508_v23, %v3697_v46  ;;  %v3916_v11 = vpop.f32.mrb[55].mxu0 }
 0x4e1   : > { %v7718_v14 = vadd.f32 %v3916_v11, %v3692_v50 }
 0x4e3   : > { %v4511_v22 = vpop.f32.mrb[56].mxu0 }
 0x4e4   : > { %v7724_v29 = vadd.f32 %v4511_v22, %v3707_v0  ;;  %v3926_v24 = vpop.f32.mrb[57].mxu0 }
 0x4e5   : > { %v7726_v19 = vadd.f32 %v3926_v24, %v3702_v7 }
 0x4e6   : > { %v3726_v26 = vpop.f32.mrb[22].mxu1 }
 0x4e7   : > { %v3728_v38 = vpop.f32.mrb[23].mxu1  ;;  %v4514_v55 = vpop.f32.mrb[58].mxu0  ;;  %v3727_v35 = vadd.f32 %v7673_v41, %v3726_v26 }
 0x4e8   : > { %v7730_v6 = vadd.f32 %v4514_v55, %v3717_v60  ;;  %v3936_v30 = vpop.f32.mrb[59].mxu0  ;;  %v4029_v60 = vmax.f32 %v7694_v61, 0.0  ;;  %v4031_v61 = vmax.f32 %v7702_v12, 0.0  ;;  %v4033_v12 = vmax.f32 %v7710_v52, 0.0 }
 0x4e9   : > { %v7732_v34 = vadd.f32 %v3936_v30, %v3712_v37  ;;  %v4035_v52 = vmax.f32 %v7718_v14, 0.0 }
 0x4eb   : > { %v4517_v44 = vpop.f32.mrb[60].mxu0 }
 0x4ec   : > { %v3952_v20 = vadd.f32 %v4517_v44, %v3727_v35  ;;  %v3946_v28 = vpop.f32.mrb[61].mxu0  ;;  %v4030_v35 = vmax.f32 %v7692_v9, 0.0  ;;  %v4032_v9 = vmax.f32 %v7700_v59, 0.0  ;;  %v4034_v59 = vmax.f32 %v7708_v40, 0.0 }
 0x4ed   : > { %v3947_v25 = vadd.f32 %v3946_v28, %v3722_v45  ;;  %v4036_v40 = vmax.f32 %v7716_v54, 0.0 }
 0x4ee   : > { %v4042_v33 = vmax.f32 %v3952_v20, 0.0 }
 0x4ef   : > { %v4041_v8 = vmax.f32 %v3947_v25, 0.0  ;;  %v4520_v5 = vpop.f32.mrb[62].mxu0 }
 0x4f0   : > { %v4679_v49 = vpack.i.bf16 %v4042_v33, %v4026_v47  ;;  %v3956_v42 = vpop.f32.mrb[63].mxu0 }
 0x4f1   : > { %v4677_v62 = vpack.i.bf16 %v4041_v8, %v4025_v58 }
 0x4f2   : > { %v3731_v17 = vpop.f32.mrb[24].mxu1 }
 0x4f3   : > { %v3732_v43 = vadd.f32 %v7673_v41, %v3731_v17  ;;  %v3733_v18 = vpop.f32.mrb[25].mxu1  ;;  %v4523_v16 = vpop.f32.mrb[64].mxu0  ;;  %4678 = vxpose.xlu0.b32.start [1/16] (narrow) %v4677_v62, 64 }
 0x4f4   : > { %v3966_v3 = vpop.f32.mrb[65].mxu0 }
 0x4f5   : > { %v3957_v63 = vadd.f32 %v3956_v42, %v3732_v43 }
 0x4f7   : > { %v4043_v4 = vmax.f32 %v3957_v63, 0.0  ;;  %v4526_v51 = vpop.f32.mrb[66].mxu0  ;;  %4680 = vxpose.xlu0.b32.cont [2/16] (narrow) %v4679_v49, 64 }
 0x4f8   : > { %v3976_v39 = vpop.f32.mrb[67].mxu0 }
 0x4f9   : > { %v4681_v56 = vpack.i.bf16 %v4043_v4, %v4027_v57 }
 0x4fb   : > { %v4529_v53 = vpop.f32.mrb[68].mxu0  ;;  %4682 = vxpose.xlu0.b32.cont [3/16] (narrow) %v4681_v56, 64 }
 0x4fc   : > { %v3986_v13 = vpop.f32.mrb[69].mxu0 }
 0x4fe   : > { %v3736_v31 = vpop.f32.mrb[26].mxu1 }
 0x4ff   : > { %v3737_v2 = vadd.f32 %v7673_v41, %v3736_v31  ;;  %v3738_v32 = vpop.f32.mrb[27].mxu1  ;;  %v7741_v15 = vpop.f32.mrb[70].mxu0 }
 0x500   : > { %v3996_v1 = vpop.f32.mrb[71].mxu0 }
 0x501   : > { %v3962_v21 = vadd.f32 %v4520_v5, %v3737_v2 }
 0x503   : > { %v4044_v10 = vmax.f32 %v3962_v21, 0.0  ;;  %v7744_v48 = vpop.f32.mrb[72].mxu0 }
 0x504   : > { %v7746_v46 = vpop.f32.mrb[73].mxu0 }
 0x505   : > { %v4683_v50 = vpack.i.bf16 %v4044_v10, %v4028_v27 }
 0x507   : > { %4684 = vxpose.xlu0.b32.cont [4/16] (narrow) %v4683_v50, 64  ;;  %v7748_v23 = vpop.f32.mrb[74].mxu0 }
 0x508   : > { %v7750_v11 = vpop.f32.mrb[75].mxu0 }
 0x509   : > { %v3741_v0 = vpop.f32.mrb[28].mxu1 }
 0x50a   : > { %v3742_v7 = vadd.f32 %v7673_v41, %v3741_v0  ;;  %v3743_v22 = vpop.f32.mrb[29].mxu1 }
 0x50c   : > { %v3967_v24 = vadd.f32 %v3966_v3, %v3742_v7 }
 0x50e   : > { %v4045_v26 = vmax.f32 %v3967_v24, 0.0 }
 0x510   : > { %v4685_v36 = vpack.i.bf16 %v4045_v26, %v4029_v60 }
 0x512   : > { %4686 = vxpose.xlu0.b32.cont [5/16] (narrow) %v4685_v36, 64 }
 0x515   : > { %v3746_v37 = vpop.f32.mrb[30].mxu1 }
 0x516   : > { %v3747_v38 = vadd.f32 %v7673_v41, %v3746_v37  ;;  %v3748_v55 = vpop.f32.mrb[31].mxu1  ;;  %v4037_v37 = vmax.f32 %v7726_v19, 0.0 }
 0x518   : > { %v3972_v30 = vadd.f32 %v4523_v16, %v3747_v38 }
 0x51a   : > { %v4046_v45 = vmax.f32 %v3972_v30, 0.0 }
 0x51c   : > { %v4687_v44 = vpack.i.bf16 %v4046_v45, %v4030_v35  ;;  %v4038_v45 = vmax.f32 %v7724_v29, 0.0 }
 0x51e   : > { %4688 = vxpose.xlu0.b32.cont [6/16] (narrow) %v4687_v44, 64 }
 0x521   : > { %v3751_v20 = vpop.f32.mrb[32].mxu1 }
 0x522   : > { %v3752_v28 = vadd.f32 %v7673_v41, %v3751_v20  ;;  %v3753_v25 = vpop.f32.mrb[33].mxu1 }
 0x524   : > { %v3977_v47 = vadd.f32 %v3976_v39, %v3752_v28 }
 0x526   : > { %v4047_v33 = vmax.f32 %v3977_v47, 0.0  ;;  %v4039_v47 = vmax.f32 %v7732_v34, 0.0 }
 0x528   : > { %v4689_v58 = vpack.i.bf16 %v4047_v33, %v4031_v61 }
 0x52a   : > { %4690 = vxpose.xlu0.b32.cont [7/16] (narrow) %v4689_v58, 64 }
 0x52d   : > { %v3756_v8 = vpop.f32.mrb[34].mxu1 }
 0x52e   : > { %v3757_v5 = vadd.f32 %v7673_v41, %v3756_v8  ;;  %v3758_v49 = vpop.f32.mrb[35].mxu1 }
 0x530   : > { %v3982_v42 = vadd.f32 %v4526_v51, %v3757_v5  ;;  %v4040_v5 = vmax.f32 %v7730_v6, 0.0 }
 0x532   : > { %v4048_v62 = vmax.f32 %v3982_v42, 0.0 }
 0x534   : > { %v4691_v17 = vpack.i.bf16 %v4048_v62, %v4032_v9 }
 0x536   : > { %4692 = vxpose.xlu0.b32.cont [8/16] (narrow) %v4691_v17, 64 }
 0x539   : > { %v3761_v43 = vpop.f32.mrb[36].mxu1 }
 0x53a   : > { %v3762_v18 = vadd.f32 %v7673_v41, %v3761_v43  ;;  %v3763_v16 = vpop.f32.mrb[37].mxu1 }
 0x53c   : > { %v3987_v3 = vadd.f32 %v3986_v13, %v3762_v18 }
 0x53e   : > { %v4049_v63 = vmax.f32 %v3987_v3, 0.0 }
 0x540   : > { %v4693_v57 = vpack.i.bf16 %v4049_v63, %v4033_v12 }
 0x542   : > { %4694 = vxpose.xlu0.b32.cont [9/16] (narrow) %v4693_v57, 64 }
 0x545   : > { %v3766_v4 = vpop.f32.mrb[38].mxu1 }
 0x546   : > { %v3767_v39 = vadd.f32 %v7673_v41, %v3766_v4  ;;  %v3768_v56 = vpop.f32.mrb[39].mxu1 }
 0x548   : > { %v3992_v51 = vadd.f32 %v4529_v53, %v3767_v39 }
 0x54a   : > { %v4050_v31 = vmax.f32 %v3992_v51, 0.0 }
 0x54c   : > { %v4695_v2 = vpack.i.bf16 %v4050_v31, %v4034_v59 }
 0x54e   : > { %4696 = vxpose.xlu0.b32.cont [10/16] (narrow) %v4695_v2, 64 }
 0x551   : > { %v3771_v32 = vpop.f32.mrb[40].mxu1 }
 0x552   : > { %v3772_v21 = vadd.f32 %v7673_v41, %v3771_v32  ;;  %v3773_v27 = vpop.f32.mrb[41].mxu1 }
 0x554   : > { %v3997_v13 = vadd.f32 %v3996_v1, %v3772_v21 }
 0x556   : > { %v4051_v10 = vmax.f32 %v3997_v13, 0.0 }
 0x558   : > { %v4697_v50 = vpack.i.bf16 %v4051_v10, %v4035_v52 }
 0x55a   : > { %4698 = vxpose.xlu0.b32.cont [11/16] (narrow) %v4697_v50, 64 }
 0x55d   : > { %v3776_v0 = vpop.f32.mrb[42].mxu1 }
 0x55e   : > { %v3777_v7 = vadd.f32 %v7673_v41, %v3776_v0  ;;  %v3778_v22 = vpop.f32.mrb[43].mxu1 }
 0x560   : > { %v4002_v53 = vadd.f32 %v7741_v15, %v3777_v7 }
 0x562   : > { %v4052_v24 = vmax.f32 %v4002_v53, 0.0 }
 0x564   : > { %v4699_v60 = vpack.i.bf16 %v4052_v24, %v4036_v40 }
 0x566   : > { %4700 = vxpose.xlu0.b32.cont [12/16] (narrow) %v4699_v60, 64 }
 0x569   : > { %v3781_v26 = vpop.f32.mrb[44].mxu1 }
 0x56a   : > { %v3782_v36 = vadd.f32 %v7673_v41, %v3781_v26  ;;  %v3783_v1 = vpop.f32.mrb[45].mxu1 }
 0x56c   : > { %v4007_v14 = vadd.f32 %v7746_v46, %v3782_v36 }
 0x56e   : > { %v4053_v38 = vmax.f32 %v4007_v14, 0.0 }
 0x570   : > { %v4701_v55 = vpack.i.bf16 %v4053_v38, %v4037_v37 }
 0x572   : > { %4702 = vxpose.xlu0.b32.cont [13/16] (narrow) %v4701_v55, 64 }
 0x575   : > { %v3786_v30 = vpop.f32.mrb[46].mxu1 }
 0x576   : > { %v3787_v35 = vadd.f32 %v7673_v41, %v3786_v30  ;;  %v3788_v15 = vpop.f32.mrb[47].mxu1 }
 0x578   : > { %v4012_v54 = vadd.f32 %v7744_v48, %v3787_v35 }
 0x57a   : > { %v4054_v44 = vmax.f32 %v4012_v54, 0.0 }
 0x57c   : > { %v4703_v20 = vpack.i.bf16 %v4054_v44, %v4038_v45 }
 0x57e   : > { %4704 = vxpose.xlu0.b32.cont [14/16] (narrow) %v4703_v20, 64 }
 0x581   : > { %v3791_v28 = vpop.f32.mrb[48].mxu1 }
 0x582   : > { %v3792_v46 = vadd.f32 %v7673_v41, %v3791_v28  ;;  %v3793_v25 = vpop.f32.mrb[49].mxu1 }
 0x584   : > { %v4017_v19 = vadd.f32 %v7750_v11, %v3792_v46 }
 0x586   : > { %v4055_v61 = vmax.f32 %v4017_v19, 0.0 }
 0x588   : > { %v4705_v33 = vpack.i.bf16 %v4055_v61, %v4039_v47 }
 0x58a   : > { %4706 = vxpose.xlu0.b32.cont [15/16] (narrow) %v4705_v33, 64 }
 0x58d   : > { %v3796_v58 = vpop.f32.mrb[50].mxu1 }
 0x58e   : > { %v3797_v48 = vadd.f32 %v7673_v41, %v3796_v58  ;;  %v3798_v8 = vpop.f32.mrb[51].mxu1 }
 0x590   : > { %v4022_v29 = vadd.f32 %v7748_v23, %v3797_v48 }
 0x592   : > { %v4056_v49 = vmax.f32 %v4022_v29, 0.0 }
 0x594   : > { %v4707_v42 = vpack.i.bf16 %v4056_v49, %v4040_v5 }
 0x596   : > { %4708 = vxpose.xlu0.b32.end [16/16] (narrow) %v4707_v42, 64 }
 0x5da   : > { %v4709_v9 = vpop.trf.xlu0 }
 0x5db   : > { %v4713_v62 = vunpack.i.h.bf16 %v4709_v9  ;;  %v4710_v11 = vunpack.i.l.bf16 %v4709_v9 }
 0x5dd   : > { %v4344_v41 = vpack.c.bf16 %v4713_v62, %v4710_v11 }
 0x5de   : > { %v4714_v34 = vpop.trf.xlu0 }
 0x5df   : > { %4169 = vst [vmem:[%s7785_s9] sm:$0xff] %v4344_v41  ;;  %v4718_v6 = vunpack.i.h.bf16 %v4714_v34  ;;  %v4715_v23 = vunpack.i.l.bf16 %v4714_v34 }
 0x5e1   : > { %v4345_v17 = vpack.c.bf16 %v4718_v6, %v4715_v23 }
 0x5e2   : > { %v4719_v43 = vpop.trf.xlu0 }
 0x5e3   : > { %4170 = vst [vmem:[%s7785_s9 + $0x8] sm:$0xff] %v4345_v17  ;;  %v4723_v18 = vunpack.i.h.bf16 %v4719_v43  ;;  %v4720_v16 = vunpack.i.l.bf16 %v4719_v43 }
 0x5e5   : > { %v4346_v3 = vpack.c.bf16 %v4723_v18, %v4720_v16 }
 0x5e6   : > { %v4724_v12 = vpop.trf.xlu0 }
 0x5e7   : > { %4171 = vst [vmem:[%s7785_s9 + $0x10] sm:$0xff] %v4346_v3  ;;  %v4728_v63 = vunpack.i.h.bf16 %v4724_v12  ;;  %v4725_v57 = vunpack.i.l.bf16 %v4724_v12 }
 0x5e9   : > { %v4347_v4 = vpack.c.bf16 %v4728_v63, %v4725_v57 }
 0x5ea   : > { %v4729_v39 = vpop.trf.xlu0 }
 0x5eb   : > { %4172 = vst [vmem:[%s7785_s9 + $0x18] sm:$0xff] %v4347_v4  ;;  %v4733_v56 = vunpack.i.h.bf16 %v4729_v39  ;;  %v4730_v51 = vunpack.i.l.bf16 %v4729_v39 }
 0x5ed   : > { %v4348_v59 = vpack.c.bf16 %v4733_v56, %v4730_v51 }
 0x5ee   : > { %v4734_v31 = vpop.trf.xlu0 }
 0x5ef   : > { %4173 = vst [vmem:[%s7785_s9 + $0x20] sm:$0xff] %v4348_v59  ;;  %v4738_v2 = vunpack.i.h.bf16 %v4734_v31  ;;  %v4735_v32 = vunpack.i.l.bf16 %v4734_v31 }
 0x5f1   : > { %v4349_v21 = vpack.c.bf16 %v4738_v2, %v4735_v32 }
 0x5f2   : > { %v4739_v27 = vpop.trf.xlu0 }
 0x5f3   : > { %4174 = vst [vmem:[%s7785_s9 + $0x28] sm:$0xff] %v4349_v21  ;;  %v4743_v13 = vunpack.i.h.bf16 %v4739_v27  ;;  %v4740_v52 = vunpack.i.l.bf16 %v4739_v27 }
 0x5f5   : > { %v4350_v10 = vpack.c.bf16 %v4743_v13, %v4740_v52 }
 0x5f6   : > { %v4744_v50 = vpop.trf.xlu0 }
 0x5f7   : > { %4175 = vst [vmem:[%s7785_s9 + $0x30] sm:$0xff] %v4350_v10  ;;  %v4748_v0 = vunpack.i.h.bf16 %v4744_v50  ;;  %v4745_v7 = vunpack.i.l.bf16 %v4744_v50 }
 0x5f9   : > { %v4351_v22 = vpack.c.bf16 %v4748_v0, %v4745_v7 }
 0x5fb   : > { %4176 = vst [vmem:[%s7785_s9 + $0x38] sm:$0xff] %v4351_v22 }
 0x5fc PF: > { %s17_s18 = sadd.s32 1, %s4822_s18  }
 0x5fd   : > { %p14_p5 = scmp.ge.s32.totalorder %s17_s18, 4  }
 0x5ff   :  { %16 = sbr.rel (!%p14_p5) target bundleno = 2 (0x2), region = 81 }
 0x606   :  { %4198 = vsyncpa [#allocation6], 1 }
 0x607   :  { %4200 = vsyncpa [#allocation6 + $0x1], 1 }
 0x608   :  { %4201 = vsyncpa [#allocation8], 1 }

// kernel: red_q_forward.3
= control target key start
LH: loop header
LB: loop body
LE: loop exit
PB: predicated region body
PF: predicated region fallthrough
CT: control target
= control target key end

     0   :  { %9 = vsyncpa [#allocation4], 0  ;;  %s13110_s0 = inlined_call_operand.vmem [shape: bf16[2,16384], index: 0, kind: input, shape index: {}]   ;;  %s13111_s1 = inlined_call_operand.hbm [shape: bf16[16384,256], index: 1, kind: input, shape index: {}]   ;;  %s13112_s2 = inlined_call_operand.hbm [shape: f32[1,256], index: 2, kind: input, shape index: {}]   ;;  %s13113_s3 = inlined_call_operand.vmem [shape: f32[256,4], index: 3, kind: input, shape index: {}]   ;;  %s13114_s4 = inlined_call_operand.vmem [shape: f32[1,2,4], index: 4, kind: output, shape index: {}]  }
   0x1   :  { %11 = vsyncpa [#allocation4 + $0x1], 0 }
   0x2   :  { %12 = vsyncpa [#allocation6], 0  ;;  %s11493_s15 = smov 0   ;;  %s11495_s16 = smov 0  }
   0x3   :  { %s11497_s17 = smov 0   ;;  %s11499_s18 = smov 0  }
   0x4   :  { %s11501_s19 = smov 0   ;;  %s11503_s20 = smov 0  }
   0x5 LB: > { %s8495_s21 = sadd.s32 4294967295, %s11459_s20   ;;  %s65_s22 = sadd.s32 1, %s11447_s17  ;;  %s11459_s20 = sphi %s11503_s20, %s18_s20   ;;  %s11455_s19 = sphi %s11501_s19, %s13135_s19   ;;  %s11451_s18 = sphi %s11499_s18, %s13134_s18   ;;  %s11447_s17 = sphi %s11497_s17, %s13133_s17   ;;  %s11443_s16 = sphi %s11495_s16, %s13132_s16   ;;  %s11439_s15 = sphi %s11493_s15, %s13131_s15  }
   0x6   : > { %p72_p0 = scmp.ne.s32.totalorder %s11447_s17, %s11443_s16  ;;  %p73_p1 = scmp.eq.s32.totalorder %s11459_s20, 0 }
   0x7   : > { %p78_p2 = scmp.ne.s32.totalorder %s11443_s16, %s11439_s15  ;;  %p11527_p3 = scmp.eq.s32.totalorder %s8495_s21, 0 }
   0x8   : > { %p74_p4 = por %p73_p1, %p72_p0  ;;  %p8496_p5 = scmp.ge.s32.totalorder %s11459_s20, 1 }
   0x9   : > { %s13120_s23 = scalar_select %p11527_p3, 1, 0 }
   0xa   : > { %p11534_p6 = por %p11527_p3, %p78_p2  ;;  %p167_p7 = scmp.lt.s32.totalorder %s11459_s20, 3 }
   0xb   : > { %s11461_s26 = smov [#allocation5]   ;;  %p9743_p10 = scmp.lt.s32.totalorder %s11459_s20, 2 }
   0xc   : > { %s13121_s24 = scalar_select %p11534_p6, 1, 0 }
   0xd   : > { %p11539_p8 = pnand %p8496_p5, %p167_p7  ;;  %s183_s27 = sshll.u32 %s11461_s26, 4  ;;  %s184_s27 = int_to_ptr.vmem [resolvable:$true] %s183_s27 }
   0xe   : > { %s211_s28 = sand.u32 1, %s11447_s17   ;;  %p11553_p12 = pnand %p9743_p10, %p74_p4 }
   0xf   : > { %s13122_s25 = scalar_select %p11539_p8, 1, 0 }
  0x10   : > { %p9734_p9 = pneg %p11539_p8  ;;  %s11347_s7 = scalar_lea.hbm %s13112_s2, 32 }
  0x11   : > { %s13124_s30 = scalar_select %p11553_p12, 1, 0 }
  0x12   : > { %p11549_p11 = pnand %p9734_p9, %p11527_p3  ;;  %p11348_p13 = scmp.ne.s32.totalorder %s13112_s2, %s11347_s7 }
  0x13   : > { %p11354_p5 = scmp.lt.u32.totalorder %s11347_s7, %s13112_s2 }
  0x14   : > { %p11349_p0 = pneg %p11549_p11 }
  0x16   : > { %p11350_p1 = pnand %p11349_p0, %p11348_p13 }
  0x18   : > { %p11351_p2 = pneg %p11350_p1 }
  0x1a   : > { %p11356_p4 = pnand %p11354_p5, %p11351_p2 }
  0x1c   : > { %11359 = shalt.err (!%p11356_p4)
}
  0x1d   : > { %s11360_s12 = scalar_lea.vmem %s184_s27, 32  ;;  %p11368_p3 = scmp.lt.s32.totalorder %s184_s27, %s184_s27 }
  0x1e   : > { %p11361_p7 = scmp.ne.s32.totalorder %s184_s27, %s11360_s12  ;;  %p11369_p6 = scmp.lt.s32.totalorder %s11360_s12, %s11360_s12 }
  0x20   : > { %p11363_p9 = pnand %p11361_p7, %p11349_p0  ;;  %p11370_p8 = por %p11369_p6, %p11368_p3 }
  0x22   : > { %p11364_p10 = pneg %p11363_p9 }
  0x24   : > { %p11371_p12 = pnand %p11370_p8, %p11364_p10 }
  0x26   : > { %11374 = shalt.err (!%p11371_p12)
}
  0x27   : > { %9737 = dma.hbm_to_vmem [thread:$0]  (!%p11549_p11), %s13112_s2, 32, %s184_s27, [#allocation6]  }
  0x28   : > { %s27_s15 = sadd.s32 1, %s11455_s19  ;;  %s8500_s21 = sshll.u32 %s211_s28, 13 }
  0x29   : > { %p28_p13 = scmp.ge.s32.totalorder %s27_s15, 2  ;;  %s9538_s26 = sshll.u32 %s11455_s19, 17 }
  0x2a   : > { %s215_s5 = scalar_lea.vmem [#allocation3], %s8500_s21  ;;  %s11582_s8 = scalar_lea.hbm %s13111_s1, %s9538_s26 }
  0x2b   : > { %s225_s6 = sshll.u32 %s215_s5, 4  ;;  %s13137_s15 = smov (%p28_p13, %s27_s15), 0  ;;  %s11584_s6 = int_to_ptr.vmem [resolvable:$true] %s225_s6 }
  0x2c   : > { %s60_s27 = ssub.s32 %s11455_s19, %s13137_s15  ;;  %s11594_s10 = scalar_lea.sflag [#allocation4], %s211_s28 }
  0x2d   : > { %p11588_p3 = scmp.eq.s32.totalorder %s60_s27, 0  ;;  %s11375_s11 = scalar_lea.hbm %s11582_s8, 131072 }
  0x2e   : > { %p11376_p6 = scmp.ne.s32.totalorder %s11582_s8, %s11375_s11  ;;  %p13126_p8 = scmp.ne.s32.totalorder %s13124_s30, 0 }
  0x2f   : > { %s11380_s14 = scalar_lea.hbm %s13111_s1, 262144  ;;  %p11381_p1 = scmp.lt.u32.totalorder %s11582_s8, %s13111_s1 }
  0x30   : > { %p11377_p11 = pneg %p13126_p8  ;;  %p11382_p2 = scmp.lt.u32.totalorder %s11380_s14, %s11375_s11 }
  0x31   : > { %p11384_p4 = scmp.lt.u32.totalorder %s11375_s11, %s11582_s8 }
  0x32   : > { %p11378_p12 = pnand %p11377_p11, %p11376_p6  ;;  %p11383_p5 = por %p11382_p2, %p11381_p1 }
  0x34   : > { %p11379_p0 = pneg %p11378_p12  ;;  %p11385_p7 = por %p11384_p4, %p11383_p5 }
  0x36   : > { %p11386_p9 = pnand %p11385_p7, %p11379_p0 }
  0x38   : > { %11389 = shalt.err (!%p11386_p9)
}
  0x39   : > { %s11390_s28 = scalar_lea.vmem %s11584_s6, 131072  ;;  %s11462_s5 = smov [#allocation3]  }
  0x3a   : > { %p11391_p10 = scmp.ne.s32.totalorder %s11584_s6, %s11390_s28  ;;  %s11395_s29 = sshll.u32 %s11462_s5, 4  ;;  %s11396_s29 = int_to_ptr.vmem [resolvable:$false] %s11395_s29 }
  0x3b   : > { %s11397_s7 = scalar_lea.vmem %s11396_s29, 262144  ;;  %p11398_p12 = scmp.lt.s32.totalorder %s11584_s6, %s11396_s29 }
  0x3c   : > { %p11393_p13 = pnand %p11391_p10, %p11377_p11  ;;  %p11399_p1 = scmp.lt.s32.totalorder %s11397_s7, %s11390_s28 }
  0x3e   : > { %p11394_p6 = pneg %p11393_p13  ;;  %p11400_p2 = por %p11399_p1, %p11398_p12 }
  0x40   : > { %p11401_p5 = pnand %p11400_p2, %p11394_p6 }
  0x42   : > { %11404 = shalt.err (!%p11401_p5)
}
  0x43   : > { %s11463_s27 = smov 128   ;;  %s11464_s11 = smov 8  }
  0x44   : > { %9741 = dma.hbm_to_vmem [thread:$0]  (!%p13126_p8), %s11582_s8, 131072, %s11584_s6, %s11594_s10, %s11463_s27, %s11463_s27, %s11464_s11  }
  0x45   : > { %s11627_s12 = scalar_select %p11588_p3, %s11447_s17, %s65_s22  }
  0x46   : > { %p13127_p11 = scmp.ne.s32.totalorder %s13122_s25, 0 }
  0x47   : > { %s239_s13 = sand.u32 (!%p13127_p11), 1, %s11443_s16   ;;  %p13128_p0 = scmp.ne.s32.totalorder (!%p13127_p11), %s13121_s24, 0 }
  0x48   : > { %237 = sbr.rel (%p13127_p11) target bundleno = 1572 (0x624), region = 36  ;;  %s8505_s14 = sshll.u32 (!%p13127_p11), %s239_s13, 13 }
  0x49   : > { %s240_s21 = scalar_lea.sflag (!%p13127_p11), [#allocation4], %s239_s13  ;;  %s11632_s26 = scalar_lea.vmem (!%p13127_p11), [#allocation3], %s8505_s14 }
  0x4f   : > { %11430 = dma.done.wait (%p13128_p0), %s240_s21, 131072  }
  0x50   : > { %11432 = vsyncadd (%p13128_p0), %s240_s21, 4294836224  ;;  %p13129_p8 = scmp.ne.s32.totalorder %s13120_s23, 0 }
  0x52   : > { %11434 = dma.done.wait (%p13129_p8), [#allocation6], 32  }
  0x53   : > { %11436 = vsyncadd (%p13129_p8), [#allocation6], 4294967264  ;;  %s8507_s22 = sshll.u32 %s11451_s18, 6  ;;  %p8508_p4 = scmp.ne.s32.totalorder %s11451_s18, 0 }
  0x54   : > { %p281_p3 = scmp.lt.s32.totalorder %s8507_s22, 127  ;;  %v11465_v0 = vmov (!%p8508_p4), 0.0  }
  0x55   : > { %301 = sbr.rel (%p8508_p4) target bundleno = 92 (0x5c), region = 48  ;;  %302 = vst [vmem:[#allocation2] sm:$0xf] (!%p8508_p4), %v11465_v0 }
  0x56   : > { %s13139_s22 = smov (!%p281_p3, %s8507_s22), 127 }
  0x57   : > { %s11646_s6 = scalar_lea.vmem %s13110_s0, %s13139_s22 }
  0x5c PF: > { %v9799_v1 = vld [vmem:[%s11632_s26 + $0x4] ss:$8 sps:$4 sm:$0xff]   ;;  %v9803_v3 = vld [vmem:[%s11632_s26] ss:$8 sps:$4 sm:$0xff]   ;;  %v9805_v5 = vld [vmem:[%s11632_s26 + $0x14] ss:$8 sps:$4 sm:$0xff]   ;;  %v1348_v39 = vlaneseq }
  0x5d   : > { %v9801_v2 = vld [vmem:[%s11632_s26 + $0x1004] ss:$8 sps:$4 sm:$0xff]   ;;  %6920 = vmatprep.subr.bf16.mxu1 %v9799_v1  ;;  %v9804_v4 = vld [vmem:[%s11632_s26 + $0x1000] ss:$8 sps:$4 sm:$0xff]   ;;  %v9807_v6 = vld [vmem:[%s11632_s26 + $0x1014] ss:$8 sps:$4 sm:$0xff]  }
  0x5e   : > { %7576 = vmatprep.subr.bf16.mxu0 %v9801_v2  ;;  %6921 = vmatpush1.bf16.msra.mxu1 %v9803_v3  ;;  %v9809_v7 = vld [vmem:[%s11632_s26 + $0x10] ss:$8 sps:$4 sm:$0xff]   ;;  %v9811_v9 = vld [vmem:[%s11632_s26 + $0x24] ss:$8 sps:$4 sm:$0xff]   ;;  %v9815_v11 = vld [vmem:[%s11632_s26 + $0x20] ss:$8 sps:$4 sm:$0xff]  }
  0x5f   : > { %7577 = vmatpush1.bf16.msra.mxu0 %v9804_v4  ;;  %6922 = vmatprep.subr.bf16.mxu1 %v9805_v5  ;;  %v9810_v8 = vld [vmem:[%s11632_s26 + $0x1010] ss:$8 sps:$4 sm:$0xff]   ;;  %v9813_v10 = vld [vmem:[%s11632_s26 + $0x1024] ss:$8 sps:$4 sm:$0xff]   ;;  %v9816_v12 = vld [vmem:[%s11632_s26 + $0x1020] ss:$8 sps:$4 sm:$0xff]  }
  0x60   : > { %7578 = vmatprep.subr.bf16.mxu0 %v9807_v6  ;;  %v9817_v13 = vld [vmem:[%s11632_s26 + $0x34] ss:$8 sps:$4 sm:$0xff]   ;;  %v9821_v15 = vld [vmem:[%s11632_s26 + $0x30] ss:$8 sps:$4 sm:$0xff]   ;;  %v9823_v17 = vld [vmem:[%s11632_s26 + $0x44] ss:$8 sps:$4 sm:$0xff]  }
  0x61   : > { %v9819_v14 = vld [vmem:[%s11632_s26 + $0x1034] ss:$8 sps:$4 sm:$0xff]   ;;  %v9822_v16 = vld [vmem:[%s11632_s26 + $0x1030] ss:$8 sps:$4 sm:$0xff]   ;;  %v9825_v18 = vld [vmem:[%s11632_s26 + $0x1044] ss:$8 sps:$4 sm:$0xff]  }
  0x62   : > { %6923 = vmatpush1.bf16.msra.mxu1 %v9809_v7  ;;  %v9827_v19 = vld [vmem:[%s11632_s26 + $0x40] ss:$8 sps:$4 sm:$0xff]   ;;  %v9829_v21 = vld [vmem:[%s11632_s26 + $0x54] ss:$8 sps:$4 sm:$0xff]   ;;  %v9833_v23 = vld [vmem:[%s11632_s26 + $0x50] ss:$8 sps:$4 sm:$0xff]  }
  0x63   : > { %7579 = vmatpush1.bf16.msra.mxu0 %v9810_v8  ;;  %6924 = vmatprep.subr.bf16.mxu1 %v9811_v9  ;;  %v9828_v20 = vld [vmem:[%s11632_s26 + $0x1040] ss:$8 sps:$4 sm:$0xff]   ;;  %v9831_v22 = vld [vmem:[%s11632_s26 + $0x1054] ss:$8 sps:$4 sm:$0xff]   ;;  %v9834_v24 = vld [vmem:[%s11632_s26 + $0x1050] ss:$8 sps:$4 sm:$0xff]  }
  0x64   : > { %7580 = vmatprep.subr.bf16.mxu0 %v9813_v10  ;;  %v9835_v25 = vld [vmem:[%s11632_s26 + $0x64] ss:$8 sps:$4 sm:$0xff]   ;;  %v9839_v27 = vld [vmem:[%s11632_s26 + $0x60] ss:$8 sps:$4 sm:$0xff]   ;;  %v9841_v29 = vld [vmem:[%s11632_s26 + $0x74] ss:$8 sps:$4 sm:$0xff]  }
  0x65   : > { %v9837_v26 = vld [vmem:[%s11632_s26 + $0x1064] ss:$8 sps:$4 sm:$0xff]   ;;  %v9840_v28 = vld [vmem:[%s11632_s26 + $0x1060] ss:$8 sps:$4 sm:$0xff]   ;;  %v9843_v30 = vld [vmem:[%s11632_s26 + $0x1074] ss:$8 sps:$4 sm:$0xff]  }
  0x66   : > { %6925 = vmatpush1.bf16.msra.mxu1 %v9815_v11  ;;  %v9845_v31 = vld [vmem:[%s11632_s26 + $0x70] ss:$8 sps:$4 sm:$0xff]   ;;  %v9847_v33 = vld [vmem:[%s11632_s26 + $0x84] ss:$8 sps:$4 sm:$0xff]   ;;  %v9851_v35 = vld [vmem:[%s11632_s26 + $0x80] ss:$8 sps:$4 sm:$0xff]  }
  0x67   : > { %7581 = vmatpush1.bf16.msra.mxu0 %v9816_v12  ;;  %6926 = vmatprep.subr.bf16.mxu1 %v9817_v13  ;;  %v9846_v32 = vld [vmem:[%s11632_s26 + $0x1070] ss:$8 sps:$4 sm:$0xff]   ;;  %v9849_v34 = vld [vmem:[%s11632_s26 + $0x1084] ss:$8 sps:$4 sm:$0xff]   ;;  %v9852_v36 = vld [vmem:[%s11632_s26 + $0x1080] ss:$8 sps:$4 sm:$0xff]  }
  0x68   : > { %7582 = vmatprep.subr.bf16.mxu0 %v9819_v14  ;;  %v11466_v37 = vmov 1966171168   ;;  %v9853_v40 = vld [vmem:[%s11632_s26 + $0x94] ss:$8 sps:$4 sm:$0xff]   ;;  %v9857_v42 = vld [vmem:[%s11632_s26 + $0x90] ss:$8 sps:$4 sm:$0xff]  }
  0x69   : > { %v1346_v38 = vunpack.c.l.s4 %v11466_v37  ;;  %v9855_v41 = vld [vmem:[%s11632_s26 + $0x1094] ss:$8 sps:$4 sm:$0xff]   ;;  %v11688_v44 = vshrl.u32 %v1348_v39, 7  ;;  %v9858_v45 = vld [vmem:[%s11632_s26 + $0x1090] ss:$8 sps:$4 sm:$0xff]   ;;  %p9533_p7 = scmp.ne.s32.totalorder %s11451_s18, 1 }
  0x6a   : > { %6927 = vmatpush1.bf16.msra.mxu1 %v9821_v15  ;;  %v9859_v46 = vld [vmem:[%s11632_s26 + $0xa4] ss:$8 sps:$4 sm:$0xff]   ;;  %v9863_v48 = vld [vmem:[%s11632_s26 + $0xa0] ss:$8 sps:$4 sm:$0xff]   ;;  %v9865_v51 = vld [vmem:[%s11632_s26 + $0xb4] ss:$8 sps:$4 sm:$0xff]  }
  0x6b   : > { %7583 = vmatpush1.bf16.msra.mxu0 %v9822_v16  ;;  %6928 = vmatprep.subr.bf16.mxu1 %v9823_v17  ;;  %v1347_v43 = vunpack.c.0.s8 %v1346_v38  ;;  %v9861_v47 = vld [vmem:[%s11632_s26 + $0x10a4] ss:$8 sps:$4 sm:$0xff]   ;;  %v9864_v49 = vld [vmem:[%s11632_s26 + $0x10a0] ss:$8 sps:$4 sm:$0xff]   ;;  %v9867_v52 = vld [vmem:[%s11632_s26 + $0x10b4] ss:$8 sps:$4 sm:$0xff]  }
  0x6c   : > { %7584 = vmatprep.subr.bf16.mxu0 %v9825_v18  ;;  %v11701_v53 = vld [vmem:[%s11646_s6] sm:$0xff]  ;;  %v9869_v54 = vld [vmem:[%s11632_s26 + $0xb0] ss:$8 sps:$4 sm:$0xff]   ;;  %v9871_v58 = vld [vmem:[%s11632_s26 + $0xc4] ss:$8 sps:$4 sm:$0xff]   ;;  %vm8384_vm0 = vcmask (!%p9533_p7), 25600  }
  0x6d   : > { %v11696_v50 = vsub.s32 %v1347_v43, %v11688_v44  ;;  %v9870_v56 = vld [vmem:[%s11632_s26 + $0x10b0] ss:$8 sps:$4 sm:$0xff]   ;;  %v11708_v57 = vld [vmem:[%s11646_s6 + $0x20] sm:$0xff]  ;;  %v9873_v59 = vld [vmem:[%s11632_s26 + $0x10c4] ss:$8 sps:$4 sm:$0xff]  }
  0x6e   : > { %6929 = vmatpush1.bf16.msra.mxu1 %v9827_v19  ;;  %v9875_v0 = vld [vmem:[%s11632_s26 + $0xc0] ss:$8 sps:$4 sm:$0xff]   ;;  %v9877_v2 = vld [vmem:[%s11632_s26 + $0xd4] ss:$8 sps:$4 sm:$0xff]   ;;  %v9881_v5 = vld [vmem:[%s11632_s26 + $0xd0] ss:$8 sps:$4 sm:$0xff]  }
  0x6f   : > { %7585 = vmatpush1.bf16.msra.mxu0 %v9828_v20  ;;  %6930 = vmatprep.subr.bf16.mxu1 %v9829_v21  ;;  %v1351_v55 = vrot.slane %v11701_v53, %v11696_v50  ;;  %v1547_v61 = vrot.slane %v11708_v57, %v11696_v50  ;;  %v9876_v1 = vld [vmem:[%s11632_s26 + $0x10c0] ss:$8 sps:$4 sm:$0xff]   ;;  %v9879_v3 = vld [vmem:[%s11632_s26 + $0x10d4] ss:$8 sps:$4 sm:$0xff]   ;;  %v9882_v6 = vld [vmem:[%s11632_s26 + $0x10d0] ss:$8 sps:$4 sm:$0xff]  }
  0x70   : > { %7586 = vmatprep.subr.bf16.mxu0 %v9831_v22  ;;  %v9883_v7 = vld [vmem:[%s11632_s26 + $0xe4] ss:$8 sps:$4 sm:$0xff]   ;;  %v9887_v9 = vld [vmem:[%s11632_s26 + $0xe0] ss:$8 sps:$4 sm:$0xff]   ;;  %v9889_v11 = vld [vmem:[%s11632_s26 + $0xf4] ss:$8 sps:$4 sm:$0xff]  }
  0x71   : > { %v1359_v60 = vcombine.high %v1351_v55, %v1351_v55  ;;  %v1555_v63 = vcombine.high %v1547_v61, %v1547_v61  ;;  %v9885_v8 = vld [vmem:[%s11632_s26 + $0x10e4] ss:$8 sps:$4 sm:$0xff]   ;;  %v9888_v10 = vld [vmem:[%s11632_s26 + $0x10e0] ss:$8 sps:$4 sm:$0xff]   ;;  %v9891_v12 = vld [vmem:[%s11632_s26 + $0x10f4] ss:$8 sps:$4 sm:$0xff]   ;;  %v11733_v17 = vrot.slane %v1351_v55, %v11696_v50  ;;  %v11736_v18 = vrot.slane %v1547_v61, %v11696_v50 }
  0x72   : > { %6931 = vmatpush1.bf16.msra.mxu1 %v9833_v23  ;;  %v9893_v13 = vld [vmem:[%s11632_s26 + $0xf0] ss:$8 sps:$4 sm:$0xff]   ;;  %v9898_v15 = vld [vmem:[%s11632_s26 + $0x104] ss:$8 sps:$4 sm:$0xff]   ;;  %v9896_v19 = vld [vmem:[%s11632_s26 + $0x100] ss:$8 sps:$4 sm:$0xff]  }
  0x73   : > { %7587 = vmatpush1.bf16.msra.mxu0 %v9834_v24  ;;  %6932 = vmatprep.subr.bf16.mxu1 %v9835_v25  ;;  %v1381_v62 = vrot.slane %v1359_v60, %v11696_v50  ;;  %v1577_v4 = vrot.slane %v1555_v63, %v11696_v50  ;;  %v9894_v14 = vld [vmem:[%s11632_s26 + $0x10f0] ss:$8 sps:$4 sm:$0xff]   ;;  %v9902_v16 = vld [vmem:[%s11632_s26 + $0x1104] ss:$8 sps:$4 sm:$0xff]   ;;  %v9900_v20 = vld [vmem:[%s11632_s26 + $0x1100] ss:$8 sps:$4 sm:$0xff]  }
  0x74   : > { %7588 = vmatprep.subr.bf16.mxu0 %v9837_v26  ;;  %v9905_v21 = vld [vmem:[%s11632_s26 + $0x114] ss:$8 sps:$4 sm:$0xff]   ;;  %v9903_v25 = vld [vmem:[%s11632_s26 + $0x110] ss:$8 sps:$4 sm:$0xff]   ;;  %v9921_v37 = vld [vmem:[%s11632_s26 + $0x140] ss:$8 sps:$4 sm:$0xff]  }
  0x75   : > { %6952 = vmatprep.mubr.bf16.mxu1 %v1381_v62  ;;  %7608 = vmatprep.mubr.bf16.mxu0 %v1577_v4  ;;  %v9908_v22 = vld [vmem:[%s11632_s26 + $0x1114] ss:$8 sps:$4 sm:$0xff]   ;;  %v1391_v23 = vcombine.high %v1381_v62, %v1381_v62  ;;  %v1587_v24 = vcombine.high %v1577_v4, %v1577_v4  ;;  %v9906_v26 = vld [vmem:[%s11632_s26 + $0x1110] ss:$8 sps:$4 sm:$0xff]   ;;  %v9924_v38 = vld [vmem:[%s11632_s26 + $0x1140] ss:$8 sps:$4 sm:$0xff]  }
  0x76   : > { %6933 = vmatpush1.bf16.msra.mxu1 %v9839_v27  ;;  %v9911_v27 = vld [vmem:[%s11632_s26 + $0x124] ss:$8 sps:$4 sm:$0xff]   ;;  %v9929_v39 = vld [vmem:[%s11632_s26 + $0x154] ss:$8 sps:$4 sm:$0xff]   ;;  %v9951_v61 = vld [vmem:[%s11632_s26 + $0x190] ss:$8 sps:$4 sm:$0xff]  }
  0x77   : > { %7589 = vmatpush1.bf16.msra.mxu0 %v9840_v28  ;;  %6934 = vmatprep.subr.bf16.mxu1 %v9841_v29  ;;  %v9914_v28 = vld [vmem:[%s11632_s26 + $0x1124] ss:$8 sps:$4 sm:$0xff]   ;;  %v9909_v29 = vld [vmem:[%s11632_s26 + $0x120] ss:$8 sps:$4 sm:$0xff]   ;;  %v9956_v60 = vld [vmem:[%s11632_s26 + $0x1194] ss:$8 sps:$4 sm:$0xff]  }
  0x78   : > { %7590 = vmatprep.subr.bf16.mxu0 %v9843_v30  ;;  %v9912_v30 = vld [vmem:[%s11632_s26 + $0x1120] ss:$8 sps:$4 sm:$0xff]   ;;  %v9935_v43 = vld [vmem:[%s11632_s26 + $0x164] ss:$8 sps:$4 sm:$0xff]   ;;  %v9954_v62 = vld [vmem:[%s11632_s26 + $0x1190] ss:$8 sps:$4 sm:$0xff]  }
  0x79   : > { %v9950_v55 = vld [vmem:[%s11632_s26 + $0x1184] ss:$8 sps:$4 sm:$0xff]   ;;  %v9968_v4 = vld [vmem:[%s11632_s26 + $0x11b4] ss:$8 sps:$4 sm:$0xff]  }
  0x7a   : > { %6935 = vmatpush1.bf16.msra.mxu1 %v9845_v31  ;;  %v9917_v31 = vld [vmem:[%s11632_s26 + $0x134] ss:$8 sps:$4 sm:$0xff]   ;;  %v9959_v63 = vld [vmem:[%s11632_s26 + $0x1a4] ss:$8 sps:$4 sm:$0xff]  }
  0x7b   : > { %7591 = vmatpush1.bf16.msra.mxu0 %v9846_v32  ;;  %6936 = vmatprep.subr.bf16.mxu1 %v9847_v33  ;;  %v9920_v32 = vld [vmem:[%s11632_s26 + $0x1134] ss:$8 sps:$4 sm:$0xff]   ;;  %v9915_v33 = vld [vmem:[%s11632_s26 + $0x130] ss:$8 sps:$4 sm:$0xff]  }
  0x7c   : > { %7592 = vmatprep.subr.bf16.mxu0 %v9849_v34  ;;  %v9918_v34 = vld [vmem:[%s11632_s26 + $0x1130] ss:$8 sps:$4 sm:$0xff]  }
  0x7e   : > { %6937 = vmatpush1.bf16.msra.mxu1 %v9851_v35  ;;  %v9923_v35 = vld [vmem:[%s11632_s26 + $0x144] ss:$8 sps:$4 sm:$0xff]  }
  0x7f   : > { %7593 = vmatpush1.bf16.msra.mxu0 %v9852_v36  ;;  %6938 = vmatprep.subr.bf16.mxu1 %v9853_v40  ;;  %v9926_v36 = vld [vmem:[%s11632_s26 + $0x1144] ss:$8 sps:$4 sm:$0xff]   ;;  %v9932_v40 = vld [vmem:[%s11632_s26 + $0x1154] ss:$8 sps:$4 sm:$0xff]  }
  0x80   : > { %7594 = vmatprep.subr.bf16.mxu0 %v9855_v41  ;;  %v9927_v41 = vld [vmem:[%s11632_s26 + $0x150] ss:$8 sps:$4 sm:$0xff]  }
  0x82   : > { %6939 = vmatpush1.bf16.msra.mxu1 %v9857_v42  ;;  %v9930_v42 = vld [vmem:[%s11632_s26 + $0x1150] ss:$8 sps:$4 sm:$0xff]  }
  0x83   : > { %7595 = vmatpush1.bf16.msra.mxu0 %v9858_v45  ;;  %6940 = vmatprep.subr.bf16.mxu1 %v9859_v46  ;;  %v9938_v45 = vld [vmem:[%s11632_s26 + $0x1164] ss:$8 sps:$4 sm:$0xff]   ;;  %v9933_v46 = vld [vmem:[%s11632_s26 + $0x160] ss:$8 sps:$4 sm:$0xff]  }
  0x84   : > { %7596 = vmatprep.subr.bf16.mxu0 %v9861_v47  ;;  %v9936_v47 = vld [vmem:[%s11632_s26 + $0x1160] ss:$8 sps:$4 sm:$0xff]  }
  0x86   : > { %6941 = vmatpush1.bf16.msra.mxu1 %v9863_v48  ;;  %v9941_v48 = vld [vmem:[%s11632_s26 + $0x174] ss:$8 sps:$4 sm:$0xff]  }
  0x87   : > { %7597 = vmatpush1.bf16.msra.mxu0 %v9864_v49  ;;  %6942 = vmatprep.subr.bf16.mxu1 %v9865_v51  ;;  %v9944_v49 = vld [vmem:[%s11632_s26 + $0x1174] ss:$8 sps:$4 sm:$0xff]   ;;  %v9939_v51 = vld [vmem:[%s11632_s26 + $0x170] ss:$8 sps:$4 sm:$0xff]  }
  0x88   : > { %7598 = vmatprep.subr.bf16.mxu0 %v9867_v52  ;;  %v9942_v52 = vld [vmem:[%s11632_s26 + $0x1170] ss:$8 sps:$4 sm:$0xff]  }
  0x8a   : > { %6943 = vmatpush1.bf16.msra.mxu1 %v9869_v54  ;;  %v9947_v54 = vld [vmem:[%s11632_s26 + $0x184] ss:$8 sps:$4 sm:$0xff]  }
  0x8b   : > { %7599 = vmatpush1.bf16.msra.mxu0 %v9870_v56  ;;  %6944 = vmatprep.subr.bf16.mxu1 %v9871_v58  ;;  %v9945_v56 = vld [vmem:[%s11632_s26 + $0x180] ss:$8 sps:$4 sm:$0xff]  }
  0x8c   : > { %7600 = vmatprep.subr.bf16.mxu0 %v9873_v59  ;;  %v9948_v58 = vld [vmem:[%s11632_s26 + $0x1180] ss:$8 sps:$4 sm:$0xff]   ;;  %v9953_v59 = vld [vmem:[%s11632_s26 + $0x194] ss:$8 sps:$4 sm:$0xff]  }
  0x8e   : > { %6945 = vmatpush1.bf16.msra.mxu1 %v9875_v0  ;;  %v9962_v0 = vld [vmem:[%s11632_s26 + $0x11a4] ss:$8 sps:$4 sm:$0xff]  }
  0x8f   : > { %7601 = vmatpush1.bf16.msra.mxu0 %v9876_v1  ;;  %6946 = vmatprep.subr.bf16.mxu1 %v9877_v2  ;;  %v9957_v1 = vld [vmem:[%s11632_s26 + $0x1a0] ss:$8 sps:$4 sm:$0xff]  }
  0x90   : > { %7602 = vmatprep.subr.bf16.mxu0 %v9879_v3  ;;  %v9960_v2 = vld [vmem:[%s11632_s26 + $0x11a0] ss:$8 sps:$4 sm:$0xff]   ;;  %v9965_v3 = vld [vmem:[%s11632_s26 + $0x1b4] ss:$8 sps:$4 sm:$0xff]  }
  0x92   : > { %6947 = vmatpush1.bf16.msra.mxu1 %v9881_v5  ;;  %v9963_v5 = vld [vmem:[%s11632_s26 + $0x1b0] ss:$8 sps:$4 sm:$0xff]  }
  0x93   : > { %7603 = vmatpush1.bf16.msra.mxu0 %v9882_v6  ;;  %6948 = vmatprep.subr.bf16.mxu1 %v9883_v7  ;;  %v9966_v6 = vld [vmem:[%s11632_s26 + $0x11b0] ss:$8 sps:$4 sm:$0xff]   ;;  %v9971_v7 = vld [vmem:[%s11632_s26 + $0x1c4] ss:$8 sps:$4 sm:$0xff]  }
  0x94   : > { %7604 = vmatprep.subr.bf16.mxu0 %v9885_v8  ;;  %v9974_v8 = vld [vmem:[%s11632_s26 + $0x11c4] ss:$8 sps:$4 sm:$0xff]  }
  0x96   : > { %6949 = vmatpush1.bf16.msra.mxu1 %v9887_v9  ;;  %v9969_v9 = vld [vmem:[%s11632_s26 + $0x1c0] ss:$8 sps:$4 sm:$0xff]  }
  0x97   : > { %7605 = vmatpush1.bf16.msra.mxu0 %v9888_v10  ;;  %6950 = vmatprep.subr.bf16.mxu1 %v9889_v11  ;;  %v9972_v10 = vld [vmem:[%s11632_s26 + $0x11c0] ss:$8 sps:$4 sm:$0xff]   ;;  %v9977_v11 = vld [vmem:[%s11632_s26 + $0x1d4] ss:$8 sps:$4 sm:$0xff]  }
  0x98   : > { %7606 = vmatprep.subr.bf16.mxu0 %v9891_v12  ;;  %v9980_v12 = vld [vmem:[%s11632_s26 + $0x11d4] ss:$8 sps:$4 sm:$0xff]  }
  0x9a   : > { %6951 = vmatpush1.bf16.msra.mxu1 %v9893_v13  ;;  %v9975_v13 = vld [vmem:[%s11632_s26 + $0x1d0] ss:$8 sps:$4 sm:$0xff]  }
  0x9b   : > { %7607 = vmatpush1.bf16.msra.mxu0 %v9894_v14  ;;  %6961 = vmatprep.subr.bf16.mxu1 %v9898_v15  ;;  %v9978_v14 = vld [vmem:[%s11632_s26 + $0x11d0] ss:$8 sps:$4 sm:$0xff]   ;;  %v9983_v15 = vld [vmem:[%s11632_s26 + $0x1e4] ss:$8 sps:$4 sm:$0xff]  }
  0x9c   : > { %7617 = vmatprep.subr.bf16.mxu0 %v9902_v16  ;;  %v9986_v16 = vld [vmem:[%s11632_s26 + $0x11e4] ss:$8 sps:$4 sm:$0xff]  }
  0x9d   : > { %6953 = vmatmul.mubr.bf16.vlgmr.msra.gmra.mrb[0].mxu1 %v11733_v17 }
  0x9e   : > { %7609 = vmatmul.mubr.bf16.vlgmr.msra.gmra.mrb[0].mxu0 %v11736_v18  ;;  %6962 = vmatpush1.bf16.msra.mxu1 %v9896_v19  ;;  %v1344_v19 = vcombine.high %v11701_v53, %v11701_v53  ;;  %v9987_v53 = vld [vmem:[%s11632_s26 + $0x1f0] ss:$8 sps:$4 sm:$0xff]  }
  0x9f   : > { %7618 = vmatpush1.bf16.msra.mxu0 %v9900_v20  ;;  %6963 = vmatprep.subr.bf16.mxu1 %v9905_v21  ;;  %v1540_v20 = vcombine.high %v11708_v57, %v11708_v57  ;;  %v9981_v21 = vld [vmem:[%s11632_s26 + $0x1e0] ss:$8 sps:$4 sm:$0xff]   ;;  %v9990_v57 = vld [vmem:[%s11632_s26 + $0x11f0] ss:$8 sps:$4 sm:$0xff]  }
  0xa0   : > { %7619 = vmatprep.subr.bf16.mxu0 %v9908_v22  ;;  %6993 = vmatprep.mubr.bf16.mxu1 %v1391_v23  ;;  %v9984_v22 = vld [vmem:[%s11632_s26 + $0x11e0] ss:$8 sps:$4 sm:$0xff]   ;;  %v9989_v23 = vld [vmem:[%s11632_s26 + $0x1f4] ss:$8 sps:$4 sm:$0xff]  }
  0xa1   : > { %7649 = vmatprep.mubr.bf16.mxu0 %v1587_v24  ;;  %v9992_v24 = vld [vmem:[%s11632_s26 + $0x11f4] ss:$8 sps:$4 sm:$0xff]  }
  0xa2   : > { %6964 = vmatpush1.bf16.msra.mxu1 %v9903_v25  ;;  %v11805_v25 = vrot.slane %v1344_v19, %v11696_v50  ;;  %v10059_v19 = vld [vmem:[%s11632_s26 + $0x2b0] ss:$8 sps:$4 sm:$0xff]  }
  0xa3   : > { %7620 = vmatpush1.bf16.msra.mxu0 %v9906_v26  ;;  %6965 = vmatprep.subr.bf16.mxu1 %v9911_v27  ;;  %v11808_v26 = vrot.slane %v1540_v20, %v11696_v50  ;;  %v9995_v27 = vld [vmem:[%s11632_s26 + $0x204] ss:$8 sps:$4 sm:$0xff]   ;;  %v10062_v20 = vld [vmem:[%s11632_s26 + $0x12b0] ss:$8 sps:$4 sm:$0xff]  }
  0xa4   : > { %7621 = vmatprep.subr.bf16.mxu0 %v9914_v28  ;;  %v9998_v28 = vld [vmem:[%s11632_s26 + $0x1204] ss:$8 sps:$4 sm:$0xff]  }
  0xa6   : > { %6966 = vmatpush1.bf16.msra.mxu1 %v9909_v29  ;;  %v1360_v29 = vcombine.high %v11805_v25, %v11805_v25 }
  0xa7   : > { %7622 = vmatpush1.bf16.msra.mxu0 %v9912_v30  ;;  %6967 = vmatprep.subr.bf16.mxu1 %v9917_v31  ;;  %v1556_v30 = vcombine.high %v11808_v26, %v11808_v26  ;;  %v1389_v31 = vcombine.high %v11733_v17, %v11733_v17 }
  0xa8   : > { %7623 = vmatprep.subr.bf16.mxu0 %v9920_v32  ;;  %v1585_v32 = vcombine.high %v11736_v18, %v11736_v18  ;;  %v9999_v18 = vld [vmem:[%s11632_s26 + $0x210] ss:$8 sps:$4 sm:$0xff]  }
  0xa9   : > { %v11830_v17 = vrot.slane %v1556_v30, %v11696_v50  ;;  %v10082_v30 = vld [vmem:[%s11632_s26 + $0x12e4] ss:$8 sps:$4 sm:$0xff]  }
  0xaa   : > { %6968 = vmatpush1.bf16.msra.mxu1 %v9915_v33  ;;  %v9993_v33 = vld [vmem:[%s11632_s26 + $0x200] ss:$8 sps:$4 sm:$0xff]  }
  0xab   : > { %7624 = vmatpush1.bf16.msra.mxu0 %v9918_v34  ;;  %6969 = vmatprep.subr.bf16.mxu1 %v9923_v35  ;;  %v9996_v34 = vld [vmem:[%s11632_s26 + $0x1200] ss:$8 sps:$4 sm:$0xff]   ;;  %v10001_v35 = vld [vmem:[%s11632_s26 + $0x214] ss:$8 sps:$4 sm:$0xff]  }
  0xac   : > { %7625 = vmatprep.subr.bf16.mxu0 %v9926_v36  ;;  %v10004_v36 = vld [vmem:[%s11632_s26 + $0x1214] ss:$8 sps:$4 sm:$0xff]  }
  0xae   : > { %6970 = vmatpush1.bf16.msra.mxu1 %v9921_v37  ;;  %v11827_v37 = vrot.slane %v1360_v29, %v11696_v50  ;;  %v10079_v29 = vld [vmem:[%s11632_s26 + $0x2e4] ss:$8 sps:$4 sm:$0xff]  }
  0xaf   : > { %7626 = vmatpush1.bf16.msra.mxu0 %v9924_v38  ;;  %6971 = vmatprep.subr.bf16.mxu1 %v9929_v39  ;;  %v10002_v38 = vld [vmem:[%s11632_s26 + $0x1210] ss:$8 sps:$4 sm:$0xff]   ;;  %v10007_v39 = vld [vmem:[%s11632_s26 + $0x224] ss:$8 sps:$4 sm:$0xff]  }
  0xb0   : > { %7627 = vmatprep.subr.bf16.mxu0 %v9932_v40  ;;  %v10010_v40 = vld [vmem:[%s11632_s26 + $0x1224] ss:$8 sps:$4 sm:$0xff]  }
  0xb2   : > { %6972 = vmatpush1.bf16.msra.mxu1 %v9927_v41  ;;  %v10005_v41 = vld [vmem:[%s11632_s26 + $0x220] ss:$8 sps:$4 sm:$0xff]  }
  0xb3   : > { %7628 = vmatpush1.bf16.msra.mxu0 %v9930_v42  ;;  %6973 = vmatprep.subr.bf16.mxu1 %v9935_v43  ;;  %v10008_v42 = vld [vmem:[%s11632_s26 + $0x1220] ss:$8 sps:$4 sm:$0xff]   ;;  %v10013_v43 = vld [vmem:[%s11632_s26 + $0x234] ss:$8 sps:$4 sm:$0xff]  }
  0xb4   : > { %7629 = vmatprep.subr.bf16.mxu0 %v9938_v45  ;;  %v10016_v45 = vld [vmem:[%s11632_s26 + $0x1234] ss:$8 sps:$4 sm:$0xff]  }
  0xb6   : > { %6974 = vmatpush1.bf16.msra.mxu1 %v9933_v46  ;;  %v10011_v46 = vld [vmem:[%s11632_s26 + $0x230] ss:$8 sps:$4 sm:$0xff]  }
  0xb7   : > { %7630 = vmatpush1.bf16.msra.mxu0 %v9936_v47  ;;  %6975 = vmatprep.subr.bf16.mxu1 %v9941_v48  ;;  %v10014_v47 = vld [vmem:[%s11632_s26 + $0x1230] ss:$8 sps:$4 sm:$0xff]   ;;  %v10019_v48 = vld [vmem:[%s11632_s26 + $0x244] ss:$8 sps:$4 sm:$0xff]  }
  0xb8   : > { %7631 = vmatprep.subr.bf16.mxu0 %v9944_v49  ;;  %v10022_v49 = vld [vmem:[%s11632_s26 + $0x1244] ss:$8 sps:$4 sm:$0xff]  }
  0xba   : > { %6976 = vmatpush1.bf16.msra.mxu1 %v9939_v51  ;;  %v10017_v51 = vld [vmem:[%s11632_s26 + $0x240] ss:$8 sps:$4 sm:$0xff]  }
  0xbb   : > { %7632 = vmatpush1.bf16.msra.mxu0 %v9942_v52  ;;  %6977 = vmatprep.subr.bf16.mxu1 %v9947_v54  ;;  %v10020_v52 = vld [vmem:[%s11632_s26 + $0x1240] ss:$8 sps:$4 sm:$0xff]   ;;  %v10025_v54 = vld [vmem:[%s11632_s26 + $0x254] ss:$8 sps:$4 sm:$0xff]  }
  0xbc   : > { %7633 = vmatprep.subr.bf16.mxu0 %v9950_v55  ;;  %v10028_v55 = vld [vmem:[%s11632_s26 + $0x1254] ss:$8 sps:$4 sm:$0xff]  }
  0xbe   : > { %6978 = vmatpush1.bf16.msra.mxu1 %v9945_v56  ;;  %v10023_v56 = vld [vmem:[%s11632_s26 + $0x250] ss:$8 sps:$4 sm:$0xff]  }
  0xbf   : > { %7634 = vmatpush1.bf16.msra.mxu0 %v9948_v58  ;;  %6979 = vmatprep.subr.bf16.mxu1 %v9953_v59  ;;  %v10026_v58 = vld [vmem:[%s11632_s26 + $0x1250] ss:$8 sps:$4 sm:$0xff]   ;;  %v10031_v59 = vld [vmem:[%s11632_s26 + $0x264] ss:$8 sps:$4 sm:$0xff]  }
  0xc0   : > { %7635 = vmatprep.subr.bf16.mxu0 %v9956_v60  ;;  %v10034_v60 = vld [vmem:[%s11632_s26 + $0x1264] ss:$8 sps:$4 sm:$0xff]  }
  0xc2   : > { %6980 = vmatpush1.bf16.msra.mxu1 %v9951_v61  ;;  %v10029_v61 = vld [vmem:[%s11632_s26 + $0x260] ss:$8 sps:$4 sm:$0xff]  }
  0xc3   : > { %7636 = vmatpush1.bf16.msra.mxu0 %v9954_v62  ;;  %6981 = vmatprep.subr.bf16.mxu1 %v9959_v63  ;;  %v10032_v62 = vld [vmem:[%s11632_s26 + $0x1260] ss:$8 sps:$4 sm:$0xff]   ;;  %v10037_v63 = vld [vmem:[%s11632_s26 + $0x274] ss:$8 sps:$4 sm:$0xff]  }
  0xc4   : > { %7637 = vmatprep.subr.bf16.mxu0 %v9962_v0  ;;  %v10040_v0 = vld [vmem:[%s11632_s26 + $0x1274] ss:$8 sps:$4 sm:$0xff]  }
  0xc6   : > { %6982 = vmatpush1.bf16.msra.mxu1 %v9957_v1  ;;  %v10035_v1 = vld [vmem:[%s11632_s26 + $0x270] ss:$8 sps:$4 sm:$0xff]  }
  0xc7   : > { %7638 = vmatpush1.bf16.msra.mxu0 %v9960_v2  ;;  %6983 = vmatprep.subr.bf16.mxu1 %v9965_v3  ;;  %v10038_v2 = vld [vmem:[%s11632_s26 + $0x1270] ss:$8 sps:$4 sm:$0xff]   ;;  %v10043_v3 = vld [vmem:[%s11632_s26 + $0x284] ss:$8 sps:$4 sm:$0xff]  }
  0xc8   : > { %7639 = vmatprep.subr.bf16.mxu0 %v9968_v4  ;;  %v10046_v4 = vld [vmem:[%s11632_s26 + $0x1284] ss:$8 sps:$4 sm:$0xff]  }
  0xca   : > { %6984 = vmatpush1.bf16.msra.mxu1 %v9963_v5  ;;  %v10041_v5 = vld [vmem:[%s11632_s26 + $0x280] ss:$8 sps:$4 sm:$0xff]  }
  0xcb   : > { %7640 = vmatpush1.bf16.msra.mxu0 %v9966_v6  ;;  %6985 = vmatprep.subr.bf16.mxu1 %v9971_v7  ;;  %v10044_v6 = vld [vmem:[%s11632_s26 + $0x1280] ss:$8 sps:$4 sm:$0xff]   ;;  %v10049_v7 = vld [vmem:[%s11632_s26 + $0x294] ss:$8 sps:$4 sm:$0xff]  }
  0xcc   : > { %7641 = vmatprep.subr.bf16.mxu0 %v9974_v8  ;;  %v10052_v8 = vld [vmem:[%s11632_s26 + $0x1294] ss:$8 sps:$4 sm:$0xff]  }
  0xce   : > { %6986 = vmatpush1.bf16.msra.mxu1 %v9969_v9  ;;  %v10047_v9 = vld [vmem:[%s11632_s26 + $0x290] ss:$8 sps:$4 sm:$0xff]  }
  0xcf   : > { %7642 = vmatpush1.bf16.msra.mxu0 %v9972_v10  ;;  %6987 = vmatprep.subr.bf16.mxu1 %v9977_v11  ;;  %v10050_v10 = vld [vmem:[%s11632_s26 + $0x1290] ss:$8 sps:$4 sm:$0xff]   ;;  %v10055_v11 = vld [vmem:[%s11632_s26 + $0x2a4] ss:$8 sps:$4 sm:$0xff]  }
  0xd0   : > { %7643 = vmatprep.subr.bf16.mxu0 %v9980_v12  ;;  %v10058_v12 = vld [vmem:[%s11632_s26 + $0x12a4] ss:$8 sps:$4 sm:$0xff]  }
  0xd2   : > { %6988 = vmatpush1.bf16.msra.mxu1 %v9975_v13  ;;  %v10053_v13 = vld [vmem:[%s11632_s26 + $0x2a0] ss:$8 sps:$4 sm:$0xff]  }
  0xd3   : > { %7644 = vmatpush1.bf16.msra.mxu0 %v9978_v14  ;;  %6989 = vmatprep.subr.bf16.mxu1 %v9983_v15  ;;  %v10056_v14 = vld [vmem:[%s11632_s26 + $0x12a0] ss:$8 sps:$4 sm:$0xff]   ;;  %v10061_v15 = vld [vmem:[%s11632_s26 + $0x2b4] ss:$8 sps:$4 sm:$0xff]  }
  0xd4   : > { %7645 = vmatprep.subr.bf16.mxu0 %v9986_v16  ;;  %v10064_v16 = vld [vmem:[%s11632_s26 + $0x12b4] ss:$8 sps:$4 sm:$0xff]  }
  0xd6   : > { %6990 = vmatpush1.bf16.msra.mxu1 %v9981_v21  ;;  %v10067_v21 = vld [vmem:[%s11632_s26 + $0x2c4] ss:$8 sps:$4 sm:$0xff]  }
  0xd7   : > { %7646 = vmatpush1.bf16.msra.mxu0 %v9984_v22  ;;  %6991 = vmatprep.subr.bf16.mxu1 %v9989_v23  ;;  %v10070_v22 = vld [vmem:[%s11632_s26 + $0x12c4] ss:$8 sps:$4 sm:$0xff]   ;;  %v10065_v23 = vld [vmem:[%s11632_s26 + $0x2c0] ss:$8 sps:$4 sm:$0xff]  }
  0xd8   : > { %7647 = vmatprep.subr.bf16.mxu0 %v9992_v24  ;;  %v10068_v24 = vld [vmem:[%s11632_s26 + $0x12c0] ss:$8 sps:$4 sm:$0xff]  }
  0xda   : > { %6992 = vmatpush1.bf16.msra.mxu1 %v9987_v53  ;;  %v10073_v53 = vld [vmem:[%s11632_s26 + $0x2d4] ss:$8 sps:$4 sm:$0xff]  }
  0xdb   : > { %7648 = vmatpush1.bf16.msra.mxu0 %v9990_v57  ;;  %7002 = vmatprep.subr.bf16.mxu1 %v9995_v27  ;;  %v10076_v57 = vld [vmem:[%s11632_s26 + $0x12d4] ss:$8 sps:$4 sm:$0xff]   ;;  %v10071_v27 = vld [vmem:[%s11632_s26 + $0x2d0] ss:$8 sps:$4 sm:$0xff]  }
  0xdc   : > { %7658 = vmatprep.subr.bf16.mxu0 %v9998_v28  ;;  %v10074_v28 = vld [vmem:[%s11632_s26 + $0x12d0] ss:$8 sps:$4 sm:$0xff]  }
  0xdd   : > { %6994 = vmatmul.mubr.bf16.vlgmr.msra.gmra.mrb[0].mxu1 %v1389_v31  ;;  %v10077_v31 = vld [vmem:[%s11632_s26 + $0x2e0] ss:$8 sps:$4 sm:$0xff]  }
  0xde   : > { %7650 = vmatmul.mubr.bf16.vlgmr.msra.gmra.mrb[0].mxu0 %v1585_v32  ;;  %7003 = vmatpush1.bf16.msra.mxu1 %v9993_v33  ;;  %v10080_v32 = vld [vmem:[%s11632_s26 + $0x12e0] ss:$8 sps:$4 sm:$0xff]   ;;  %v10085_v33 = vld [vmem:[%s11632_s26 + $0x2f4] ss:$8 sps:$4 sm:$0xff]  }
  0xdf   : > { %7659 = vmatpush1.bf16.msra.mxu0 %v9996_v34  ;;  %7004 = vmatprep.subr.bf16.mxu1 %v10001_v35  ;;  %v10088_v34 = vld [vmem:[%s11632_s26 + $0x12f4] ss:$8 sps:$4 sm:$0xff]   ;;  %v10083_v35 = vld [vmem:[%s11632_s26 + $0x2f0] ss:$8 sps:$4 sm:$0xff]  }
  0xe0   : > { %7660 = vmatprep.subr.bf16.mxu0 %v10004_v36  ;;  %7034 = vmatprep.mubr.bf16.mxu1 %v11827_v37  ;;  %v10086_v36 = vld [vmem:[%s11632_s26 + $0x12f0] ss:$8 sps:$4 sm:$0xff]  }
  0xe1   : > { %7690 = vmatprep.mubr.bf16.mxu0 %v11830_v17 }
  0xe2   : > { %7005 = vmatpush1.bf16.msra.mxu1 %v9999_v18  ;;  %v10091_v18 = vld [vmem:[%s11632_s26 + $0x304] ss:$8 sps:$4 sm:$0xff]  }
  0xe3   : > { %7661 = vmatpush1.bf16.msra.mxu0 %v10002_v38  ;;  %7006 = vmatprep.subr.bf16.mxu1 %v10007_v39  ;;  %v10094_v38 = vld [vmem:[%s11632_s26 + $0x1304] ss:$8 sps:$4 sm:$0xff]   ;;  %v11896_v39 = vrot.slane %v11805_v25, %v11696_v50  ;;  %v1392_v25 = vcombine.high %v11827_v37, %v11827_v37 }
  0xe4   : > { %7662 = vmatprep.subr.bf16.mxu0 %v10010_v40  ;;  %v11900_v40 = vrot.slane %v11808_v26, %v11696_v50  ;;  %v10095_v26 = vld [vmem:[%s11632_s26 + $0x310] ss:$8 sps:$4 sm:$0xff]   ;;  %v10103_v37 = vld [vmem:[%s11632_s26 + $0x324] ss:$8 sps:$4 sm:$0xff]  }
  0xe6   : > { %7007 = vmatpush1.bf16.msra.mxu1 %v10005_v41  ;;  %v10089_v41 = vld [vmem:[%s11632_s26 + $0x300] ss:$8 sps:$4 sm:$0xff]  }
  0xe7   : > { %7663 = vmatpush1.bf16.msra.mxu0 %v10008_v42  ;;  %7008 = vmatprep.subr.bf16.mxu1 %v10013_v43  ;;  %v10092_v42 = vld [vmem:[%s11632_s26 + $0x1300] ss:$8 sps:$4 sm:$0xff]   ;;  %v10097_v43 = vld [vmem:[%s11632_s26 + $0x314] ss:$8 sps:$4 sm:$0xff]  }
  0xe8   : > { %7664 = vmatprep.subr.bf16.mxu0 %v10016_v45  ;;  %v10100_v45 = vld [vmem:[%s11632_s26 + $0x1314] ss:$8 sps:$4 sm:$0xff]  }
  0xea   : > { %7009 = vmatpush1.bf16.msra.mxu1 %v10011_v46  ;;  %v1588_v46 = vcombine.high %v11830_v17, %v11830_v17  ;;  %v10101_v17 = vld [vmem:[%s11632_s26 + $0x320] ss:$8 sps:$4 sm:$0xff]  }
  0xeb   : > { %7665 = vmatpush1.bf16.msra.mxu0 %v10014_v47  ;;  %7010 = vmatprep.subr.bf16.mxu1 %v10019_v48  ;;  %v10098_v47 = vld [vmem:[%s11632_s26 + $0x1310] ss:$8 sps:$4 sm:$0xff]   ;;  %v10106_v48 = vld [vmem:[%s11632_s26 + $0x1324] ss:$8 sps:$4 sm:$0xff]  }
  0xec   : > { %7666 = vmatprep.subr.bf16.mxu0 %v10022_v49  ;;  %v10104_v49 = vld [vmem:[%s11632_s26 + $0x1320] ss:$8 sps:$4 sm:$0xff]  }
  0xee   : > { %7011 = vmatpush1.bf16.msra.mxu1 %v10017_v51  ;;  %v10109_v51 = vld [vmem:[%s11632_s26 + $0x334] ss:$8 sps:$4 sm:$0xff]  }
  0xef   : > { %7667 = vmatpush1.bf16.msra.mxu0 %v10020_v52  ;;  %7012 = vmatprep.subr.bf16.mxu1 %v10025_v54  ;;  %v10112_v52 = vld [vmem:[%s11632_s26 + $0x1334] ss:$8 sps:$4 sm:$0xff]   ;;  %v10107_v54 = vld [vmem:[%s11632_s26 + $0x330] ss:$8 sps:$4 sm:$0xff]  }
  0xf0   : > { %7668 = vmatprep.subr.bf16.mxu0 %v10028_v55  ;;  %v10110_v55 = vld [vmem:[%s11632_s26 + $0x1330] ss:$8 sps:$4 sm:$0xff]  }
  0xf2   : > { %7013 = vmatpush1.bf16.msra.mxu1 %v10023_v56  ;;  %v10115_v56 = vld [vmem:[%s11632_s26 + $0x344] ss:$8 sps:$4 sm:$0xff]  }
  0xf3   : > { %7669 = vmatpush1.bf16.msra.mxu0 %v10026_v58  ;;  %7014 = vmatprep.subr.bf16.mxu1 %v10031_v59  ;;  %v10118_v58 = vld [vmem:[%s11632_s26 + $0x1344] ss:$8 sps:$4 sm:$0xff]   ;;  %v10113_v59 = vld [vmem:[%s11632_s26 + $0x340] ss:$8 sps:$4 sm:$0xff]  }
  0xf4   : > { %7670 = vmatprep.subr.bf16.mxu0 %v10034_v60  ;;  %v10116_v60 = vld [vmem:[%s11632_s26 + $0x1340] ss:$8 sps:$4 sm:$0xff]  }
  0xf6   : > { %7015 = vmatpush1.bf16.msra.mxu1 %v10029_v61  ;;  %v10121_v61 = vld [vmem:[%s11632_s26 + $0x354] ss:$8 sps:$4 sm:$0xff]  }
  0xf7   : > { %7671 = vmatpush1.bf16.msra.mxu0 %v10032_v62  ;;  %7016 = vmatprep.subr.bf16.mxu1 %v10037_v63  ;;  %v10124_v62 = vld [vmem:[%s11632_s26 + $0x1354] ss:$8 sps:$4 sm:$0xff]   ;;  %v10119_v63 = vld [vmem:[%s11632_s26 + $0x350] ss:$8 sps:$4 sm:$0xff]  }
  0xf8   : > { %7672 = vmatprep.subr.bf16.mxu0 %v10040_v0  ;;  %v10122_v0 = vld [vmem:[%s11632_s26 + $0x1350] ss:$8 sps:$4 sm:$0xff]  }
  0xfa   : > { %7017 = vmatpush1.bf16.msra.mxu1 %v10035_v1  ;;  %v10127_v1 = vld [vmem:[%s11632_s26 + $0x364] ss:$8 sps:$4 sm:$0xff]  }
  0xfb   : > { %7673 = vmatpush1.bf16.msra.mxu0 %v10038_v2  ;;  %7018 = vmatprep.subr.bf16.mxu1 %v10043_v3  ;;  %v10130_v2 = vld [vmem:[%s11632_s26 + $0x1364] ss:$8 sps:$4 sm:$0xff]   ;;  %v10125_v3 = vld [vmem:[%s11632_s26 + $0x360] ss:$8 sps:$4 sm:$0xff]  }
  0xfc   : > { %7674 = vmatprep.subr.bf16.mxu0 %v10046_v4  ;;  %v10128_v4 = vld [vmem:[%s11632_s26 + $0x1360] ss:$8 sps:$4 sm:$0xff]  }
  0xfe   : > { %7019 = vmatpush1.bf16.msra.mxu1 %v10041_v5  ;;  %v10133_v5 = vld [vmem:[%s11632_s26 + $0x374] ss:$8 sps:$4 sm:$0xff]  }
  0xff   : > { %7675 = vmatpush1.bf16.msra.mxu0 %v10044_v6  ;;  %7020 = vmatprep.subr.bf16.mxu1 %v10049_v7  ;;  %v10136_v6 = vld [vmem:[%s11632_s26 + $0x1374] ss:$8 sps:$4 sm:$0xff]   ;;  %v10131_v7 = vld [vmem:[%s11632_s26 + $0x370] ss:$8 sps:$4 sm:$0xff]  }
 0x100   : > { %7676 = vmatprep.subr.bf16.mxu0 %v10052_v8  ;;  %v10134_v8 = vld [vmem:[%s11632_s26 + $0x1370] ss:$8 sps:$4 sm:$0xff]  }
 0x102   : > { %7021 = vmatpush1.bf16.msra.mxu1 %v10047_v9  ;;  %v10139_v9 = vld [vmem:[%s11632_s26 + $0x384] ss:$8 sps:$4 sm:$0xff]  }
 0x103   : > { %7677 = vmatpush1.bf16.msra.mxu0 %v10050_v10  ;;  %7022 = vmatprep.subr.bf16.mxu1 %v10055_v11  ;;  %v10142_v10 = vld [vmem:[%s11632_s26 + $0x1384] ss:$8 sps:$4 sm:$0xff]   ;;  %v10137_v11 = vld [vmem:[%s11632_s26 + $0x380] ss:$8 sps:$4 sm:$0xff]  }
 0x104   : > { %7678 = vmatprep.subr.bf16.mxu0 %v10058_v12  ;;  %v10140_v12 = vld [vmem:[%s11632_s26 + $0x1380] ss:$8 sps:$4 sm:$0xff]  }
 0x106   : > { %7023 = vmatpush1.bf16.msra.mxu1 %v10053_v13  ;;  %v10145_v13 = vld [vmem:[%s11632_s26 + $0x394] ss:$8 sps:$4 sm:$0xff]  }
 0x107   : > { %7679 = vmatpush1.bf16.msra.mxu0 %v10056_v14  ;;  %7024 = vmatprep.subr.bf16.mxu1 %v10061_v15  ;;  %v10148_v14 = vld [vmem:[%s11632_s26 + $0x1394] ss:$8 sps:$4 sm:$0xff]   ;;  %v10143_v15 = vld [vmem:[%s11632_s26 + $0x390] ss:$8 sps:$4 sm:$0xff]  }
 0x108   : > { %7680 = vmatprep.subr.bf16.mxu0 %v10064_v16  ;;  %v10146_v16 = vld [vmem:[%s11632_s26 + $0x1390] ss:$8 sps:$4 sm:$0xff]  }
 0x10a   : > { %7025 = vmatpush1.bf16.msra.mxu1 %v10059_v19  ;;  %v10151_v19 = vld [vmem:[%s11632_s26 + $0x3a4] ss:$8 sps:$4 sm:$0xff]  }
 0x10b   : > { %7681 = vmatpush1.bf16.msra.mxu0 %v10062_v20  ;;  %7026 = vmatprep.subr.bf16.mxu1 %v10067_v21  ;;  %v10154_v20 = vld [vmem:[%s11632_s26 + $0x13a4] ss:$8 sps:$4 sm:$0xff]   ;;  %v10149_v21 = vld [vmem:[%s11632_s26 + $0x3a0] ss:$8 sps:$4 sm:$0xff]  }
 0x10c   : > { %7682 = vmatprep.subr.bf16.mxu0 %v10070_v22  ;;  %v10152_v22 = vld [vmem:[%s11632_s26 + $0x13a0] ss:$8 sps:$4 sm:$0xff]  }
 0x10e   : > { %7027 = vmatpush1.bf16.msra.mxu1 %v10065_v23  ;;  %v10157_v23 = vld [vmem:[%s11632_s26 + $0x3b4] ss:$8 sps:$4 sm:$0xff]  }
 0x10f   : > { %7683 = vmatpush1.bf16.msra.mxu0 %v10068_v24  ;;  %7028 = vmatprep.subr.bf16.mxu1 %v10073_v53  ;;  %v10160_v24 = vld [vmem:[%s11632_s26 + $0x13b4] ss:$8 sps:$4 sm:$0xff]   ;;  %v10155_v53 = vld [vmem:[%s11632_s26 + $0x3b0] ss:$8 sps:$4 sm:$0xff]  }
 0x110   : > { %7684 = vmatprep.subr.bf16.mxu0 %v10076_v57  ;;  %v10158_v57 = vld [vmem:[%s11632_s26 + $0x13b0] ss:$8 sps:$4 sm:$0xff]  }
 0x112   : > { %7029 = vmatpush1.bf16.msra.mxu1 %v10071_v27  ;;  %v10163_v27 = vld [vmem:[%s11632_s26 + $0x3c4] ss:$8 sps:$4 sm:$0xff]  }
 0x113   : > { %7685 = vmatpush1.bf16.msra.mxu0 %v10074_v28  ;;  %7030 = vmatprep.subr.bf16.mxu1 %v10079_v29  ;;  %v10166_v28 = vld [vmem:[%s11632_s26 + $0x13c4] ss:$8 sps:$4 sm:$0xff]   ;;  %v10161_v29 = vld [vmem:[%s11632_s26 + $0x3c0] ss:$8 sps:$4 sm:$0xff]  }
 0x114   : > { %7686 = vmatprep.subr.bf16.mxu0 %v10082_v30  ;;  %v10164_v30 = vld [vmem:[%s11632_s26 + $0x13c0] ss:$8 sps:$4 sm:$0xff]  }
 0x116   : > { %7031 = vmatpush1.bf16.msra.mxu1 %v10077_v31  ;;  %v10169_v31 = vld [vmem:[%s11632_s26 + $0x3d4] ss:$8 sps:$4 sm:$0xff]  }
 0x117   : > { %7687 = vmatpush1.bf16.msra.mxu0 %v10080_v32  ;;  %7032 = vmatprep.subr.bf16.mxu1 %v10085_v33  ;;  %v10172_v32 = vld [vmem:[%s11632_s26 + $0x13d4] ss:$8 sps:$4 sm:$0xff]   ;;  %v10167_v33 = vld [vmem:[%s11632_s26 + $0x3d0] ss:$8 sps:$4 sm:$0xff]  }
 0x118   : > { %7688 = vmatprep.subr.bf16.mxu0 %v10088_v34  ;;  %v10170_v34 = vld [vmem:[%s11632_s26 + $0x13d0] ss:$8 sps:$4 sm:$0xff]  }
 0x11a   : > { %7033 = vmatpush1.bf16.msra.mxu1 %v10083_v35  ;;  %v10175_v35 = vld [vmem:[%s11632_s26 + $0x3e4] ss:$8 sps:$4 sm:$0xff]  }
 0x11b   : > { %7689 = vmatpush1.bf16.msra.mxu0 %v10086_v36  ;;  %7043 = vmatprep.subr.bf16.mxu1 %v10091_v18  ;;  %v10178_v36 = vld [vmem:[%s11632_s26 + $0x13e4] ss:$8 sps:$4 sm:$0xff]   ;;  %v10173_v18 = vld [vmem:[%s11632_s26 + $0x3e0] ss:$8 sps:$4 sm:$0xff]  }
 0x11c   : > { %7699 = vmatprep.subr.bf16.mxu0 %v10094_v38  ;;  %v10176_v38 = vld [vmem:[%s11632_s26 + $0x13e0] ss:$8 sps:$4 sm:$0xff]  }
 0x11d   : > { %7035 = vmatmul.mubr.bf16.vlgmr.msra.gmra.mrb[0].mxu1 %v11896_v39 }
 0x11e   : > { %7691 = vmatmul.mubr.bf16.vlgmr.msra.gmra.mrb[0].mxu0 %v11900_v40  ;;  %7044 = vmatpush1.bf16.msra.mxu1 %v10089_v41  ;;  %v11967_v41 = vld.sshfl [vmem:[%s11646_s6 + $0x8] sm:$0xff pattern:$0x75316420] }
 0x11f   : > { %7700 = vmatpush1.bf16.msra.mxu0 %v10092_v42  ;;  %7045 = vmatprep.subr.bf16.mxu1 %v10097_v43  ;;  %v11970_v42 = vld.sshfl [vmem:[%s11646_s6 + $0x28] sm:$0xff pattern:$0x75316420]  ;;  %v10181_v43 = vld [vmem:[%s11632_s26 + $0x3f4] ss:$8 sps:$4 sm:$0xff]  }
 0x120   : > { %7701 = vmatprep.subr.bf16.mxu0 %v10100_v45  ;;  %7075 = vmatprep.mubr.bf16.mxu1 %v1392_v25  ;;  %v10184_v45 = vld [vmem:[%s11632_s26 + $0x13f4] ss:$8 sps:$4 sm:$0xff]   ;;  %v10179_v25 = vld [vmem:[%s11632_s26 + $0x3f0] ss:$8 sps:$4 sm:$0xff]  }
 0x121   : > { %7731 = vmatprep.mubr.bf16.mxu0 %v1588_v46  ;;  %v10182_v46 = vld [vmem:[%s11632_s26 + $0x13f0] ss:$8 sps:$4 sm:$0xff]  }
 0x122   : > { %7046 = vmatpush1.bf16.msra.mxu1 %v10095_v26  ;;  %v10187_v26 = vld [vmem:[%s11632_s26 + $0x404] ss:$8 sps:$4 sm:$0xff]  }
 0x123   : > { %7702 = vmatpush1.bf16.msra.mxu0 %v10098_v47  ;;  %7047 = vmatprep.subr.bf16.mxu1 %v10103_v37  ;;  %v10190_v47 = vld [vmem:[%s11632_s26 + $0x1404] ss:$8 sps:$4 sm:$0xff]   ;;  %v1408_v37 = vcombine.high %v11967_v41, %v11967_v41 }
 0x124   : > { %7703 = vmatprep.subr.bf16.mxu0 %v10106_v48  ;;  %v1604_v48 = vcombine.high %v11970_v42, %v11970_v42 }
 0x126   : > { %7048 = vmatpush1.bf16.msra.mxu1 %v10101_v17  ;;  %v10185_v17 = vld [vmem:[%s11632_s26 + $0x400] ss:$8 sps:$4 sm:$0xff]  }
 0x127   : > { %7704 = vmatpush1.bf16.msra.mxu0 %v10104_v49  ;;  %7049 = vmatprep.subr.bf16.mxu1 %v10109_v51  ;;  %v10188_v49 = vld [vmem:[%s11632_s26 + $0x1400] ss:$8 sps:$4 sm:$0xff]   ;;  %v1390_v51 = vcombine.high %v11896_v39, %v11896_v39  ;;  %v10191_v39 = vld [vmem:[%s11632_s26 + $0x410] ss:$8 sps:$4 sm:$0xff]  }
 0x128   : > { %7705 = vmatprep.subr.bf16.mxu0 %v10112_v52  ;;  %v1586_v52 = vcombine.high %v11900_v40, %v11900_v40  ;;  %v10194_v40 = vld [vmem:[%s11632_s26 + $0x1410] ss:$8 sps:$4 sm:$0xff]  }
 0x12a   : > { %7050 = vmatpush1.bf16.msra.mxu1 %v10107_v54  ;;  %v10193_v54 = vld [vmem:[%s11632_s26 + $0x414] ss:$8 sps:$4 sm:$0xff]  }
 0x12b   : > { %7706 = vmatpush1.bf16.msra.mxu0 %v10110_v55  ;;  %7051 = vmatprep.subr.bf16.mxu1 %v10115_v56  ;;  %v10196_v55 = vld [vmem:[%s11632_s26 + $0x1414] ss:$8 sps:$4 sm:$0xff]   ;;  %v11991_v56 = vrot.slane %v1408_v37, %v11696_v50  ;;  %v10271_v37 = vld [vmem:[%s11632_s26 + $0x4e4] ss:$8 sps:$4 sm:$0xff]  }
 0x12c   : > { %7707 = vmatprep.subr.bf16.mxu0 %v10118_v58  ;;  %v11994_v58 = vrot.slane %v1604_v48, %v11696_v50  ;;  %v10274_v48 = vld [vmem:[%s11632_s26 + $0x14e4] ss:$8 sps:$4 sm:$0xff]  }
 0x12e   : > { %7052 = vmatpush1.bf16.msra.mxu1 %v10113_v59  ;;  %v10199_v59 = vld [vmem:[%s11632_s26 + $0x424] ss:$8 sps:$4 sm:$0xff]  }
 0x12f   : > { %7708 = vmatpush1.bf16.msra.mxu0 %v10116_v60  ;;  %7053 = vmatprep.subr.bf16.mxu1 %v10121_v61  ;;  %v10202_v60 = vld [vmem:[%s11632_s26 + $0x1424] ss:$8 sps:$4 sm:$0xff]   ;;  %v10197_v61 = vld [vmem:[%s11632_s26 + $0x420] ss:$8 sps:$4 sm:$0xff]  }
 0x130   : > { %7709 = vmatprep.subr.bf16.mxu0 %v10124_v62  ;;  %v10200_v62 = vld [vmem:[%s11632_s26 + $0x1420] ss:$8 sps:$4 sm:$0xff]  }
 0x132   : > { %7054 = vmatpush1.bf16.msra.mxu1 %v10119_v63  ;;  %v10205_v63 = vld [vmem:[%s11632_s26 + $0x434] ss:$8 sps:$4 sm:$0xff]  }
 0x133   : > { %7710 = vmatpush1.bf16.msra.mxu0 %v10122_v0  ;;  %7055 = vmatprep.subr.bf16.mxu1 %v10127_v1  ;;  %v10208_v0 = vld [vmem:[%s11632_s26 + $0x1434] ss:$8 sps:$4 sm:$0xff]   ;;  %v10203_v1 = vld [vmem:[%s11632_s26 + $0x430] ss:$8 sps:$4 sm:$0xff]  }
 0x134   : > { %7711 = vmatprep.subr.bf16.mxu0 %v10130_v2  ;;  %v10206_v2 = vld [vmem:[%s11632_s26 + $0x1430] ss:$8 sps:$4 sm:$0xff]  }
 0x136   : > { %7056 = vmatpush1.bf16.msra.mxu1 %v10125_v3  ;;  %v10211_v3 = vld [vmem:[%s11632_s26 + $0x444] ss:$8 sps:$4 sm:$0xff]  }
 0x137   : > { %7712 = vmatpush1.bf16.msra.mxu0 %v10128_v4  ;;  %7057 = vmatprep.subr.bf16.mxu1 %v10133_v5  ;;  %v10214_v4 = vld [vmem:[%s11632_s26 + $0x1444] ss:$8 sps:$4 sm:$0xff]   ;;  %v10209_v5 = vld [vmem:[%s11632_s26 + $0x440] ss:$8 sps:$4 sm:$0xff]  }
 0x138   : > { %7713 = vmatprep.subr.bf16.mxu0 %v10136_v6  ;;  %v10212_v6 = vld [vmem:[%s11632_s26 + $0x1440] ss:$8 sps:$4 sm:$0xff]  }
 0x13a   : > { %7058 = vmatpush1.bf16.msra.mxu1 %v10131_v7  ;;  %v10217_v7 = vld [vmem:[%s11632_s26 + $0x454] ss:$8 sps:$4 sm:$0xff]  }
 0x13b   : > { %7714 = vmatpush1.bf16.msra.mxu0 %v10134_v8  ;;  %7059 = vmatprep.subr.bf16.mxu1 %v10139_v9  ;;  %v10220_v8 = vld [vmem:[%s11632_s26 + $0x1454] ss:$8 sps:$4 sm:$0xff]   ;;  %v10215_v9 = vld [vmem:[%s11632_s26 + $0x450] ss:$8 sps:$4 sm:$0xff]  }
 0x13c   : > { %7715 = vmatprep.subr.bf16.mxu0 %v10142_v10  ;;  %v10218_v10 = vld [vmem:[%s11632_s26 + $0x1450] ss:$8 sps:$4 sm:$0xff]  }
 0x13e   : > { %7060 = vmatpush1.bf16.msra.mxu1 %v10137_v11  ;;  %v10223_v11 = vld [vmem:[%s11632_s26 + $0x464] ss:$8 sps:$4 sm:$0xff]  }
 0x13f   : > { %7716 = vmatpush1.bf16.msra.mxu0 %v10140_v12  ;;  %7061 = vmatprep.subr.bf16.mxu1 %v10145_v13  ;;  %v10226_v12 = vld [vmem:[%s11632_s26 + $0x1464] ss:$8 sps:$4 sm:$0xff]   ;;  %v10221_v13 = vld [vmem:[%s11632_s26 + $0x460] ss:$8 sps:$4 sm:$0xff]  }
 0x140   : > { %7717 = vmatprep.subr.bf16.mxu0 %v10148_v14  ;;  %v10224_v14 = vld [vmem:[%s11632_s26 + $0x1460] ss:$8 sps:$4 sm:$0xff]  }
 0x142   : > { %7062 = vmatpush1.bf16.msra.mxu1 %v10143_v15  ;;  %v10229_v15 = vld [vmem:[%s11632_s26 + $0x474] ss:$8 sps:$4 sm:$0xff]  }
 0x143   : > { %7718 = vmatpush1.bf16.msra.mxu0 %v10146_v16  ;;  %7063 = vmatprep.subr.bf16.mxu1 %v10151_v19  ;;  %v10232_v16 = vld [vmem:[%s11632_s26 + $0x1474] ss:$8 sps:$4 sm:$0xff]   ;;  %v10227_v19 = vld [vmem:[%s11632_s26 + $0x470] ss:$8 sps:$4 sm:$0xff]  }
 0x144   : > { %7719 = vmatprep.subr.bf16.mxu0 %v10154_v20  ;;  %v10230_v20 = vld [vmem:[%s11632_s26 + $0x1470] ss:$8 sps:$4 sm:$0xff]  }
 0x146   : > { %7064 = vmatpush1.bf16.msra.mxu1 %v10149_v21  ;;  %v10235_v21 = vld [vmem:[%s11632_s26 + $0x484] ss:$8 sps:$4 sm:$0xff]  }
 0x147   : > { %7720 = vmatpush1.bf16.msra.mxu0 %v10152_v22  ;;  %7065 = vmatprep.subr.bf16.mxu1 %v10157_v23  ;;  %v10238_v22 = vld [vmem:[%s11632_s26 + $0x1484] ss:$8 sps:$4 sm:$0xff]   ;;  %v10233_v23 = vld [vmem:[%s11632_s26 + $0x480] ss:$8 sps:$4 sm:$0xff]  }
 0x148   : > { %7721 = vmatprep.subr.bf16.mxu0 %v10160_v24  ;;  %v10236_v24 = vld [vmem:[%s11632_s26 + $0x1480] ss:$8 sps:$4 sm:$0xff]  }
 0x14a   : > { %7066 = vmatpush1.bf16.msra.mxu1 %v10155_v53  ;;  %v10241_v53 = vld [vmem:[%s11632_s26 + $0x494] ss:$8 sps:$4 sm:$0xff]  }
 0x14b   : > { %7722 = vmatpush1.bf16.msra.mxu0 %v10158_v57  ;;  %7067 = vmatprep.subr.bf16.mxu1 %v10163_v27  ;;  %v10244_v57 = vld [vmem:[%s11632_s26 + $0x1494] ss:$8 sps:$4 sm:$0xff]   ;;  %v10239_v27 = vld [vmem:[%s11632_s26 + $0x490] ss:$8 sps:$4 sm:$0xff]  }
 0x14c   : > { %7723 = vmatprep.subr.bf16.mxu0 %v10166_v28  ;;  %v10242_v28 = vld [vmem:[%s11632_s26 + $0x1490] ss:$8 sps:$4 sm:$0xff]  }
 0x14e   : > { %7068 = vmatpush1.bf16.msra.mxu1 %v10161_v29  ;;  %v10247_v29 = vld [vmem:[%s11632_s26 + $0x4a4] ss:$8 sps:$4 sm:$0xff]  }
 0x14f   : > { %7724 = vmatpush1.bf16.msra.mxu0 %v10164_v30  ;;  %7069 = vmatprep.subr.bf16.mxu1 %v10169_v31  ;;  %v10250_v30 = vld [vmem:[%s11632_s26 + $0x14a4] ss:$8 sps:$4 sm:$0xff]   ;;  %v10245_v31 = vld [vmem:[%s11632_s26 + $0x4a0] ss:$8 sps:$4 sm:$0xff]  }
 0x150   : > { %7725 = vmatprep.subr.bf16.mxu0 %v10172_v32  ;;  %v10248_v32 = vld [vmem:[%s11632_s26 + $0x14a0] ss:$8 sps:$4 sm:$0xff]  }
 0x152   : > { %7070 = vmatpush1.bf16.msra.mxu1 %v10167_v33  ;;  %v10253_v33 = vld [vmem:[%s11632_s26 + $0x4b4] ss:$8 sps:$4 sm:$0xff]  }
 0x153   : > { %7726 = vmatpush1.bf16.msra.mxu0 %v10170_v34  ;;  %7071 = vmatprep.subr.bf16.mxu1 %v10175_v35  ;;  %v10256_v34 = vld [vmem:[%s11632_s26 + $0x14b4] ss:$8 sps:$4 sm:$0xff]   ;;  %v10251_v35 = vld [vmem:[%s11632_s26 + $0x4b0] ss:$8 sps:$4 sm:$0xff]  }
 0x154   : > { %7727 = vmatprep.subr.bf16.mxu0 %v10178_v36  ;;  %v10254_v36 = vld [vmem:[%s11632_s26 + $0x14b0] ss:$8 sps:$4 sm:$0xff]  }
 0x156   : > { %7072 = vmatpush1.bf16.msra.mxu1 %v10173_v18  ;;  %v10259_v18 = vld [vmem:[%s11632_s26 + $0x4c4] ss:$8 sps:$4 sm:$0xff]  }
 0x157   : > { %7728 = vmatpush1.bf16.msra.mxu0 %v10176_v38  ;;  %7073 = vmatprep.subr.bf16.mxu1 %v10181_v43  ;;  %v10262_v38 = vld [vmem:[%s11632_s26 + $0x14c4] ss:$8 sps:$4 sm:$0xff]   ;;  %v10257_v43 = vld [vmem:[%s11632_s26 + $0x4c0] ss:$8 sps:$4 sm:$0xff]  }
 0x158   : > { %7729 = vmatprep.subr.bf16.mxu0 %v10184_v45  ;;  %v10260_v45 = vld [vmem:[%s11632_s26 + $0x14c0] ss:$8 sps:$4 sm:$0xff]  }
 0x15a   : > { %7074 = vmatpush1.bf16.msra.mxu1 %v10179_v25  ;;  %v10265_v25 = vld [vmem:[%s11632_s26 + $0x4d4] ss:$8 sps:$4 sm:$0xff]  }
 0x15b   : > { %7730 = vmatpush1.bf16.msra.mxu0 %v10182_v46  ;;  %7084 = vmatprep.subr.bf16.mxu1 %v10187_v26  ;;  %v10268_v46 = vld [vmem:[%s11632_s26 + $0x14d4] ss:$8 sps:$4 sm:$0xff]   ;;  %v10263_v26 = vld [vmem:[%s11632_s26 + $0x4d0] ss:$8 sps:$4 sm:$0xff]  }
 0x15c   : > { %7740 = vmatprep.subr.bf16.mxu0 %v10190_v47  ;;  %v10266_v47 = vld [vmem:[%s11632_s26 + $0x14d0] ss:$8 sps:$4 sm:$0xff]  }
 0x15d   : > { %7076 = vmatmul.mubr.bf16.vlgmr.msra.gmra.mrb[0].mxu1 %v1390_v51  ;;  %v10277_v51 = vld [vmem:[%s11632_s26 + $0x4f4] ss:$8 sps:$4 sm:$0xff]  }
 0x15e   : > { %7732 = vmatmul.mubr.bf16.vlgmr.msra.gmra.mrb[0].mxu0 %v1586_v52  ;;  %7085 = vmatpush1.bf16.msra.mxu1 %v10185_v17  ;;  %v10269_v17 = vld [vmem:[%s11632_s26 + $0x4e0] ss:$8 sps:$4 sm:$0xff]   ;;  %v10280_v52 = vld [vmem:[%s11632_s26 + $0x14f4] ss:$8 sps:$4 sm:$0xff]  }
 0x15f   : > { %7741 = vmatpush1.bf16.msra.mxu0 %v10188_v49  ;;  %7086 = vmatprep.subr.bf16.mxu1 %v10193_v54  ;;  %v10272_v49 = vld [vmem:[%s11632_s26 + $0x14e0] ss:$8 sps:$4 sm:$0xff]   ;;  %v10275_v54 = vld [vmem:[%s11632_s26 + $0x4f0] ss:$8 sps:$4 sm:$0xff]  }
 0x160   : > { %7742 = vmatprep.subr.bf16.mxu0 %v10196_v55  ;;  %7116 = vmatprep.mubr.bf16.mxu1 %v11991_v56  ;;  %v10278_v55 = vld [vmem:[%s11632_s26 + $0x14f0] ss:$8 sps:$4 sm:$0xff]  }
 0x161   : > { %7772 = vmatprep.mubr.bf16.mxu0 %v11994_v58 }
 0x162   : > { %7087 = vmatpush1.bf16.msra.mxu1 %v10191_v39  ;;  %v10283_v39 = vld [vmem:[%s11632_s26 + $0x504] ss:$8 sps:$4 sm:$0xff]  }
 0x163   : > { %7743 = vmatpush1.bf16.msra.mxu0 %v10194_v40  ;;  %7088 = vmatprep.subr.bf16.mxu1 %v10199_v59  ;;  %v10286_v40 = vld [vmem:[%s11632_s26 + $0x1504] ss:$8 sps:$4 sm:$0xff]   ;;  %v12060_v59 = vrot.slane %v11967_v41, %v11696_v50  ;;  %v1440_v41 = vcombine.high %v11991_v56, %v11991_v56 }
 0x164   : > { %7744 = vmatprep.subr.bf16.mxu0 %v10202_v60  ;;  %v12064_v60 = vrot.slane %v11970_v42, %v11696_v50  ;;  %v10287_v42 = vld [vmem:[%s11632_s26 + $0x510] ss:$8 sps:$4 sm:$0xff]   ;;  %v10295_v56 = vld [vmem:[%s11632_s26 + $0x524] ss:$8 sps:$4 sm:$0xff]  }
 0x166   : > { %7089 = vmatpush1.bf16.msra.mxu1 %v10197_v61  ;;  %v10281_v61 = vld [vmem:[%s11632_s26 + $0x500] ss:$8 sps:$4 sm:$0xff]  }
 0x167   : > { %7745 = vmatpush1.bf16.msra.mxu0 %v10200_v62  ;;  %7090 = vmatprep.subr.bf16.mxu1 %v10205_v63  ;;  %v10284_v62 = vld [vmem:[%s11632_s26 + $0x1500] ss:$8 sps:$4 sm:$0xff]   ;;  %v10289_v63 = vld [vmem:[%s11632_s26 + $0x514] ss:$8 sps:$4 sm:$0xff]  }
 0x168   : > { %7746 = vmatprep.subr.bf16.mxu0 %v10208_v0  ;;  %v10292_v0 = vld [vmem:[%s11632_s26 + $0x1514] ss:$8 sps:$4 sm:$0xff]  }
 0x16a   : > { %7091 = vmatpush1.bf16.msra.mxu1 %v10203_v1  ;;  %v1636_v1 = vcombine.high %v11994_v58, %v11994_v58  ;;  %v10293_v58 = vld [vmem:[%s11632_s26 + $0x520] ss:$8 sps:$4 sm:$0xff]  }
 0x16b   : > { %7747 = vmatpush1.bf16.msra.mxu0 %v10206_v2  ;;  %7092 = vmatprep.subr.bf16.mxu1 %v10211_v3  ;;  %v10290_v2 = vld [vmem:[%s11632_s26 + $0x1510] ss:$8 sps:$4 sm:$0xff]   ;;  %v10298_v3 = vld [vmem:[%s11632_s26 + $0x1524] ss:$8 sps:$4 sm:$0xff]  }
 0x16c   : > { %7748 = vmatprep.subr.bf16.mxu0 %v10214_v4  ;;  %v10296_v4 = vld [vmem:[%s11632_s26 + $0x1520] ss:$8 sps:$4 sm:$0xff]  }
 0x16e   : > { %7093 = vmatpush1.bf16.msra.mxu1 %v10209_v5  ;;  %v10301_v5 = vld [vmem:[%s11632_s26 + $0x534] ss:$8 sps:$4 sm:$0xff]  }
 0x16f   : > { %7749 = vmatpush1.bf16.msra.mxu0 %v10212_v6  ;;  %7094 = vmatprep.subr.bf16.mxu1 %v10217_v7  ;;  %v10304_v6 = vld [vmem:[%s11632_s26 + $0x1534] ss:$8 sps:$4 sm:$0xff]   ;;  %v10299_v7 = vld [vmem:[%s11632_s26 + $0x530] ss:$8 sps:$4 sm:$0xff]  }
 0x170   : > { %7750 = vmatprep.subr.bf16.mxu0 %v10220_v8  ;;  %v10302_v8 = vld [vmem:[%s11632_s26 + $0x1530] ss:$8 sps:$4 sm:$0xff]  }
 0x172   : > { %7095 = vmatpush1.bf16.msra.mxu1 %v10215_v9  ;;  %v10307_v9 = vld [vmem:[%s11632_s26 + $0x544] ss:$8 sps:$4 sm:$0xff]  }
 0x173   : > { %7751 = vmatpush1.bf16.msra.mxu0 %v10218_v10  ;;  %7096 = vmatprep.subr.bf16.mxu1 %v10223_v11  ;;  %v10310_v10 = vld [vmem:[%s11632_s26 + $0x1544] ss:$8 sps:$4 sm:$0xff]   ;;  %v10305_v11 = vld [vmem:[%s11632_s26 + $0x540] ss:$8 sps:$4 sm:$0xff]  }
 0x174   : > { %7752 = vmatprep.subr.bf16.mxu0 %v10226_v12  ;;  %v10308_v12 = vld [vmem:[%s11632_s26 + $0x1540] ss:$8 sps:$4 sm:$0xff]  }
 0x176   : > { %7097 = vmatpush1.bf16.msra.mxu1 %v10221_v13  ;;  %v10313_v13 = vld [vmem:[%s11632_s26 + $0x554] ss:$8 sps:$4 sm:$0xff]  }
 0x177   : > { %7753 = vmatpush1.bf16.msra.mxu0 %v10224_v14  ;;  %7098 = vmatprep.subr.bf16.mxu1 %v10229_v15  ;;  %v10316_v14 = vld [vmem:[%s11632_s26 + $0x1554] ss:$8 sps:$4 sm:$0xff]   ;;  %v10311_v15 = vld [vmem:[%s11632_s26 + $0x550] ss:$8 sps:$4 sm:$0xff]  }
 0x178   : > { %7754 = vmatprep.subr.bf16.mxu0 %v10232_v16  ;;  %v10314_v16 = vld [vmem:[%s11632_s26 + $0x1550] ss:$8 sps:$4 sm:$0xff]  }
 0x17a   : > { %7099 = vmatpush1.bf16.msra.mxu1 %v10227_v19  ;;  %v10319_v19 = vld [vmem:[%s11632_s26 + $0x564] ss:$8 sps:$4 sm:$0xff]  }
 0x17b   : > { %7755 = vmatpush1.bf16.msra.mxu0 %v10230_v20  ;;  %7100 = vmatprep.subr.bf16.mxu1 %v10235_v21  ;;  %v10322_v20 = vld [vmem:[%s11632_s26 + $0x1564] ss:$8 sps:$4 sm:$0xff]   ;;  %v10317_v21 = vld [vmem:[%s11632_s26 + $0x560] ss:$8 sps:$4 sm:$0xff]  }
 0x17c   : > { %7756 = vmatprep.subr.bf16.mxu0 %v10238_v22  ;;  %v10320_v22 = vld [vmem:[%s11632_s26 + $0x1560] ss:$8 sps:$4 sm:$0xff]  }
 0x17e   : > { %7101 = vmatpush1.bf16.msra.mxu1 %v10233_v23  ;;  %v10325_v23 = vld [vmem:[%s11632_s26 + $0x574] ss:$8 sps:$4 sm:$0xff]  }
 0x17f   : > { %7757 = vmatpush1.bf16.msra.mxu0 %v10236_v24  ;;  %7102 = vmatprep.subr.bf16.mxu1 %v10241_v53  ;;  %v10328_v24 = vld [vmem:[%s11632_s26 + $0x1574] ss:$8 sps:$4 sm:$0xff]   ;;  %v10323_v53 = vld [vmem:[%s11632_s26 + $0x570] ss:$8 sps:$4 sm:$0xff]  }
 0x180   : > { %7758 = vmatprep.subr.bf16.mxu0 %v10244_v57  ;;  %v10326_v57 = vld [vmem:[%s11632_s26 + $0x1570] ss:$8 sps:$4 sm:$0xff]  }
 0x182   : > { %7103 = vmatpush1.bf16.msra.mxu1 %v10239_v27  ;;  %v10331_v27 = vld [vmem:[%s11632_s26 + $0x584] ss:$8 sps:$4 sm:$0xff]  }
 0x183   : > { %7759 = vmatpush1.bf16.msra.mxu0 %v10242_v28  ;;  %7104 = vmatprep.subr.bf16.mxu1 %v10247_v29  ;;  %v10334_v28 = vld [vmem:[%s11632_s26 + $0x1584] ss:$8 sps:$4 sm:$0xff]   ;;  %v10329_v29 = vld [vmem:[%s11632_s26 + $0x580] ss:$8 sps:$4 sm:$0xff]  }
 0x184   : > { %7760 = vmatprep.subr.bf16.mxu0 %v10250_v30  ;;  %v10332_v30 = vld [vmem:[%s11632_s26 + $0x1580] ss:$8 sps:$4 sm:$0xff]  }
 0x186   : > { %7105 = vmatpush1.bf16.msra.mxu1 %v10245_v31  ;;  %v10337_v31 = vld [vmem:[%s11632_s26 + $0x594] ss:$8 sps:$4 sm:$0xff]  }
 0x187   : > { %7761 = vmatpush1.bf16.msra.mxu0 %v10248_v32  ;;  %7106 = vmatprep.subr.bf16.mxu1 %v10253_v33  ;;  %v10340_v32 = vld [vmem:[%s11632_s26 + $0x1594] ss:$8 sps:$4 sm:$0xff]   ;;  %v10335_v33 = vld [vmem:[%s11632_s26 + $0x590] ss:$8 sps:$4 sm:$0xff]  }
 0x188   : > { %7762 = vmatprep.subr.bf16.mxu0 %v10256_v34  ;;  %v10338_v34 = vld [vmem:[%s11632_s26 + $0x1590] ss:$8 sps:$4 sm:$0xff]  }
 0x18a   : > { %7107 = vmatpush1.bf16.msra.mxu1 %v10251_v35  ;;  %v10343_v35 = vld [vmem:[%s11632_s26 + $0x5a4] ss:$8 sps:$4 sm:$0xff]  }
 0x18b   : > { %7763 = vmatpush1.bf16.msra.mxu0 %v10254_v36  ;;  %7108 = vmatprep.subr.bf16.mxu1 %v10259_v18  ;;  %v10346_v36 = vld [vmem:[%s11632_s26 + $0x15a4] ss:$8 sps:$4 sm:$0xff]   ;;  %v10341_v18 = vld [vmem:[%s11632_s26 + $0x5a0] ss:$8 sps:$4 sm:$0xff]  }
 0x18c   : > { %7764 = vmatprep.subr.bf16.mxu0 %v10262_v38  ;;  %v10344_v38 = vld [vmem:[%s11632_s26 + $0x15a0] ss:$8 sps:$4 sm:$0xff]  }
 0x18e   : > { %7109 = vmatpush1.bf16.msra.mxu1 %v10257_v43  ;;  %v10349_v43 = vld [vmem:[%s11632_s26 + $0x5b4] ss:$8 sps:$4 sm:$0xff]  }
 0x18f   : > { %7765 = vmatpush1.bf16.msra.mxu0 %v10260_v45  ;;  %7110 = vmatprep.subr.bf16.mxu1 %v10265_v25  ;;  %v10352_v45 = vld [vmem:[%s11632_s26 + $0x15b4] ss:$8 sps:$4 sm:$0xff]   ;;  %v10347_v25 = vld [vmem:[%s11632_s26 + $0x5b0] ss:$8 sps:$4 sm:$0xff]  }
 0x190   : > { %7766 = vmatprep.subr.bf16.mxu0 %v10268_v46  ;;  %v10350_v46 = vld [vmem:[%s11632_s26 + $0x15b0] ss:$8 sps:$4 sm:$0xff]  }
 0x192   : > { %7111 = vmatpush1.bf16.msra.mxu1 %v10263_v26  ;;  %v10355_v26 = vld [vmem:[%s11632_s26 + $0x5c4] ss:$8 sps:$4 sm:$0xff]  }
 0x193   : > { %7767 = vmatpush1.bf16.msra.mxu0 %v10266_v47  ;;  %7112 = vmatprep.subr.bf16.mxu1 %v10271_v37  ;;  %v10358_v47 = vld [vmem:[%s11632_s26 + $0x15c4] ss:$8 sps:$4 sm:$0xff]   ;;  %v10353_v37 = vld [vmem:[%s11632_s26 + $0x5c0] ss:$8 sps:$4 sm:$0xff]  }
 0x194   : > { %7768 = vmatprep.subr.bf16.mxu0 %v10274_v48  ;;  %v10356_v48 = vld [vmem:[%s11632_s26 + $0x15c0] ss:$8 sps:$4 sm:$0xff]  }
 0x196   : > { %7113 = vmatpush1.bf16.msra.mxu1 %v10269_v17  ;;  %v10361_v17 = vld [vmem:[%s11632_s26 + $0x5d4] ss:$8 sps:$4 sm:$0xff]  }
 0x197   : > { %7769 = vmatpush1.bf16.msra.mxu0 %v10272_v49  ;;  %7114 = vmatprep.subr.bf16.mxu1 %v10277_v51  ;;  %v10364_v49 = vld [vmem:[%s11632_s26 + $0x15d4] ss:$8 sps:$4 sm:$0xff]   ;;  %v10359_v51 = vld [vmem:[%s11632_s26 + $0x5d0] ss:$8 sps:$4 sm:$0xff]  }
 0x198   : > { %7770 = vmatprep.subr.bf16.mxu0 %v10280_v52  ;;  %v10362_v52 = vld [vmem:[%s11632_s26 + $0x15d0] ss:$8 sps:$4 sm:$0xff]  }
 0x19a   : > { %7115 = vmatpush1.bf16.msra.mxu1 %v10275_v54  ;;  %v10367_v54 = vld [vmem:[%s11632_s26 + $0x5e4] ss:$8 sps:$4 sm:$0xff]  }
 0x19b   : > { %7771 = vmatpush1.bf16.msra.mxu0 %v10278_v55  ;;  %7125 = vmatprep.subr.bf16.mxu1 %v10283_v39  ;;  %v10370_v55 = vld [vmem:[%s11632_s26 + $0x15e4] ss:$8 sps:$4 sm:$0xff]  }
 0x19c   : > { %7781 = vmatprep.subr.bf16.mxu0 %v10286_v40  ;;  %v11343_v39 = vld [vmem:[%s11646_s6 + $0x8] sm:$0xff] }
 0x19d   : > { %7117 = vmatmul.mubr.bf16.vlgmr.msra.gmra.mrb[0].mxu1 %v12060_v59  ;;  %v1393_v40 = vcombine.high %v11343_v39, %v11343_v39  ;;  %v10445_v39 = vld [vmem:[%s11632_s26 + $0x6b4] ss:$8 sps:$4 sm:$0xff]  }
 0x19e   : > { %7773 = vmatmul.mubr.bf16.vlgmr.msra.gmra.mrb[0].mxu0 %v12064_v60  ;;  %7126 = vmatpush1.bf16.msra.mxu1 %v10281_v61  ;;  %v11344_v61 = vld [vmem:[%s11646_s6 + $0x28] sm:$0xff] }
 0x19f   : > { %7782 = vmatpush1.bf16.msra.mxu0 %v10284_v62  ;;  %7127 = vmatprep.subr.bf16.mxu1 %v10289_v63  ;;  %v1589_v62 = vcombine.high %v11344_v61, %v11344_v61  ;;  %v10365_v63 = vld [vmem:[%s11632_s26 + $0x5e0] ss:$8 sps:$4 sm:$0xff]   ;;  %v10443_v61 = vld [vmem:[%s11632_s26 + $0x6b0] ss:$8 sps:$4 sm:$0xff]  }
 0x1a0   : > { %7783 = vmatprep.subr.bf16.mxu0 %v10292_v0  ;;  %7157 = vmatprep.mubr.bf16.mxu1 %v1440_v41  ;;  %v10368_v0 = vld [vmem:[%s11632_s26 + $0x15e0] ss:$8 sps:$4 sm:$0xff]   ;;  %v10373_v41 = vld [vmem:[%s11632_s26 + $0x5f4] ss:$8 sps:$4 sm:$0xff]  }
 0x1a1   : > { %7813 = vmatprep.mubr.bf16.mxu0 %v1636_v1  ;;  %v10376_v1 = vld [vmem:[%s11632_s26 + $0x15f4] ss:$8 sps:$4 sm:$0xff]  }
 0x1a2   : > { %7128 = vmatpush1.bf16.msra.mxu1 %v10287_v42  ;;  %v12135_v42 = vrot.slane %v1393_v40, %v11696_v50  ;;  %v10448_v40 = vld [vmem:[%s11632_s26 + $0x16b4] ss:$8 sps:$4 sm:$0xff]  }
 0x1a3   : > { %7784 = vmatpush1.bf16.msra.mxu0 %v10290_v2  ;;  %7129 = vmatprep.subr.bf16.mxu1 %v10295_v56  ;;  %v12138_v2 = vrot.slane %v1589_v62, %v11696_v50  ;;  %v10371_v56 = vld [vmem:[%s11632_s26 + $0x5f0] ss:$8 sps:$4 sm:$0xff]  }
 0x1a4   : > { %7785 = vmatprep.subr.bf16.mxu0 %v10298_v3  ;;  %v10374_v3 = vld [vmem:[%s11632_s26 + $0x15f0] ss:$8 sps:$4 sm:$0xff]  }
 0x1a5   : > { %v10446_v62 = vld [vmem:[%s11632_s26 + $0x16b0] ss:$8 sps:$4 sm:$0xff]  }
 0x1a6   : > { %7130 = vmatpush1.bf16.msra.mxu1 %v10293_v58  ;;  %v10379_v58 = vld [vmem:[%s11632_s26 + $0x604] ss:$8 sps:$4 sm:$0xff]  }
 0x1a7   : > { %7786 = vmatpush1.bf16.msra.mxu0 %v10296_v4  ;;  %7131 = vmatprep.subr.bf16.mxu1 %v10301_v5  ;;  %v10382_v4 = vld [vmem:[%s11632_s26 + $0x1604] ss:$8 sps:$4 sm:$0xff]   ;;  %v1409_v5 = vcombine.high %v12135_v42, %v12135_v42 }
 0x1a8   : > { %7787 = vmatprep.subr.bf16.mxu0 %v10304_v6  ;;  %v1605_v6 = vcombine.high %v12138_v2, %v12138_v2 }
 0x1aa   : > { %7132 = vmatpush1.bf16.msra.mxu1 %v10299_v7  ;;  %v1438_v7 = vcombine.high %v12060_v59, %v12060_v59  ;;  %v12160_v59 = vrot.slane %v1605_v6, %v11696_v50  ;;  %v10466_v6 = vld [vmem:[%s11632_s26 + $0x16e4] ss:$8 sps:$4 sm:$0xff]  }
 0x1ab   : > { %7788 = vmatpush1.bf16.msra.mxu0 %v10302_v8  ;;  %7133 = vmatprep.subr.bf16.mxu1 %v10307_v9  ;;  %v1634_v8 = vcombine.high %v12064_v60, %v12064_v60  ;;  %v10377_v9 = vld [vmem:[%s11632_s26 + $0x600] ss:$8 sps:$4 sm:$0xff]   ;;  %v10383_v60 = vld [vmem:[%s11632_s26 + $0x610] ss:$8 sps:$4 sm:$0xff]  }
 0x1ac   : > { %7789 = vmatprep.subr.bf16.mxu0 %v10310_v10  ;;  %v10380_v10 = vld [vmem:[%s11632_s26 + $0x1600] ss:$8 sps:$4 sm:$0xff]  }
 0x1ae   : > { %7134 = vmatpush1.bf16.msra.mxu1 %v10305_v11  ;;  %v10385_v11 = vld [vmem:[%s11632_s26 + $0x614] ss:$8 sps:$4 sm:$0xff]  }
 0x1af   : > { %7790 = vmatpush1.bf16.msra.mxu0 %v10308_v12  ;;  %7135 = vmatprep.subr.bf16.mxu1 %v10313_v13  ;;  %v10388_v12 = vld [vmem:[%s11632_s26 + $0x1614] ss:$8 sps:$4 sm:$0xff]   ;;  %v12157_v13 = vrot.slane %v1409_v5, %v11696_v50  ;;  %v10463_v5 = vld [vmem:[%s11632_s26 + $0x6e4] ss:$8 sps:$4 sm:$0xff]  }
 0x1b0   : > { %7791 = vmatprep.subr.bf16.mxu0 %v10316_v14  ;;  %v10386_v14 = vld [vmem:[%s11632_s26 + $0x1610] ss:$8 sps:$4 sm:$0xff]  }
 0x1b2   : > { %7136 = vmatpush1.bf16.msra.mxu1 %v10311_v15  ;;  %v10391_v15 = vld [vmem:[%s11632_s26 + $0x624] ss:$8 sps:$4 sm:$0xff]  }
 0x1b3   : > { %7792 = vmatpush1.bf16.msra.mxu0 %v10314_v16  ;;  %7137 = vmatprep.subr.bf16.mxu1 %v10319_v19  ;;  %v10394_v16 = vld [vmem:[%s11632_s26 + $0x1624] ss:$8 sps:$4 sm:$0xff]   ;;  %v10389_v19 = vld [vmem:[%s11632_s26 + $0x620] ss:$8 sps:$4 sm:$0xff]  }
 0x1b4   : > { %7793 = vmatprep.subr.bf16.mxu0 %v10322_v20  ;;  %v10392_v20 = vld [vmem:[%s11632_s26 + $0x1620] ss:$8 sps:$4 sm:$0xff]  }
 0x1b6   : > { %7138 = vmatpush1.bf16.msra.mxu1 %v10317_v21  ;;  %v10397_v21 = vld [vmem:[%s11632_s26 + $0x634] ss:$8 sps:$4 sm:$0xff]  }
 0x1b7   : > { %7794 = vmatpush1.bf16.msra.mxu0 %v10320_v22  ;;  %7139 = vmatprep.subr.bf16.mxu1 %v10325_v23  ;;  %v10400_v22 = vld [vmem:[%s11632_s26 + $0x1634] ss:$8 sps:$4 sm:$0xff]   ;;  %v10395_v23 = vld [vmem:[%s11632_s26 + $0x630] ss:$8 sps:$4 sm:$0xff]  }
 0x1b8   : > { %7795 = vmatprep.subr.bf16.mxu0 %v10328_v24  ;;  %v10398_v24 = vld [vmem:[%s11632_s26 + $0x1630] ss:$8 sps:$4 sm:$0xff]  }
 0x1ba   : > { %7140 = vmatpush1.bf16.msra.mxu1 %v10323_v53  ;;  %v10403_v53 = vld [vmem:[%s11632_s26 + $0x644] ss:$8 sps:$4 sm:$0xff]  }
 0x1bb   : > { %7796 = vmatpush1.bf16.msra.mxu0 %v10326_v57  ;;  %7141 = vmatprep.subr.bf16.mxu1 %v10331_v27  ;;  %v10406_v57 = vld [vmem:[%s11632_s26 + $0x1644] ss:$8 sps:$4 sm:$0xff]   ;;  %v10401_v27 = vld [vmem:[%s11632_s26 + $0x640] ss:$8 sps:$4 sm:$0xff]  }
 0x1bc   : > { %7797 = vmatprep.subr.bf16.mxu0 %v10334_v28  ;;  %v10404_v28 = vld [vmem:[%s11632_s26 + $0x1640] ss:$8 sps:$4 sm:$0xff]  }
 0x1be   : > { %7142 = vmatpush1.bf16.msra.mxu1 %v10329_v29  ;;  %v10409_v29 = vld [vmem:[%s11632_s26 + $0x654] ss:$8 sps:$4 sm:$0xff]  }
 0x1bf   : > { %7798 = vmatpush1.bf16.msra.mxu0 %v10332_v30  ;;  %7143 = vmatprep.subr.bf16.mxu1 %v10337_v31  ;;  %v10412_v30 = vld [vmem:[%s11632_s26 + $0x1654] ss:$8 sps:$4 sm:$0xff]   ;;  %v10407_v31 = vld [vmem:[%s11632_s26 + $0x650] ss:$8 sps:$4 sm:$0xff]  }
 0x1c0   : > { %7799 = vmatprep.subr.bf16.mxu0 %v10340_v32  ;;  %v10410_v32 = vld [vmem:[%s11632_s26 + $0x1650] ss:$8 sps:$4 sm:$0xff]  }
 0x1c2   : > { %7144 = vmatpush1.bf16.msra.mxu1 %v10335_v33  ;;  %v10415_v33 = vld [vmem:[%s11632_s26 + $0x664] ss:$8 sps:$4 sm:$0xff]  }
 0x1c3   : > { %7800 = vmatpush1.bf16.msra.mxu0 %v10338_v34  ;;  %7145 = vmatprep.subr.bf16.mxu1 %v10343_v35  ;;  %v10418_v34 = vld [vmem:[%s11632_s26 + $0x1664] ss:$8 sps:$4 sm:$0xff]   ;;  %v10413_v35 = vld [vmem:[%s11632_s26 + $0x660] ss:$8 sps:$4 sm:$0xff]  }
 0x1c4   : > { %7801 = vmatprep.subr.bf16.mxu0 %v10346_v36  ;;  %v10416_v36 = vld [vmem:[%s11632_s26 + $0x1660] ss:$8 sps:$4 sm:$0xff]  }
 0x1c6   : > { %7146 = vmatpush1.bf16.msra.mxu1 %v10341_v18  ;;  %v10421_v18 = vld [vmem:[%s11632_s26 + $0x674] ss:$8 sps:$4 sm:$0xff]  }
 0x1c7   : > { %7802 = vmatpush1.bf16.msra.mxu0 %v10344_v38  ;;  %7147 = vmatprep.subr.bf16.mxu1 %v10349_v43  ;;  %v10424_v38 = vld [vmem:[%s11632_s26 + $0x1674] ss:$8 sps:$4 sm:$0xff]   ;;  %v10419_v43 = vld [vmem:[%s11632_s26 + $0x670] ss:$8 sps:$4 sm:$0xff]  }
 0x1c8   : > { %7803 = vmatprep.subr.bf16.mxu0 %v10352_v45  ;;  %v10422_v45 = vld [vmem:[%s11632_s26 + $0x1670] ss:$8 sps:$4 sm:$0xff]  }
 0x1ca   : > { %7148 = vmatpush1.bf16.msra.mxu1 %v10347_v25  ;;  %v10427_v25 = vld [vmem:[%s11632_s26 + $0x684] ss:$8 sps:$4 sm:$0xff]  }
 0x1cb   : > { %7804 = vmatpush1.bf16.msra.mxu0 %v10350_v46  ;;  %7149 = vmatprep.subr.bf16.mxu1 %v10355_v26  ;;  %v10430_v46 = vld [vmem:[%s11632_s26 + $0x1684] ss:$8 sps:$4 sm:$0xff]   ;;  %v10425_v26 = vld [vmem:[%s11632_s26 + $0x680] ss:$8 sps:$4 sm:$0xff]  }
 0x1cc   : > { %7805 = vmatprep.subr.bf16.mxu0 %v10358_v47  ;;  %v10428_v47 = vld [vmem:[%s11632_s26 + $0x1680] ss:$8 sps:$4 sm:$0xff]  }
 0x1ce   : > { %7150 = vmatpush1.bf16.msra.mxu1 %v10353_v37  ;;  %v10433_v37 = vld [vmem:[%s11632_s26 + $0x694] ss:$8 sps:$4 sm:$0xff]  }
 0x1cf   : > { %7806 = vmatpush1.bf16.msra.mxu0 %v10356_v48  ;;  %7151 = vmatprep.subr.bf16.mxu1 %v10361_v17  ;;  %v10436_v48 = vld [vmem:[%s11632_s26 + $0x1694] ss:$8 sps:$4 sm:$0xff]   ;;  %v10431_v17 = vld [vmem:[%s11632_s26 + $0x690] ss:$8 sps:$4 sm:$0xff]  }
 0x1d0   : > { %7807 = vmatprep.subr.bf16.mxu0 %v10364_v49  ;;  %v10434_v49 = vld [vmem:[%s11632_s26 + $0x1690] ss:$8 sps:$4 sm:$0xff]  }
 0x1d2   : > { %7152 = vmatpush1.bf16.msra.mxu1 %v10359_v51  ;;  %v10439_v51 = vld [vmem:[%s11632_s26 + $0x6a4] ss:$8 sps:$4 sm:$0xff]  }
 0x1d3   : > { %7808 = vmatpush1.bf16.msra.mxu0 %v10362_v52  ;;  %7153 = vmatprep.subr.bf16.mxu1 %v10367_v54  ;;  %v10442_v52 = vld [vmem:[%s11632_s26 + $0x16a4] ss:$8 sps:$4 sm:$0xff]   ;;  %v10437_v54 = vld [vmem:[%s11632_s26 + $0x6a0] ss:$8 sps:$4 sm:$0xff]  }
 0x1d4   : > { %7809 = vmatprep.subr.bf16.mxu0 %v10370_v55  ;;  %v10440_v55 = vld [vmem:[%s11632_s26 + $0x16a0] ss:$8 sps:$4 sm:$0xff]  }
 0x1d6   : > { %7154 = vmatpush1.bf16.msra.mxu1 %v10365_v63  ;;  %v10451_v63 = vld [vmem:[%s11632_s26 + $0x6c4] ss:$8 sps:$4 sm:$0xff]  }
 0x1d7   : > { %7810 = vmatpush1.bf16.msra.mxu0 %v10368_v0  ;;  %7155 = vmatprep.subr.bf16.mxu1 %v10373_v41  ;;  %v10454_v0 = vld [vmem:[%s11632_s26 + $0x16c4] ss:$8 sps:$4 sm:$0xff]   ;;  %v10449_v41 = vld [vmem:[%s11632_s26 + $0x6c0] ss:$8 sps:$4 sm:$0xff]  }
 0x1d8   : > { %7811 = vmatprep.subr.bf16.mxu0 %v10376_v1  ;;  %v10452_v1 = vld [vmem:[%s11632_s26 + $0x16c0] ss:$8 sps:$4 sm:$0xff]  }
 0x1da   : > { %7156 = vmatpush1.bf16.msra.mxu1 %v10371_v56  ;;  %v10457_v56 = vld [vmem:[%s11632_s26 + $0x6d4] ss:$8 sps:$4 sm:$0xff]  }
 0x1db   : > { %7812 = vmatpush1.bf16.msra.mxu0 %v10374_v3  ;;  %7166 = vmatprep.subr.bf16.mxu1 %v10379_v58  ;;  %v10460_v3 = vld [vmem:[%s11632_s26 + $0x16d4] ss:$8 sps:$4 sm:$0xff]   ;;  %v10455_v58 = vld [vmem:[%s11632_s26 + $0x6d0] ss:$8 sps:$4 sm:$0xff]  }
 0x1dc   : > { %7822 = vmatprep.subr.bf16.mxu0 %v10382_v4  ;;  %v10458_v4 = vld [vmem:[%s11632_s26 + $0x16d0] ss:$8 sps:$4 sm:$0xff]  }
 0x1dd   : > { %7158 = vmatmul.mubr.bf16.vlgmr.msra.gmra.mrb[0].mxu1 %v1438_v7  ;;  %v10461_v7 = vld [vmem:[%s11632_s26 + $0x6e0] ss:$8 sps:$4 sm:$0xff]  }
 0x1de   : > { %7814 = vmatmul.mubr.bf16.vlgmr.msra.gmra.mrb[0].mxu0 %v1634_v8  ;;  %7167 = vmatpush1.bf16.msra.mxu1 %v10377_v9  ;;  %v10464_v8 = vld [vmem:[%s11632_s26 + $0x16e0] ss:$8 sps:$4 sm:$0xff]   ;;  %v10469_v9 = vld [vmem:[%s11632_s26 + $0x6f4] ss:$8 sps:$4 sm:$0xff]  }
 0x1df   : > { %7823 = vmatpush1.bf16.msra.mxu0 %v10380_v10  ;;  %7168 = vmatprep.subr.bf16.mxu1 %v10385_v11  ;;  %v10472_v10 = vld [vmem:[%s11632_s26 + $0x16f4] ss:$8 sps:$4 sm:$0xff]   ;;  %v10467_v11 = vld [vmem:[%s11632_s26 + $0x6f0] ss:$8 sps:$4 sm:$0xff]  }
 0x1e0   : > { %7824 = vmatprep.subr.bf16.mxu0 %v10388_v12  ;;  %7198 = vmatprep.mubr.bf16.mxu1 %v12157_v13  ;;  %v10470_v12 = vld [vmem:[%s11632_s26 + $0x16f0] ss:$8 sps:$4 sm:$0xff]  }
 0x1e1   : > { %7854 = vmatprep.mubr.bf16.mxu0 %v12160_v59 }
 0x1e2   : > { %7169 = vmatpush1.bf16.msra.mxu1 %v10383_v60  ;;  %v10476_v60 = vld [vmem:[%s11632_s26 + $0x704] ss:$8 sps:$4 sm:$0xff]  }
 0x1e3   : > { %7825 = vmatpush1.bf16.msra.mxu0 %v10386_v14  ;;  %7170 = vmatprep.subr.bf16.mxu1 %v10391_v15  ;;  %v10480_v14 = vld [vmem:[%s11632_s26 + $0x1704] ss:$8 sps:$4 sm:$0xff]   ;;  %v12226_v15 = vrot.slane %v12135_v42, %v11696_v50  ;;  %v1441_v42 = vcombine.high %v12157_v13, %v12157_v13 }
 0x1e4   : > { %7826 = vmatprep.subr.bf16.mxu0 %v10394_v16  ;;  %v12230_v16 = vrot.slane %v12138_v2, %v11696_v50  ;;  %v10481_v2 = vld [vmem:[%s11632_s26 + $0x710] ss:$8 sps:$4 sm:$0xff]   ;;  %v10489_v13 = vld [vmem:[%s11632_s26 + $0x724] ss:$8 sps:$4 sm:$0xff]  }
 0x1e6   : > { %7171 = vmatpush1.bf16.msra.mxu1 %v10389_v19  ;;  %v10474_v19 = vld [vmem:[%s11632_s26 + $0x700] ss:$8 sps:$4 sm:$0xff]  }
 0x1e7   : > { %7827 = vmatpush1.bf16.msra.mxu0 %v10392_v20  ;;  %7172 = vmatprep.subr.bf16.mxu1 %v10397_v21  ;;  %v10478_v20 = vld [vmem:[%s11632_s26 + $0x1700] ss:$8 sps:$4 sm:$0xff]   ;;  %v10483_v21 = vld [vmem:[%s11632_s26 + $0x714] ss:$8 sps:$4 sm:$0xff]  }
 0x1e8   : > { %7828 = vmatprep.subr.bf16.mxu0 %v10400_v22  ;;  %v10486_v22 = vld [vmem:[%s11632_s26 + $0x1714] ss:$8 sps:$4 sm:$0xff]  }
 0x1ea   : > { %7173 = vmatpush1.bf16.msra.mxu1 %v10395_v23  ;;  %v1637_v23 = vcombine.high %v12160_v59, %v12160_v59  ;;  %v10487_v59 = vld [vmem:[%s11632_s26 + $0x720] ss:$8 sps:$4 sm:$0xff]  }
 0x1eb   : > { %7829 = vmatpush1.bf16.msra.mxu0 %v10398_v24  ;;  %7174 = vmatprep.subr.bf16.mxu1 %v10403_v53  ;;  %v10484_v24 = vld [vmem:[%s11632_s26 + $0x1710] ss:$8 sps:$4 sm:$0xff]   ;;  %v10492_v53 = vld [vmem:[%s11632_s26 + $0x1724] ss:$8 sps:$4 sm:$0xff]  }
 0x1ec   : > { %7830 = vmatprep.subr.bf16.mxu0 %v10406_v57  ;;  %v10490_v57 = vld [vmem:[%s11632_s26 + $0x1720] ss:$8 sps:$4 sm:$0xff]  }
 0x1ee   : > { %7175 = vmatpush1.bf16.msra.mxu1 %v10401_v27  ;;  %v10495_v27 = vld [vmem:[%s11632_s26 + $0x734] ss:$8 sps:$4 sm:$0xff]  }
 0x1ef   : > { %7831 = vmatpush1.bf16.msra.mxu0 %v10404_v28  ;;  %7176 = vmatprep.subr.bf16.mxu1 %v10409_v29  ;;  %v10498_v28 = vld [vmem:[%s11632_s26 + $0x1734] ss:$8 sps:$4 sm:$0xff]   ;;  %v10493_v29 = vld [vmem:[%s11632_s26 + $0x730] ss:$8 sps:$4 sm:$0xff]  }
 0x1f0   : > { %7832 = vmatprep.subr.bf16.mxu0 %v10412_v30  ;;  %v10496_v30 = vld [vmem:[%s11632_s26 + $0x1730] ss:$8 sps:$4 sm:$0xff]  }
 0x1f2   : > { %7177 = vmatpush1.bf16.msra.mxu1 %v10407_v31  ;;  %v10501_v31 = vld [vmem:[%s11632_s26 + $0x744] ss:$8 sps:$4 sm:$0xff]  }
 0x1f3   : > { %7833 = vmatpush1.bf16.msra.mxu0 %v10410_v32  ;;  %7178 = vmatprep.subr.bf16.mxu1 %v10415_v33  ;;  %v10504_v32 = vld [vmem:[%s11632_s26 + $0x1744] ss:$8 sps:$4 sm:$0xff]   ;;  %v10499_v33 = vld [vmem:[%s11632_s26 + $0x740] ss:$8 sps:$4 sm:$0xff]  }
 0x1f4   : > { %7834 = vmatprep.subr.bf16.mxu0 %v10418_v34  ;;  %v10502_v34 = vld [vmem:[%s11632_s26 + $0x1740] ss:$8 sps:$4 sm:$0xff]  }
 0x1f6   : > { %7179 = vmatpush1.bf16.msra.mxu1 %v10413_v35  ;;  %v10507_v35 = vld [vmem:[%s11632_s26 + $0x754] ss:$8 sps:$4 sm:$0xff]  }
 0x1f7   : > { %7835 = vmatpush1.bf16.msra.mxu0 %v10416_v36  ;;  %7180 = vmatprep.subr.bf16.mxu1 %v10421_v18  ;;  %v10510_v36 = vld [vmem:[%s11632_s26 + $0x1754] ss:$8 sps:$4 sm:$0xff]   ;;  %v10505_v18 = vld [vmem:[%s11632_s26 + $0x750] ss:$8 sps:$4 sm:$0xff]  }
 0x1f8   : > { %7836 = vmatprep.subr.bf16.mxu0 %v10424_v38  ;;  %v10508_v38 = vld [vmem:[%s11632_s26 + $0x1750] ss:$8 sps:$4 sm:$0xff]  }
 0x1fa   : > { %7181 = vmatpush1.bf16.msra.mxu1 %v10419_v43  ;;  %v10513_v43 = vld [vmem:[%s11632_s26 + $0x764] ss:$8 sps:$4 sm:$0xff]  }
 0x1fb   : > { %7837 = vmatpush1.bf16.msra.mxu0 %v10422_v45  ;;  %7182 = vmatprep.subr.bf16.mxu1 %v10427_v25  ;;  %v10516_v45 = vld [vmem:[%s11632_s26 + $0x1764] ss:$8 sps:$4 sm:$0xff]   ;;  %v10511_v25 = vld [vmem:[%s11632_s26 + $0x760] ss:$8 sps:$4 sm:$0xff]  }
 0x1fc   : > { %7838 = vmatprep.subr.bf16.mxu0 %v10430_v46  ;;  %v10514_v46 = vld [vmem:[%s11632_s26 + $0x1760] ss:$8 sps:$4 sm:$0xff]  }
 0x1fe   : > { %7183 = vmatpush1.bf16.msra.mxu1 %v10425_v26  ;;  %v10519_v26 = vld [vmem:[%s11632_s26 + $0x774] ss:$8 sps:$4 sm:$0xff]  }
 0x1ff   : > { %7839 = vmatpush1.bf16.msra.mxu0 %v10428_v47  ;;  %7184 = vmatprep.subr.bf16.mxu1 %v10433_v37  ;;  %v10522_v47 = vld [vmem:[%s11632_s26 + $0x1774] ss:$8 sps:$4 sm:$0xff]   ;;  %v10517_v37 = vld [vmem:[%s11632_s26 + $0x770] ss:$8 sps:$4 sm:$0xff]  }
 0x200   : > { %7840 = vmatprep.subr.bf16.mxu0 %v10436_v48  ;;  %v10520_v48 = vld [vmem:[%s11632_s26 + $0x1770] ss:$8 sps:$4 sm:$0xff]  }
 0x202   : > { %7185 = vmatpush1.bf16.msra.mxu1 %v10431_v17  ;;  %v10525_v17 = vld [vmem:[%s11632_s26 + $0x784] ss:$8 sps:$4 sm:$0xff]  }
 0x203   : > { %7841 = vmatpush1.bf16.msra.mxu0 %v10434_v49  ;;  %7186 = vmatprep.subr.bf16.mxu1 %v10439_v51  ;;  %v10528_v49 = vld [vmem:[%s11632_s26 + $0x1784] ss:$8 sps:$4 sm:$0xff]   ;;  %v10523_v51 = vld [vmem:[%s11632_s26 + $0x780] ss:$8 sps:$4 sm:$0xff]  }
 0x204   : > { %7842 = vmatprep.subr.bf16.mxu0 %v10442_v52  ;;  %v10526_v52 = vld [vmem:[%s11632_s26 + $0x1780] ss:$8 sps:$4 sm:$0xff]  }
 0x206   : > { %7187 = vmatpush1.bf16.msra.mxu1 %v10437_v54  ;;  %v10531_v54 = vld [vmem:[%s11632_s26 + $0x794] ss:$8 sps:$4 sm:$0xff]  }
 0x207   : > { %7843 = vmatpush1.bf16.msra.mxu0 %v10440_v55  ;;  %7188 = vmatprep.subr.bf16.mxu1 %v10445_v39  ;;  %v10534_v55 = vld [vmem:[%s11632_s26 + $0x1794] ss:$8 sps:$4 sm:$0xff]   ;;  %v10529_v39 = vld [vmem:[%s11632_s26 + $0x790] ss:$8 sps:$4 sm:$0xff]  }
 0x208   : > { %7844 = vmatprep.subr.bf16.mxu0 %v10448_v40  ;;  %v10532_v40 = vld [vmem:[%s11632_s26 + $0x1790] ss:$8 sps:$4 sm:$0xff]  }
 0x20a   : > { %7189 = vmatpush1.bf16.msra.mxu1 %v10443_v61  ;;  %v10537_v61 = vld [vmem:[%s11632_s26 + $0x7a4] ss:$8 sps:$4 sm:$0xff]  }
 0x20b   : > { %7845 = vmatpush1.bf16.msra.mxu0 %v10446_v62  ;;  %7190 = vmatprep.subr.bf16.mxu1 %v10451_v63  ;;  %v10540_v62 = vld [vmem:[%s11632_s26 + $0x17a4] ss:$8 sps:$4 sm:$0xff]   ;;  %v10535_v63 = vld [vmem:[%s11632_s26 + $0x7a0] ss:$8 sps:$4 sm:$0xff]  }
 0x20c   : > { %7846 = vmatprep.subr.bf16.mxu0 %v10454_v0  ;;  %v10538_v0 = vld [vmem:[%s11632_s26 + $0x17a0] ss:$8 sps:$4 sm:$0xff]  }
 0x20e   : > { %7191 = vmatpush1.bf16.msra.mxu1 %v10449_v41  ;;  %v10543_v41 = vld [vmem:[%s11632_s26 + $0x7b4] ss:$8 sps:$4 sm:$0xff]  }
 0x20f   : > { %7847 = vmatpush1.bf16.msra.mxu0 %v10452_v1  ;;  %7192 = vmatprep.subr.bf16.mxu1 %v10457_v56  ;;  %v10546_v1 = vld [vmem:[%s11632_s26 + $0x17b4] ss:$8 sps:$4 sm:$0xff]   ;;  %v10541_v56 = vld [vmem:[%s11632_s26 + $0x7b0] ss:$8 sps:$4 sm:$0xff]  }
 0x210   : > { %7848 = vmatprep.subr.bf16.mxu0 %v10460_v3  ;;  %v10544_v3 = vld [vmem:[%s11632_s26 + $0x17b0] ss:$8 sps:$4 sm:$0xff]  }
 0x212   : > { %7193 = vmatpush1.bf16.msra.mxu1 %v10455_v58  ;;  %v10549_v58 = vld [vmem:[%s11632_s26 + $0x7c4] ss:$8 sps:$4 sm:$0xff]  }
 0x213   : > { %7849 = vmatpush1.bf16.msra.mxu0 %v10458_v4  ;;  %7194 = vmatprep.subr.bf16.mxu1 %v10463_v5  ;;  %v10552_v4 = vld [vmem:[%s11632_s26 + $0x17c4] ss:$8 sps:$4 sm:$0xff]   ;;  %v10547_v5 = vld [vmem:[%s11632_s26 + $0x7c0] ss:$8 sps:$4 sm:$0xff]  }
 0x214   : > { %7850 = vmatprep.subr.bf16.mxu0 %v10466_v6  ;;  %v10550_v6 = vld [vmem:[%s11632_s26 + $0x17c0] ss:$8 sps:$4 sm:$0xff]  }
 0x216   : > { %7195 = vmatpush1.bf16.msra.mxu1 %v10461_v7  ;;  %v10555_v7 = vld [vmem:[%s11632_s26 + $0x7d4] ss:$8 sps:$4 sm:$0xff]  }
 0x217   : > { %7851 = vmatpush1.bf16.msra.mxu0 %v10464_v8  ;;  %7196 = vmatprep.subr.bf16.mxu1 %v10469_v9  ;;  %v10558_v8 = vld [vmem:[%s11632_s26 + $0x17d4] ss:$8 sps:$4 sm:$0xff]   ;;  %v10553_v9 = vld [vmem:[%s11632_s26 + $0x7d0] ss:$8 sps:$4 sm:$0xff]  }
 0x218   : > { %7852 = vmatprep.subr.bf16.mxu0 %v10472_v10  ;;  %v10556_v10 = vld [vmem:[%s11632_s26 + $0x17d0] ss:$8 sps:$4 sm:$0xff]  }
 0x21a   : > { %7197 = vmatpush1.bf16.msra.mxu1 %v10467_v11  ;;  %v10561_v11 = vld [vmem:[%s11632_s26 + $0x7e4] ss:$8 sps:$4 sm:$0xff]  }
 0x21b   : > { %7853 = vmatpush1.bf16.msra.mxu0 %v10470_v12  ;;  %7207 = vmatprep.subr.bf16.mxu1 %v10476_v60  ;;  %v10564_v12 = vld [vmem:[%s11632_s26 + $0x17e4] ss:$8 sps:$4 sm:$0xff]  }
 0x21c   : > { %7863 = vmatprep.subr.bf16.mxu0 %v10480_v14  ;;  %v12295_v60 = vld [vmem:[%s11646_s6 + $0x10] sm:$0xff] }
 0x21d   : > { %7199 = vmatmul.mubr.bf16.vlgmr.msra.gmra.mrb[0].mxu1 %v12226_v15  ;;  %v12298_v14 = vld [vmem:[%s11646_s6 + $0x30] sm:$0xff] }
 0x21e   : > { %7855 = vmatmul.mubr.bf16.vlgmr.msra.gmra.mrb[0].mxu0 %v12230_v16  ;;  %7208 = vmatpush1.bf16.msra.mxu1 %v10474_v19  ;;  %v10559_v19 = vld [vmem:[%s11632_s26 + $0x7e0] ss:$8 sps:$4 sm:$0xff]  }
 0x21f   : > { %7864 = vmatpush1.bf16.msra.mxu0 %v10478_v20  ;;  %7209 = vmatprep.subr.bf16.mxu1 %v10483_v21  ;;  %v10562_v20 = vld [vmem:[%s11632_s26 + $0x17e0] ss:$8 sps:$4 sm:$0xff]   ;;  %v10567_v21 = vld [vmem:[%s11632_s26 + $0x7f4] ss:$8 sps:$4 sm:$0xff]  }
 0x220   : > { %7865 = vmatprep.subr.bf16.mxu0 %v10486_v22  ;;  %7239 = vmatprep.mubr.bf16.mxu1 %v1441_v42  ;;  %v10570_v22 = vld [vmem:[%s11632_s26 + $0x17f4] ss:$8 sps:$4 sm:$0xff]   ;;  %v12306_v42 = vrot.slane %v12295_v60, %v11696_v50 }
 0x221   : > { %7895 = vmatprep.mubr.bf16.mxu0 %v1637_v23  ;;  %v12310_v23 = vrot.slane %v12298_v14, %v11696_v50 }
 0x222   : > { %7210 = vmatpush1.bf16.msra.mxu1 %v10481_v2  ;;  %v10565_v2 = vld [vmem:[%s11632_s26 + $0x7f0] ss:$8 sps:$4 sm:$0xff]  }
 0x223   : > { %7866 = vmatpush1.bf16.msra.mxu0 %v10484_v24  ;;  %7211 = vmatprep.subr.bf16.mxu1 %v10489_v13  ;;  %v10568_v24 = vld [vmem:[%s11632_s26 + $0x17f0] ss:$8 sps:$4 sm:$0xff]   ;;  %v10573_v13 = vld [vmem:[%s11632_s26 + $0x804] ss:$8 sps:$4 sm:$0xff]  }
 0x224   : > { %7867 = vmatprep.subr.bf16.mxu0 %v10492_v53  ;;  %v10576_v53 = vld [vmem:[%s11632_s26 + $0x1804] ss:$8 sps:$4 sm:$0xff]  }
 0x226   : > { %7212 = vmatpush1.bf16.msra.mxu1 %v10487_v59  ;;  %v1457_v59 = vcombine.high %v12306_v42, %v12306_v42 }
 0x227   : > { %7868 = vmatpush1.bf16.msra.mxu0 %v10490_v57  ;;  %7213 = vmatprep.subr.bf16.mxu1 %v10495_v27  ;;  %v1653_v57 = vcombine.high %v12310_v23, %v12310_v23  ;;  %v1439_v27 = vcombine.high %v12226_v15, %v12226_v15 }
 0x228   : > { %7869 = vmatprep.subr.bf16.mxu0 %v10498_v28  ;;  %v1635_v28 = vcombine.high %v12230_v16, %v12230_v16  ;;  %v10577_v16 = vld [vmem:[%s11632_s26 + $0x810] ss:$8 sps:$4 sm:$0xff]  }
 0x229   : > { %v12332_v15 = vrot.slane %v1653_v57, %v11696_v50  ;;  %v10652_v57 = vld [vmem:[%s11632_s26 + $0x18d0] ss:$8 sps:$4 sm:$0xff]  }
 0x22a   : > { %7214 = vmatpush1.bf16.msra.mxu1 %v10493_v29  ;;  %v10571_v29 = vld [vmem:[%s11632_s26 + $0x800] ss:$8 sps:$4 sm:$0xff]  }
 0x22b   : > { %7870 = vmatpush1.bf16.msra.mxu0 %v10496_v30  ;;  %7215 = vmatprep.subr.bf16.mxu1 %v10501_v31  ;;  %v10574_v30 = vld [vmem:[%s11632_s26 + $0x1800] ss:$8 sps:$4 sm:$0xff]   ;;  %v10579_v31 = vld [vmem:[%s11632_s26 + $0x814] ss:$8 sps:$4 sm:$0xff]  }
 0x22c   : > { %7871 = vmatprep.subr.bf16.mxu0 %v10504_v32  ;;  %v10582_v32 = vld [vmem:[%s11632_s26 + $0x1814] ss:$8 sps:$4 sm:$0xff]  }
 0x22e   : > { %7216 = vmatpush1.bf16.msra.mxu1 %v10499_v33  ;;  %v12329_v33 = vrot.slane %v1457_v59, %v11696_v50  ;;  %v10649_v59 = vld [vmem:[%s11632_s26 + $0x8d0] ss:$8 sps:$4 sm:$0xff]  }
 0x22f   : > { %7872 = vmatpush1.bf16.msra.mxu0 %v10502_v34  ;;  %7217 = vmatprep.subr.bf16.mxu1 %v10507_v35  ;;  %v10580_v34 = vld [vmem:[%s11632_s26 + $0x1810] ss:$8 sps:$4 sm:$0xff]   ;;  %v10585_v35 = vld [vmem:[%s11632_s26 + $0x824] ss:$8 sps:$4 sm:$0xff]  }
 0x230   : > { %7873 = vmatprep.subr.bf16.mxu0 %v10510_v36  ;;  %v10588_v36 = vld [vmem:[%s11632_s26 + $0x1824] ss:$8 sps:$4 sm:$0xff]  }
 0x232   : > { %7218 = vmatpush1.bf16.msra.mxu1 %v10505_v18  ;;  %v10583_v18 = vld [vmem:[%s11632_s26 + $0x820] ss:$8 sps:$4 sm:$0xff]  }
 0x233   : > { %7874 = vmatpush1.bf16.msra.mxu0 %v10508_v38  ;;  %7219 = vmatprep.subr.bf16.mxu1 %v10513_v43  ;;  %v10586_v38 = vld [vmem:[%s11632_s26 + $0x1820] ss:$8 sps:$4 sm:$0xff]   ;;  %v10591_v43 = vld [vmem:[%s11632_s26 + $0x834] ss:$8 sps:$4 sm:$0xff]  }
 0x234   : > { %7875 = vmatprep.subr.bf16.mxu0 %v10516_v45  ;;  %v10594_v45 = vld [vmem:[%s11632_s26 + $0x1834] ss:$8 sps:$4 sm:$0xff]  }
 0x236   : > { %7220 = vmatpush1.bf16.msra.mxu1 %v10511_v25  ;;  %v10589_v25 = vld [vmem:[%s11632_s26 + $0x830] ss:$8 sps:$4 sm:$0xff]  }
 0x237   : > { %7876 = vmatpush1.bf16.msra.mxu0 %v10514_v46  ;;  %7221 = vmatprep.subr.bf16.mxu1 %v10519_v26  ;;  %v10592_v46 = vld [vmem:[%s11632_s26 + $0x1830] ss:$8 sps:$4 sm:$0xff]   ;;  %v10597_v26 = vld [vmem:[%s11632_s26 + $0x844] ss:$8 sps:$4 sm:$0xff]  }
 0x238   : > { %7877 = vmatprep.subr.bf16.mxu0 %v10522_v47  ;;  %v10600_v47 = vld [vmem:[%s11632_s26 + $0x1844] ss:$8 sps:$4 sm:$0xff]  }
 0x23a   : > { %7222 = vmatpush1.bf16.msra.mxu1 %v10517_v37  ;;  %v10595_v37 = vld [vmem:[%s11632_s26 + $0x840] ss:$8 sps:$4 sm:$0xff]  }
 0x23b   : > { %7878 = vmatpush1.bf16.msra.mxu0 %v10520_v48  ;;  %7223 = vmatprep.subr.bf16.mxu1 %v10525_v17  ;;  %v10598_v48 = vld [vmem:[%s11632_s26 + $0x1840] ss:$8 sps:$4 sm:$0xff]   ;;  %v10603_v17 = vld [vmem:[%s11632_s26 + $0x854] ss:$8 sps:$4 sm:$0xff]  }
 0x23c   : > { %7879 = vmatprep.subr.bf16.mxu0 %v10528_v49  ;;  %v10606_v49 = vld [vmem:[%s11632_s26 + $0x1854] ss:$8 sps:$4 sm:$0xff]  }
 0x23e   : > { %7224 = vmatpush1.bf16.msra.mxu1 %v10523_v51  ;;  %v10601_v51 = vld [vmem:[%s11632_s26 + $0x850] ss:$8 sps:$4 sm:$0xff]  }
 0x23f   : > { %7880 = vmatpush1.bf16.msra.mxu0 %v10526_v52  ;;  %7225 = vmatprep.subr.bf16.mxu1 %v10531_v54  ;;  %v10604_v52 = vld [vmem:[%s11632_s26 + $0x1850] ss:$8 sps:$4 sm:$0xff]   ;;  %v10609_v54 = vld [vmem:[%s11632_s26 + $0x864] ss:$8 sps:$4 sm:$0xff]  }
 0x240   : > { %7881 = vmatprep.subr.bf16.mxu0 %v10534_v55  ;;  %v10612_v55 = vld [vmem:[%s11632_s26 + $0x1864] ss:$8 sps:$4 sm:$0xff]  }
 0x242   : > { %7226 = vmatpush1.bf16.msra.mxu1 %v10529_v39  ;;  %v10607_v39 = vld [vmem:[%s11632_s26 + $0x860] ss:$8 sps:$4 sm:$0xff]  }
 0x243   : > { %7882 = vmatpush1.bf16.msra.mxu0 %v10532_v40  ;;  %7227 = vmatprep.subr.bf16.mxu1 %v10537_v61  ;;  %v10610_v40 = vld [vmem:[%s11632_s26 + $0x1860] ss:$8 sps:$4 sm:$0xff]   ;;  %v10615_v61 = vld [vmem:[%s11632_s26 + $0x874] ss:$8 sps:$4 sm:$0xff]  }
 0x244   : > { %7883 = vmatprep.subr.bf16.mxu0 %v10540_v62  ;;  %v10618_v62 = vld [vmem:[%s11632_s26 + $0x1874] ss:$8 sps:$4 sm:$0xff]  }
 0x246   : > { %7228 = vmatpush1.bf16.msra.mxu1 %v10535_v63  ;;  %v10613_v63 = vld [vmem:[%s11632_s26 + $0x870] ss:$8 sps:$4 sm:$0xff]  }
 0x247   : > { %7884 = vmatpush1.bf16.msra.mxu0 %v10538_v0  ;;  %7229 = vmatprep.subr.bf16.mxu1 %v10543_v41  ;;  %v10616_v0 = vld [vmem:[%s11632_s26 + $0x1870] ss:$8 sps:$4 sm:$0xff]   ;;  %v10621_v41 = vld [vmem:[%s11632_s26 + $0x884] ss:$8 sps:$4 sm:$0xff]  }
 0x248   : > { %7885 = vmatprep.subr.bf16.mxu0 %v10546_v1  ;;  %v10624_v1 = vld [vmem:[%s11632_s26 + $0x1884] ss:$8 sps:$4 sm:$0xff]  }
 0x24a   : > { %7230 = vmatpush1.bf16.msra.mxu1 %v10541_v56  ;;  %v10619_v56 = vld [vmem:[%s11632_s26 + $0x880] ss:$8 sps:$4 sm:$0xff]  }
 0x24b   : > { %7886 = vmatpush1.bf16.msra.mxu0 %v10544_v3  ;;  %7231 = vmatprep.subr.bf16.mxu1 %v10549_v58  ;;  %v10622_v3 = vld [vmem:[%s11632_s26 + $0x1880] ss:$8 sps:$4 sm:$0xff]   ;;  %v10627_v58 = vld [vmem:[%s11632_s26 + $0x894] ss:$8 sps:$4 sm:$0xff]  }
 0x24c   : > { %7887 = vmatprep.subr.bf16.mxu0 %v10552_v4  ;;  %v10630_v4 = vld [vmem:[%s11632_s26 + $0x1894] ss:$8 sps:$4 sm:$0xff]  }
 0x24e   : > { %7232 = vmatpush1.bf16.msra.mxu1 %v10547_v5  ;;  %v10625_v5 = vld [vmem:[%s11632_s26 + $0x890] ss:$8 sps:$4 sm:$0xff]  }
 0x24f   : > { %7888 = vmatpush1.bf16.msra.mxu0 %v10550_v6  ;;  %7233 = vmatprep.subr.bf16.mxu1 %v10555_v7  ;;  %v10628_v6 = vld [vmem:[%s11632_s26 + $0x1890] ss:$8 sps:$4 sm:$0xff]   ;;  %v10633_v7 = vld [vmem:[%s11632_s26 + $0x8a4] ss:$8 sps:$4 sm:$0xff]  }
 0x250   : > { %7889 = vmatprep.subr.bf16.mxu0 %v10558_v8  ;;  %v10636_v8 = vld [vmem:[%s11632_s26 + $0x18a4] ss:$8 sps:$4 sm:$0xff]  }
 0x252   : > { %7234 = vmatpush1.bf16.msra.mxu1 %v10553_v9  ;;  %v10631_v9 = vld [vmem:[%s11632_s26 + $0x8a0] ss:$8 sps:$4 sm:$0xff]  }
 0x253   : > { %7890 = vmatpush1.bf16.msra.mxu0 %v10556_v10  ;;  %7235 = vmatprep.subr.bf16.mxu1 %v10561_v11  ;;  %v10634_v10 = vld [vmem:[%s11632_s26 + $0x18a0] ss:$8 sps:$4 sm:$0xff]   ;;  %v10639_v11 = vld [vmem:[%s11632_s26 + $0x8b4] ss:$8 sps:$4 sm:$0xff]  }
 0x254   : > { %7891 = vmatprep.subr.bf16.mxu0 %v10564_v12  ;;  %v10642_v12 = vld [vmem:[%s11632_s26 + $0x18b4] ss:$8 sps:$4 sm:$0xff]  }
 0x256   : > { %7236 = vmatpush1.bf16.msra.mxu1 %v10559_v19  ;;  %v10637_v19 = vld [vmem:[%s11632_s26 + $0x8b0] ss:$8 sps:$4 sm:$0xff]  }
 0x257   : > { %7892 = vmatpush1.bf16.msra.mxu0 %v10562_v20  ;;  %7237 = vmatprep.subr.bf16.mxu1 %v10567_v21  ;;  %v10640_v20 = vld [vmem:[%s11632_s26 + $0x18b0] ss:$8 sps:$4 sm:$0xff]   ;;  %v10645_v21 = vld [vmem:[%s11632_s26 + $0x8c4] ss:$8 sps:$4 sm:$0xff]  }
 0x258   : > { %7893 = vmatprep.subr.bf16.mxu0 %v10570_v22  ;;  %v10648_v22 = vld [vmem:[%s11632_s26 + $0x18c4] ss:$8 sps:$4 sm:$0xff]  }
 0x25a   : > { %7238 = vmatpush1.bf16.msra.mxu1 %v10565_v2  ;;  %v10643_v2 = vld [vmem:[%s11632_s26 + $0x8c0] ss:$8 sps:$4 sm:$0xff]  }
 0x25b   : > { %7894 = vmatpush1.bf16.msra.mxu0 %v10568_v24  ;;  %7248 = vmatprep.subr.bf16.mxu1 %v10573_v13  ;;  %v10646_v24 = vld [vmem:[%s11632_s26 + $0x18c0] ss:$8 sps:$4 sm:$0xff]   ;;  %v10651_v13 = vld [vmem:[%s11632_s26 + $0x8d4] ss:$8 sps:$4 sm:$0xff]  }
 0x25c   : > { %7904 = vmatprep.subr.bf16.mxu0 %v10576_v53  ;;  %v10654_v53 = vld [vmem:[%s11632_s26 + $0x18d4] ss:$8 sps:$4 sm:$0xff]  }
 0x25d   : > { %7240 = vmatmul.mubr.bf16.vlgmr.msra.gmra.mrb[0].mxu1 %v1439_v27  ;;  %v10657_v27 = vld [vmem:[%s11632_s26 + $0x8e4] ss:$8 sps:$4 sm:$0xff]  }
 0x25e   : > { %7896 = vmatmul.mubr.bf16.vlgmr.msra.gmra.mrb[0].mxu0 %v1635_v28  ;;  %7249 = vmatpush1.bf16.msra.mxu1 %v10571_v29  ;;  %v10660_v28 = vld [vmem:[%s11632_s26 + $0x18e4] ss:$8 sps:$4 sm:$0xff]   ;;  %v10655_v29 = vld [vmem:[%s11632_s26 + $0x8e0] ss:$8 sps:$4 sm:$0xff]  }
 0x25f   : > { %7905 = vmatpush1.bf16.msra.mxu0 %v10574_v30  ;;  %7250 = vmatprep.subr.bf16.mxu1 %v10579_v31  ;;  %v10658_v30 = vld [vmem:[%s11632_s26 + $0x18e0] ss:$8 sps:$4 sm:$0xff]   ;;  %v10663_v31 = vld [vmem:[%s11632_s26 + $0x8f4] ss:$8 sps:$4 sm:$0xff]  }
 0x260   : > { %7906 = vmatprep.subr.bf16.mxu0 %v10582_v32  ;;  %7280 = vmatprep.mubr.bf16.mxu1 %v12329_v33  ;;  %v10666_v32 = vld [vmem:[%s11632_s26 + $0x18f4] ss:$8 sps:$4 sm:$0xff]  }
 0x261   : > { %7936 = vmatprep.mubr.bf16.mxu0 %v12332_v15 }
 0x262   : > { %7251 = vmatpush1.bf16.msra.mxu1 %v10577_v16  ;;  %v10661_v16 = vld [vmem:[%s11632_s26 + $0x8f0] ss:$8 sps:$4 sm:$0xff]  }
 0x263   : > { %7907 = vmatpush1.bf16.msra.mxu0 %v10580_v34  ;;  %7252 = vmatprep.subr.bf16.mxu1 %v10585_v35  ;;  %v10664_v34 = vld [vmem:[%s11632_s26 + $0x18f0] ss:$8 sps:$4 sm:$0xff]   ;;  %v10669_v35 = vld [vmem:[%s11632_s26 + $0x904] ss:$8 sps:$4 sm:$0xff]  }
 0x264   : > { %7908 = vmatprep.subr.bf16.mxu0 %v10588_v36  ;;  %v10672_v36 = vld [vmem:[%s11632_s26 + $0x1904] ss:$8 sps:$4 sm:$0xff]  }
 0x266   : > { %7253 = vmatpush1.bf16.msra.mxu1 %v10583_v18  ;;  %v12398_v18 = vrot.slane %v12306_v42, %v11696_v50  ;;  %v1489_v42 = vcombine.high %v12329_v33, %v12329_v33  ;;  %v10681_v33 = vld [vmem:[%s11632_s26 + $0x924] ss:$8 sps:$4 sm:$0xff]  }
 0x267   : > { %7909 = vmatpush1.bf16.msra.mxu0 %v10586_v38  ;;  %7254 = vmatprep.subr.bf16.mxu1 %v10591_v43  ;;  %v12402_v38 = vrot.slane %v12310_v23, %v11696_v50  ;;  %v10667_v43 = vld [vmem:[%s11632_s26 + $0x900] ss:$8 sps:$4 sm:$0xff]   ;;  %v10673_v23 = vld [vmem:[%s11632_s26 + $0x910] ss:$8 sps:$4 sm:$0xff]  }
 0x268   : > { %7910 = vmatprep.subr.bf16.mxu0 %v10594_v45  ;;  %v10670_v45 = vld [vmem:[%s11632_s26 + $0x1900] ss:$8 sps:$4 sm:$0xff]  }
 0x26a   : > { %7255 = vmatpush1.bf16.msra.mxu1 %v10589_v25  ;;  %v10675_v25 = vld [vmem:[%s11632_s26 + $0x914] ss:$8 sps:$4 sm:$0xff]  }
 0x26b   : > { %7911 = vmatpush1.bf16.msra.mxu0 %v10592_v46  ;;  %7256 = vmatprep.subr.bf16.mxu1 %v10597_v26  ;;  %v10678_v46 = vld [vmem:[%s11632_s26 + $0x1914] ss:$8 sps:$4 sm:$0xff]   ;;  %v1685_v26 = vcombine.high %v12332_v15, %v12332_v15  ;;  %v10679_v15 = vld [vmem:[%s11632_s26 + $0x920] ss:$8 sps:$4 sm:$0xff]  }
 0x26c   : > { %7912 = vmatprep.subr.bf16.mxu0 %v10600_v47  ;;  %v10676_v47 = vld [vmem:[%s11632_s26 + $0x1910] ss:$8 sps:$4 sm:$0xff]  }
 0x26e   : > { %7257 = vmatpush1.bf16.msra.mxu1 %v10595_v37  ;;  %v10684_v37 = vld [vmem:[%s11632_s26 + $0x1924] ss:$8 sps:$4 sm:$0xff]  }
 0x26f   : > { %7913 = vmatpush1.bf16.msra.mxu0 %v10598_v48  ;;  %7258 = vmatprep.subr.bf16.mxu1 %v10603_v17  ;;  %v10682_v48 = vld [vmem:[%s11632_s26 + $0x1920] ss:$8 sps:$4 sm:$0xff]   ;;  %v10687_v17 = vld [vmem:[%s11632_s26 + $0x934] ss:$8 sps:$4 sm:$0xff]  }
 0x270   : > { %7914 = vmatprep.subr.bf16.mxu0 %v10606_v49  ;;  %v10690_v49 = vld [vmem:[%s11632_s26 + $0x1934] ss:$8 sps:$4 sm:$0xff]  }
 0x272   : > { %7259 = vmatpush1.bf16.msra.mxu1 %v10601_v51  ;;  %v10685_v51 = vld [vmem:[%s11632_s26 + $0x930] ss:$8 sps:$4 sm:$0xff]  }
 0x273   : > { %7915 = vmatpush1.bf16.msra.mxu0 %v10604_v52  ;;  %7260 = vmatprep.subr.bf16.mxu1 %v10609_v54  ;;  %v10688_v52 = vld [vmem:[%s11632_s26 + $0x1930] ss:$8 sps:$4 sm:$0xff]   ;;  %v10693_v54 = vld [vmem:[%s11632_s26 + $0x944] ss:$8 sps:$4 sm:$0xff]  }
 0x274   : > { %7916 = vmatprep.subr.bf16.mxu0 %v10612_v55  ;;  %v10696_v55 = vld [vmem:[%s11632_s26 + $0x1944] ss:$8 sps:$4 sm:$0xff]  }
 0x276   : > { %7261 = vmatpush1.bf16.msra.mxu1 %v10607_v39  ;;  %v10691_v39 = vld [vmem:[%s11632_s26 + $0x940] ss:$8 sps:$4 sm:$0xff]  }
 0x277   : > { %7917 = vmatpush1.bf16.msra.mxu0 %v10610_v40  ;;  %7262 = vmatprep.subr.bf16.mxu1 %v10615_v61  ;;  %v10694_v40 = vld [vmem:[%s11632_s26 + $0x1940] ss:$8 sps:$4 sm:$0xff]   ;;  %v10699_v61 = vld [vmem:[%s11632_s26 + $0x954] ss:$8 sps:$4 sm:$0xff]  }
 0x278   : > { %7918 = vmatprep.subr.bf16.mxu0 %v10618_v62  ;;  %v10702_v62 = vld [vmem:[%s11632_s26 + $0x1954] ss:$8 sps:$4 sm:$0xff]  }
 0x27a   : > { %7263 = vmatpush1.bf16.msra.mxu1 %v10613_v63  ;;  %v10697_v63 = vld [vmem:[%s11632_s26 + $0x950] ss:$8 sps:$4 sm:$0xff]  }
 0x27b   : > { %7919 = vmatpush1.bf16.msra.mxu0 %v10616_v0  ;;  %7264 = vmatprep.subr.bf16.mxu1 %v10621_v41  ;;  %v10700_v0 = vld [vmem:[%s11632_s26 + $0x1950] ss:$8 sps:$4 sm:$0xff]   ;;  %v10705_v41 = vld [vmem:[%s11632_s26 + $0x964] ss:$8 sps:$4 sm:$0xff]  }
 0x27c   : > { %7920 = vmatprep.subr.bf16.mxu0 %v10624_v1  ;;  %v10708_v1 = vld [vmem:[%s11632_s26 + $0x1964] ss:$8 sps:$4 sm:$0xff]  }
 0x27e   : > { %7265 = vmatpush1.bf16.msra.mxu1 %v10619_v56  ;;  %v10703_v56 = vld [vmem:[%s11632_s26 + $0x960] ss:$8 sps:$4 sm:$0xff]  }
 0x27f   : > { %7921 = vmatpush1.bf16.msra.mxu0 %v10622_v3  ;;  %7266 = vmatprep.subr.bf16.mxu1 %v10627_v58  ;;  %v10706_v3 = vld [vmem:[%s11632_s26 + $0x1960] ss:$8 sps:$4 sm:$0xff]   ;;  %v10711_v58 = vld [vmem:[%s11632_s26 + $0x974] ss:$8 sps:$4 sm:$0xff]  }
 0x280   : > { %7922 = vmatprep.subr.bf16.mxu0 %v10630_v4  ;;  %v10714_v4 = vld [vmem:[%s11632_s26 + $0x1974] ss:$8 sps:$4 sm:$0xff]  }
 0x282   : > { %7267 = vmatpush1.bf16.msra.mxu1 %v10625_v5  ;;  %v10709_v5 = vld [vmem:[%s11632_s26 + $0x970] ss:$8 sps:$4 sm:$0xff]  }
 0x283   : > { %7923 = vmatpush1.bf16.msra.mxu0 %v10628_v6  ;;  %7268 = vmatprep.subr.bf16.mxu1 %v10633_v7  ;;  %v10712_v6 = vld [vmem:[%s11632_s26 + $0x1970] ss:$8 sps:$4 sm:$0xff]   ;;  %v10717_v7 = vld [vmem:[%s11632_s26 + $0x984] ss:$8 sps:$4 sm:$0xff]  }
 0x284   : > { %7924 = vmatprep.subr.bf16.mxu0 %v10636_v8  ;;  %v10720_v8 = vld [vmem:[%s11632_s26 + $0x1984] ss:$8 sps:$4 sm:$0xff]  }
 0x286   : > { %7269 = vmatpush1.bf16.msra.mxu1 %v10631_v9  ;;  %v10715_v9 = vld [vmem:[%s11632_s26 + $0x980] ss:$8 sps:$4 sm:$0xff]  }
 0x287   : > { %7925 = vmatpush1.bf16.msra.mxu0 %v10634_v10  ;;  %7270 = vmatprep.subr.bf16.mxu1 %v10639_v11  ;;  %v10718_v10 = vld [vmem:[%s11632_s26 + $0x1980] ss:$8 sps:$4 sm:$0xff]   ;;  %v10723_v11 = vld [vmem:[%s11632_s26 + $0x994] ss:$8 sps:$4 sm:$0xff]  }
 0x288   : > { %7926 = vmatprep.subr.bf16.mxu0 %v10642_v12  ;;  %v10726_v12 = vld [vmem:[%s11632_s26 + $0x1994] ss:$8 sps:$4 sm:$0xff]  }
 0x28a   : > { %7271 = vmatpush1.bf16.msra.mxu1 %v10637_v19  ;;  %v10721_v19 = vld [vmem:[%s11632_s26 + $0x990] ss:$8 sps:$4 sm:$0xff]  }
 0x28b   : > { %7927 = vmatpush1.bf16.msra.mxu0 %v10640_v20  ;;  %7272 = vmatprep.subr.bf16.mxu1 %v10645_v21  ;;  %v10724_v20 = vld [vmem:[%s11632_s26 + $0x1990] ss:$8 sps:$4 sm:$0xff]   ;;  %v10729_v21 = vld [vmem:[%s11632_s26 + $0x9a4] ss:$8 sps:$4 sm:$0xff]  }
 0x28c   : > { %7928 = vmatprep.subr.bf16.mxu0 %v10648_v22  ;;  %v10732_v22 = vld [vmem:[%s11632_s26 + $0x19a4] ss:$8 sps:$4 sm:$0xff]  }
 0x28e   : > { %7273 = vmatpush1.bf16.msra.mxu1 %v10643_v2  ;;  %v10727_v2 = vld [vmem:[%s11632_s26 + $0x9a0] ss:$8 sps:$4 sm:$0xff]  }
 0x28f   : > { %7929 = vmatpush1.bf16.msra.mxu0 %v10646_v24  ;;  %7274 = vmatprep.subr.bf16.mxu1 %v10651_v13  ;;  %v10730_v24 = vld [vmem:[%s11632_s26 + $0x19a0] ss:$8 sps:$4 sm:$0xff]   ;;  %v10735_v13 = vld [vmem:[%s11632_s26 + $0x9b4] ss:$8 sps:$4 sm:$0xff]  }
 0x290   : > { %7930 = vmatprep.subr.bf16.mxu0 %v10654_v53  ;;  %v10738_v53 = vld [vmem:[%s11632_s26 + $0x19b4] ss:$8 sps:$4 sm:$0xff]  }
 0x292   : > { %7275 = vmatpush1.bf16.msra.mxu1 %v10649_v59  ;;  %v10733_v59 = vld [vmem:[%s11632_s26 + $0x9b0] ss:$8 sps:$4 sm:$0xff]  }
 0x293   : > { %7931 = vmatpush1.bf16.msra.mxu0 %v10652_v57  ;;  %7276 = vmatprep.subr.bf16.mxu1 %v10657_v27  ;;  %v10736_v57 = vld [vmem:[%s11632_s26 + $0x19b0] ss:$8 sps:$4 sm:$0xff]   ;;  %v10741_v27 = vld [vmem:[%s11632_s26 + $0x9c4] ss:$8 sps:$4 sm:$0xff]  }
 0x294   : > { %7932 = vmatprep.subr.bf16.mxu0 %v10660_v28  ;;  %v10744_v28 = vld [vmem:[%s11632_s26 + $0x19c4] ss:$8 sps:$4 sm:$0xff]  }
 0x296   : > { %7277 = vmatpush1.bf16.msra.mxu1 %v10655_v29  ;;  %v10739_v29 = vld [vmem:[%s11632_s26 + $0x9c0] ss:$8 sps:$4 sm:$0xff]  }
 0x297   : > { %7933 = vmatpush1.bf16.msra.mxu0 %v10658_v30  ;;  %7278 = vmatprep.subr.bf16.mxu1 %v10663_v31  ;;  %v10742_v30 = vld [vmem:[%s11632_s26 + $0x19c0] ss:$8 sps:$4 sm:$0xff]   ;;  %v10747_v31 = vld [vmem:[%s11632_s26 + $0x9d4] ss:$8 sps:$4 sm:$0xff]  }
 0x298   : > { %7934 = vmatprep.subr.bf16.mxu0 %v10666_v32  ;;  %v10750_v32 = vld [vmem:[%s11632_s26 + $0x19d4] ss:$8 sps:$4 sm:$0xff]  }
 0x29a   : > { %7279 = vmatpush1.bf16.msra.mxu1 %v10661_v16  ;;  %v10745_v16 = vld [vmem:[%s11632_s26 + $0x9d0] ss:$8 sps:$4 sm:$0xff]  }
 0x29b   : > { %7935 = vmatpush1.bf16.msra.mxu0 %v10664_v34  ;;  %7289 = vmatprep.subr.bf16.mxu1 %v10669_v35  ;;  %v10748_v34 = vld [vmem:[%s11632_s26 + $0x19d0] ss:$8 sps:$4 sm:$0xff]   ;;  %v10753_v35 = vld [vmem:[%s11632_s26 + $0x9e4] ss:$8 sps:$4 sm:$0xff]  }
 0x29c   : > { %7945 = vmatprep.subr.bf16.mxu0 %v10672_v36  ;;  %v10756_v36 = vld [vmem:[%s11632_s26 + $0x19e4] ss:$8 sps:$4 sm:$0xff]  }
 0x29d   : > { %7281 = vmatmul.mubr.bf16.vlgmr.msra.gmra.mrb[0].mxu1 %v12398_v18 }
 0x29e   : > { %7937 = vmatmul.mubr.bf16.vlgmr.msra.gmra.mrb[0].mxu0 %v12402_v38  ;;  %7290 = vmatpush1.bf16.msra.mxu1 %v10667_v43  ;;  %v1442_v43 = vcombine.high %v12295_v60, %v12295_v60  ;;  %v10757_v60 = vld [vmem:[%s11632_s26 + $0x9f0] ss:$8 sps:$4 sm:$0xff]  }
 0x29f   : > { %7946 = vmatpush1.bf16.msra.mxu0 %v10670_v45  ;;  %7291 = vmatprep.subr.bf16.mxu1 %v10675_v25  ;;  %v1638_v45 = vcombine.high %v12298_v14, %v12298_v14  ;;  %v10751_v25 = vld [vmem:[%s11632_s26 + $0x9e0] ss:$8 sps:$4 sm:$0xff]   ;;  %v10760_v14 = vld [vmem:[%s11632_s26 + $0x19f0] ss:$8 sps:$4 sm:$0xff]  }
 0x2a0   : > { %7947 = vmatprep.subr.bf16.mxu0 %v10678_v46  ;;  %7321 = vmatprep.mubr.bf16.mxu1 %v1489_v42  ;;  %v10754_v46 = vld [vmem:[%s11632_s26 + $0x19e0] ss:$8 sps:$4 sm:$0xff]   ;;  %v10759_v42 = vld [vmem:[%s11632_s26 + $0x9f4] ss:$8 sps:$4 sm:$0xff]  }
 0x2a1   : > { %7977 = vmatprep.mubr.bf16.mxu0 %v1685_v26  ;;  %v10762_v26 = vld [vmem:[%s11632_s26 + $0x19f4] ss:$8 sps:$4 sm:$0xff]  }
 0x2a2   : > { %7292 = vmatpush1.bf16.msra.mxu1 %v10673_v23  ;;  %v12475_v23 = vrot.slane %v1442_v43, %v11696_v50  ;;  %v10829_v43 = vld [vmem:[%s11632_s26 + $0xab0] ss:$8 sps:$4 sm:$0xff]  }
 0x2a3   : > { %7948 = vmatpush1.bf16.msra.mxu0 %v10676_v47  ;;  %7293 = vmatprep.subr.bf16.mxu1 %v10681_v33  ;;  %v12478_v47 = vrot.slane %v1638_v45, %v11696_v50  ;;  %v10765_v33 = vld [vmem:[%s11632_s26 + $0xa04] ss:$8 sps:$4 sm:$0xff]   ;;  %v10832_v45 = vld [vmem:[%s11632_s26 + $0x1ab0] ss:$8 sps:$4 sm:$0xff]  }
 0x2a4   : > { %7949 = vmatprep.subr.bf16.mxu0 %v10684_v37  ;;  %v10768_v37 = vld [vmem:[%s11632_s26 + $0x1a04] ss:$8 sps:$4 sm:$0xff]  }
 0x2a6   : > { %7294 = vmatpush1.bf16.msra.mxu1 %v10679_v15  ;;  %v1458_v15 = vcombine.high %v12475_v23, %v12475_v23 }
 0x2a7   : > { %7950 = vmatpush1.bf16.msra.mxu0 %v10682_v48  ;;  %7295 = vmatprep.subr.bf16.mxu1 %v10687_v17  ;;  %v1654_v48 = vcombine.high %v12478_v47, %v12478_v47  ;;  %v1487_v17 = vcombine.high %v12398_v18, %v12398_v18 }
 0x2a8   : > { %7951 = vmatprep.subr.bf16.mxu0 %v10690_v49  ;;  %v1683_v49 = vcombine.high %v12402_v38, %v12402_v38  ;;  %v10769_v38 = vld [vmem:[%s11632_s26 + $0xa10] ss:$8 sps:$4 sm:$0xff]  }
 0x2a9   : > { %v12500_v18 = vrot.slane %v1654_v48, %v11696_v50  ;;  %v10852_v48 = vld [vmem:[%s11632_s26 + $0x1ae4] ss:$8 sps:$4 sm:$0xff]  }
 0x2aa   : > { %7296 = vmatpush1.bf16.msra.mxu1 %v10685_v51  ;;  %v10763_v51 = vld [vmem:[%s11632_s26 + $0xa00] ss:$8 sps:$4 sm:$0xff]  }
 0x2ab   : > { %7952 = vmatpush1.bf16.msra.mxu0 %v10688_v52  ;;  %7297 = vmatprep.subr.bf16.mxu1 %v10693_v54  ;;  %v10766_v52 = vld [vmem:[%s11632_s26 + $0x1a00] ss:$8 sps:$4 sm:$0xff]   ;;  %v10771_v54 = vld [vmem:[%s11632_s26 + $0xa14] ss:$8 sps:$4 sm:$0xff]  }
 0x2ac   : > { %7953 = vmatprep.subr.bf16.mxu0 %v10696_v55  ;;  %v10774_v55 = vld [vmem:[%s11632_s26 + $0x1a14] ss:$8 sps:$4 sm:$0xff]  }
 0x2ae   : > { %7298 = vmatpush1.bf16.msra.mxu1 %v10691_v39  ;;  %v12497_v39 = vrot.slane %v1458_v15, %v11696_v50  ;;  %v10849_v15 = vld [vmem:[%s11632_s26 + $0xae4] ss:$8 sps:$4 sm:$0xff]  }
 0x2af   : > { %7954 = vmatpush1.bf16.msra.mxu0 %v10694_v40  ;;  %7299 = vmatprep.subr.bf16.mxu1 %v10699_v61  ;;  %v10772_v40 = vld [vmem:[%s11632_s26 + $0x1a10] ss:$8 sps:$4 sm:$0xff]   ;;  %v10777_v61 = vld [vmem:[%s11632_s26 + $0xa24] ss:$8 sps:$4 sm:$0xff]  }
 0x2b0   : > { %7955 = vmatprep.subr.bf16.mxu0 %v10702_v62  ;;  %v10780_v62 = vld [vmem:[%s11632_s26 + $0x1a24] ss:$8 sps:$4 sm:$0xff]  }
 0x2b2   : > { %7300 = vmatpush1.bf16.msra.mxu1 %v10697_v63  ;;  %v10775_v63 = vld [vmem:[%s11632_s26 + $0xa20] ss:$8 sps:$4 sm:$0xff]  }
 0x2b3   : > { %7956 = vmatpush1.bf16.msra.mxu0 %v10700_v0  ;;  %7301 = vmatprep.subr.bf16.mxu1 %v10705_v41  ;;  %v10778_v0 = vld [vmem:[%s11632_s26 + $0x1a20] ss:$8 sps:$4 sm:$0xff]   ;;  %v10783_v41 = vld [vmem:[%s11632_s26 + $0xa34] ss:$8 sps:$4 sm:$0xff]  }
 0x2b4   : > { %7957 = vmatprep.subr.bf16.mxu0 %v10708_v1  ;;  %v10786_v1 = vld [vmem:[%s11632_s26 + $0x1a34] ss:$8 sps:$4 sm:$0xff]  }
 0x2b6   : > { %7302 = vmatpush1.bf16.msra.mxu1 %v10703_v56  ;;  %v10781_v56 = vld [vmem:[%s11632_s26 + $0xa30] ss:$8 sps:$4 sm:$0xff]  }
 0x2b7   : > { %7958 = vmatpush1.bf16.msra.mxu0 %v10706_v3  ;;  %7303 = vmatprep.subr.bf16.mxu1 %v10711_v58  ;;  %v10784_v3 = vld [vmem:[%s11632_s26 + $0x1a30] ss:$8 sps:$4 sm:$0xff]   ;;  %v10789_v58 = vld [vmem:[%s11632_s26 + $0xa44] ss:$8 sps:$4 sm:$0xff]  }
 0x2b8   : > { %7959 = vmatprep.subr.bf16.mxu0 %v10714_v4  ;;  %v10792_v4 = vld [vmem:[%s11632_s26 + $0x1a44] ss:$8 sps:$4 sm:$0xff]  }
 0x2ba   : > { %7304 = vmatpush1.bf16.msra.mxu1 %v10709_v5  ;;  %v10787_v5 = vld [vmem:[%s11632_s26 + $0xa40] ss:$8 sps:$4 sm:$0xff]  }
 0x2bb   : > { %7960 = vmatpush1.bf16.msra.mxu0 %v10712_v6  ;;  %7305 = vmatprep.subr.bf16.mxu1 %v10717_v7  ;;  %v10790_v6 = vld [vmem:[%s11632_s26 + $0x1a40] ss:$8 sps:$4 sm:$0xff]   ;;  %v10795_v7 = vld [vmem:[%s11632_s26 + $0xa54] ss:$8 sps:$4 sm:$0xff]  }
 0x2bc   : > { %7961 = vmatprep.subr.bf16.mxu0 %v10720_v8  ;;  %v10798_v8 = vld [vmem:[%s11632_s26 + $0x1a54] ss:$8 sps:$4 sm:$0xff]  }
 0x2be   : > { %7306 = vmatpush1.bf16.msra.mxu1 %v10715_v9  ;;  %v10793_v9 = vld [vmem:[%s11632_s26 + $0xa50] ss:$8 sps:$4 sm:$0xff]  }
 0x2bf   : > { %7962 = vmatpush1.bf16.msra.mxu0 %v10718_v10  ;;  %7307 = vmatprep.subr.bf16.mxu1 %v10723_v11  ;;  %v10796_v10 = vld [vmem:[%s11632_s26 + $0x1a50] ss:$8 sps:$4 sm:$0xff]   ;;  %v10801_v11 = vld [vmem:[%s11632_s26 + $0xa64] ss:$8 sps:$4 sm:$0xff]  }
 0x2c0   : > { %7963 = vmatprep.subr.bf16.mxu0 %v10726_v12  ;;  %v10804_v12 = vld [vmem:[%s11632_s26 + $0x1a64] ss:$8 sps:$4 sm:$0xff]  }
 0x2c2   : > { %7308 = vmatpush1.bf16.msra.mxu1 %v10721_v19  ;;  %v10799_v19 = vld [vmem:[%s11632_s26 + $0xa60] ss:$8 sps:$4 sm:$0xff]  }
 0x2c3   : > { %7964 = vmatpush1.bf16.msra.mxu0 %v10724_v20  ;;  %7309 = vmatprep.subr.bf16.mxu1 %v10729_v21  ;;  %v10802_v20 = vld [vmem:[%s11632_s26 + $0x1a60] ss:$8 sps:$4 sm:$0xff]   ;;  %v10807_v21 = vld [vmem:[%s11632_s26 + $0xa74] ss:$8 sps:$4 sm:$0xff]  }
 0x2c4   : > { %7965 = vmatprep.subr.bf16.mxu0 %v10732_v22  ;;  %v10810_v22 = vld [vmem:[%s11632_s26 + $0x1a74] ss:$8 sps:$4 sm:$0xff]  }
 0x2c6   : > { %7310 = vmatpush1.bf16.msra.mxu1 %v10727_v2  ;;  %v10805_v2 = vld [vmem:[%s11632_s26 + $0xa70] ss:$8 sps:$4 sm:$0xff]  }
 0x2c7   : > { %7966 = vmatpush1.bf16.msra.mxu0 %v10730_v24  ;;  %7311 = vmatprep.subr.bf16.mxu1 %v10735_v13  ;;  %v10808_v24 = vld [vmem:[%s11632_s26 + $0x1a70] ss:$8 sps:$4 sm:$0xff]   ;;  %v10813_v13 = vld [vmem:[%s11632_s26 + $0xa84] ss:$8 sps:$4 sm:$0xff]  }
 0x2c8   : > { %7967 = vmatprep.subr.bf16.mxu0 %v10738_v53  ;;  %v10816_v53 = vld [vmem:[%s11632_s26 + $0x1a84] ss:$8 sps:$4 sm:$0xff]  }
 0x2ca   : > { %7312 = vmatpush1.bf16.msra.mxu1 %v10733_v59  ;;  %v10811_v59 = vld [vmem:[%s11632_s26 + $0xa80] ss:$8 sps:$4 sm:$0xff]  }
 0x2cb   : > { %7968 = vmatpush1.bf16.msra.mxu0 %v10736_v57  ;;  %7313 = vmatprep.subr.bf16.mxu1 %v10741_v27  ;;  %v10814_v57 = vld [vmem:[%s11632_s26 + $0x1a80] ss:$8 sps:$4 sm:$0xff]   ;;  %v10819_v27 = vld [vmem:[%s11632_s26 + $0xa94] ss:$8 sps:$4 sm:$0xff]  }
 0x2cc   : > { %7969 = vmatprep.subr.bf16.mxu0 %v10744_v28  ;;  %v10822_v28 = vld [vmem:[%s11632_s26 + $0x1a94] ss:$8 sps:$4 sm:$0xff]  }
 0x2ce   : > { %7314 = vmatpush1.bf16.msra.mxu1 %v10739_v29  ;;  %v10817_v29 = vld [vmem:[%s11632_s26 + $0xa90] ss:$8 sps:$4 sm:$0xff]  }
 0x2cf   : > { %7970 = vmatpush1.bf16.msra.mxu0 %v10742_v30  ;;  %7315 = vmatprep.subr.bf16.mxu1 %v10747_v31  ;;  %v10820_v30 = vld [vmem:[%s11632_s26 + $0x1a90] ss:$8 sps:$4 sm:$0xff]   ;;  %v10825_v31 = vld [vmem:[%s11632_s26 + $0xaa4] ss:$8 sps:$4 sm:$0xff]  }
 0x2d0   : > { %7971 = vmatprep.subr.bf16.mxu0 %v10750_v32  ;;  %v10828_v32 = vld [vmem:[%s11632_s26 + $0x1aa4] ss:$8 sps:$4 sm:$0xff]  }
 0x2d2   : > { %7316 = vmatpush1.bf16.msra.mxu1 %v10745_v16  ;;  %v10823_v16 = vld [vmem:[%s11632_s26 + $0xaa0] ss:$8 sps:$4 sm:$0xff]  }
 0x2d3   : > { %7972 = vmatpush1.bf16.msra.mxu0 %v10748_v34  ;;  %7317 = vmatprep.subr.bf16.mxu1 %v10753_v35  ;;  %v10826_v34 = vld [vmem:[%s11632_s26 + $0x1aa0] ss:$8 sps:$4 sm:$0xff]   ;;  %v10831_v35 = vld [vmem:[%s11632_s26 + $0xab4] ss:$8 sps:$4 sm:$0xff]  }
 0x2d4   : > { %7973 = vmatprep.subr.bf16.mxu0 %v10756_v36  ;;  %v10834_v36 = vld [vmem:[%s11632_s26 + $0x1ab4] ss:$8 sps:$4 sm:$0xff]  }
 0x2d6   : > { %7318 = vmatpush1.bf16.msra.mxu1 %v10751_v25  ;;  %v10837_v25 = vld [vmem:[%s11632_s26 + $0xac4] ss:$8 sps:$4 sm:$0xff]  }
 0x2d7   : > { %7974 = vmatpush1.bf16.msra.mxu0 %v10754_v46  ;;  %7319 = vmatprep.subr.bf16.mxu1 %v10759_v42  ;;  %v10840_v46 = vld [vmem:[%s11632_s26 + $0x1ac4] ss:$8 sps:$4 sm:$0xff]   ;;  %v10835_v42 = vld [vmem:[%s11632_s26 + $0xac0] ss:$8 sps:$4 sm:$0xff]  }
 0x2d8   : > { %7975 = vmatprep.subr.bf16.mxu0 %v10762_v26  ;;  %v10838_v26 = vld [vmem:[%s11632_s26 + $0x1ac0] ss:$8 sps:$4 sm:$0xff]  }
 0x2da   : > { %7320 = vmatpush1.bf16.msra.mxu1 %v10757_v60  ;;  %v10843_v60 = vld [vmem:[%s11632_s26 + $0xad4] ss:$8 sps:$4 sm:$0xff]  }
 0x2db   : > { %7976 = vmatpush1.bf16.msra.mxu0 %v10760_v14  ;;  %7330 = vmatprep.subr.bf16.mxu1 %v10765_v33  ;;  %v10846_v14 = vld [vmem:[%s11632_s26 + $0x1ad4] ss:$8 sps:$4 sm:$0xff]   ;;  %v10841_v33 = vld [vmem:[%s11632_s26 + $0xad0] ss:$8 sps:$4 sm:$0xff]  }
 0x2dc   : > { %7986 = vmatprep.subr.bf16.mxu0 %v10768_v37  ;;  %v10844_v37 = vld [vmem:[%s11632_s26 + $0x1ad0] ss:$8 sps:$4 sm:$0xff]  }
 0x2dd   : > { %7322 = vmatmul.mubr.bf16.vlgmr.msra.gmra.mrb[0].mxu1 %v1487_v17  ;;  %v10847_v17 = vld [vmem:[%s11632_s26 + $0xae0] ss:$8 sps:$4 sm:$0xff]  }
 0x2de   : > { %7978 = vmatmul.mubr.bf16.vlgmr.msra.gmra.mrb[0].mxu0 %v1683_v49  ;;  %7331 = vmatpush1.bf16.msra.mxu1 %v10763_v51  ;;  %v10850_v49 = vld [vmem:[%s11632_s26 + $0x1ae0] ss:$8 sps:$4 sm:$0xff]   ;;  %v10855_v51 = vld [vmem:[%s11632_s26 + $0xaf4] ss:$8 sps:$4 sm:$0xff]  }
 0x2df   : > { %7987 = vmatpush1.bf16.msra.mxu0 %v10766_v52  ;;  %7332 = vmatprep.subr.bf16.mxu1 %v10771_v54  ;;  %v10858_v52 = vld [vmem:[%s11632_s26 + $0x1af4] ss:$8 sps:$4 sm:$0xff]   ;;  %v10853_v54 = vld [vmem:[%s11632_s26 + $0xaf0] ss:$8 sps:$4 sm:$0xff]  }
 0x2e0   : > { %7988 = vmatprep.subr.bf16.mxu0 %v10774_v55  ;;  %7362 = vmatprep.mubr.bf16.mxu1 %v12497_v39  ;;  %v10856_v55 = vld [vmem:[%s11632_s26 + $0x1af0] ss:$8 sps:$4 sm:$0xff]  }
 0x2e1   : > { %8018 = vmatprep.mubr.bf16.mxu0 %v12500_v18 }
 0x2e2   : > { %7333 = vmatpush1.bf16.msra.mxu1 %v10769_v38  ;;  %v10862_v38 = vld [vmem:[%s11632_s26 + $0xb04] ss:$8 sps:$4 sm:$0xff]  }
 0x2e3   : > { %7989 = vmatpush1.bf16.msra.mxu0 %v10772_v40  ;;  %7334 = vmatprep.subr.bf16.mxu1 %v10777_v61  ;;  %v10866_v40 = vld [vmem:[%s11632_s26 + $0x1b04] ss:$8 sps:$4 sm:$0xff]   ;;  %v12566_v61 = vrot.slane %v12475_v23, %v11696_v50  ;;  %v1490_v23 = vcombine.high %v12497_v39, %v12497_v39 }
 0x2e4   : > { %7990 = vmatprep.subr.bf16.mxu0 %v10780_v62  ;;  %v12570_v62 = vrot.slane %v12478_v47, %v11696_v50  ;;  %v10867_v47 = vld [vmem:[%s11632_s26 + $0xb10] ss:$8 sps:$4 sm:$0xff]   ;;  %v10875_v39 = vld [vmem:[%s11632_s26 + $0xb24] ss:$8 sps:$4 sm:$0xff]  }
 0x2e6   : > { %7335 = vmatpush1.bf16.msra.mxu1 %v10775_v63  ;;  %v10860_v63 = vld [vmem:[%s11632_s26 + $0xb00] ss:$8 sps:$4 sm:$0xff]  }
 0x2e7   : > { %7991 = vmatpush1.bf16.msra.mxu0 %v10778_v0  ;;  %7336 = vmatprep.subr.bf16.mxu1 %v10783_v41  ;;  %v10864_v0 = vld [vmem:[%s11632_s26 + $0x1b00] ss:$8 sps:$4 sm:$0xff]   ;;  %v10869_v41 = vld [vmem:[%s11632_s26 + $0xb14] ss:$8 sps:$4 sm:$0xff]  }
 0x2e8   : > { %7992 = vmatprep.subr.bf16.mxu0 %v10786_v1  ;;  %v10872_v1 = vld [vmem:[%s11632_s26 + $0x1b14] ss:$8 sps:$4 sm:$0xff]  }
 0x2ea   : > { %7337 = vmatpush1.bf16.msra.mxu1 %v10781_v56  ;;  %v1686_v56 = vcombine.high %v12500_v18, %v12500_v18  ;;  %v10873_v18 = vld [vmem:[%s11632_s26 + $0xb20] ss:$8 sps:$4 sm:$0xff]  }
 0x2eb   : > { %7993 = vmatpush1.bf16.msra.mxu0 %v10784_v3  ;;  %7338 = vmatprep.subr.bf16.mxu1 %v10789_v58  ;;  %v10870_v3 = vld [vmem:[%s11632_s26 + $0x1b10] ss:$8 sps:$4 sm:$0xff]   ;;  %v10878_v58 = vld [vmem:[%s11632_s26 + $0x1b24] ss:$8 sps:$4 sm:$0xff]  }
 0x2ec   : > { %7994 = vmatprep.subr.bf16.mxu0 %v10792_v4  ;;  %v10876_v4 = vld [vmem:[%s11632_s26 + $0x1b20] ss:$8 sps:$4 sm:$0xff]  }
 0x2ee   : > { %7339 = vmatpush1.bf16.msra.mxu1 %v10787_v5  ;;  %v10881_v5 = vld [vmem:[%s11632_s26 + $0xb34] ss:$8 sps:$4 sm:$0xff]  }
 0x2ef   : > { %7995 = vmatpush1.bf16.msra.mxu0 %v10790_v6  ;;  %7340 = vmatprep.subr.bf16.mxu1 %v10795_v7  ;;  %v10884_v6 = vld [vmem:[%s11632_s26 + $0x1b34] ss:$8 sps:$4 sm:$0xff]   ;;  %v10879_v7 = vld [vmem:[%s11632_s26 + $0xb30] ss:$8 sps:$4 sm:$0xff]  }
 0x2f0   : > { %7996 = vmatprep.subr.bf16.mxu0 %v10798_v8  ;;  %v10882_v8 = vld [vmem:[%s11632_s26 + $0x1b30] ss:$8 sps:$4 sm:$0xff]  }
 0x2f2   : > { %7341 = vmatpush1.bf16.msra.mxu1 %v10793_v9  ;;  %v10887_v9 = vld [vmem:[%s11632_s26 + $0xb44] ss:$8 sps:$4 sm:$0xff]  }
 0x2f3   : > { %7997 = vmatpush1.bf16.msra.mxu0 %v10796_v10  ;;  %7342 = vmatprep.subr.bf16.mxu1 %v10801_v11  ;;  %v10890_v10 = vld [vmem:[%s11632_s26 + $0x1b44] ss:$8 sps:$4 sm:$0xff]   ;;  %v10885_v11 = vld [vmem:[%s11632_s26 + $0xb40] ss:$8 sps:$4 sm:$0xff]  }
 0x2f4   : > { %7998 = vmatprep.subr.bf16.mxu0 %v10804_v12  ;;  %v10888_v12 = vld [vmem:[%s11632_s26 + $0x1b40] ss:$8 sps:$4 sm:$0xff]  }
 0x2f6   : > { %7343 = vmatpush1.bf16.msra.mxu1 %v10799_v19  ;;  %v10893_v19 = vld [vmem:[%s11632_s26 + $0xb54] ss:$8 sps:$4 sm:$0xff]  }
 0x2f7   : > { %7999 = vmatpush1.bf16.msra.mxu0 %v10802_v20  ;;  %7344 = vmatprep.subr.bf16.mxu1 %v10807_v21  ;;  %v10896_v20 = vld [vmem:[%s11632_s26 + $0x1b54] ss:$8 sps:$4 sm:$0xff]   ;;  %v10891_v21 = vld [vmem:[%s11632_s26 + $0xb50] ss:$8 sps:$4 sm:$0xff]  }
 0x2f8   : > { %8000 = vmatprep.subr.bf16.mxu0 %v10810_v22  ;;  %v10894_v22 = vld [vmem:[%s11632_s26 + $0x1b50] ss:$8 sps:$4 sm:$0xff]  }
 0x2fa   : > { %7345 = vmatpush1.bf16.msra.mxu1 %v10805_v2  ;;  %v10899_v2 = vld [vmem:[%s11632_s26 + $0xb64] ss:$8 sps:$4 sm:$0xff]  }
 0x2fb   : > { %8001 = vmatpush1.bf16.msra.mxu0 %v10808_v24  ;;  %7346 = vmatprep.subr.bf16.mxu1 %v10813_v13  ;;  %v10902_v24 = vld [vmem:[%s11632_s26 + $0x1b64] ss:$8 sps:$4 sm:$0xff]   ;;  %v10897_v13 = vld [vmem:[%s11632_s26 + $0xb60] ss:$8 sps:$4 sm:$0xff]  }
 0x2fc   : > { %8002 = vmatprep.subr.bf16.mxu0 %v10816_v53  ;;  %v10900_v53 = vld [vmem:[%s11632_s26 + $0x1b60] ss:$8 sps:$4 sm:$0xff]  }
 0x2fe   : > { %7347 = vmatpush1.bf16.msra.mxu1 %v10811_v59  ;;  %v10905_v59 = vld [vmem:[%s11632_s26 + $0xb74] ss:$8 sps:$4 sm:$0xff]  }
 0x2ff   : > { %8003 = vmatpush1.bf16.msra.mxu0 %v10814_v57  ;;  %7348 = vmatprep.subr.bf16.mxu1 %v10819_v27  ;;  %v10908_v57 = vld [vmem:[%s11632_s26 + $0x1b74] ss:$8 sps:$4 sm:$0xff]   ;;  %v10903_v27 = vld [vmem:[%s11632_s26 + $0xb70] ss:$8 sps:$4 sm:$0xff]  }
 0x300   : > { %8004 = vmatprep.subr.bf16.mxu0 %v10822_v28  ;;  %v10906_v28 = vld [vmem:[%s11632_s26 + $0x1b70] ss:$8 sps:$4 sm:$0xff]  }
 0x302   : > { %7349 = vmatpush1.bf16.msra.mxu1 %v10817_v29  ;;  %v10911_v29 = vld [vmem:[%s11632_s26 + $0xb84] ss:$8 sps:$4 sm:$0xff]  }
 0x303   : > { %8005 = vmatpush1.bf16.msra.mxu0 %v10820_v30  ;;  %7350 = vmatprep.subr.bf16.mxu1 %v10825_v31  ;;  %v10914_v30 = vld [vmem:[%s11632_s26 + $0x1b84] ss:$8 sps:$4 sm:$0xff]   ;;  %v10909_v31 = vld [vmem:[%s11632_s26 + $0xb80] ss:$8 sps:$4 sm:$0xff]  }
 0x304   : > { %8006 = vmatprep.subr.bf16.mxu0 %v10828_v32  ;;  %v10912_v32 = vld [vmem:[%s11632_s26 + $0x1b80] ss:$8 sps:$4 sm:$0xff]  }
 0x306   : > { %7351 = vmatpush1.bf16.msra.mxu1 %v10823_v16  ;;  %v10917_v16 = vld [vmem:[%s11632_s26 + $0xb94] ss:$8 sps:$4 sm:$0xff]  }
 0x307   : > { %8007 = vmatpush1.bf16.msra.mxu0 %v10826_v34  ;;  %7352 = vmatprep.subr.bf16.mxu1 %v10831_v35  ;;  %v10920_v34 = vld [vmem:[%s11632_s26 + $0x1b94] ss:$8 sps:$4 sm:$0xff]   ;;  %v10915_v35 = vld [vmem:[%s11632_s26 + $0xb90] ss:$8 sps:$4 sm:$0xff]  }
 0x308   : > { %8008 = vmatprep.subr.bf16.mxu0 %v10834_v36  ;;  %v10918_v36 = vld [vmem:[%s11632_s26 + $0x1b90] ss:$8 sps:$4 sm:$0xff]  }
 0x30a   : > { %7353 = vmatpush1.bf16.msra.mxu1 %v10829_v43  ;;  %v10923_v43 = vld [vmem:[%s11632_s26 + $0xba4] ss:$8 sps:$4 sm:$0xff]  }
 0x30b   : > { %8009 = vmatpush1.bf16.msra.mxu0 %v10832_v45  ;;  %7354 = vmatprep.subr.bf16.mxu1 %v10837_v25  ;;  %v10926_v45 = vld [vmem:[%s11632_s26 + $0x1ba4] ss:$8 sps:$4 sm:$0xff]   ;;  %v10921_v25 = vld [vmem:[%s11632_s26 + $0xba0] ss:$8 sps:$4 sm:$0xff]  }
 0x30c   : > { %8010 = vmatprep.subr.bf16.mxu0 %v10840_v46  ;;  %v10924_v46 = vld [vmem:[%s11632_s26 + $0x1ba0] ss:$8 sps:$4 sm:$0xff]  }
 0x30e   : > { %7355 = vmatpush1.bf16.msra.mxu1 %v10835_v42  ;;  %v10929_v42 = vld [vmem:[%s11632_s26 + $0xbb4] ss:$8 sps:$4 sm:$0xff]  }
 0x30f   : > { %8011 = vmatpush1.bf16.msra.mxu0 %v10838_v26  ;;  %7356 = vmatprep.subr.bf16.mxu1 %v10843_v60  ;;  %v10932_v26 = vld [vmem:[%s11632_s26 + $0x1bb4] ss:$8 sps:$4 sm:$0xff]   ;;  %v10927_v60 = vld [vmem:[%s11632_s26 + $0xbb0] ss:$8 sps:$4 sm:$0xff]  }
 0x310   : > { %8012 = vmatprep.subr.bf16.mxu0 %v10846_v14  ;;  %v10930_v14 = vld [vmem:[%s11632_s26 + $0x1bb0] ss:$8 sps:$4 sm:$0xff]  }
 0x312   : > { %7357 = vmatpush1.bf16.msra.mxu1 %v10841_v33  ;;  %v10935_v33 = vld [vmem:[%s11632_s26 + $0xbc4] ss:$8 sps:$4 sm:$0xff]  }
 0x313   : > { %8013 = vmatpush1.bf16.msra.mxu0 %v10844_v37  ;;  %7358 = vmatprep.subr.bf16.mxu1 %v10849_v15  ;;  %v10938_v37 = vld [vmem:[%s11632_s26 + $0x1bc4] ss:$8 sps:$4 sm:$0xff]   ;;  %v10933_v15 = vld [vmem:[%s11632_s26 + $0xbc0] ss:$8 sps:$4 sm:$0xff]  }
 0x314   : > { %8014 = vmatprep.subr.bf16.mxu0 %v10852_v48  ;;  %v10936_v48 = vld [vmem:[%s11632_s26 + $0x1bc0] ss:$8 sps:$4 sm:$0xff]  }
 0x316   : > { %7359 = vmatpush1.bf16.msra.mxu1 %v10847_v17  ;;  %v10941_v17 = vld [vmem:[%s11632_s26 + $0xbd4] ss:$8 sps:$4 sm:$0xff]  }
 0x317   : > { %8015 = vmatpush1.bf16.msra.mxu0 %v10850_v49  ;;  %7360 = vmatprep.subr.bf16.mxu1 %v10855_v51  ;;  %v10944_v49 = vld [vmem:[%s11632_s26 + $0x1bd4] ss:$8 sps:$4 sm:$0xff]   ;;  %v10939_v51 = vld [vmem:[%s11632_s26 + $0xbd0] ss:$8 sps:$4 sm:$0xff]  }
 0x318   : > { %8016 = vmatprep.subr.bf16.mxu0 %v10858_v52  ;;  %v10942_v52 = vld [vmem:[%s11632_s26 + $0x1bd0] ss:$8 sps:$4 sm:$0xff]  }
 0x31a   : > { %7361 = vmatpush1.bf16.msra.mxu1 %v10853_v54  ;;  %v10947_v54 = vld [vmem:[%s11632_s26 + $0xbe4] ss:$8 sps:$4 sm:$0xff]  }
 0x31b   : > { %8017 = vmatpush1.bf16.msra.mxu0 %v10856_v55  ;;  %7371 = vmatprep.subr.bf16.mxu1 %v10862_v38  ;;  %v10950_v55 = vld [vmem:[%s11632_s26 + $0x1be4] ss:$8 sps:$4 sm:$0xff]   ;;  %v12635_v38 = vld [vmem:[%s11646_s6 + $0x18] sm:$0xff] }
 0x31c   : > { %8027 = vmatprep.subr.bf16.mxu0 %v10866_v40  ;;  %v12638_v40 = vld [vmem:[%s11646_s6 + $0x38] sm:$0xff] }
 0x31d   : > { %7363 = vmatmul.mubr.bf16.vlgmr.msra.gmra.mrb[0].mxu1 %v12566_v61 }
 0x31e   : > { %8019 = vmatmul.mubr.bf16.vlgmr.msra.gmra.mrb[0].mxu0 %v12570_v62  ;;  %7372 = vmatpush1.bf16.msra.mxu1 %v10860_v63  ;;  %v10945_v63 = vld [vmem:[%s11632_s26 + $0xbe0] ss:$8 sps:$4 sm:$0xff]  }
 0x31f   : > { %8028 = vmatpush1.bf16.msra.mxu0 %v10864_v0  ;;  %7373 = vmatprep.subr.bf16.mxu1 %v10869_v41  ;;  %v10948_v0 = vld [vmem:[%s11632_s26 + $0x1be0] ss:$8 sps:$4 sm:$0xff]   ;;  %v10953_v41 = vld [vmem:[%s11632_s26 + $0xbf4] ss:$8 sps:$4 sm:$0xff]  }
 0x320   : > { %8029 = vmatprep.subr.bf16.mxu0 %v10872_v1  ;;  %7403 = vmatprep.mubr.bf16.mxu1 %v1490_v23  ;;  %v10956_v1 = vld [vmem:[%s11632_s26 + $0x1bf4] ss:$8 sps:$4 sm:$0xff]   ;;  %v12646_v23 = vrot.slane %v12635_v38, %v11696_v50 }
 0x321   : > { %8059 = vmatprep.mubr.bf16.mxu0 %v1686_v56  ;;  %v12650_v56 = vrot.slane %v12638_v40, %v11696_v50 }
 0x322   : > { %7374 = vmatpush1.bf16.msra.mxu1 %v10867_v47  ;;  %v10951_v47 = vld [vmem:[%s11632_s26 + $0xbf0] ss:$8 sps:$4 sm:$0xff]  }
 0x323   : > { %8030 = vmatpush1.bf16.msra.mxu0 %v10870_v3  ;;  %7375 = vmatprep.subr.bf16.mxu1 %v10875_v39  ;;  %v10954_v3 = vld [vmem:[%s11632_s26 + $0x1bf0] ss:$8 sps:$4 sm:$0xff]   ;;  %v10959_v39 = vld [vmem:[%s11632_s26 + $0xc04] ss:$8 sps:$4 sm:$0xff]  }
 0x324   : > { %8031 = vmatprep.subr.bf16.mxu0 %v10878_v58  ;;  %v10962_v58 = vld [vmem:[%s11632_s26 + $0x1c04] ss:$8 sps:$4 sm:$0xff]  }
 0x326   : > { %7376 = vmatpush1.bf16.msra.mxu1 %v10873_v18  ;;  %v1506_v18 = vcombine.high %v12646_v23, %v12646_v23 }
 0x327   : > { %8032 = vmatpush1.bf16.msra.mxu0 %v10876_v4  ;;  %7377 = vmatprep.subr.bf16.mxu1 %v10881_v5  ;;  %v1702_v4 = vcombine.high %v12650_v56, %v12650_v56  ;;  %v1488_v5 = vcombine.high %v12566_v61, %v12566_v61 }
 0x328   : > { %8033 = vmatprep.subr.bf16.mxu0 %v10884_v6  ;;  %v1684_v6 = vcombine.high %v12570_v62, %v12570_v62  ;;  %v10963_v62 = vld [vmem:[%s11632_s26 + $0xc10] ss:$8 sps:$4 sm:$0xff]  }
 0x329   : > { %v12672_v61 = vrot.slane %v1702_v4, %v11696_v50  ;;  %v11038_v4 = vld [vmem:[%s11632_s26 + $0x1cd0] ss:$8 sps:$4 sm:$0xff]  }
 0x32a   : > { %7378 = vmatpush1.bf16.msra.mxu1 %v10879_v7  ;;  %v10957_v7 = vld [vmem:[%s11632_s26 + $0xc00] ss:$8 sps:$4 sm:$0xff]  }
 0x32b   : > { %8034 = vmatpush1.bf16.msra.mxu0 %v10882_v8  ;;  %7379 = vmatprep.subr.bf16.mxu1 %v10887_v9  ;;  %v10960_v8 = vld [vmem:[%s11632_s26 + $0x1c00] ss:$8 sps:$4 sm:$0xff]   ;;  %v10965_v9 = vld [vmem:[%s11632_s26 + $0xc14] ss:$8 sps:$4 sm:$0xff]  }
 0x32c   : > { %8035 = vmatprep.subr.bf16.mxu0 %v10890_v10  ;;  %v10968_v10 = vld [vmem:[%s11632_s26 + $0x1c14] ss:$8 sps:$4 sm:$0xff]  }
 0x32e   : > { %7380 = vmatpush1.bf16.msra.mxu1 %v10885_v11  ;;  %v12669_v11 = vrot.slane %v1506_v18, %v11696_v50  ;;  %v11035_v18 = vld [vmem:[%s11632_s26 + $0xcd0] ss:$8 sps:$4 sm:$0xff]  }
 0x32f   : > { %8036 = vmatpush1.bf16.msra.mxu0 %v10888_v12  ;;  %7381 = vmatprep.subr.bf16.mxu1 %v10893_v19  ;;  %v10966_v12 = vld [vmem:[%s11632_s26 + $0x1c10] ss:$8 sps:$4 sm:$0xff]   ;;  %v10971_v19 = vld [vmem:[%s11632_s26 + $0xc24] ss:$8 sps:$4 sm:$0xff]  }
 0x330   : > { %8037 = vmatprep.subr.bf16.mxu0 %v10896_v20  ;;  %v10974_v20 = vld [vmem:[%s11632_s26 + $0x1c24] ss:$8 sps:$4 sm:$0xff]  }
 0x332   : > { %7382 = vmatpush1.bf16.msra.mxu1 %v10891_v21  ;;  %v10969_v21 = vld [vmem:[%s11632_s26 + $0xc20] ss:$8 sps:$4 sm:$0xff]  }
 0x333   : > { %8038 = vmatpush1.bf16.msra.mxu0 %v10894_v22  ;;  %7383 = vmatprep.subr.bf16.mxu1 %v10899_v2  ;;  %v10972_v22 = vld [vmem:[%s11632_s26 + $0x1c20] ss:$8 sps:$4 sm:$0xff]   ;;  %v10977_v2 = vld [vmem:[%s11632_s26 + $0xc34] ss:$8 sps:$4 sm:$0xff]  }
 0x334   : > { %8039 = vmatprep.subr.bf16.mxu0 %v10902_v24  ;;  %v10980_v24 = vld [vmem:[%s11632_s26 + $0x1c34] ss:$8 sps:$4 sm:$0xff]  }
 0x336   : > { %7384 = vmatpush1.bf16.msra.mxu1 %v10897_v13  ;;  %v10975_v13 = vld [vmem:[%s11632_s26 + $0xc30] ss:$8 sps:$4 sm:$0xff]  }
 0x337   : > { %8040 = vmatpush1.bf16.msra.mxu0 %v10900_v53  ;;  %7385 = vmatprep.subr.bf16.mxu1 %v10905_v59  ;;  %v10978_v53 = vld [vmem:[%s11632_s26 + $0x1c30] ss:$8 sps:$4 sm:$0xff]   ;;  %v10983_v59 = vld [vmem:[%s11632_s26 + $0xc44] ss:$8 sps:$4 sm:$0xff]  }
 0x338   : > { %8041 = vmatprep.subr.bf16.mxu0 %v10908_v57  ;;  %v10986_v57 = vld [vmem:[%s11632_s26 + $0x1c44] ss:$8 sps:$4 sm:$0xff]  }
 0x33a   : > { %7386 = vmatpush1.bf16.msra.mxu1 %v10903_v27  ;;  %v10981_v27 = vld [vmem:[%s11632_s26 + $0xc40] ss:$8 sps:$4 sm:$0xff]  }
 0x33b   : > { %8042 = vmatpush1.bf16.msra.mxu0 %v10906_v28  ;;  %7387 = vmatprep.subr.bf16.mxu1 %v10911_v29  ;;  %v10984_v28 = vld [vmem:[%s11632_s26 + $0x1c40] ss:$8 sps:$4 sm:$0xff]   ;;  %v10989_v29 = vld [vmem:[%s11632_s26 + $0xc54] ss:$8 sps:$4 sm:$0xff]  }
 0x33c   : > { %8043 = vmatprep.subr.bf16.mxu0 %v10914_v30  ;;  %v10992_v30 = vld [vmem:[%s11632_s26 + $0x1c54] ss:$8 sps:$4 sm:$0xff]  }
 0x33e   : > { %7388 = vmatpush1.bf16.msra.mxu1 %v10909_v31  ;;  %v10987_v31 = vld [vmem:[%s11632_s26 + $0xc50] ss:$8 sps:$4 sm:$0xff]  }
 0x33f   : > { %8044 = vmatpush1.bf16.msra.mxu0 %v10912_v32  ;;  %7389 = vmatprep.subr.bf16.mxu1 %v10917_v16  ;;  %v10990_v32 = vld [vmem:[%s11632_s26 + $0x1c50] ss:$8 sps:$4 sm:$0xff]   ;;  %v10995_v16 = vld [vmem:[%s11632_s26 + $0xc64] ss:$8 sps:$4 sm:$0xff]  }
 0x340   : > { %8045 = vmatprep.subr.bf16.mxu0 %v10920_v34  ;;  %v10998_v34 = vld [vmem:[%s11632_s26 + $0x1c64] ss:$8 sps:$4 sm:$0xff]  }
 0x342   : > { %7390 = vmatpush1.bf16.msra.mxu1 %v10915_v35  ;;  %v10993_v35 = vld [vmem:[%s11632_s26 + $0xc60] ss:$8 sps:$4 sm:$0xff]  }
 0x343   : > { %8046 = vmatpush1.bf16.msra.mxu0 %v10918_v36  ;;  %7391 = vmatprep.subr.bf16.mxu1 %v10923_v43  ;;  %v10996_v36 = vld [vmem:[%s11632_s26 + $0x1c60] ss:$8 sps:$4 sm:$0xff]   ;;  %v11001_v43 = vld [vmem:[%s11632_s26 + $0xc74] ss:$8 sps:$4 sm:$0xff]  }
 0x344   : > { %8047 = vmatprep.subr.bf16.mxu0 %v10926_v45  ;;  %v11004_v45 = vld [vmem:[%s11632_s26 + $0x1c74] ss:$8 sps:$4 sm:$0xff]  }
 0x346   : > { %7392 = vmatpush1.bf16.msra.mxu1 %v10921_v25  ;;  %v10999_v25 = vld [vmem:[%s11632_s26 + $0xc70] ss:$8 sps:$4 sm:$0xff]  }
 0x347   : > { %8048 = vmatpush1.bf16.msra.mxu0 %v10924_v46  ;;  %7393 = vmatprep.subr.bf16.mxu1 %v10929_v42  ;;  %v11002_v46 = vld [vmem:[%s11632_s26 + $0x1c70] ss:$8 sps:$4 sm:$0xff]   ;;  %v11007_v42 = vld [vmem:[%s11632_s26 + $0xc84] ss:$8 sps:$4 sm:$0xff]  }
 0x348   : > { %8049 = vmatprep.subr.bf16.mxu0 %v10932_v26  ;;  %v11010_v26 = vld [vmem:[%s11632_s26 + $0x1c84] ss:$8 sps:$4 sm:$0xff]  }
 0x34a   : > { %7394 = vmatpush1.bf16.msra.mxu1 %v10927_v60  ;;  %v11005_v60 = vld [vmem:[%s11632_s26 + $0xc80] ss:$8 sps:$4 sm:$0xff]  }
 0x34b   : > { %8050 = vmatpush1.bf16.msra.mxu0 %v10930_v14  ;;  %7395 = vmatprep.subr.bf16.mxu1 %v10935_v33  ;;  %v11008_v14 = vld [vmem:[%s11632_s26 + $0x1c80] ss:$8 sps:$4 sm:$0xff]   ;;  %v11013_v33 = vld [vmem:[%s11632_s26 + $0xc94] ss:$8 sps:$4 sm:$0xff]  }
 0x34c   : > { %8051 = vmatprep.subr.bf16.mxu0 %v10938_v37  ;;  %v11016_v37 = vld [vmem:[%s11632_s26 + $0x1c94] ss:$8 sps:$4 sm:$0xff]  }
 0x34e   : > { %7396 = vmatpush1.bf16.msra.mxu1 %v10933_v15  ;;  %v11011_v15 = vld [vmem:[%s11632_s26 + $0xc90] ss:$8 sps:$4 sm:$0xff]  }
 0x34f   : > { %8052 = vmatpush1.bf16.msra.mxu0 %v10936_v48  ;;  %7397 = vmatprep.subr.bf16.mxu1 %v10941_v17  ;;  %v11014_v48 = vld [vmem:[%s11632_s26 + $0x1c90] ss:$8 sps:$4 sm:$0xff]   ;;  %v11019_v17 = vld [vmem:[%s11632_s26 + $0xca4] ss:$8 sps:$4 sm:$0xff]  }
 0x350   : > { %8053 = vmatprep.subr.bf16.mxu0 %v10944_v49  ;;  %v11022_v49 = vld [vmem:[%s11632_s26 + $0x1ca4] ss:$8 sps:$4 sm:$0xff]  }
 0x352   : > { %7398 = vmatpush1.bf16.msra.mxu1 %v10939_v51  ;;  %v11017_v51 = vld [vmem:[%s11632_s26 + $0xca0] ss:$8 sps:$4 sm:$0xff]  }
 0x353   : > { %8054 = vmatpush1.bf16.msra.mxu0 %v10942_v52  ;;  %7399 = vmatprep.subr.bf16.mxu1 %v10947_v54  ;;  %v11020_v52 = vld [vmem:[%s11632_s26 + $0x1ca0] ss:$8 sps:$4 sm:$0xff]   ;;  %v11025_v54 = vld [vmem:[%s11632_s26 + $0xcb4] ss:$8 sps:$4 sm:$0xff]  }
 0x354   : > { %8055 = vmatprep.subr.bf16.mxu0 %v10950_v55  ;;  %v11028_v55 = vld [vmem:[%s11632_s26 + $0x1cb4] ss:$8 sps:$4 sm:$0xff]  }
 0x356   : > { %7400 = vmatpush1.bf16.msra.mxu1 %v10945_v63  ;;  %v11023_v63 = vld [vmem:[%s11632_s26 + $0xcb0] ss:$8 sps:$4 sm:$0xff]  }
 0x357   : > { %8056 = vmatpush1.bf16.msra.mxu0 %v10948_v0  ;;  %7401 = vmatprep.subr.bf16.mxu1 %v10953_v41  ;;  %v11026_v0 = vld [vmem:[%s11632_s26 + $0x1cb0] ss:$8 sps:$4 sm:$0xff]   ;;  %v11031_v41 = vld [vmem:[%s11632_s26 + $0xcc4] ss:$8 sps:$4 sm:$0xff]  }
 0x358   : > { %8057 = vmatprep.subr.bf16.mxu0 %v10956_v1  ;;  %v11034_v1 = vld [vmem:[%s11632_s26 + $0x1cc4] ss:$8 sps:$4 sm:$0xff]  }
 0x35a   : > { %7402 = vmatpush1.bf16.msra.mxu1 %v10951_v47  ;;  %v11029_v47 = vld [vmem:[%s11632_s26 + $0xcc0] ss:$8 sps:$4 sm:$0xff]  }
 0x35b   : > { %8058 = vmatpush1.bf16.msra.mxu0 %v10954_v3  ;;  %7412 = vmatprep.subr.bf16.mxu1 %v10959_v39  ;;  %v11032_v3 = vld [vmem:[%s11632_s26 + $0x1cc0] ss:$8 sps:$4 sm:$0xff]   ;;  %v11037_v39 = vld [vmem:[%s11632_s26 + $0xcd4] ss:$8 sps:$4 sm:$0xff]  }
 0x35c   : > { %8068 = vmatprep.subr.bf16.mxu0 %v10962_v58  ;;  %v11040_v58 = vld [vmem:[%s11632_s26 + $0x1cd4] ss:$8 sps:$4 sm:$0xff]  }
 0x35d   : > { %7404 = vmatmul.mubr.bf16.vlgmr.msra.gmra.mrb[0].mxu1 %v1488_v5  ;;  %v11043_v5 = vld [vmem:[%s11632_s26 + $0xce4] ss:$8 sps:$4 sm:$0xff]  }
 0x35e   : > { %8060 = vmatmul.mubr.bf16.vlgmr.msra.gmra.mrb[0].mxu0 %v1684_v6  ;;  %7413 = vmatpush1.bf16.msra.mxu1 %v10957_v7  ;;  %v11046_v6 = vld [vmem:[%s11632_s26 + $0x1ce4] ss:$8 sps:$4 sm:$0xff]   ;;  %v11041_v7 = vld [vmem:[%s11632_s26 + $0xce0] ss:$8 sps:$4 sm:$0xff]  }
 0x35f   : > { %8069 = vmatpush1.bf16.msra.mxu0 %v10960_v8  ;;  %7414 = vmatprep.subr.bf16.mxu1 %v10965_v9  ;;  %v11044_v8 = vld [vmem:[%s11632_s26 + $0x1ce0] ss:$8 sps:$4 sm:$0xff]   ;;  %v11049_v9 = vld [vmem:[%s11632_s26 + $0xcf4] ss:$8 sps:$4 sm:$0xff]  }
 0x360   : > { %8070 = vmatprep.subr.bf16.mxu0 %v10968_v10  ;;  %7444 = vmatprep.mubr.bf16.mxu1 %v12669_v11  ;;  %v11052_v10 = vld [vmem:[%s11632_s26 + $0x1cf4] ss:$8 sps:$4 sm:$0xff]  }
 0x361   : > { %8100 = vmatprep.mubr.bf16.mxu0 %v12672_v61 }
 0x362   : > { %7415 = vmatpush1.bf16.msra.mxu1 %v10963_v62  ;;  %v11047_v62 = vld [vmem:[%s11632_s26 + $0xcf0] ss:$8 sps:$4 sm:$0xff]  }
 0x363   : > { %8071 = vmatpush1.bf16.msra.mxu0 %v10966_v12  ;;  %7416 = vmatprep.subr.bf16.mxu1 %v10971_v19  ;;  %v11050_v12 = vld [vmem:[%s11632_s26 + $0x1cf0] ss:$8 sps:$4 sm:$0xff]   ;;  %v11055_v19 = vld [vmem:[%s11632_s26 + $0xd04] ss:$8 sps:$4 sm:$0xff]  }
 0x364   : > { %8072 = vmatprep.subr.bf16.mxu0 %v10974_v20  ;;  %v11058_v20 = vld [vmem:[%s11632_s26 + $0x1d04] ss:$8 sps:$4 sm:$0xff]  }
 0x366   : > { %7417 = vmatpush1.bf16.msra.mxu1 %v10969_v21  ;;  %v12738_v21 = vrot.slane %v12646_v23, %v11696_v50  ;;  %v1538_v23 = vcombine.high %v12669_v11, %v12669_v11  ;;  %v11067_v11 = vld [vmem:[%s11632_s26 + $0xd24] ss:$8 sps:$4 sm:$0xff]  }
 0x367   : > { %8073 = vmatpush1.bf16.msra.mxu0 %v10972_v22  ;;  %7418 = vmatprep.subr.bf16.mxu1 %v10977_v2  ;;  %v12742_v22 = vrot.slane %v12650_v56, %v11696_v50  ;;  %v11053_v2 = vld [vmem:[%s11632_s26 + $0xd00] ss:$8 sps:$4 sm:$0xff]   ;;  %v11059_v56 = vld [vmem:[%s11632_s26 + $0xd10] ss:$8 sps:$4 sm:$0xff]  }
 0x368   : > { %8074 = vmatprep.subr.bf16.mxu0 %v10980_v24  ;;  %v11056_v24 = vld [vmem:[%s11632_s26 + $0x1d00] ss:$8 sps:$4 sm:$0xff]  }
 0x36a   : > { %7419 = vmatpush1.bf16.msra.mxu1 %v10975_v13  ;;  %v11061_v13 = vld [vmem:[%s11632_s26 + $0xd14] ss:$8 sps:$4 sm:$0xff]  }
 0x36b   : > { %8075 = vmatpush1.bf16.msra.mxu0 %v10978_v53  ;;  %7420 = vmatprep.subr.bf16.mxu1 %v10983_v59  ;;  %v11064_v53 = vld [vmem:[%s11632_s26 + $0x1d14] ss:$8 sps:$4 sm:$0xff]   ;;  %v1734_v59 = vcombine.high %v12672_v61, %v12672_v61  ;;  %v11065_v61 = vld [vmem:[%s11632_s26 + $0xd20] ss:$8 sps:$4 sm:$0xff]  }
 0x36c   : > { %8076 = vmatprep.subr.bf16.mxu0 %v10986_v57  ;;  %v11062_v57 = vld [vmem:[%s11632_s26 + $0x1d10] ss:$8 sps:$4 sm:$0xff]  }
 0x36e   : > { %7421 = vmatpush1.bf16.msra.mxu1 %v10981_v27  ;;  %v11070_v27 = vld [vmem:[%s11632_s26 + $0x1d24] ss:$8 sps:$4 sm:$0xff]  }
 0x36f   : > { %8077 = vmatpush1.bf16.msra.mxu0 %v10984_v28  ;;  %7422 = vmatprep.subr.bf16.mxu1 %v10989_v29  ;;  %v11068_v28 = vld [vmem:[%s11632_s26 + $0x1d20] ss:$8 sps:$4 sm:$0xff]   ;;  %v11073_v29 = vld [vmem:[%s11632_s26 + $0xd34] ss:$8 sps:$4 sm:$0xff]  }
 0x370   : > { %8078 = vmatprep.subr.bf16.mxu0 %v10992_v30  ;;  %v11076_v30 = vld [vmem:[%s11632_s26 + $0x1d34] ss:$8 sps:$4 sm:$0xff]  }
 0x372   : > { %7423 = vmatpush1.bf16.msra.mxu1 %v10987_v31  ;;  %v11071_v31 = vld [vmem:[%s11632_s26 + $0xd30] ss:$8 sps:$4 sm:$0xff]  }
 0x373   : > { %8079 = vmatpush1.bf16.msra.mxu0 %v10990_v32  ;;  %7424 = vmatprep.subr.bf16.mxu1 %v10995_v16  ;;  %v11074_v32 = vld [vmem:[%s11632_s26 + $0x1d30] ss:$8 sps:$4 sm:$0xff]   ;;  %v11079_v16 = vld [vmem:[%s11632_s26 + $0xd44] ss:$8 sps:$4 sm:$0xff]  }
 0x374   : > { %8080 = vmatprep.subr.bf16.mxu0 %v10998_v34  ;;  %v11082_v34 = vld [vmem:[%s11632_s26 + $0x1d44] ss:$8 sps:$4 sm:$0xff]  }
 0x376   : > { %7425 = vmatpush1.bf16.msra.mxu1 %v10993_v35  ;;  %v11077_v35 = vld [vmem:[%s11632_s26 + $0xd40] ss:$8 sps:$4 sm:$0xff]  }
 0x377   : > { %8081 = vmatpush1.bf16.msra.mxu0 %v10996_v36  ;;  %7426 = vmatprep.subr.bf16.mxu1 %v11001_v43  ;;  %v11080_v36 = vld [vmem:[%s11632_s26 + $0x1d40] ss:$8 sps:$4 sm:$0xff]   ;;  %v11085_v43 = vld [vmem:[%s11632_s26 + $0xd54] ss:$8 sps:$4 sm:$0xff]  }
 0x378   : > { %8082 = vmatprep.subr.bf16.mxu0 %v11004_v45  ;;  %v11088_v45 = vld [vmem:[%s11632_s26 + $0x1d54] ss:$8 sps:$4 sm:$0xff]  }
 0x37a   : > { %7427 = vmatpush1.bf16.msra.mxu1 %v10999_v25  ;;  %v11083_v25 = vld [vmem:[%s11632_s26 + $0xd50] ss:$8 sps:$4 sm:$0xff]  }
 0x37b   : > { %8083 = vmatpush1.bf16.msra.mxu0 %v11002_v46  ;;  %7428 = vmatprep.subr.bf16.mxu1 %v11007_v42  ;;  %v11086_v46 = vld [vmem:[%s11632_s26 + $0x1d50] ss:$8 sps:$4 sm:$0xff]   ;;  %v11091_v42 = vld [vmem:[%s11632_s26 + $0xd64] ss:$8 sps:$4 sm:$0xff]  }
 0x37c   : > { %8084 = vmatprep.subr.bf16.mxu0 %v11010_v26  ;;  %v11094_v26 = vld [vmem:[%s11632_s26 + $0x1d64] ss:$8 sps:$4 sm:$0xff]  }
 0x37e   : > { %7429 = vmatpush1.bf16.msra.mxu1 %v11005_v60  ;;  %v11089_v60 = vld [vmem:[%s11632_s26 + $0xd60] ss:$8 sps:$4 sm:$0xff]  }
 0x37f   : > { %8085 = vmatpush1.bf16.msra.mxu0 %v11008_v14  ;;  %7430 = vmatprep.subr.bf16.mxu1 %v11013_v33  ;;  %v11092_v14 = vld [vmem:[%s11632_s26 + $0x1d60] ss:$8 sps:$4 sm:$0xff]   ;;  %v11097_v33 = vld [vmem:[%s11632_s26 + $0xd74] ss:$8 sps:$4 sm:$0xff]  }
 0x380   : > { %8086 = vmatprep.subr.bf16.mxu0 %v11016_v37  ;;  %v11100_v37 = vld [vmem:[%s11632_s26 + $0x1d74] ss:$8 sps:$4 sm:$0xff]  }
 0x382   : > { %7431 = vmatpush1.bf16.msra.mxu1 %v11011_v15  ;;  %v11095_v15 = vld [vmem:[%s11632_s26 + $0xd70] ss:$8 sps:$4 sm:$0xff]  }
 0x383   : > { %8087 = vmatpush1.bf16.msra.mxu0 %v11014_v48  ;;  %7432 = vmatprep.subr.bf16.mxu1 %v11019_v17  ;;  %v11098_v48 = vld [vmem:[%s11632_s26 + $0x1d70] ss:$8 sps:$4 sm:$0xff]   ;;  %v11103_v17 = vld [vmem:[%s11632_s26 + $0xd84] ss:$8 sps:$4 sm:$0xff]  }
 0x384   : > { %8088 = vmatprep.subr.bf16.mxu0 %v11022_v49  ;;  %v11106_v49 = vld [vmem:[%s11632_s26 + $0x1d84] ss:$8 sps:$4 sm:$0xff]  }
 0x386   : > { %7433 = vmatpush1.bf16.msra.mxu1 %v11017_v51  ;;  %v11101_v51 = vld [vmem:[%s11632_s26 + $0xd80] ss:$8 sps:$4 sm:$0xff]  }
 0x387   : > { %8089 = vmatpush1.bf16.msra.mxu0 %v11020_v52  ;;  %7434 = vmatprep.subr.bf16.mxu1 %v11025_v54  ;;  %v11104_v52 = vld [vmem:[%s11632_s26 + $0x1d80] ss:$8 sps:$4 sm:$0xff]   ;;  %v11109_v54 = vld [vmem:[%s11632_s26 + $0xd94] ss:$8 sps:$4 sm:$0xff]  }
 0x388   : > { %8090 = vmatprep.subr.bf16.mxu0 %v11028_v55  ;;  %v11112_v55 = vld [vmem:[%s11632_s26 + $0x1d94] ss:$8 sps:$4 sm:$0xff]  }
 0x38a   : > { %7435 = vmatpush1.bf16.msra.mxu1 %v11023_v63  ;;  %v11107_v63 = vld [vmem:[%s11632_s26 + $0xd90] ss:$8 sps:$4 sm:$0xff]  }
 0x38b   : > { %8091 = vmatpush1.bf16.msra.mxu0 %v11026_v0  ;;  %7436 = vmatprep.subr.bf16.mxu1 %v11031_v41  ;;  %v11110_v0 = vld [vmem:[%s11632_s26 + $0x1d90] ss:$8 sps:$4 sm:$0xff]   ;;  %v11115_v41 = vld [vmem:[%s11632_s26 + $0xda4] ss:$8 sps:$4 sm:$0xff]  }
 0x38c   : > { %8092 = vmatprep.subr.bf16.mxu0 %v11034_v1  ;;  %v11118_v1 = vld [vmem:[%s11632_s26 + $0x1da4] ss:$8 sps:$4 sm:$0xff]  }
 0x38e   : > { %7437 = vmatpush1.bf16.msra.mxu1 %v11029_v47  ;;  %v11113_v47 = vld [vmem:[%s11632_s26 + $0xda0] ss:$8 sps:$4 sm:$0xff]  }
 0x38f   : > { %8093 = vmatpush1.bf16.msra.mxu0 %v11032_v3  ;;  %7438 = vmatprep.subr.bf16.mxu1 %v11037_v39  ;;  %v11116_v3 = vld [vmem:[%s11632_s26 + $0x1da0] ss:$8 sps:$4 sm:$0xff]   ;;  %v11121_v39 = vld [vmem:[%s11632_s26 + $0xdb4] ss:$8 sps:$4 sm:$0xff]  }
 0x390   : > { %8094 = vmatprep.subr.bf16.mxu0 %v11040_v58  ;;  %v11124_v58 = vld [vmem:[%s11632_s26 + $0x1db4] ss:$8 sps:$4 sm:$0xff]  }
 0x392   : > { %7439 = vmatpush1.bf16.msra.mxu1 %v11035_v18  ;;  %v11119_v18 = vld [vmem:[%s11632_s26 + $0xdb0] ss:$8 sps:$4 sm:$0xff]  }
 0x393   : > { %8095 = vmatpush1.bf16.msra.mxu0 %v11038_v4  ;;  %7440 = vmatprep.subr.bf16.mxu1 %v11043_v5  ;;  %v11122_v4 = vld [vmem:[%s11632_s26 + $0x1db0] ss:$8 sps:$4 sm:$0xff]   ;;  %v11127_v5 = vld [vmem:[%s11632_s26 + $0xdc4] ss:$8 sps:$4 sm:$0xff]  }
 0x394   : > { %8096 = vmatprep.subr.bf16.mxu0 %v11046_v6  ;;  %v11130_v6 = vld [vmem:[%s11632_s26 + $0x1dc4] ss:$8 sps:$4 sm:$0xff]  }
 0x396   : > { %7441 = vmatpush1.bf16.msra.mxu1 %v11041_v7  ;;  %v11125_v7 = vld [vmem:[%s11632_s26 + $0xdc0] ss:$8 sps:$4 sm:$0xff]  }
 0x397   : > { %8097 = vmatpush1.bf16.msra.mxu0 %v11044_v8  ;;  %7442 = vmatprep.subr.bf16.mxu1 %v11049_v9  ;;  %v11128_v8 = vld [vmem:[%s11632_s26 + $0x1dc0] ss:$8 sps:$4 sm:$0xff]   ;;  %v11133_v9 = vld [vmem:[%s11632_s26 + $0xdd4] ss:$8 sps:$4 sm:$0xff]  }
 0x398   : > { %8098 = vmatprep.subr.bf16.mxu0 %v11052_v10  ;;  %v11136_v10 = vld [vmem:[%s11632_s26 + $0x1dd4] ss:$8 sps:$4 sm:$0xff]  }
 0x39a   : > { %7443 = vmatpush1.bf16.msra.mxu1 %v11047_v62  ;;  %v11131_v62 = vld [vmem:[%s11632_s26 + $0xdd0] ss:$8 sps:$4 sm:$0xff]  }
 0x39b   : > { %8099 = vmatpush1.bf16.msra.mxu0 %v11050_v12  ;;  %7453 = vmatprep.subr.bf16.mxu1 %v11055_v19  ;;  %v11134_v12 = vld [vmem:[%s11632_s26 + $0x1dd0] ss:$8 sps:$4 sm:$0xff]   ;;  %v11139_v19 = vld [vmem:[%s11632_s26 + $0xde4] ss:$8 sps:$4 sm:$0xff]  }
 0x39c   : > { %8109 = vmatprep.subr.bf16.mxu0 %v11058_v20  ;;  %v11142_v20 = vld [vmem:[%s11632_s26 + $0x1de4] ss:$8 sps:$4 sm:$0xff]  }
 0x39d   : > { %7445 = vmatmul.mubr.bf16.vlgmr.msra.gmra.mrb[0].mxu1 %v12738_v21 }
 0x39e   : > { %8101 = vmatmul.mubr.bf16.vlgmr.msra.gmra.mrb[0].mxu0 %v12742_v22  ;;  %7454 = vmatpush1.bf16.msra.mxu1 %v11053_v2  ;;  %v1491_v2 = vcombine.high %v12635_v38, %v12635_v38  ;;  %v11143_v38 = vld [vmem:[%s11632_s26 + $0xdf0] ss:$8 sps:$4 sm:$0xff]  }
 0x39f   : > { %8110 = vmatpush1.bf16.msra.mxu0 %v11056_v24  ;;  %7455 = vmatprep.subr.bf16.mxu1 %v11061_v13  ;;  %v1687_v24 = vcombine.high %v12638_v40, %v12638_v40  ;;  %v11137_v13 = vld [vmem:[%s11632_s26 + $0xde0] ss:$8 sps:$4 sm:$0xff]   ;;  %v11146_v40 = vld [vmem:[%s11632_s26 + $0x1df0] ss:$8 sps:$4 sm:$0xff]  }
 0x3a0   : > { %8111 = vmatprep.subr.bf16.mxu0 %v11064_v53  ;;  %7485 = vmatprep.mubr.bf16.mxu1 %v1538_v23  ;;  %v11140_v53 = vld [vmem:[%s11632_s26 + $0x1de0] ss:$8 sps:$4 sm:$0xff]   ;;  %v11145_v23 = vld [vmem:[%s11632_s26 + $0xdf4] ss:$8 sps:$4 sm:$0xff]  }
 0x3a1   : > { %8141 = vmatprep.mubr.bf16.mxu0 %v1734_v59  ;;  %v11148_v59 = vld [vmem:[%s11632_s26 + $0x1df4] ss:$8 sps:$4 sm:$0xff]  }
 0x3a2   : > { %7456 = vmatpush1.bf16.msra.mxu1 %v11059_v56  ;;  %v12815_v56 = vrot.slane %v1491_v2, %v11696_v50  ;;  %v11215_v2 = vld [vmem:[%s11632_s26 + $0xeb0] ss:$8 sps:$4 sm:$0xff]  }
 0x3a3   : > { %8112 = vmatpush1.bf16.msra.mxu0 %v11062_v57  ;;  %7457 = vmatprep.subr.bf16.mxu1 %v11067_v11  ;;  %v12818_v57 = vrot.slane %v1687_v24, %v11696_v50  ;;  %v11151_v11 = vld [vmem:[%s11632_s26 + $0xe04] ss:$8 sps:$4 sm:$0xff]   ;;  %v11218_v24 = vld [vmem:[%s11632_s26 + $0x1eb0] ss:$8 sps:$4 sm:$0xff]  }
 0x3a4   : > { %8113 = vmatprep.subr.bf16.mxu0 %v11070_v27  ;;  %v11154_v27 = vld [vmem:[%s11632_s26 + $0x1e04] ss:$8 sps:$4 sm:$0xff]  }
 0x3a6   : > { %7458 = vmatpush1.bf16.msra.mxu1 %v11065_v61  ;;  %v1507_v61 = vcombine.high %v12815_v56, %v12815_v56 }
 0x3a7   : > { %8114 = vmatpush1.bf16.msra.mxu0 %v11068_v28  ;;  %7459 = vmatprep.subr.bf16.mxu1 %v11073_v29  ;;  %v1703_v28 = vcombine.high %v12818_v57, %v12818_v57  ;;  %v1536_v29 = vcombine.high %v12738_v21, %v12738_v21 }
 0x3a8   : > { %8115 = vmatprep.subr.bf16.mxu0 %v11076_v30  ;;  %v1732_v30 = vcombine.high %v12742_v22, %v12742_v22  ;;  %v11155_v22 = vld [vmem:[%s11632_s26 + $0xe10] ss:$8 sps:$4 sm:$0xff]  }
 0x3a9   : > { %v12840_v21 = vrot.slane %v1703_v28, %v11696_v50  ;;  %v11238_v28 = vld [vmem:[%s11632_s26 + $0x1ee4] ss:$8 sps:$4 sm:$0xff]  }
 0x3aa   : > { %7460 = vmatpush1.bf16.msra.mxu1 %v11071_v31  ;;  %v11149_v31 = vld [vmem:[%s11632_s26 + $0xe00] ss:$8 sps:$4 sm:$0xff]  }
 0x3ab   : > { %8116 = vmatpush1.bf16.msra.mxu0 %v11074_v32  ;;  %7461 = vmatprep.subr.bf16.mxu1 %v11079_v16  ;;  %v11152_v32 = vld [vmem:[%s11632_s26 + $0x1e00] ss:$8 sps:$4 sm:$0xff]   ;;  %v11157_v16 = vld [vmem:[%s11632_s26 + $0xe14] ss:$8 sps:$4 sm:$0xff]  }
 0x3ac   : > { %8117 = vmatprep.subr.bf16.mxu0 %v11082_v34  ;;  %v11160_v34 = vld [vmem:[%s11632_s26 + $0x1e14] ss:$8 sps:$4 sm:$0xff]  }
 0x3ae   : > { %7462 = vmatpush1.bf16.msra.mxu1 %v11077_v35  ;;  %v12837_v35 = vrot.slane %v1507_v61, %v11696_v50  ;;  %v11235_v61 = vld [vmem:[%s11632_s26 + $0xee4] ss:$8 sps:$4 sm:$0xff]  }
 0x3af   : > { %8118 = vmatpush1.bf16.msra.mxu0 %v11080_v36  ;;  %7463 = vmatprep.subr.bf16.mxu1 %v11085_v43  ;;  %v11158_v36 = vld [vmem:[%s11632_s26 + $0x1e10] ss:$8 sps:$4 sm:$0xff]   ;;  %v11163_v43 = vld [vmem:[%s11632_s26 + $0xe24] ss:$8 sps:$4 sm:$0xff]  }
 0x3b0   : > { %8119 = vmatprep.subr.bf16.mxu0 %v11088_v45  ;;  %v11166_v45 = vld [vmem:[%s11632_s26 + $0x1e24] ss:$8 sps:$4 sm:$0xff]  }
 0x3b2   : > { %7464 = vmatpush1.bf16.msra.mxu1 %v11083_v25  ;;  %v11161_v25 = vld [vmem:[%s11632_s26 + $0xe20] ss:$8 sps:$4 sm:$0xff]  }
 0x3b3   : > { %8120 = vmatpush1.bf16.msra.mxu0 %v11086_v46  ;;  %7465 = vmatprep.subr.bf16.mxu1 %v11091_v42  ;;  %v11164_v46 = vld [vmem:[%s11632_s26 + $0x1e20] ss:$8 sps:$4 sm:$0xff]   ;;  %v11169_v42 = vld [vmem:[%s11632_s26 + $0xe34] ss:$8 sps:$4 sm:$0xff]  }
 0x3b4   : > { %8121 = vmatprep.subr.bf16.mxu0 %v11094_v26  ;;  %v11172_v26 = vld [vmem:[%s11632_s26 + $0x1e34] ss:$8 sps:$4 sm:$0xff]  }
 0x3b6   : > { %7466 = vmatpush1.bf16.msra.mxu1 %v11089_v60  ;;  %v11167_v60 = vld [vmem:[%s11632_s26 + $0xe30] ss:$8 sps:$4 sm:$0xff]  }
 0x3b7   : > { %8122 = vmatpush1.bf16.msra.mxu0 %v11092_v14  ;;  %7467 = vmatprep.subr.bf16.mxu1 %v11097_v33  ;;  %v11170_v14 = vld [vmem:[%s11632_s26 + $0x1e30] ss:$8 sps:$4 sm:$0xff]   ;;  %v11175_v33 = vld [vmem:[%s11632_s26 + $0xe44] ss:$8 sps:$4 sm:$0xff]  }
 0x3b8   : > { %8123 = vmatprep.subr.bf16.mxu0 %v11100_v37  ;;  %v11178_v37 = vld [vmem:[%s11632_s26 + $0x1e44] ss:$8 sps:$4 sm:$0xff]  }
 0x3ba   : > { %7468 = vmatpush1.bf16.msra.mxu1 %v11095_v15  ;;  %v11173_v15 = vld [vmem:[%s11632_s26 + $0xe40] ss:$8 sps:$4 sm:$0xff]  }
 0x3bb   : > { %8124 = vmatpush1.bf16.msra.mxu0 %v11098_v48  ;;  %7469 = vmatprep.subr.bf16.mxu1 %v11103_v17  ;;  %v11176_v48 = vld [vmem:[%s11632_s26 + $0x1e40] ss:$8 sps:$4 sm:$0xff]   ;;  %v11181_v17 = vld [vmem:[%s11632_s26 + $0xe54] ss:$8 sps:$4 sm:$0xff]  }
 0x3bc   : > { %8125 = vmatprep.subr.bf16.mxu0 %v11106_v49  ;;  %v11184_v49 = vld [vmem:[%s11632_s26 + $0x1e54] ss:$8 sps:$4 sm:$0xff]  }
 0x3be   : > { %7470 = vmatpush1.bf16.msra.mxu1 %v11101_v51  ;;  %v11179_v51 = vld [vmem:[%s11632_s26 + $0xe50] ss:$8 sps:$4 sm:$0xff]  }
 0x3bf   : > { %8126 = vmatpush1.bf16.msra.mxu0 %v11104_v52  ;;  %7471 = vmatprep.subr.bf16.mxu1 %v11109_v54  ;;  %v11182_v52 = vld [vmem:[%s11632_s26 + $0x1e50] ss:$8 sps:$4 sm:$0xff]   ;;  %v11187_v54 = vld [vmem:[%s11632_s26 + $0xe64] ss:$8 sps:$4 sm:$0xff]  }
 0x3c0   : > { %8127 = vmatprep.subr.bf16.mxu0 %v11112_v55  ;;  %v11190_v55 = vld [vmem:[%s11632_s26 + $0x1e64] ss:$8 sps:$4 sm:$0xff]  }
 0x3c2   : > { %7472 = vmatpush1.bf16.msra.mxu1 %v11107_v63  ;;  %v11185_v63 = vld [vmem:[%s11632_s26 + $0xe60] ss:$8 sps:$4 sm:$0xff]  }
 0x3c3   : > { %8128 = vmatpush1.bf16.msra.mxu0 %v11110_v0  ;;  %7473 = vmatprep.subr.bf16.mxu1 %v11115_v41  ;;  %v11188_v0 = vld [vmem:[%s11632_s26 + $0x1e60] ss:$8 sps:$4 sm:$0xff]   ;;  %v11193_v41 = vld [vmem:[%s11632_s26 + $0xe74] ss:$8 sps:$4 sm:$0xff]  }
 0x3c4   : > { %8129 = vmatprep.subr.bf16.mxu0 %v11118_v1  ;;  %v11196_v1 = vld [vmem:[%s11632_s26 + $0x1e74] ss:$8 sps:$4 sm:$0xff]  }
 0x3c6   : > { %7474 = vmatpush1.bf16.msra.mxu1 %v11113_v47  ;;  %v11191_v47 = vld [vmem:[%s11632_s26 + $0xe70] ss:$8 sps:$4 sm:$0xff]  }
 0x3c7   : > { %8130 = vmatpush1.bf16.msra.mxu0 %v11116_v3  ;;  %7475 = vmatprep.subr.bf16.mxu1 %v11121_v39  ;;  %v11194_v3 = vld [vmem:[%s11632_s26 + $0x1e70] ss:$8 sps:$4 sm:$0xff]   ;;  %v11199_v39 = vld [vmem:[%s11632_s26 + $0xe84] ss:$8 sps:$4 sm:$0xff]  }
 0x3c8   : > { %8131 = vmatprep.subr.bf16.mxu0 %v11124_v58  ;;  %v11202_v58 = vld [vmem:[%s11632_s26 + $0x1e84] ss:$8 sps:$4 sm:$0xff]  }
 0x3ca   : > { %7476 = vmatpush1.bf16.msra.mxu1 %v11119_v18  ;;  %v11197_v18 = vld [vmem:[%s11632_s26 + $0xe80] ss:$8 sps:$4 sm:$0xff]  }
 0x3cb   : > { %8132 = vmatpush1.bf16.msra.mxu0 %v11122_v4  ;;  %7477 = vmatprep.subr.bf16.mxu1 %v11127_v5  ;;  %v11200_v4 = vld [vmem:[%s11632_s26 + $0x1e80] ss:$8 sps:$4 sm:$0xff]   ;;  %v11205_v5 = vld [vmem:[%s11632_s26 + $0xe94] ss:$8 sps:$4 sm:$0xff]  }
 0x3cc   : > { %8133 = vmatprep.subr.bf16.mxu0 %v11130_v6  ;;  %v11208_v6 = vld [vmem:[%s11632_s26 + $0x1e94] ss:$8 sps:$4 sm:$0xff]  }
 0x3ce   : > { %7478 = vmatpush1.bf16.msra.mxu1 %v11125_v7  ;;  %v11203_v7 = vld [vmem:[%s11632_s26 + $0xe90] ss:$8 sps:$4 sm:$0xff]  }
 0x3cf   : > { %8134 = vmatpush1.bf16.msra.mxu0 %v11128_v8  ;;  %7479 = vmatprep.subr.bf16.mxu1 %v11133_v9  ;;  %v11206_v8 = vld [vmem:[%s11632_s26 + $0x1e90] ss:$8 sps:$4 sm:$0xff]   ;;  %v11211_v9 = vld [vmem:[%s11632_s26 + $0xea4] ss:$8 sps:$4 sm:$0xff]  }
 0x3d0   : > { %8135 = vmatprep.subr.bf16.mxu0 %v11136_v10  ;;  %v11214_v10 = vld [vmem:[%s11632_s26 + $0x1ea4] ss:$8 sps:$4 sm:$0xff]  }
 0x3d2   : > { %7480 = vmatpush1.bf16.msra.mxu1 %v11131_v62  ;;  %v11209_v62 = vld [vmem:[%s11632_s26 + $0xea0] ss:$8 sps:$4 sm:$0xff]  }
 0x3d3   : > { %8136 = vmatpush1.bf16.msra.mxu0 %v11134_v12  ;;  %7481 = vmatprep.subr.bf16.mxu1 %v11139_v19  ;;  %v11212_v12 = vld [vmem:[%s11632_s26 + $0x1ea0] ss:$8 sps:$4 sm:$0xff]   ;;  %v11217_v19 = vld [vmem:[%s11632_s26 + $0xeb4] ss:$8 sps:$4 sm:$0xff]  }
 0x3d4   : > { %8137 = vmatprep.subr.bf16.mxu0 %v11142_v20  ;;  %v11220_v20 = vld [vmem:[%s11632_s26 + $0x1eb4] ss:$8 sps:$4 sm:$0xff]  }
 0x3d6   : > { %7482 = vmatpush1.bf16.msra.mxu1 %v11137_v13  ;;  %v11223_v13 = vld [vmem:[%s11632_s26 + $0xec4] ss:$8 sps:$4 sm:$0xff]  }
 0x3d7   : > { %8138 = vmatpush1.bf16.msra.mxu0 %v11140_v53  ;;  %7483 = vmatprep.subr.bf16.mxu1 %v11145_v23  ;;  %v11226_v53 = vld [vmem:[%s11632_s26 + $0x1ec4] ss:$8 sps:$4 sm:$0xff]   ;;  %v11221_v23 = vld [vmem:[%s11632_s26 + $0xec0] ss:$8 sps:$4 sm:$0xff]  }
 0x3d8   : > { %8139 = vmatprep.subr.bf16.mxu0 %v11148_v59  ;;  %v11224_v59 = vld [vmem:[%s11632_s26 + $0x1ec0] ss:$8 sps:$4 sm:$0xff]  }
 0x3da   : > { %7484 = vmatpush1.bf16.msra.mxu1 %v11143_v38  ;;  %v11229_v38 = vld [vmem:[%s11632_s26 + $0xed4] ss:$8 sps:$4 sm:$0xff]  }
 0x3db   : > { %8140 = vmatpush1.bf16.msra.mxu0 %v11146_v40  ;;  %7494 = vmatprep.subr.bf16.mxu1 %v11151_v11  ;;  %v11232_v40 = vld [vmem:[%s11632_s26 + $0x1ed4] ss:$8 sps:$4 sm:$0xff]   ;;  %v11227_v11 = vld [vmem:[%s11632_s26 + $0xed0] ss:$8 sps:$4 sm:$0xff]  }
 0x3dc   : > { %8150 = vmatprep.subr.bf16.mxu0 %v11154_v27  ;;  %v11230_v27 = vld [vmem:[%s11632_s26 + $0x1ed0] ss:$8 sps:$4 sm:$0xff]  }
 0x3dd   : > { %7486 = vmatmul.mubr.bf16.vlgmr.msra.gmra.mrb[0].mxu1 %v1536_v29  ;;  %v11233_v29 = vld [vmem:[%s11632_s26 + $0xee0] ss:$8 sps:$4 sm:$0xff]  }
 0x3de   : > { %8142 = vmatmul.mubr.bf16.vlgmr.msra.gmra.mrb[0].mxu0 %v1732_v30  ;;  %7495 = vmatpush1.bf16.msra.mxu1 %v11149_v31  ;;  %v11236_v30 = vld [vmem:[%s11632_s26 + $0x1ee0] ss:$8 sps:$4 sm:$0xff]   ;;  %v11241_v31 = vld [vmem:[%s11632_s26 + $0xef4] ss:$8 sps:$4 sm:$0xff]  }
 0x3df   : > { %8151 = vmatpush1.bf16.msra.mxu0 %v11152_v32  ;;  %7496 = vmatprep.subr.bf16.mxu1 %v11157_v16  ;;  %v11244_v32 = vld [vmem:[%s11632_s26 + $0x1ef4] ss:$8 sps:$4 sm:$0xff]   ;;  %v11239_v16 = vld [vmem:[%s11632_s26 + $0xef0] ss:$8 sps:$4 sm:$0xff]  }
 0x3e0   : > { %8152 = vmatprep.subr.bf16.mxu0 %v11160_v34  ;;  %7526 = vmatprep.mubr.bf16.mxu1 %v12837_v35  ;;  %v11242_v34 = vld [vmem:[%s11632_s26 + $0x1ef0] ss:$8 sps:$4 sm:$0xff]  }
 0x3e1   : > { %8182 = vmatprep.mubr.bf16.mxu0 %v12840_v21 }
 0x3e2   : > { %7497 = vmatpush1.bf16.msra.mxu1 %v11155_v22  ;;  %v11248_v22 = vld [vmem:[%s11632_s26 + $0xf04] ss:$8 sps:$4 sm:$0xff]  }
 0x3e3   : > { %8153 = vmatpush1.bf16.msra.mxu0 %v11158_v36  ;;  %7498 = vmatprep.subr.bf16.mxu1 %v11163_v43  ;;  %v11252_v36 = vld [vmem:[%s11632_s26 + $0x1f04] ss:$8 sps:$4 sm:$0xff]   ;;  %v12906_v43 = vrot.slane %v12815_v56, %v11696_v50  ;;  %v1539_v56 = vcombine.high %v12837_v35, %v12837_v35 }
 0x3e4   : > { %8154 = vmatprep.subr.bf16.mxu0 %v11166_v45  ;;  %v12910_v45 = vrot.slane %v12818_v57, %v11696_v50  ;;  %v11253_v50 = vld [vmem:[%s11632_s26 + $0xf10] ss:$8 sps:$4 sm:$0xff]   ;;  %v11261_v35 = vld [vmem:[%s11632_s26 + $0xf24] ss:$8 sps:$4 sm:$0xff]  }
 0x3e5   : > { %v11256_v57 = vld [vmem:[%s11632_s26 + $0x1f10] ss:$8 sps:$4 sm:$0xff]  }
 0x3e6   : > { %7499 = vmatpush1.bf16.msra.mxu1 %v11161_v25  ;;  %v11246_v25 = vld [vmem:[%s11632_s26 + $0xf00] ss:$8 sps:$4 sm:$0xff]  }
 0x3e7   : > { %8155 = vmatpush1.bf16.msra.mxu0 %v11164_v46  ;;  %7500 = vmatprep.subr.bf16.mxu1 %v11169_v42  ;;  %v11250_v46 = vld [vmem:[%s11632_s26 + $0x1f00] ss:$8 sps:$4 sm:$0xff]   ;;  %v11255_v42 = vld [vmem:[%s11632_s26 + $0xf14] ss:$8 sps:$4 sm:$0xff]  }
 0x3e8   : > { %8156 = vmatprep.subr.bf16.mxu0 %v11172_v26  ;;  %v11258_v26 = vld [vmem:[%s11632_s26 + $0x1f14] ss:$8 sps:$4 sm:$0xff]  }
 0x3ea   : > { %7501 = vmatpush1.bf16.msra.mxu1 %v11167_v60  ;;  %v1735_v60 = vcombine.high %v12840_v21, %v12840_v21  ;;  %v11259_v21 = vld [vmem:[%s11632_s26 + $0xf20] ss:$8 sps:$4 sm:$0xff]  }
 0x3eb   : > { %8157 = vmatpush1.bf16.msra.mxu0 %v11170_v14  ;;  %7502 = vmatprep.subr.bf16.mxu1 %v11175_v33  ;;  %v11264_v14 = vld [vmem:[%s11632_s26 + $0x1f24] ss:$8 sps:$4 sm:$0xff]   ;;  %v11262_v33 = vld [vmem:[%s11632_s26 + $0x1f20] ss:$8 sps:$4 sm:$0xff]  }
 0x3ec   : > { %8158 = vmatprep.subr.bf16.mxu0 %v11178_v37  ;;  %v11267_v37 = vld [vmem:[%s11632_s26 + $0xf34] ss:$8 sps:$4 sm:$0xff]  }
 0x3ee   : > { %7503 = vmatpush1.bf16.msra.mxu1 %v11173_v15  ;;  %v11270_v15 = vld [vmem:[%s11632_s26 + $0x1f34] ss:$8 sps:$4 sm:$0xff]  }
 0x3ef   : > { %8159 = vmatpush1.bf16.msra.mxu0 %v11176_v48  ;;  %7504 = vmatprep.subr.bf16.mxu1 %v11181_v17  ;;  %v11265_v48 = vld [vmem:[%s11632_s26 + $0xf30] ss:$8 sps:$4 sm:$0xff]  }
 0x3f0   : > { %8160 = vmatprep.subr.bf16.mxu0 %v11184_v49  ;;  %v11268_v17 = vld [vmem:[%s11632_s26 + $0x1f30] ss:$8 sps:$4 sm:$0xff]   ;;  %v11273_v49 = vld [vmem:[%s11632_s26 + $0xf44] ss:$8 sps:$4 sm:$0xff]  }
 0x3f2   : > { %7505 = vmatpush1.bf16.msra.mxu1 %v11179_v51  ;;  %v11276_v51 = vld [vmem:[%s11632_s26 + $0x1f44] ss:$8 sps:$4 sm:$0xff]  }
 0x3f3   : > { %8161 = vmatpush1.bf16.msra.mxu0 %v11182_v52  ;;  %7506 = vmatprep.subr.bf16.mxu1 %v11187_v54  ;;  %v11271_v52 = vld [vmem:[%s11632_s26 + $0xf40] ss:$8 sps:$4 sm:$0xff]  }
 0x3f4   : > { %8162 = vmatprep.subr.bf16.mxu0 %v11190_v55  ;;  %v11274_v54 = vld [vmem:[%s11632_s26 + $0x1f40] ss:$8 sps:$4 sm:$0xff]   ;;  %v11279_v55 = vld [vmem:[%s11632_s26 + $0xf54] ss:$8 sps:$4 sm:$0xff]  }
 0x3f6   : > { %7507 = vmatpush1.bf16.msra.mxu1 %v11185_v63  ;;  %v11282_v63 = vld [vmem:[%s11632_s26 + $0x1f54] ss:$8 sps:$4 sm:$0xff]  }
 0x3f7   : > { %8163 = vmatpush1.bf16.msra.mxu0 %v11188_v0  ;;  %7508 = vmatprep.subr.bf16.mxu1 %v11193_v41  ;;  %v11277_v0 = vld [vmem:[%s11632_s26 + $0xf50] ss:$8 sps:$4 sm:$0xff]  }
 0x3f8   : > { %8164 = vmatprep.subr.bf16.mxu0 %v11196_v1  ;;  %v11280_v41 = vld [vmem:[%s11632_s26 + $0x1f50] ss:$8 sps:$4 sm:$0xff]   ;;  %v11285_v1 = vld [vmem:[%s11632_s26 + $0xf64] ss:$8 sps:$4 sm:$0xff]  }
 0x3fa   : > { %7509 = vmatpush1.bf16.msra.mxu1 %v11191_v47  ;;  %v11288_v47 = vld [vmem:[%s11632_s26 + $0x1f64] ss:$8 sps:$4 sm:$0xff]  }
 0x3fb   : > { %8165 = vmatpush1.bf16.msra.mxu0 %v11194_v3  ;;  %7510 = vmatprep.subr.bf16.mxu1 %v11199_v39  ;;  %v11283_v3 = vld [vmem:[%s11632_s26 + $0xf60] ss:$8 sps:$4 sm:$0xff]  }
 0x3fc   : > { %8166 = vmatprep.subr.bf16.mxu0 %v11202_v58  ;;  %v11286_v39 = vld [vmem:[%s11632_s26 + $0x1f60] ss:$8 sps:$4 sm:$0xff]   ;;  %v11291_v58 = vld [vmem:[%s11632_s26 + $0xf74] ss:$8 sps:$4 sm:$0xff]  }
 0x3fe   : > { %7511 = vmatpush1.bf16.msra.mxu1 %v11197_v18  ;;  %v11294_v18 = vld [vmem:[%s11632_s26 + $0x1f74] ss:$8 sps:$4 sm:$0xff]  }
 0x3ff   : > { %8167 = vmatpush1.bf16.msra.mxu0 %v11200_v4  ;;  %7512 = vmatprep.subr.bf16.mxu1 %v11205_v5  ;;  %v11289_v4 = vld [vmem:[%s11632_s26 + $0xf70] ss:$8 sps:$4 sm:$0xff]  }
 0x400   : > { %8168 = vmatprep.subr.bf16.mxu0 %v11208_v6  ;;  %v11292_v5 = vld [vmem:[%s11632_s26 + $0x1f70] ss:$8 sps:$4 sm:$0xff]   ;;  %v11297_v6 = vld [vmem:[%s11632_s26 + $0xf84] ss:$8 sps:$4 sm:$0xff]  }
 0x402   : > { %7513 = vmatpush1.bf16.msra.mxu1 %v11203_v7  ;;  %v11300_v7 = vld [vmem:[%s11632_s26 + $0x1f84] ss:$8 sps:$4 sm:$0xff]  }
 0x403   : > { %8169 = vmatpush1.bf16.msra.mxu0 %v11206_v8  ;;  %7514 = vmatprep.subr.bf16.mxu1 %v11211_v9  ;;  %v11295_v8 = vld [vmem:[%s11632_s26 + $0xf80] ss:$8 sps:$4 sm:$0xff]  }
 0x404   : > { %8170 = vmatprep.subr.bf16.mxu0 %v11214_v10  ;;  %v11298_v9 = vld [vmem:[%s11632_s26 + $0x1f80] ss:$8 sps:$4 sm:$0xff]   ;;  %v11303_v10 = vld [vmem:[%s11632_s26 + $0xf94] ss:$8 sps:$4 sm:$0xff]  }
 0x406   : > { %7515 = vmatpush1.bf16.msra.mxu1 %v11209_v62  ;;  %v11306_v62 = vld [vmem:[%s11632_s26 + $0x1f94] ss:$8 sps:$4 sm:$0xff]  }
 0x407   : > { %8171 = vmatpush1.bf16.msra.mxu0 %v11212_v12  ;;  %7516 = vmatprep.subr.bf16.mxu1 %v11217_v19  ;;  %v11301_v12 = vld [vmem:[%s11632_s26 + $0xf90] ss:$8 sps:$4 sm:$0xff]  }
 0x408   : > { %8172 = vmatprep.subr.bf16.mxu0 %v11220_v20  ;;  %v11304_v19 = vld [vmem:[%s11632_s26 + $0x1f90] ss:$8 sps:$4 sm:$0xff]   ;;  %v11309_v20 = vld [vmem:[%s11632_s26 + $0xfa4] ss:$8 sps:$4 sm:$0xff]  }
 0x40a   : > { %7517 = vmatpush1.bf16.msra.mxu1 %v11215_v2  ;;  %v11312_v2 = vld [vmem:[%s11632_s26 + $0x1fa4] ss:$8 sps:$4 sm:$0xff]  }
 0x40b   : > { %8173 = vmatpush1.bf16.msra.mxu0 %v11218_v24  ;;  %7518 = vmatprep.subr.bf16.mxu1 %v11223_v13  ;;  %v11307_v24 = vld [vmem:[%s11632_s26 + $0xfa0] ss:$8 sps:$4 sm:$0xff]  }
 0x40c   : > { %8174 = vmatprep.subr.bf16.mxu0 %v11226_v53  ;;  %v11310_v13 = vld [vmem:[%s11632_s26 + $0x1fa0] ss:$8 sps:$4 sm:$0xff]   ;;  %v11315_v53 = vld [vmem:[%s11632_s26 + $0xfb4] ss:$8 sps:$4 sm:$0xff]  }
 0x40e   : > { %7519 = vmatpush1.bf16.msra.mxu1 %v11221_v23  ;;  %v11318_v23 = vld [vmem:[%s11632_s26 + $0x1fb4] ss:$8 sps:$4 sm:$0xff]  }
 0x40f   : > { %8175 = vmatpush1.bf16.msra.mxu0 %v11224_v59  ;;  %7520 = vmatprep.subr.bf16.mxu1 %v11229_v38  ;;  %v11313_v59 = vld [vmem:[%s11632_s26 + $0xfb0] ss:$8 sps:$4 sm:$0xff]  }
 0x410   : > { %8176 = vmatprep.subr.bf16.mxu0 %v11232_v40  ;;  %v11316_v38 = vld [vmem:[%s11632_s26 + $0x1fb0] ss:$8 sps:$4 sm:$0xff]   ;;  %v11321_v40 = vld [vmem:[%s11632_s26 + $0xfc4] ss:$8 sps:$4 sm:$0xff]  }
 0x412   : > { %7521 = vmatpush1.bf16.msra.mxu1 %v11227_v11  ;;  %v11324_v11 = vld [vmem:[%s11632_s26 + $0x1fc4] ss:$8 sps:$4 sm:$0xff]  }
 0x413   : > { %8177 = vmatpush1.bf16.msra.mxu0 %v11230_v27  ;;  %7522 = vmatprep.subr.bf16.mxu1 %v11235_v61  ;;  %v11319_v27 = vld [vmem:[%s11632_s26 + $0xfc0] ss:$8 sps:$4 sm:$0xff]  }
 0x414   : > { %8178 = vmatprep.subr.bf16.mxu0 %v11238_v28  ;;  %v11322_v61 = vld [vmem:[%s11632_s26 + $0x1fc0] ss:$8 sps:$4 sm:$0xff]   ;;  %v11327_v28 = vld [vmem:[%s11632_s26 + $0xfd4] ss:$8 sps:$4 sm:$0xff]  }
 0x416   : > { %7523 = vmatpush1.bf16.msra.mxu1 %v11233_v29  ;;  %v11330_v29 = vld [vmem:[%s11632_s26 + $0x1fd4] ss:$8 sps:$4 sm:$0xff]  }
 0x417   : > { %8179 = vmatpush1.bf16.msra.mxu0 %v11236_v30  ;;  %7524 = vmatprep.subr.bf16.mxu1 %v11241_v31  ;;  %v11325_v30 = vld [vmem:[%s11632_s26 + $0xfd0] ss:$8 sps:$4 sm:$0xff]  }
 0x418   : > { %8180 = vmatprep.subr.bf16.mxu0 %v11244_v32  ;;  %v11328_v31 = vld [vmem:[%s11632_s26 + $0x1fd0] ss:$8 sps:$4 sm:$0xff]   ;;  %v11333_v32 = vld [vmem:[%s11632_s26 + $0xfe4] ss:$8 sps:$4 sm:$0xff]  }
 0x41a   : > { %7525 = vmatpush1.bf16.msra.mxu1 %v11239_v16  ;;  %v11336_v16 = vld [vmem:[%s11632_s26 + $0x1fe4] ss:$8 sps:$4 sm:$0xff]  }
 0x41b   : > { %8181 = vmatpush1.bf16.msra.mxu0 %v11242_v34  ;;  %7535 = vmatprep.subr.bf16.mxu1 %v11248_v22  ;;  %v11331_v34 = vld [vmem:[%s11632_s26 + $0xfe0] ss:$8 sps:$4 sm:$0xff]  }
 0x41c   : > { %8191 = vmatprep.subr.bf16.mxu0 %v11252_v36  ;;  %v11334_v22 = vld [vmem:[%s11632_s26 + $0x1fe0] ss:$8 sps:$4 sm:$0xff]   ;;  %v11339_v36 = vld [vmem:[%s11632_s26 + $0xff4] ss:$8 sps:$4 sm:$0xff]  }
 0x41d   : > { %7527 = vmatmul.mubr.bf16.vlgmr.msra.gmra.mrb[0].mxu1 %v12906_v43 }
 0x41e   : > { %8183 = vmatmul.mubr.bf16.vlgmr.msra.gmra.mrb[0].mxu0 %v12910_v45  ;;  %7536 = vmatpush1.bf16.msra.mxu1 %v11246_v25  ;;  %v11342_v25 = vld [vmem:[%s11632_s26 + $0x1ff4] ss:$8 sps:$4 sm:$0xff]  }
 0x41f   : > { %8192 = vmatpush1.bf16.msra.mxu0 %v11250_v46  ;;  %7537 = vmatprep.subr.bf16.mxu1 %v11255_v42  ;;  %v11337_v46 = vld [vmem:[%s11632_s26 + $0xff0] ss:$8 sps:$4 sm:$0xff]  }
 0x420   : > { %8193 = vmatprep.subr.bf16.mxu0 %v11258_v26  ;;  %7567 = vmatprep.mubr.bf16.mxu1 %v1539_v56  ;;  %v11340_v42 = vld [vmem:[%s11632_s26 + $0x1ff0] ss:$8 sps:$4 sm:$0xff]   ;;  %v1537_v26 = vcombine.high %v12906_v43, %v12906_v43  ;;  %v1733_v56 = vcombine.high %v12910_v45, %v12910_v45 }
 0x421   : > { %8223 = vmatprep.mubr.bf16.mxu0 %v1735_v60  ;;  %v11467_v60 = vmov 1983009808  }
 0x422   : > { %7538 = vmatpush1.bf16.msra.mxu1 %v11253_v50  ;;  %v8236_v50 = vunpack.c.l.s4 %v11467_v60 }
 0x423   : > { %8194 = vmatpush1.bf16.msra.mxu0 %v11256_v57  ;;  %7539 = vmatprep.subr.bf16.mxu1 %v11261_v35 }
 0x424   : > { %8195 = vmatprep.subr.bf16.mxu0 %v11264_v14  ;;  %v8237_v57 = vunpack.c.0.s8 %v8236_v50 }
 0x426   : > { %7540 = vmatpush1.bf16.msra.mxu1 %v11259_v21 }
 0x427   : > { %8196 = vmatpush1.bf16.msra.mxu0 %v11262_v33  ;;  %7541 = vmatprep.subr.bf16.mxu1 %v11267_v37 }
 0x428   : > { %8197 = vmatprep.subr.bf16.mxu0 %v11270_v15 }
 0x42a   : > { %7542 = vmatpush1.bf16.msra.mxu1 %v11265_v48  ;;  %v12985_v48 = vsub.s32 %v8237_v57, %v11688_v44 }
 0x42b   : > { %8198 = vmatpush1.bf16.msra.mxu0 %v11268_v17  ;;  %7543 = vmatprep.subr.bf16.mxu1 %v11273_v49 }
 0x42c   : > { %8199 = vmatprep.subr.bf16.mxu0 %v11276_v51 }
 0x42e   : > { %7544 = vmatpush1.bf16.msra.mxu1 %v11271_v52  ;;  %v303_v52 = vld [vmem:[#allocation2] sm:$0xf] }
 0x42f   : > { %8200 = vmatpush1.bf16.msra.mxu0 %v11274_v54  ;;  %7545 = vmatprep.subr.bf16.mxu1 %v11279_v55 }
 0x430   : > { %8201 = vmatprep.subr.bf16.mxu0 %v11282_v63  ;;  %v8287_v63 = vld [vmem:[%s13113_s3 + $0x80] sm:$0xff] (!%p9533_p7) }
 0x432   : > { %7546 = vmatpush1.bf16.msra.mxu1 %v11277_v0  ;;  %v8288_v0 = vld [vmem:[%s13113_s3 + $0x88] sm:$0xff] (!%p9533_p7) }
 0x433   : > { %8202 = vmatpush1.bf16.msra.mxu0 %v11280_v41  ;;  %7547 = vmatprep.subr.bf16.mxu1 %v11285_v1  ;;  %v8271_v41 = vld [vmem:[%s13113_s3] sm:$0xff] (!%p9533_p7)  ;;  %v9574_v1 = vpack.c.bf16 (!%p9533_p7), %v8288_v0, %v8287_v63 }
 0x434   : > { %8203 = vmatprep.subr.bf16.mxu0 %v11288_v47  ;;  %v8272_v47 = vld [vmem:[%s13113_s3 + $0x8] sm:$0xff] (!%p9533_p7) }
 0x436   : > { %7548 = vmatpush1.bf16.msra.mxu1 %v11283_v3  ;;  %v8289_v3 = vld [vmem:[%s13113_s3 + $0x90] sm:$0xff] (!%p9533_p7) }
 0x437   : > { %8204 = vmatpush1.bf16.msra.mxu0 %v11286_v39  ;;  %7549 = vmatprep.subr.bf16.mxu1 %v11291_v58  ;;  %v8290_v39 = vld [vmem:[%s13113_s3 + $0x98] sm:$0xff] (!%p9533_p7)  ;;  %v9576_v58 = vpack.c.bf16 (!%p9533_p7), %v8272_v47, %v8271_v41 }
 0x438   : > { %8205 = vmatprep.subr.bf16.mxu0 %v11294_v18  ;;  %v9578_v18 = vpack.c.bf16 (!%p9533_p7), %v8290_v39, %v8289_v3 }
 0x43a   : > { %7550 = vmatpush1.bf16.msra.mxu1 %v11289_v4  ;;  %v8273_v4 = vld [vmem:[%s13113_s3 + $0x10] sm:$0xff] (!%p9533_p7) }
 0x43b   : > { %8206 = vmatpush1.bf16.msra.mxu0 %v11292_v5  ;;  %7551 = vmatprep.subr.bf16.mxu1 %v11297_v6  ;;  %v8274_v5 = vld [vmem:[%s13113_s3 + $0x18] sm:$0xff] (!%p9533_p7)  ;;  %v8291_v6 = vld [vmem:[%s13113_s3 + $0xa0] sm:$0xff] (!%p9533_p7) }
 0x43c   : > { %8207 = vmatprep.subr.bf16.mxu0 %v11300_v7  ;;  %v8292_v7 = vld [vmem:[%s13113_s3 + $0xa8] sm:$0xff] (!%p9533_p7) }
 0x43e   : > { %7552 = vmatpush1.bf16.msra.mxu1 %v11295_v8  ;;  %v9580_v8 = vpack.c.bf16 (!%p9533_p7), %v8274_v5, %v8273_v4 }
 0x43f   : > { %8208 = vmatpush1.bf16.msra.mxu0 %v11298_v9  ;;  %7553 = vmatprep.subr.bf16.mxu1 %v11303_v10  ;;  %v9582_v9 = vpack.c.bf16 (!%p9533_p7), %v8292_v7, %v8291_v6  ;;  %v8275_v10 = vld [vmem:[%s13113_s3 + $0x20] sm:$0xff] (!%p9533_p7) }
 0x440   : > { %8209 = vmatprep.subr.bf16.mxu0 %v11306_v62  ;;  %v8276_v62 = vld [vmem:[%s13113_s3 + $0x28] sm:$0xff] (!%p9533_p7) }
 0x442   : > { %7554 = vmatpush1.bf16.msra.mxu1 %v11301_v12  ;;  %v8293_v12 = vld [vmem:[%s13113_s3 + $0xb0] sm:$0xff] (!%p9533_p7) }
 0x443   : > { %8210 = vmatpush1.bf16.msra.mxu0 %v11304_v19  ;;  %7555 = vmatprep.subr.bf16.mxu1 %v11309_v20  ;;  %v8294_v19 = vld [vmem:[%s13113_s3 + $0xb8] sm:$0xff] (!%p9533_p7)  ;;  %v9584_v20 = vpack.c.bf16 (!%p9533_p7), %v8276_v62, %v8275_v10 }
 0x444   : > { %8211 = vmatprep.subr.bf16.mxu0 %v11312_v2  ;;  %v8254_v2 = vsub.s32 (!%p9533_p7), 0, %v11688_v44 }
 0x446   : > { %7556 = vmatpush1.bf16.msra.mxu1 %v11307_v24  ;;  %v8258_v24 = vsub.s32 (!%p9533_p7), 1, %v11688_v44 }
 0x447   : > { %8212 = vmatpush1.bf16.msra.mxu0 %v11310_v13  ;;  %7557 = vmatprep.subr.bf16.mxu1 %v11315_v53  ;;  %v9586_v13 = vpack.c.bf16 (!%p9533_p7), %v8294_v19, %v8293_v12  ;;  %v8277_v53 = vld [vmem:[%s13113_s3 + $0x30] sm:$0xff] (!%p9533_p7) }
 0x448   : > { %8213 = vmatprep.subr.bf16.mxu0 %v11318_v23  ;;  %v8278_v23 = vld [vmem:[%s13113_s3 + $0x38] sm:$0xff] (!%p9533_p7) }
 0x449   : > { %v9588_v44 = vpack.c.bf16 (!%p9533_p7), %v8278_v23, %v8277_v53 }
 0x44a   : > { %7558 = vmatpush1.bf16.msra.mxu1 %v11313_v59  ;;  %v8295_v59 = vld [vmem:[%s13113_s3 + $0xc0] sm:$0xff] (!%p9533_p7) }
 0x44b   : > { %8214 = vmatpush1.bf16.msra.mxu0 %v11316_v38  ;;  %7559 = vmatprep.subr.bf16.mxu1 %v11321_v40  ;;  %v8296_v38 = vld [vmem:[%s13113_s3 + $0xc8] sm:$0xff] (!%p9533_p7)  ;;  %v8250_v40 = vld [vmem:[#allocation5] sm:$0x3] (!%p9533_p7) }
 0x44c   : > { %8215 = vmatprep.subr.bf16.mxu0 %v11324_v11  ;;  %v8255_v11 = vrot.slane (!%p9533_p7), %v8250_v40, %v8254_v2 }
 0x44e   : > { %7560 = vmatpush1.bf16.msra.mxu1 %v11319_v27  ;;  %v8259_v27 = vrot.slane (!%p9533_p7), %v8250_v40, %v8258_v24 }
 0x44f   : > { %8216 = vmatpush1.bf16.msra.mxu0 %v11322_v61  ;;  %7561 = vmatprep.subr.bf16.mxu1 %v11327_v28  ;;  %v9590_v61 = vpack.c.bf16 (!%p9533_p7), %v8296_v38, %v8295_v59  ;;  %v8279_v28 = vld [vmem:[%s13113_s3 + $0x40] sm:$0xff] (!%p9533_p7) }
 0x450   : > { %8217 = vmatprep.subr.bf16.mxu0 %v11330_v29  ;;  %v8280_v29 = vld [vmem:[%s13113_s3 + $0x48] sm:$0xff] (!%p9533_p7) }
 0x452   : > { %7562 = vmatpush1.bf16.msra.mxu1 %v11325_v30  ;;  %v8297_v30 = vld [vmem:[%s13113_s3 + $0xd0] sm:$0xff] (!%p9533_p7) }
 0x453   : > { %8218 = vmatpush1.bf16.msra.mxu0 %v11328_v31  ;;  %7563 = vmatprep.subr.bf16.mxu1 %v11333_v32  ;;  %v8298_v31 = vld [vmem:[%s13113_s3 + $0xd8] sm:$0xff] (!%p9533_p7)  ;;  %v8260_v32 = vcombine.low (!%p9533_p7), %v8255_v11, %v8259_v27 }
 0x454   : > { %8219 = vmatprep.subr.bf16.mxu0 %v11336_v16 }
 0x456   : > { %7564 = vmatpush1.bf16.msra.mxu1 %v11331_v34  ;;  %v9592_v34 = vpack.c.bf16 (!%p9533_p7), %v8280_v29, %v8279_v28 }
 0x457   : > { %8220 = vmatpush1.bf16.msra.mxu0 %v11334_v22  ;;  %7565 = vmatprep.subr.bf16.mxu1 %v11339_v36  ;;  %v8267_v22 = vrot.slane (!%p9533_p7), %v8260_v32, %v12985_v48  ;;  %v9594_v36 = vpack.c.bf16 (!%p9533_p7), %v8298_v31, %v8297_v30 }
 0x458   : > { %8221 = vmatprep.subr.bf16.mxu0 %v11342_v25  ;;  %v8281_v25 = vld [vmem:[%s13113_s3 + $0x50] sm:$0xff] (!%p9533_p7) }
 0x45a   : > { %7566 = vmatpush1.bf16.msra.mxu1 %v11337_v46  ;;  %v8282_v46 = vld [vmem:[%s13113_s3 + $0x58] sm:$0xff] (!%p9533_p7) }
 0x45b   : > { %8222 = vmatpush1.bf16.msra.mxu0 %v11340_v42  ;;  %v8299_v42 = vld [vmem:[%s13113_s3 + $0xe0] sm:$0xff] (!%p9533_p7)  ;;  %v9596_v60 = vpack.c.bf16 (!%p9533_p7), %v8282_v46, %v8281_v25 }
 0x45c   : > { %9575 = vmatprep.subr.bf16.mxu0 (!%p9533_p7), %v9574_v1 }
 0x45d   : > { %7568 = vmatmul.mubr.bf16.vlgmr.msra.gmra.mrb[0].mxu1 %v1537_v26  ;;  %v8300_v26 = vld [vmem:[%s13113_s3 + $0xe8] sm:$0xff] (!%p9533_p7) }
 0x45e   : > { %8224 = vmatmul.mubr.bf16.vlgmr.msra.gmra.mrb[0].mxu0 %v1733_v56  ;;  %v9598_v57 = vpack.c.bf16 (!%p9533_p7), %v8300_v26, %v8299_v42 }
 0x45f   : > { %9577 = vmatpush3.bf16.msra.mxu0 (!%p9533_p7), %v9576_v58 }
 0x460   : > { %9579 = vmatprep.subr.bf16.mxu0 (!%p9533_p7), %v9578_v18 }
 0x463   : > { %9581 = vmatpush3.bf16.msra.mxu0 (!%p9533_p7), %v9580_v8 }
 0x464   : > { %9583 = vmatprep.subr.bf16.mxu0 (!%p9533_p7), %v9582_v9 }
 0x467   : > { %9585 = vmatpush3.bf16.msra.mxu0 (!%p9533_p7), %v9584_v20 }
 0x468   : > { %9587 = vmatprep.subr.bf16.mxu0 (!%p9533_p7), %v9586_v13 }
 0x46b   : > { %9589 = vmatpush3.bf16.msra.mxu0 (!%p9533_p7), %v9588_v44 }
 0x46c   : > { %9591 = vmatprep.subr.bf16.mxu0 (!%p9533_p7), %v9590_v61 }
 0x46f   : > { %9593 = vmatpush3.bf16.msra.mxu0 (!%p9533_p7), %v9592_v34 }
 0x470   : > { %9595 = vmatprep.subr.bf16.mxu0 (!%p9533_p7), %v9594_v36 }
 0x473   : > { %9597 = vmatpush3.bf16.msra.mxu0 (!%p9533_p7), %v9596_v60 }
 0x474   : > { %9599 = vmatprep.subr.bf16.mxu0 (!%p9533_p7), %v9598_v57 }
 0x530   : > { %v7569_v35 = vpop.f32.mrb[0].mxu1 }
 0x531   : > { %v8225_v14 = vpop.f32.mrb[0].mxu0  ;;  %v7571_v33 = vpop.f32.mrb[1].mxu1 }
 0x532   : > { %v9606_v21 = vadd.f32 %v8225_v14, %v7569_v35  ;;  %v8227_v37 = vpop.f32.mrb[1].mxu0  ;;  %v7573_v43 = vpop.f32.mrb[2].mxu1  ;;  %v8283_v35 = vld [vmem:[%s13113_s3 + $0x60] sm:$0xff] (!%p9533_p7)  ;;  %v8284_v14 = vld [vmem:[%s13113_s3 + $0x68] sm:$0xff] (!%p9533_p7) }
 0x533   : > { %v9607_v15 = vadd.f32 %v8227_v37, %v7571_v33  ;;  %v8229_v17 = vpop.f32.mrb[2].mxu0  ;;  %v7574_v49 = vpop.f32.mrb[3].mxu1  ;;  %v8302_v33 = vld [vmem:[%s13113_s3 + $0xf8] sm:$0xff] (!%p9533_p7) }
 0x534   : > { %v8230_v45 = vpop.f32.mrb[3].mxu0  ;;  %v8285_v49 = vld [vmem:[%s13113_s3 + $0x70] sm:$0xff] (!%p9533_p7) }
 0x535   : > { %v8234_v51 = vcombine.low %v9606_v21, %v9607_v15  ;;  %8248 = sbr.rel (%p9533_p7) target bundleno = 1572 (0x624), region = 52  ;;  %v8301_v21 = vld [vmem:[%s13113_s3 + $0xf0] sm:$0xff] (!%p9533_p7)  ;;  %v9600_v15 = vpack.c.bf16 (!%p9533_p7), %v8284_v14, %v8283_v35  ;;  %v8286_v45 = vld [vmem:[%s13113_s3 + $0x78] sm:$0xff] (!%p9533_p7) }
 0x536   : > { %v9602_v17 = vpack.c.bf16 (!%p9533_p7), %v8302_v33, %v8301_v21 }
 0x537   : > { %v8241_v54 = vrot.slane %v8234_v51, %v12985_v48  ;;  %9601 = vmatpush3.bf16.msra.mxu0 (!%p9533_p7), %v9600_v15  ;;  %v9604_v51 = vpack.c.bf16 (!%p9533_p7), %v8286_v45, %v8285_v49 }
 0x538   : > { %9603 = vmatprep.subr.bf16.mxu0 (!%p9533_p7), %v9602_v17 }
 0x539   : > { %v8243_v55 = vadd.f32 %v8241_v54, %v303_v52 }
 0x53b   : > { %8244 = vst [vmem:[#allocation2] sm:$0xf] %v8243_v55  ;;  %9605 = vmatpush3.bf16.msra.mxu0 (!%p9533_p7), %v9604_v51 }
 0x542   : > { %v8249_v16 = vld [vmem:[#allocation2] sm:$0xf] }
 0x543   : > { %v8269_v56 = vadd.f32 %v8267_v22, %v8249_v16 }
 0x545   : > { %v8270_v50 = vmax.f32 %v8269_v56, 0.0 }
 0x547   : > { %v8310_v37 = vrot.slane %v8270_v50, %v12985_v48 }
 0x549   : > { %v8311_v43 = vcombine.high %v8310_v37, %v8310_v37 }
 0x54b   : > { %8378 = vmatprep.mubr.f32.mxu0 %v8311_v43 }
 0x54c   : > { %8379 = vmatmul.mubr.f32.vlgmr.msra.gmra.mrb[0].mxu0 %v8310_v37 }
 0x61f   : > { %v9571_v48 = vpop.f32.mrb[0].mxu0 }
 0x620   : > { %v9572_v52 = vpop.f32.mrb[1].mxu0 }
 0x621   : > { %v9573_v54 = vadd.f32 %v9572_v52, %v9571_v48 }
 0x623   : > { %8385 = vst.msk [vmem:[%s13114_s4] sm:$0x3] %vm8384_vm0, %v9573_v54 }
 0x624 PF: > { %s18_s20 = sadd.s32 1, %s11459_s20   ;;  %s13130_s5 = smov %s13137_s15 }
 0x625   : > { %p15_p9 = scmp.ge.s32.totalorder %s18_s20, 4   ;;  %s13131_s15 = smov %s11443_s16 }
 0x626   : > { %s13132_s16 = smov %s11447_s17  ;;  %s13133_s17 = smov %s11627_s12 }
 0x627   : > { %s13134_s18 = smov %s11455_s19  ;;  %s13135_s19 = smov %s13130_s5 }
 0x628   :  { %17 = sbr.rel (!%p15_p9) target bundleno = 5 (0x5), region = 95 }
 0x62f   :  { %8405 = vsyncpa [#allocation4], 1 }
 0x630   :  { %8407 = vsyncpa [#allocation4 + $0x1], 1 }
 0x631   :  { %8408 = vsyncpa [#allocation6], 1 }

</bundles_post_ra>
